<compile_context>
chip_gen: v7x
topology: tpu7x:2x2x1
jax: 0.10.0
libtpu: 0.0.40
codegen_flags: <defaults>
</compile_context>

<pallas_src>
import functools

import jax
import jax.numpy as jnp
from jax.experimental import pallas as pl
from jax.experimental.pallas import tpu as pltpu

LANE = 128
SUBLANE = 8
NEG_MASK = -1e30  # baked into padded fc5-bias lanes -> free log_softmax masking


def _round_up(x, m):
    return (x + m - 1) // m * m


def _choose_tm(M, block_m):
    """Largest M tile (<= block_m, multiple of 8) with small row-padding waste,
    preferring a grid of >= 2 steps so both v7x TensorCores get work."""
    M8 = _round_up(max(M, 1), SUBLANE)
    for tm in (1024, 512, 256, 128, 64, 32, 16, SUBLANE):
        if tm > block_m or tm > M8:
            continue
        Mp = _round_up(M8, tm)
        waste_ok = (Mp - M) <= max(Mp // 8, SUBLANE)       # <~12.5% padded rows
        grid_ok = (Mp // tm) >= 2 or Mp <= SUBLANE or tm == SUBLANE
        if waste_ok and grid_ok:
            return tm, Mp
    return SUBLANE, M8


# ----------------------------------------------------------------------------
# Fused kernel: 5x (GEMM + bias [+ ReLU]) + log_softmax epilogue
# ----------------------------------------------------------------------------
def _mlp_fused_kernel(x_ref, w1_ref, b1_ref, w2_ref, b2_ref, w3_ref, b3_ref,
                      w4_ref, b4_ref, w5_ref, b5_ref, o_ref):
    # Cast activations to bf16 in-kernel (no wrapper HBM pass); MXU accumulates
    # in f32; bias/ReLU/softmax epilogue stays f32 (v5e has no bf16 VPU/EUP).
    h = jnp.dot(x_ref[...].astype(jnp.bfloat16), w1_ref[...],
                preferred_element_type=jnp.float32)
    h = jnp.maximum(h + b1_ref[...], 0.0)
    for w_ref, b_ref in ((w2_ref, b2_ref), (w3_ref, b3_ref), (w4_ref, b4_ref)):
        h = jnp.dot(h.astype(jnp.bfloat16), w_ref[...],
                    preferred_element_type=jnp.float32)
        h = jnp.maximum(h + b_ref[...], 0.0)
    # fc5 bias carries -1e30 in the padded class lanes (weight columns there
    # are zero), so the padded lanes never affect max / sum(exp) below.
    z = jnp.dot(h.astype(jnp.bfloat16), w5_ref[...],
                preferred_element_type=jnp.float32) + b5_ref[...]

    m = jnp.max(z, axis=-1, keepdims=True)
    s = z - m
    lse = jnp.log(jnp.sum(jnp.exp(s), axis=-1, keepdims=True))
    o_ref[...] = s - lse


# ----------------------------------------------------------------------------
# One-time parameter prep (run OUTSIDE the jitted forward and cache the result)
# ----------------------------------------------------------------------------
def prepare_params(params):
    """Pad/cast the 5 Linear layers to lane-dense form once.

    Returns a flat tuple (w1, b1, ..., w5, b5):
      * weights: bf16, out-dim padded to a multiple of 128; in-dim padded to
        the previous layer's padded out-dim (fc1 keeps its raw in-dim so the
        raw x needs no pre-padding).
      * biases: f32, shape (1, out_p); fc5's padded class lanes get -1e30.
    """
    ws = [params[f"fc{i}_w"] for i in range(1, 6)]
    bs = [params[f"fc{i}_b"] for i in range(1, 6)]
    prepared = []
    in_p = ws[0].shape[0]                      # fc1 in-dim stays unpadded
    for i, (w, b) in enumerate(zip(ws, bs)):
        out_p = _round_up(w.shape[1], LANE)
        wp = jnp.pad(w, ((0, in_p - w.shape[0]), (0, out_p - w.shape[1])))
        pad_val = NEG_MASK if i == len(ws) - 1 else 0.0
        bp = jnp.pad(b.astype(jnp.float32), (0, out_p - b.shape[0]),
                     constant_values=pad_val).reshape(1, -1)
        prepared.extend([wp.astype(jnp.bfloat16), bp])
        in_p = out_p                           # next layer's (padded) in-dim
    return tuple(prepared)


def _const_block_spec(shape, single_buffer):
    """Whole-array, grid-invariant block; single-buffered when supported."""
    if single_buffer:
        try:
            return pl.BlockSpec(shape, lambda i: (0, 0),
                                pipeline_mode=pl.Buffered(buffer_count=1))
        except Exception:
            pass  # older jax without pipeline_mode -> default double buffering
    return pl.BlockSpec(shape, lambda i: (0, 0))


# ----------------------------------------------------------------------------
# Forward wrapper: tile over M only, call the fused kernel
# ----------------------------------------------------------------------------
def mlp_forward_pallas(prepared, x, *, n_classes, block_m=512,
                       single_buffer_weights=True):
    """x: (M, input_size) f32 -> (M, n_classes) f32 log-probabilities."""
    M, K = x.shape
    assert prepared[0].shape[0] == K, "x feature dim must match fc1 in-dim"
    Np = prepared[-1].shape[1]                 # padded class dim (mult. of 128)

    tm, Mp = _choose_tm(M, block_m)
    xq = x if Mp == M else jnp.pad(x, ((0, Mp - M), (0, 0)))

    in_specs = [pl.BlockSpec((tm, K), lambda i: (i, 0))]        # raw-f32 x tile
    in_specs += [_const_block_spec(p.shape, single_buffer_weights)
                 for p in prepared]

    out = pl.pallas_call(
        _mlp_fused_kernel,
        out_shape=jax.ShapeDtypeStruct((Mp, Np), jnp.float32),
        grid=(Mp // tm,),
        in_specs=in_specs,
        out_specs=pl.BlockSpec((tm, Np), lambda i: (i, 0)),     # lane-dense out
        compiler_params=pltpu.CompilerParams(
            dimension_semantics=("parallel",),  # megacore sharding on v7x
            vmem_limit_bytes=32 * 1024 * 1024,  # covers weights + buffers on v5e
        ),
    )(xq, *prepared)

    return out[:M, :n_classes]


# ----------------------------------------------------------------------------
# Pure-JAX reference (f32) and parameter init
# ----------------------------------------------------------------------------
def mlp_forward_ref(params, x):
    h = x
    for i in range(1, 5):
        h = jnp.maximum(h @ params[f"fc{i}_w"] + params[f"fc{i}_b"], 0.0)
    z = h @ params["fc5_w"] + params["fc5_b"]
    return jax.nn.log_softmax(z, axis=1)


def init_params(key, input_size, output_size):
    dims = [input_size, 1024, 512, 128, 32, output_size]
    keys = jax.random.split(key, 2 * (len(dims) - 1))
    params = {}
    for i in range(1, len(dims)):
        bound = 1.0 / (dims[i - 1] ** 0.5)
        params[f"fc{i}_w"] = jax.random.uniform(
            keys[2 * (i - 1)], (dims[i - 1], dims[i]), jnp.float32, -bound, bound)
        params[f"fc{i}_b"] = jax.random.uniform(
            keys[2 * (i - 1) + 1], (dims[i],), jnp.float32, -bound, bound)
    return params


if __name__ == "__main__":
    input_size, output_size, batch = 784, 10, 2
    key = jax.random.PRNGKey(0)
    k_params, k_x = jax.random.split(key)
    params = init_params(k_params, input_size, output_size)
    x = jax.random.normal(k_x, (batch, input_size), jnp.float32)

    prepared = prepare_params(params)          # pad/cast once, outside jit
    fwd = jax.jit(functools.partial(mlp_forward_pallas, n_classes=output_size))
    try:
        out = jax.block_until_ready(fwd(prepared, x))
    except Exception:
        # Fallback for builds where single-buffered pipeline_mode can't lower.
        fwd = jax.jit(functools.partial(mlp_forward_pallas,
                                        n_classes=output_size,
                                        single_buffer_weights=False))
        out = jax.block_until_ready(fwd(prepared, x))

    assert out.shape == (batch, output_size)
    # log_softmax rows exponentiate-sum to ~1
    assert jnp.allclose(jnp.exp(out).sum(axis=1), 1.0, atol=1e-3)
    # matches the f32 reference up to bf16 matmul precision
    ref = mlp_forward_ref(params, x)
    assert jnp.allclose(out, ref, atol=1.5e-1), float(jnp.max(jnp.abs(out - ref)))
    print("KERNEL_OK")
</pallas_src>

<mosaic_0001>
module attributes {stable_mosaic.version = 11 : i64} {
  func.func @_mlp_fused_kernel(%arg0: i32, %arg1: memref<8x784xf32, #tpu.memory_space<vmem>>, %arg2: memref<784x1024xbf16, #tpu.memory_space<vmem>>, %arg3: memref<1x1024xf32, #tpu.memory_space<vmem>>, %arg4: memref<1024x512xbf16, #tpu.memory_space<vmem>>, %arg5: memref<1x512xf32, #tpu.memory_space<vmem>>, %arg6: memref<512x128xbf16, #tpu.memory_space<vmem>>, %arg7: memref<1x128xf32, #tpu.memory_space<vmem>>, %arg8: memref<128x128xbf16, #tpu.memory_space<vmem>>, %arg9: memref<1x128xf32, #tpu.memory_space<vmem>>, %arg10: memref<128x128xbf16, #tpu.memory_space<vmem>>, %arg11: memref<1x128xf32, #tpu.memory_space<vmem>>, %arg12: memref<8x128xf32, #tpu.memory_space<vmem>>) attributes {dimension_semantics = [#tpu.dimension_semantics<parallel>], iteration_bounds = array<i64: 1>, scalar_prefetch = 0 : i64, scratch_operands = 0 : i64, tpu.core_type = #tpu.core_type<tc>, window_params = [{transform_indices = @transform_0, window_bounds = array<i64: 8, 784>}, {pipeline_mode = #tpu.pipeline_mode<synchronous>, transform_indices = @transform_1, window_bounds = array<i64: 784, 1024>}, {pipeline_mode = #tpu.pipeline_mode<synchronous>, transform_indices = @transform_2, window_bounds = array<i64: 1, 1024>}, {pipeline_mode = #tpu.pipeline_mode<synchronous>, transform_indices = @transform_3, window_bounds = array<i64: 1024, 512>}, {pipeline_mode = #tpu.pipeline_mode<synchronous>, transform_indices = @transform_4, window_bounds = array<i64: 1, 512>}, {pipeline_mode = #tpu.pipeline_mode<synchronous>, transform_indices = @transform_5, window_bounds = array<i64: 512, 128>}, {pipeline_mode = #tpu.pipeline_mode<synchronous>, transform_indices = @transform_6, window_bounds = array<i64: 1, 128>}, {pipeline_mode = #tpu.pipeline_mode<synchronous>, transform_indices = @transform_7, window_bounds = array<i64: 128, 128>}, {pipeline_mode = #tpu.pipeline_mode<synchronous>, transform_indices = @transform_8, window_bounds = array<i64: 1, 128>}, {pipeline_mode = #tpu.pipeline_mode<synchronous>, transform_indices = @transform_9, window_bounds = array<i64: 128, 128>}, {pipeline_mode = #tpu.pipeline_mode<synchronous>, transform_indices = @transform_10, window_bounds = array<i64: 1, 128>}, {transform_indices = @transform_11, window_bounds = array<i64: 8, 128>}]} {
    %c0 = arith.constant 0 : index
    %c0_0 = arith.constant 0 : index
    %0 = vector.load %arg1[%c0, %c0_0] : memref<8x784xf32, #tpu.memory_space<vmem>>, vector<8x784xf32>
    %1 = arith.truncf %0 : vector<8x784xf32> to vector<8x784xbf16>
    %c0_1 = arith.constant 0 : index
    %c0_2 = arith.constant 0 : index
    %2 = vector.load %arg2[%c0_1, %c0_2] : memref<784x1024xbf16, #tpu.memory_space<vmem>>, vector<784x1024xbf16>
    %cst = arith.constant dense<0.000000e+00> : vector<8x1024xf32>
    %3 = tpu.matmul %1, %2, %cst {dimension_numbers = #tpu.dot_dimension_numbers<[1], [0], [0], [1], [0, 0, 1, 1], [], []>} : vector<8x784xbf16>, vector<784x1024xbf16>, vector<8x1024xf32> -> vector<8x1024xf32>
    %c0_3 = arith.constant 0 : index
    %c0_4 = arith.constant 0 : index
    %4 = vector.load %arg3[%c0_3, %c0_4] : memref<1x1024xf32, #tpu.memory_space<vmem>>, vector<1x1024xf32>
    %5 = vector.broadcast %4 : vector<1x1024xf32> to vector<8x1024xf32>
    %6 = arith.addf %3, %5 : vector<8x1024xf32>
    %cst_5 = arith.constant 0.000000e+00 : f32
    %7 = vector.broadcast %cst_5 : f32 to vector<8x1024xf32>
    %8 = arith.maximumf %6, %7 : vector<8x1024xf32>
    %9 = arith.truncf %8 : vector<8x1024xf32> to vector<8x1024xbf16>
    %c0_6 = arith.constant 0 : index
    %c0_7 = arith.constant 0 : index
    %10 = vector.load %arg4[%c0_6, %c0_7] : memref<1024x512xbf16, #tpu.memory_space<vmem>>, vector<1024x512xbf16>
    %cst_8 = arith.constant dense<0.000000e+00> : vector<8x512xf32>
    %11 = tpu.matmul %9, %10, %cst_8 {dimension_numbers = #tpu.dot_dimension_numbers<[1], [0], [0], [1], [0, 0, 1, 1], [], []>} : vector<8x1024xbf16>, vector<1024x512xbf16>, vector<8x512xf32> -> vector<8x512xf32>
    %c0_9 = arith.constant 0 : index
    %c0_10 = arith.constant 0 : index
    %12 = vector.load %arg5[%c0_9, %c0_10] : memref<1x512xf32, #tpu.memory_space<vmem>>, vector<1x512xf32>
    %13 = vector.broadcast %12 : vector<1x512xf32> to vector<8x512xf32>
    %14 = arith.addf %11, %13 : vector<8x512xf32>
    %cst_11 = arith.constant 0.000000e+00 : f32
    %15 = vector.broadcast %cst_11 : f32 to vector<8x512xf32>
    %16 = arith.maximumf %14, %15 : vector<8x512xf32>
    %17 = arith.truncf %16 : vector<8x512xf32> to vector<8x512xbf16>
    %c0_12 = arith.constant 0 : index
    %c0_13 = arith.constant 0 : index
    %18 = vector.load %arg6[%c0_12, %c0_13] : memref<512x128xbf16, #tpu.memory_space<vmem>>, vector<512x128xbf16>
    %cst_14 = arith.constant dense<0.000000e+00> : vector<8x128xf32>
    %19 = tpu.matmul %17, %18, %cst_14 {dimension_numbers = #tpu.dot_dimension_numbers<[1], [0], [0], [1], [0, 0, 1, 1], [], []>} : vector<8x512xbf16>, vector<512x128xbf16>, vector<8x128xf32> -> vector<8x128xf32>
    %c0_15 = arith.constant 0 : index
    %c0_16 = arith.constant 0 : index
    %20 = vector.load %arg7[%c0_15, %c0_16] : memref<1x128xf32, #tpu.memory_space<vmem>>, vector<1x128xf32>
    %21 = vector.broadcast %20 : vector<1x128xf32> to vector<8x128xf32>
    %22 = arith.addf %19, %21 : vector<8x128xf32>
    %cst_17 = arith.constant 0.000000e+00 : f32
    %23 = vector.broadcast %cst_17 : f32 to vector<8x128xf32>
    %24 = arith.maximumf %22, %23 : vector<8x128xf32>
    %25 = arith.truncf %24 : vector<8x128xf32> to vector<8x128xbf16>
    %c0_18 = arith.constant 0 : index
    %c0_19 = arith.constant 0 : index
    %26 = vector.load %arg8[%c0_18, %c0_19] : memref<128x128xbf16, #tpu.memory_space<vmem>>, vector<128x128xbf16>
    %cst_20 = arith.constant dense<0.000000e+00> : vector<8x128xf32>
    %27 = tpu.matmul %25, %26, %cst_20 {dimension_numbers = #tpu.dot_dimension_numbers<[1], [0], [0], [1], [0, 0, 1, 1], [], []>} : vector<8x128xbf16>, vector<128x128xbf16>, vector<8x128xf32> -> vector<8x128xf32>
    %c0_21 = arith.constant 0 : index
    %c0_22 = arith.constant 0 : index
    %28 = vector.load %arg9[%c0_21, %c0_22] : memref<1x128xf32, #tpu.memory_space<vmem>>, vector<1x128xf32>
    %29 = vector.broadcast %28 : vector<1x128xf32> to vector<8x128xf32>
    %30 = arith.addf %27, %29 : vector<8x128xf32>
    %cst_23 = arith.constant 0.000000e+00 : f32
    %31 = vector.broadcast %cst_23 : f32 to vector<8x128xf32>
    %32 = arith.maximumf %30, %31 : vector<8x128xf32>
    %33 = arith.truncf %32 : vector<8x128xf32> to vector<8x128xbf16>
    %c0_24 = arith.constant 0 : index
    %c0_25 = arith.constant 0 : index
    %34 = vector.load %arg10[%c0_24, %c0_25] : memref<128x128xbf16, #tpu.memory_space<vmem>>, vector<128x128xbf16>
    %cst_26 = arith.constant dense<0.000000e+00> : vector<8x128xf32>
    %35 = tpu.matmul %33, %34, %cst_26 {dimension_numbers = #tpu.dot_dimension_numbers<[1], [0], [0], [1], [0, 0, 1, 1], [], []>} : vector<8x128xbf16>, vector<128x128xbf16>, vector<8x128xf32> -> vector<8x128xf32>
    %c0_27 = arith.constant 0 : index
    %c0_28 = arith.constant 0 : index
    %36 = vector.load %arg11[%c0_27, %c0_28] : memref<1x128xf32, #tpu.memory_space<vmem>>, vector<1x128xf32>
    %37 = vector.broadcast %36 : vector<1x128xf32> to vector<8x128xf32>
    %38 = arith.addf %35, %37 : vector<8x128xf32>
    %cst_29 = arith.constant dense<0xFF800000> : vector<8xf32>
    %39 = vector.multi_reduction <maximumf>, %38, %cst_29 [1] : vector<8x128xf32> to vector<8xf32>
    %40 = vector.shape_cast %39 : vector<8xf32> to vector<8x1xf32>
    %41 = vector.broadcast %40 : vector<8x1xf32> to vector<8x128xf32>
    %42 = arith.subf %38, %41 : vector<8x128xf32>
    %43 = math.exp %42 : vector<8x128xf32>
    %cst_30 = arith.constant dense<0.000000e+00> : vector<8xf32>
    %44 = vector.multi_reduction <add>, %43, %cst_30 [1] : vector<8x128xf32> to vector<8xf32>
    %45 = vector.shape_cast %44 : vector<8xf32> to vector<8x1xf32>
    %46 = math.log %45 : vector<8x1xf32>
    %47 = vector.broadcast %46 : vector<8x1xf32> to vector<8x128xf32>
    %48 = arith.subf %42, %47 : vector<8x128xf32>
    %c0_31 = arith.constant 0 : index
    %c0_32 = arith.constant 0 : index
    %49 = vector.load %arg12[%c0_31, %c0_32] : memref<8x128xf32, #tpu.memory_space<vmem>>, vector<8x128xf32>
    tpu.vector_store %arg12[%c0_31, %c0_32], %48 {strides = array<i32>} : memref<8x128xf32, #tpu.memory_space<vmem>>, vector<8x128xf32>,
    return
  }
  func.func @transform_0(%arg0: i32) -> (i32, i32) {
    %c0_i32 = arith.constant 0 : i32
    %c0_i32_0 = arith.constant 0 : i32
    return %arg0, %c0_i32 : i32, i32
  }
  func.func @transform_1(%arg0: i32) -> (i32, i32) {
    %c0_i32 = arith.constant 0 : i32
    %c0_i32_0 = arith.constant 0 : i32
    %c0_i32_1 = arith.constant 0 : i32
    return %c0_i32, %c0_i32_0 : i32, i32
  }
  func.func @transform_2(%arg0: i32) -> (i32, i32) {
    %c0_i32 = arith.constant 0 : i32
    %c0_i32_0 = arith.constant 0 : i32
    %c0_i32_1 = arith.constant 0 : i32
    return %c0_i32, %c0_i32_0 : i32, i32
  }
  func.func @transform_3(%arg0: i32) -> (i32, i32) {
    %c0_i32 = arith.constant 0 : i32
    %c0_i32_0 = arith.constant 0 : i32
    %c0_i32_1 = arith.constant 0 : i32
    return %c0_i32, %c0_i32_0 : i32, i32
  }
  func.func @transform_4(%arg0: i32) -> (i32, i32) {
    %c0_i32 = arith.constant 0 : i32
    %c0_i32_0 = arith.constant 0 : i32
    %c0_i32_1 = arith.constant 0 : i32
    return %c0_i32, %c0_i32_0 : i32, i32
  }
  func.func @transform_5(%arg0: i32) -> (i32, i32) {
    %c0_i32 = arith.constant 0 : i32
    %c0_i32_0 = arith.constant 0 : i32
    %c0_i32_1 = arith.constant 0 : i32
    return %c0_i32, %c0_i32_0 : i32, i32
  }
  func.func @transform_6(%arg0: i32) -> (i32, i32) {
    %c0_i32 = arith.constant 0 : i32
    %c0_i32_0 = arith.constant 0 : i32
    %c0_i32_1 = arith.constant 0 : i32
    return %c0_i32, %c0_i32_0 : i32, i32
  }
  func.func @transform_7(%arg0: i32) -> (i32, i32) {
    %c0_i32 = arith.constant 0 : i32
    %c0_i32_0 = arith.constant 0 : i32
    %c0_i32_1 = arith.constant 0 : i32
    return %c0_i32, %c0_i32_0 : i32, i32
  }
  func.func @transform_8(%arg0: i32) -> (i32, i32) {
    %c0_i32 = arith.constant 0 : i32
    %c0_i32_0 = arith.constant 0 : i32
    %c0_i32_1 = arith.constant 0 : i32
    return %c0_i32, %c0_i32_0 : i32, i32
  }
  func.func @transform_9(%arg0: i32) -> (i32, i32) {
    %c0_i32 = arith.constant 0 : i32
    %c0_i32_0 = arith.constant 0 : i32
    %c0_i32_1 = arith.constant 0 : i32
    return %c0_i32, %c0_i32_0 : i32, i32
  }
  func.func @transform_10(%arg0: i32) -> (i32, i32) {
    %c0_i32 = arith.constant 0 : i32
    %c0_i32_0 = arith.constant 0 : i32
    %c0_i32_1 = arith.constant 0 : i32
    return %c0_i32, %c0_i32_0 : i32, i32
  }
  func.func @transform_11(%arg0: i32) -> (i32, i32) {
    %c0_i32 = arith.constant 0 : i32
    %c0_i32_0 = arith.constant 0 : i32
    return %arg0, %c0_i32 : i32, i32
  }
}

module attributes {stable_mosaic.version = 11 : i64} {
  func.func @_mlp_fused_kernel(%arg0: i32, %arg1: memref<8x784xf32, #tpu.memory_space<vmem>>, %arg2: memref<784x1024xbf16, #tpu.memory_space<vmem>>, %arg3: memref<1x1024xf32, #tpu.memory_space<vmem>>, %arg4: memref<1024x512xbf16, #tpu.memory_space<vmem>>, %arg5: memref<1x512xf32, #tpu.memory_space<vmem>>, %arg6: memref<512x128xbf16, #tpu.memory_space<vmem>>, %arg7: memref<1x128xf32, #tpu.memory_space<vmem>>, %arg8: memref<128x128xbf16, #tpu.memory_space<vmem>>, %arg9: memref<1x128xf32, #tpu.memory_space<vmem>>, %arg10: memref<128x128xbf16, #tpu.memory_space<vmem>>, %arg11: memref<1x128xf32, #tpu.memory_space<vmem>>, %arg12: memref<8x128xf32, #tpu.memory_space<vmem>>) attributes {dimension_semantics = [#tpu.dimension_semantics<parallel>], iteration_bounds = array<i64: 1>, scalar_prefetch = 0 : i64, scratch_operands = 0 : i64, tpu.core_type = #tpu.core_type<tc>, window_params = [{transform_indices = @transform_0, window_bounds = array<i64: 8, 784>}, {pipeline_mode = #tpu.pipeline_mode<synchronous>, transform_indices = @transform_1, window_bounds = array<i64: 784, 1024>}, {pipeline_mode = #tpu.pipeline_mode<synchronous>, transform_indices = @transform_2, window_bounds = array<i64: 1, 1024>}, {pipeline_mode = #tpu.pipeline_mode<synchronous>, transform_indices = @transform_3, window_bounds = array<i64: 1024, 512>}, {pipeline_mode = #tpu.pipeline_mode<synchronous>, transform_indices = @transform_4, window_bounds = array<i64: 1, 512>}, {pipeline_mode = #tpu.pipeline_mode<synchronous>, transform_indices = @transform_5, window_bounds = array<i64: 512, 128>}, {pipeline_mode = #tpu.pipeline_mode<synchronous>, transform_indices = @transform_6, window_bounds = array<i64: 1, 128>}, {pipeline_mode = #tpu.pipeline_mode<synchronous>, transform_indices = @transform_7, window_bounds = array<i64: 128, 128>}, {pipeline_mode = #tpu.pipeline_mode<synchronous>, transform_indices = @transform_8, window_bounds = array<i64: 1, 128>}, {pipeline_mode = #tpu.pipeline_mode<synchronous>, transform_indices = @transform_9, window_bounds = array<i64: 128, 128>}, {pipeline_mode = #tpu.pipeline_mode<synchronous>, transform_indices = @transform_10, window_bounds = array<i64: 1, 128>}, {transform_indices = @transform_11, window_bounds = array<i64: 8, 128>}]} {
    %c0 = arith.constant 0 : index
    %c0_0 = arith.constant 0 : index
    %0 = vector.load %arg1[%c0, %c0_0] : memref<8x784xf32, #tpu.memory_space<vmem>>, vector<8x784xf32>
    %1 = arith.truncf %0 : vector<8x784xf32> to vector<8x784xbf16>
    %c0_1 = arith.constant 0 : index
    %c0_2 = arith.constant 0 : index
    %2 = vector.load %arg2[%c0_1, %c0_2] : memref<784x1024xbf16, #tpu.memory_space<vmem>>, vector<784x1024xbf16>
    %cst = arith.constant dense<0.000000e+00> : vector<8x1024xf32>
    %3 = tpu.matmul %1, %2, %cst {dimension_numbers = #tpu.dot_dimension_numbers<[1], [0], [0], [1], [0, 0, 1, 1], [], []>} : vector<8x784xbf16>, vector<784x1024xbf16>, vector<8x1024xf32> -> vector<8x1024xf32>
    %c0_3 = arith.constant 0 : index
    %c0_4 = arith.constant 0 : index
    %4 = vector.load %arg3[%c0_3, %c0_4] : memref<1x1024xf32, #tpu.memory_space<vmem>>, vector<1x1024xf32>
    %5 = vector.broadcast %4 : vector<1x1024xf32> to vector<8x1024xf32>
    %6 = arith.addf %3, %5 : vector<8x1024xf32>
    %cst_5 = arith.constant 0.000000e+00 : f32
    %7 = vector.broadcast %cst_5 : f32 to vector<8x1024xf32>
    %8 = arith.maximumf %6, %7 : vector<8x1024xf32>
    %9 = arith.truncf %8 : vector<8x1024xf32> to vector<8x1024xbf16>
    %c0_6 = arith.constant 0 : index
    %c0_7 = arith.constant 0 : index
    %10 = vector.load %arg4[%c0_6, %c0_7] : memref<1024x512xbf16, #tpu.memory_space<vmem>>, vector<1024x512xbf16>
    %cst_8 = arith.constant dense<0.000000e+00> : vector<8x512xf32>
    %11 = tpu.matmul %9, %10, %cst_8 {dimension_numbers = #tpu.dot_dimension_numbers<[1], [0], [0], [1], [0, 0, 1, 1], [], []>} : vector<8x1024xbf16>, vector<1024x512xbf16>, vector<8x512xf32> -> vector<8x512xf32>
    %c0_9 = arith.constant 0 : index
    %c0_10 = arith.constant 0 : index
    %12 = vector.load %arg5[%c0_9, %c0_10] : memref<1x512xf32, #tpu.memory_space<vmem>>, vector<1x512xf32>
    %13 = vector.broadcast %12 : vector<1x512xf32> to vector<8x512xf32>
    %14 = arith.addf %11, %13 : vector<8x512xf32>
    %cst_11 = arith.constant 0.000000e+00 : f32
    %15 = vector.broadcast %cst_11 : f32 to vector<8x512xf32>
    %16 = arith.maximumf %14, %15 : vector<8x512xf32>
    %17 = arith.truncf %16 : vector<8x512xf32> to vector<8x512xbf16>
    %c0_12 = arith.constant 0 : index
    %c0_13 = arith.constant 0 : index
    %18 = vector.load %arg6[%c0_12, %c0_13] : memref<512x128xbf16, #tpu.memory_space<vmem>>, vector<512x128xbf16>
    %cst_14 = arith.constant dense<0.000000e+00> : vector<8x128xf32>
    %19 = tpu.matmul %17, %18, %cst_14 {dimension_numbers = #tpu.dot_dimension_numbers<[1], [0], [0], [1], [0, 0, 1, 1], [], []>} : vector<8x512xbf16>, vector<512x128xbf16>, vector<8x128xf32> -> vector<8x128xf32>
    %c0_15 = arith.constant 0 : index
    %c0_16 = arith.constant 0 : index
    %20 = vector.load %arg7[%c0_15, %c0_16] : memref<1x128xf32, #tpu.memory_space<vmem>>, vector<1x128xf32>
    %21 = vector.broadcast %20 : vector<1x128xf32> to vector<8x128xf32>
    %22 = arith.addf %19, %21 : vector<8x128xf32>
    %cst_17 = arith.constant 0.000000e+00 : f32
    %23 = vector.broadcast %cst_17 : f32 to vector<8x128xf32>
    %24 = arith.maximumf %22, %23 : vector<8x128xf32>
    %25 = arith.truncf %24 : vector<8x128xf32> to vector<8x128xbf16>
    %c0_18 = arith.constant 0 : index
    %c0_19 = arith.constant 0 : index
    %26 = vector.load %arg8[%c0_18, %c0_19] : memref<128x128xbf16, #tpu.memory_space<vmem>>, vector<128x128xbf16>
    %cst_20 = arith.constant dense<0.000000e+00> : vector<8x128xf32>
    %27 = tpu.matmul %25, %26, %cst_20 {dimension_numbers = #tpu.dot_dimension_numbers<[1], [0], [0], [1], [0, 0, 1, 1], [], []>} : vector<8x128xbf16>, vector<128x128xbf16>, vector<8x128xf32> -> vector<8x128xf32>
    %c0_21 = arith.constant 0 : index
    %c0_22 = arith.constant 0 : index
    %28 = vector.load %arg9[%c0_21, %c0_22] : memref<1x128xf32, #tpu.memory_space<vmem>>, vector<1x128xf32>
    %29 = vector.broadcast %28 : vector<1x128xf32> to vector<8x128xf32>
    %30 = arith.addf %27, %29 : vector<8x128xf32>
    %cst_23 = arith.constant 0.000000e+00 : f32
    %31 = vector.broadcast %cst_23 : f32 to vector<8x128xf32>
    %32 = arith.maximumf %30, %31 : vector<8x128xf32>
    %33 = arith.truncf %32 : vector<8x128xf32> to vector<8x128xbf16>
    %c0_24 = arith.constant 0 : index
    %c0_25 = arith.constant 0 : index
    %34 = vector.load %arg10[%c0_24, %c0_25] : memref<128x128xbf16, #tpu.memory_space<vmem>>, vector<128x128xbf16>
    %cst_26 = arith.constant dense<0.000000e+00> : vector<8x128xf32>
    %35 = tpu.matmul %33, %34, %cst_26 {dimension_numbers = #tpu.dot_dimension_numbers<[1], [0], [0], [1], [0, 0, 1, 1], [], []>} : vector<8x128xbf16>, vector<128x128xbf16>, vector<8x128xf32> -> vector<8x128xf32>
    %c0_27 = arith.constant 0 : index
    %c0_28 = arith.constant 0 : index
    %36 = vector.load %arg11[%c0_27, %c0_28] : memref<1x128xf32, #tpu.memory_space<vmem>>, vector<1x128xf32>
    %37 = vector.broadcast %36 : vector<1x128xf32> to vector<8x128xf32>
    %38 = arith.addf %35, %37 : vector<8x128xf32>
    %cst_29 = arith.constant dense<0xFF800000> : vector<8xf32>
    %39 = vector.multi_reduction <maximumf>, %38, %cst_29 [1] : vector<8x128xf32> to vector<8xf32>
    %40 = vector.shape_cast %39 : vector<8xf32> to vector<8x1xf32>
    %41 = vector.broadcast %40 : vector<8x1xf32> to vector<8x128xf32>
    %42 = arith.subf %38, %41 : vector<8x128xf32>
    %43 = math.exp %42 : vector<8x128xf32>
    %cst_30 = arith.constant dense<0.000000e+00> : vector<8xf32>
    %44 = vector.multi_reduction <add>, %43, %cst_30 [1] : vector<8x128xf32> to vector<8xf32>
    %45 = vector.shape_cast %44 : vector<8xf32> to vector<8x1xf32>
    %46 = math.log %45 : vector<8x1xf32>
    %47 = vector.broadcast %46 : vector<8x1xf32> to vector<8x128xf32>
    %48 = arith.subf %42, %47 : vector<8x128xf32>
    %c0_31 = arith.constant 0 : index
    %c0_32 = arith.constant 0 : index
    %49 = vector.load %arg12[%c0_31, %c0_32] : memref<8x128xf32, #tpu.memory_space<vmem>>, vector<8x128xf32>
    tpu.vector_store %arg12[%c0_31, %c0_32], %48 {strides = array<i32>} : memref<8x128xf32, #tpu.memory_space<vmem>>, vector<8x128xf32>,
    return
  }
  func.func @transform_0(%arg0: i32) -> (i32, i32) {
    %c0_i32 = arith.constant 0 : i32
    %c0_i32_0 = arith.constant 0 : i32
    return %arg0, %c0_i32 : i32, i32
  }
  func.func @transform_1(%arg0: i32) -> (i32, i32) {
    %c0_i32 = arith.constant 0 : i32
    %c0_i32_0 = arith.constant 0 : i32
    %c0_i32_1 = arith.constant 0 : i32
    return %c0_i32, %c0_i32_0 : i32, i32
  }
  func.func @transform_2(%arg0: i32) -> (i32, i32) {
    %c0_i32 = arith.constant 0 : i32
    %c0_i32_0 = arith.constant 0 : i32
    %c0_i32_1 = arith.constant 0 : i32
    return %c0_i32, %c0_i32_0 : i32, i32
  }
  func.func @transform_3(%arg0: i32) -> (i32, i32) {
    %c0_i32 = arith.constant 0 : i32
    %c0_i32_0 = arith.constant 0 : i32
    %c0_i32_1 = arith.constant 0 : i32
    return %c0_i32, %c0_i32_0 : i32, i32
  }
  func.func @transform_4(%arg0: i32) -> (i32, i32) {
    %c0_i32 = arith.constant 0 : i32
    %c0_i32_0 = arith.constant 0 : i32
    %c0_i32_1 = arith.constant 0 : i32
    return %c0_i32, %c0_i32_0 : i32, i32
  }
  func.func @transform_5(%arg0: i32) -> (i32, i32) {
    %c0_i32 = arith.constant 0 : i32
    %c0_i32_0 = arith.constant 0 : i32
    %c0_i32_1 = arith.constant 0 : i32
    return %c0_i32, %c0_i32_0 : i32, i32
  }
  func.func @transform_6(%arg0: i32) -> (i32, i32) {
    %c0_i32 = arith.constant 0 : i32
    %c0_i32_0 = arith.constant 0 : i32
    %c0_i32_1 = arith.constant 0 : i32
    return %c0_i32, %c0_i32_0 : i32, i32
  }
  func.func @transform_7(%arg0: i32) -> (i32, i32) {
    %c0_i32 = arith.constant 0 : i32
    %c0_i32_0 = arith.constant 0 : i32
    %c0_i32_1 = arith.constant 0 : i32
    return %c0_i32, %c0_i32_0 : i32, i32
  }
  func.func @transform_8(%arg0: i32) -> (i32, i32) {
    %c0_i32 = arith.constant 0 : i32
    %c0_i32_0 = arith.constant 0 : i32
    %c0_i32_1 = arith.constant 0 : i32
    return %c0_i32, %c0_i32_0 : i32, i32
  }
  func.func @transform_9(%arg0: i32) -> (i32, i32) {
    %c0_i32 = arith.constant 0 : i32
    %c0_i32_0 = arith.constant 0 : i32
    %c0_i32_1 = arith.constant 0 : i32
    return %c0_i32, %c0_i32_0 : i32, i32
  }
  func.func @transform_10(%arg0: i32) -> (i32, i32) {
    %c0_i32 = arith.constant 0 : i32
    %c0_i32_0 = arith.constant 0 : i32
    %c0_i32_1 = arith.constant 0 : i32
    return %c0_i32, %c0_i32_0 : i32, i32
  }
  func.func @transform_11(%arg0: i32) -> (i32, i32) {
    %c0_i32 = arith.constant 0 : i32
    %c0_i32_0 = arith.constant 0 : i32
    return %arg0, %c0_i32 : i32, i32
  }
}

</mosaic_0001>

<bundles_post_ra>
// kernel: mlp_forward_pallas.1
= control target key start
LH: loop header
LB: loop body
LE: loop exit
PB: predicated region body
PF: predicated region fallthrough
CT: control target
= control target key end

     0   :  { %16 = vsyncpa [#allocation3], 0  ;;  %s7657_s0 = inlined_call_operand.vmem [shape: f32[8,784], index: 0, kind: input, shape index: {}]   ;;  %s7658_s1 = inlined_call_operand.hbm [shape: bf16[784,1024], index: 1, kind: input, shape index: {}]   ;;  %s7659_s2 = inlined_call_operand.hbm [shape: f32[1,1024], index: 2, kind: input, shape index: {}]   ;;  %s7660_s3 = inlined_call_operand.hbm [shape: bf16[1024,512], index: 3, kind: input, shape index: {}]   ;;  %s7661_s4 = inlined_call_operand.hbm [shape: f32[1,512], index: 4, kind: input, shape index: {}]   ;;  %s7662_s5 = inlined_call_operand.hbm [shape: bf16[512,128], index: 5, kind: input, shape index: {}]   ;;  %s7663_s6 = inlined_call_operand.hbm [shape: f32[1,128], index: 6, kind: input, shape index: {}]   ;;  %s7664_s7 = inlined_call_operand.hbm [shape: bf16[128,128], index: 7, kind: input, shape index: {}]   ;;  %s7665_s8 = inlined_call_operand.hbm [shape: f32[1,128], index: 8, kind: input, shape index: {}]   ;;  %s7666_s9 = inlined_call_operand.hbm [shape: bf16[128,128], index: 9, kind: input, shape index: {}]   ;;  %s7667_s10 = inlined_call_operand.hbm [shape: f32[1,128], index: 10, kind: input, shape index: {}]   ;;  %s7668_s11 = inlined_call_operand.vmem [shape: f32[8,128], index: 11, kind: output, shape index: {}]  }
   0x1   :  { %17 = vsyncpa [#allocation5], 0 }
   0x2   :  { %18 = vsyncpa [#allocation8], 0 }
   0x3   :  { %19 = vsyncpa [#allocation11], 0 }
   0x4   :  { %20 = vsyncpa [#allocation14], 0 }
   0x5   :  { %21 = vsyncpa [#allocation17], 0  ;;  %s7310_s17 = smov [#allocation4]   ;;  %s7311_s19 = smov [#allocation7]  }
   0x6   :  { %s42_s18 = sshll.u32 %s7310_s17, 4  ;;  %s64_s20 = sshll.u32 %s7311_s19, 4  ;;  %s43_s18 = int_to_ptr.vmem [resolvable:$true] %s42_s18  ;;  %s65_s20 = int_to_ptr.vmem [resolvable:$true] %s64_s20 }
   0x7   :  { %s7078_s23 = scalar_lea.hbm %s7659_s2, 128 }
   0x8   :  { %p7079_p0 = scmp.ne.s32.totalorder %s7659_s2, %s7078_s23  ;;  %p7082_p1 = scmp.lt.u32.totalorder %s7078_s23, %s7659_s2 }
   0xa   :  { %p7084_p2 = pnand %p7082_p1, %p7079_p0 }
   0xc   :  { %7087 = shalt.err (!%p7084_p2)
}
   0xd   :  { %s7088_s28 = scalar_lea.vmem %s43_s18, 128  ;;  %p7093_p4 = scmp.lt.s32.totalorder %s43_s18, %s43_s18 }
   0xe   :  { %p7089_p3 = scmp.ne.s32.totalorder %s43_s18, %s7088_s28  ;;  %p7094_p5 = scmp.lt.s32.totalorder %s7088_s28, %s7088_s28 }
  0x10   :  { %p7095_p6 = por %p7094_p5, %p7093_p4 }
  0x12   :  { %p7096_p7 = pnand %p7095_p6, %p7089_p3 }
  0x14   :  { %7099 = shalt.err (!%p7096_p7)
}
  0x15   :  { %45 = dma.hbm_to_vmem [thread:$0]  %s7659_s2, 128, %s43_s18, [#allocation5]  }
  0x16   :  { %s7100_s14 = scalar_lea.hbm %s7661_s4, 64 }
  0x17   :  { %p7101_p8 = scmp.ne.s32.totalorder %s7661_s4, %s7100_s14  ;;  %p7104_p9 = scmp.lt.u32.totalorder %s7100_s14, %s7661_s4 }
  0x19   :  { %p7106_p10 = pnand %p7104_p9, %p7101_p8 }
  0x1b   :  { %7109 = shalt.err (!%p7106_p10)
}
  0x1c   :  { %s7110_s21 = scalar_lea.vmem %s65_s20, 64  ;;  %p7115_p12 = scmp.lt.s32.totalorder %s65_s20, %s65_s20 }
  0x1d   :  { %p7111_p11 = scmp.ne.s32.totalorder %s65_s20, %s7110_s21  ;;  %p7116_p13 = scmp.lt.s32.totalorder %s7110_s21, %s7110_s21 }
  0x1f   :  { %p7117_p0 = por %p7116_p13, %p7115_p12 }
  0x21   :  { %p7118_p1 = pnand %p7117_p0, %p7111_p11 }
  0x23   :  { %7121 = shalt.err (!%p7118_p1)
}
  0x24   :  { %67 = dma.hbm_to_vmem [thread:$0]  %s7661_s4, 64, %s65_s20, [#allocation8]  }
  0x25   :  { %s7312_s22 = smov [#allocation10]   ;;  %s7313_s24 = smov [#allocation13]  }
  0x26   :  { %s86_s23 = sshll.u32 %s7312_s22, 4  ;;  %s108_s25 = sshll.u32 %s7313_s24, 4  ;;  %s87_s23 = int_to_ptr.vmem [resolvable:$true] %s86_s23  ;;  %s109_s25 = int_to_ptr.vmem [resolvable:$true] %s108_s25 }
  0x27   :  { %s7122_s28 = scalar_lea.hbm %s7663_s6, 16 }
  0x28   :  { %p7123_p2 = scmp.ne.s32.totalorder %s7663_s6, %s7122_s28  ;;  %p7126_p3 = scmp.lt.u32.totalorder %s7122_s28, %s7663_s6 }
  0x2a   :  { %p7128_p4 = pnand %p7126_p3, %p7123_p2 }
  0x2c   :  { %7131 = shalt.err (!%p7128_p4)
}
  0x2d   :  { %s7132_s4 = scalar_lea.vmem %s87_s23, 16  ;;  %s7136_s20 = scalar_lea.vmem %s87_s23, 32 }
  0x2e   :  { %p7133_p5 = scmp.ne.s32.totalorder %s87_s23, %s7132_s4  ;;  %p7137_p6 = scmp.lt.s32.totalorder %s87_s23, %s87_s23 }
  0x2f   :  { %p7138_p7 = scmp.lt.s32.totalorder %s7136_s20, %s7132_s4 }
  0x31   :  { %p7139_p8 = por %p7138_p7, %p7137_p6 }
  0x33   :  { %p7140_p9 = pnand %p7139_p8, %p7133_p5 }
  0x35   :  { %7143 = shalt.err (!%p7140_p9)
}
  0x36   :  { %89 = dma.hbm_to_vmem [thread:$0]  %s7663_s6, 16, %s87_s23, [#allocation11]  }
  0x37   :  { %s7144_s19 = scalar_lea.hbm %s7665_s8, 16 }
  0x38   :  { %p7145_p10 = scmp.ne.s32.totalorder %s7665_s8, %s7144_s19  ;;  %p7148_p11 = scmp.lt.u32.totalorder %s7144_s19, %s7665_s8 }
  0x3a   :  { %p7150_p12 = pnand %p7148_p11, %p7145_p10 }
  0x3c   :  { %7153 = shalt.err (!%p7150_p12)
}
  0x3d   :  { %s7154_s24 = scalar_lea.vmem %s109_s25, 16  ;;  %s7158_s26 = scalar_lea.vmem %s109_s25, 32 }
  0x3e   :  { %p7155_p13 = scmp.ne.s32.totalorder %s109_s25, %s7154_s24  ;;  %p7159_p0 = scmp.lt.s32.totalorder %s109_s25, %s109_s25 }
  0x3f   :  { %p7160_p1 = scmp.lt.s32.totalorder %s7158_s26, %s7154_s24 }
  0x41   :  { %p7161_p2 = por %p7160_p1, %p7159_p0 }
  0x43   :  { %p7162_p3 = pnand %p7161_p2, %p7155_p13 }
  0x45   :  { %7165 = shalt.err (!%p7162_p3)
}
  0x46   :  { %111 = dma.hbm_to_vmem [thread:$0]  %s7665_s8, 16, %s109_s25, [#allocation14]  }
  0x47   :  { %s7314_s27 = smov [#allocation2]   ;;  %s7166_s12 = scalar_lea.hbm %s7658_s1, 50176 }
  0x48   :  { %s29_s28 = sshll.u32 %s7314_s27, 4  ;;  %p7167_p4 = scmp.ne.s32.totalorder %s7658_s1, %s7166_s12  ;;  %s30_s28 = int_to_ptr.vmem [resolvable:$true] %s29_s28 }
  0x49   :  { %p7170_p5 = scmp.lt.u32.totalorder %s7166_s12, %s7658_s1 }
  0x4b   :  { %p7172_p6 = pnand %p7170_p5, %p7167_p4 }
  0x4d   :  { %7175 = shalt.err (!%p7172_p6)
}
  0x4e   :  { %s7176_s15 = scalar_lea.vmem %s30_s28, 50176  ;;  %p7181_p8 = scmp.lt.s32.totalorder %s30_s28, %s30_s28 }
  0x4f   :  { %p7177_p7 = scmp.ne.s32.totalorder %s30_s28, %s7176_s15  ;;  %p7182_p9 = scmp.lt.s32.totalorder %s7176_s15, %s7176_s15 }
  0x51   :  { %p7183_p10 = por %p7182_p9, %p7181_p8 }
  0x53   :  { %p7184_p11 = pnand %p7183_p10, %p7177_p7 }
  0x55   :  { %7187 = shalt.err (!%p7184_p11)
}
  0x56   :  { %s7315_s8 = smov 512   ;;  %s7316_s25 = smov 32  }
  0x57   :  { %35 = dma.hbm_to_vmem [thread:$0]  %s7658_s1, 50176, %s30_s28, [#allocation3], %s7315_s8, %s7315_s8, %s7316_s25  }
  0x58   :  { %s7317_s19 = smov [#allocation6]   ;;  %s7188_s22 = scalar_lea.hbm %s7660_s3, 32768 }
  0x59   :  { %s51_s21 = sshll.u32 %s7317_s19, 4  ;;  %p7189_p12 = scmp.ne.s32.totalorder %s7660_s3, %s7188_s22  ;;  %s52_s21 = int_to_ptr.vmem [resolvable:$true] %s51_s21 }
  0x5a   :  { %p7192_p13 = scmp.lt.u32.totalorder %s7188_s22, %s7660_s3 }
  0x5c   :  { %p7194_p0 = pnand %p7192_p13, %p7189_p12 }
  0x5e   :  { %7197 = shalt.err (!%p7194_p0)
}
  0x5f   :  { %s7198_s27 = scalar_lea.vmem %s52_s21, 32768  ;;  %p7203_p2 = scmp.lt.s32.totalorder %s52_s21, %s52_s21 }
  0x60   :  { %p7199_p1 = scmp.ne.s32.totalorder %s52_s21, %s7198_s27  ;;  %p7204_p3 = scmp.lt.s32.totalorder %s7198_s27, %s7198_s27 }
  0x62   :  { %p7205_p4 = por %p7204_p3, %p7203_p2 }
  0x64   :  { %p7206_p5 = pnand %p7205_p4, %p7199_p1 }
  0x66   :  { %7209 = shalt.err (!%p7206_p5)
}
  0x67   :  { %s7318_s1 = smov 256   ;;  %s7319_s28 = smov 16  }
  0x68   :  { %57 = dma.hbm_to_vmem [thread:$0]  %s7660_s3, 32768, %s52_s21, [#allocation5], %s7318_s1, %s7318_s1, %s7319_s28  }
  0x69   :  { %s7320_s12 = smov [#allocation9]   ;;  %s7210_s14 = scalar_lea.hbm %s7662_s5, 4096 }
  0x6a   :  { %s73_s13 = sshll.u32 %s7320_s12, 4  ;;  %p7211_p6 = scmp.ne.s32.totalorder %s7662_s5, %s7210_s14  ;;  %s74_s13 = int_to_ptr.vmem [resolvable:$true] %s73_s13 }
  0x6b   :  { %p7214_p7 = scmp.lt.u32.totalorder %s7210_s14, %s7662_s5 }
  0x6d   :  { %p7216_p8 = pnand %p7214_p7, %p7211_p6 }
  0x6f   :  { %7219 = shalt.err (!%p7216_p8)
}
  0x70   :  { %s7220_s17 = scalar_lea.vmem %s74_s13, 4096  ;;  %p7225_p10 = scmp.lt.s32.totalorder %s74_s13, %s74_s13 }
  0x71   :  { %p7221_p9 = scmp.ne.s32.totalorder %s74_s13, %s7220_s17  ;;  %p7226_p11 = scmp.lt.s32.totalorder %s7220_s17, %s7220_s17 }
  0x73   :  { %p7227_p12 = por %p7226_p11, %p7225_p10 }
  0x75   :  { %p7228_p13 = pnand %p7227_p12, %p7221_p9 }
  0x77   :  { %7231 = shalt.err (!%p7228_p13)
}
  0x78   :  { %s7321_s3 = smov 64   ;;  %s7322_s19 = smov 4  }
  0x79   :  { %79 = dma.hbm_to_vmem [thread:$0]  %s7662_s5, 4096, %s74_s13, [#allocation8], %s7321_s3, %s7321_s3, %s7322_s19  }
  0x7a   :  { %s7323_s18 = smov [#allocation12]   ;;  %s7324_s24 = smov [#allocation15]  }
  0x7b   :  { %s95_s22 = sshll.u32 %s7323_s18, 4  ;;  %s117_s26 = sshll.u32 %s7324_s24, 4  ;;  %s96_s22 = int_to_ptr.vmem [resolvable:$true] %s95_s22  ;;  %s118_s26 = int_to_ptr.vmem [resolvable:$true] %s117_s26 }
  0x7c   :  { %s7232_s27 = scalar_lea.hbm %s7664_s7, 1024 }
  0x7d   :  { %p7233_p0 = scmp.ne.s32.totalorder %s7664_s7, %s7232_s27  ;;  %p7236_p1 = scmp.lt.u32.totalorder %s7232_s27, %s7664_s7 }
  0x7f   :  { %p7238_p2 = pnand %p7236_p1, %p7233_p0 }
  0x81   :  { %7241 = shalt.err (!%p7238_p2)
}
  0x82   :  { %s7242_s5 = scalar_lea.vmem %s96_s22, 1024  ;;  %p7247_p4 = scmp.lt.s32.totalorder %s96_s22, %s96_s22 }
  0x83   :  { %p7243_p3 = scmp.ne.s32.totalorder %s96_s22, %s7242_s5  ;;  %p7248_p5 = scmp.lt.s32.totalorder %s7242_s5, %s7242_s5 }
  0x85   :  { %p7249_p6 = por %p7248_p5, %p7247_p4 }
  0x87   :  { %p7250_p7 = pnand %p7249_p6, %p7243_p3 }
  0x89   :  { %7253 = shalt.err (!%p7250_p7)
}
  0x8a   :  { %101 = dma.hbm_to_vmem [thread:$0]  %s7664_s7, 1024, %s96_s22, [#allocation11], %s7321_s3, %s7321_s3, %s7322_s19  }
  0x8b   :  { %s7254_s14 = scalar_lea.hbm %s7666_s9, 1024 }
  0x8c   :  { %p7255_p8 = scmp.ne.s32.totalorder %s7666_s9, %s7254_s14  ;;  %p7258_p9 = scmp.lt.u32.totalorder %s7254_s14, %s7666_s9 }
  0x8e   :  { %p7260_p10 = pnand %p7258_p9, %p7255_p8 }
  0x90   :  { %7263 = shalt.err (!%p7260_p10)
}
  0x91   :  { %s7264_s17 = scalar_lea.vmem %s118_s26, 1024  ;;  %p7269_p12 = scmp.lt.s32.totalorder %s118_s26, %s118_s26 }
  0x92   :  { %p7265_p11 = scmp.ne.s32.totalorder %s118_s26, %s7264_s17  ;;  %p7270_p13 = scmp.lt.s32.totalorder %s7264_s17, %s7264_s17 }
  0x94   :  { %p7271_p0 = por %p7270_p13, %p7269_p12 }
  0x96   :  { %p7272_p1 = pnand %p7271_p0, %p7265_p11 }
  0x98   :  { %7275 = shalt.err (!%p7272_p1)
}
  0x99   :  { %123 = dma.hbm_to_vmem [thread:$0]  %s7666_s9, 1024, %s118_s26, [#allocation14], %s7321_s3, %s7321_s3, %s7322_s19  }
  0x9a   :  { %s7325_s2 = smov [#allocation16]   ;;  %s7276_s6 = scalar_lea.hbm %s7667_s10, 16 }
  0x9b   :  { %s130_s18 = sshll.u32 %s7325_s2, 4  ;;  %p7277_p2 = scmp.ne.s32.totalorder %s7667_s10, %s7276_s6  ;;  %s131_s18 = int_to_ptr.vmem [resolvable:$true] %s130_s18 }
  0x9c   :  { %p7280_p3 = scmp.lt.u32.totalorder %s7276_s6, %s7667_s10 }
  0x9e   :  { %p7282_p4 = pnand %p7280_p3, %p7277_p2 }
  0xa0   :  { %7285 = shalt.err (!%p7282_p4)
}
  0xa1   :  { %s7286_s29 = scalar_lea.vmem %s131_s18, 16  ;;  %s7290_s9 = scalar_lea.vmem %s131_s18, 32 }
  0xa2   :  { %p7287_p5 = scmp.ne.s32.totalorder %s131_s18, %s7286_s29  ;;  %p7291_p6 = scmp.lt.s32.totalorder %s131_s18, %s131_s18 }
  0xa3   :  { %p7292_p7 = scmp.lt.s32.totalorder %s7290_s9, %s7286_s29 }
  0xa5   :  { %p7293_p8 = por %p7292_p7, %p7291_p6 }
  0xa7   :  { %p7294_p9 = pnand %p7293_p8, %p7287_p5 }
  0xa9   :  { %7297 = shalt.err (!%p7294_p9)
}
  0xaa   :  { %133 = dma.hbm_to_vmem [thread:$0]  %s7667_s10, 16, %s131_s18, [#allocation17]  }
  0xab   :  { %7298 = dma.done.wait [#allocation3], 50176  }
  0xac   :  { %7299 = vsyncadd [#allocation3], 4294917120 }
  0xad   :  { %7300 = dma.done.wait [#allocation5], 32896  }
  0xae   :  { %7301 = vsyncadd [#allocation5], 4294934400 }
  0xaf   :  { %7302 = dma.done.wait [#allocation8], 4160  }
  0xb0   :  { %7303 = vsyncadd [#allocation8], 4294963136 }
  0xb1   :  { %7304 = dma.done.wait [#allocation11], 1040  }
  0xb2   :  { %7305 = vsyncadd [#allocation11], 4294966256 }
  0xb3   :  { %7306 = dma.done.wait [#allocation14], 1040  }
  0xb4   :  { %7307 = vsyncadd [#allocation14], 4294966256 }
  0xb5   :  { %7308 = dma.done.wait [#allocation17], 16  }
  0xb6   :  { %7309 = vsyncadd [#allocation17], 4294967280  ;;  %v179_v0 = vld [vmem:[#allocation2] sm:$0xff]  ;;  %v180_v2 = vld [vmem:[#allocation2 + $0x8] sm:$0xff]  ;;  %vm2573_vm0 = vcmask 130048   ;;  %vm7328_vm1 = vmmov 0  }
  0xb7   :  { %v183_v1 = vld [vmem:[#allocation2 + $0x20] sm:$0xff]  ;;  %v184_v4 = vld [vmem:[#allocation2 + $0x28] sm:$0xff] }
  0xb8   :  { %v5734_v3 = vcombine.high %v179_v0, %v183_v1  ;;  %v5733_v5 = vcombine.low %v179_v0, %v183_v1  ;;  %v187_v6 = vld [vmem:[#allocation2 + $0x40] sm:$0xff]  ;;  %v5736_v8 = vcombine.high %v180_v2, %v184_v4  ;;  %v5735_v9 = vcombine.low %v180_v2, %v184_v4  ;;  %v188_v11 = vld [vmem:[#allocation2 + $0x48] sm:$0xff] }
  0xb9   :  { %v191_v7 = vld [vmem:[#allocation2 + $0x60] sm:$0xff]  ;;  %v192_v12 = vld [vmem:[#allocation2 + $0x68] sm:$0xff] }
  0xba   :  { %v5742_v10 = vcombine.high %v187_v6, %v191_v7  ;;  %v195_v13 = vld [vmem:[#allocation2 + $0x80] sm:$0xff]  ;;  %2577 = vmatprep.subr.bf16.mxu0 %v5734_v3  ;;  %v5744_v14 = vcombine.high %v188_v11, %v192_v12  ;;  %v196_v16 = vld [vmem:[#allocation2 + $0x88] sm:$0xff]  ;;  %2741 = vmatprep.subr.bf16.mxu1 %v5736_v8  ;;  %v5741_v18 = vcombine.low %v187_v6, %v191_v7 }
  0xbb   :  { %v199_v15 = vld [vmem:[#allocation2 + $0xa0] sm:$0xff]  ;;  %v200_v17 = vld [vmem:[#allocation2 + $0xa8] sm:$0xff]  ;;  %2578 = vmatpush1.bf16.msra.mxu0 %v5733_v5  ;;  %2742 = vmatpush1.bf16.msra.mxu1 %v5735_v9  ;;  %v5743_v19 = vcombine.low %v188_v11, %v192_v12 }
  0xbc   :  { %2579 = vmatprep.subr.bf16.mxu0 %v5742_v10  ;;  %v5750_v20 = vcombine.high %v195_v13, %v199_v15  ;;  %2743 = vmatprep.subr.bf16.mxu1 %v5744_v14  ;;  %v5752_v21 = vcombine.high %v196_v16, %v200_v17  ;;  %v203_v22 = vld [vmem:[#allocation2 + $0xc0] sm:$0xff]  ;;  %v204_v24 = vld [vmem:[#allocation2 + $0xc8] sm:$0xff]  ;;  %v5749_v26 = vcombine.low %v195_v13, %v199_v15 }
  0xbd   :  { %v207_v23 = vld [vmem:[#allocation2 + $0xe0] sm:$0xff]  ;;  %v208_v25 = vld [vmem:[#allocation2 + $0xe8] sm:$0xff]  ;;  %v5751_v27 = vcombine.low %v196_v16, %v200_v17 }
  0xbe   :  { %v5758_v28 = vcombine.high %v203_v22, %v207_v23  ;;  %v5760_v29 = vcombine.high %v204_v24, %v208_v25  ;;  %v211_v30 = vld [vmem:[#allocation2 + $0x100] sm:$0xff]  ;;  %v212_v32 = vld [vmem:[#allocation2 + $0x108] sm:$0xff]  ;;  %v5757_v34 = vcombine.low %v203_v22, %v207_v23  ;;  %v5759_v35 = vcombine.low %v204_v24, %v208_v25 }
  0xbf   :  { %2580 = vmatpush1.bf16.msra.mxu0 %v5741_v18  ;;  %2744 = vmatpush1.bf16.msra.mxu1 %v5743_v19  ;;  %v215_v31 = vld [vmem:[#allocation2 + $0x120] sm:$0xff]  ;;  %v216_v33 = vld [vmem:[#allocation2 + $0x128] sm:$0xff] }
  0xc0   :  { %2581 = vmatprep.subr.bf16.mxu0 %v5750_v20  ;;  %2745 = vmatprep.subr.bf16.mxu1 %v5752_v21  ;;  %v5766_v36 = vcombine.high %v211_v30, %v215_v31  ;;  %v5768_v37 = vcombine.high %v212_v32, %v216_v33  ;;  %v219_v38 = vld [vmem:[#allocation2 + $0x140] sm:$0xff]  ;;  %v220_v40 = vld [vmem:[#allocation2 + $0x148] sm:$0xff]  ;;  %v5765_v42 = vcombine.low %v211_v30, %v215_v31 }
  0xc1   :  { %v223_v39 = vld [vmem:[#allocation2 + $0x160] sm:$0xff]  ;;  %v224_v41 = vld [vmem:[#allocation2 + $0x168] sm:$0xff]  ;;  %v5767_v43 = vcombine.low %v212_v32, %v216_v33 }
  0xc2   :  { %v5774_v44 = vcombine.high %v219_v38, %v223_v39  ;;  %v5776_v45 = vcombine.high %v220_v40, %v224_v41  ;;  %v227_v46 = vld [vmem:[#allocation2 + $0x180] sm:$0xff]  ;;  %v228_v48 = vld [vmem:[#allocation2 + $0x188] sm:$0xff]  ;;  %v5773_v50 = vcombine.low %v219_v38, %v223_v39  ;;  %v5775_v51 = vcombine.low %v220_v40, %v224_v41 }
  0xc3   :  { %2582 = vmatpush1.bf16.msra.mxu0 %v5749_v26  ;;  %2746 = vmatpush1.bf16.msra.mxu1 %v5751_v27  ;;  %v231_v47 = vld [vmem:[#allocation2 + $0x1a0] sm:$0xff]  ;;  %v232_v49 = vld [vmem:[#allocation2 + $0x1a8] sm:$0xff] }
  0xc4   :  { %2583 = vmatprep.subr.bf16.mxu0 %v5758_v28  ;;  %2747 = vmatprep.subr.bf16.mxu1 %v5760_v29  ;;  %v5782_v52 = vcombine.high %v227_v46, %v231_v47  ;;  %v166_v53 = vld [vmem:[%s7657_s0 + $0x8] sm:$0xff]  ;;  %v5784_v54 = vcombine.high %v228_v48, %v232_v49  ;;  %v235_v55 = vld [vmem:[#allocation2 + $0x1c0] sm:$0xff]  ;;  %v5781_v60 = vcombine.low %v227_v46, %v231_v47 }
  0xc5   :  { %v239_v56 = vld [vmem:[#allocation2 + $0x1e0] sm:$0xff]  ;;  %v7521_v57 = vpack.c.bf16 %v166_v53, %v166_v53  ;;  %v236_v58 = vld [vmem:[#allocation2 + $0x1c8] sm:$0xff]  ;;  %v5783_v61 = vcombine.low %v228_v48, %v232_v49 }
  0xc6   :  { %v240_v59 = vld [vmem:[#allocation2 + $0x1e8] sm:$0xff]  ;;  %v5790_v62 = vcombine.high %v235_v55, %v239_v56  ;;  %v243_v0 = vld [vmem:[#allocation2 + $0x200] sm:$0xff]  ;;  %v5789_v4 = vcombine.low %v235_v55, %v239_v56 }
  0xc7   :  { %2584 = vmatpush1.bf16.msra.mxu0 %v5757_v34  ;;  %2748 = vmatpush1.bf16.msra.mxu1 %v5759_v35  ;;  %v5792_v63 = vcombine.high %v236_v58, %v240_v59  ;;  %v247_v1 = vld [vmem:[#allocation2 + $0x220] sm:$0xff]  ;;  %v244_v2 = vld [vmem:[#allocation2 + $0x208] sm:$0xff]  ;;  %v5791_v5 = vcombine.low %v236_v58, %v240_v59 }
  0xc8   :  { %2585 = vmatprep.subr.bf16.mxu0 %v5766_v36  ;;  %2749 = vmatprep.subr.bf16.mxu1 %v5768_v37  ;;  %v248_v3 = vld [vmem:[#allocation2 + $0x228] sm:$0xff]  ;;  %v5798_v6 = vcombine.high %v243_v0, %v247_v1  ;;  %v251_v8 = vld [vmem:[#allocation2 + $0x240] sm:$0xff]  ;;  %v5797_v12 = vcombine.low %v243_v0, %v247_v1 }
  0xc9   :  { %2609 = vmatprep.mubr.bf16.mxu0 %v7521_v57  ;;  %2773 = vmatprep.mubr.bf16.mxu1 %v7521_v57  ;;  %v5800_v7 = vcombine.high %v244_v2, %v248_v3  ;;  %v255_v9 = vld [vmem:[#allocation2 + $0x260] sm:$0xff]  ;;  %v252_v10 = vld [vmem:[#allocation2 + $0x248] sm:$0xff]  ;;  %v5799_v13 = vcombine.low %v244_v2, %v248_v3 }
  0xca   :  { %v256_v11 = vld [vmem:[#allocation2 + $0x268] sm:$0xff]  ;;  %v5806_v14 = vcombine.high %v251_v8, %v255_v9  ;;  %v259_v16 = vld [vmem:[#allocation2 + $0x280] sm:$0xff]  ;;  %v5805_v20 = vcombine.low %v251_v8, %v255_v9 }
  0xcb   :  { %2586 = vmatpush1.bf16.msra.mxu0 %v5765_v42  ;;  %2750 = vmatpush1.bf16.msra.mxu1 %v5767_v43  ;;  %v5808_v15 = vcombine.high %v252_v10, %v256_v11  ;;  %v263_v17 = vld [vmem:[#allocation2 + $0x2a0] sm:$0xff]  ;;  %v260_v18 = vld [vmem:[#allocation2 + $0x288] sm:$0xff]  ;;  %v5807_v21 = vcombine.low %v252_v10, %v256_v11 }
  0xcc   :  { %2587 = vmatprep.subr.bf16.mxu0 %v5774_v44  ;;  %2751 = vmatprep.subr.bf16.mxu1 %v5776_v45  ;;  %v264_v19 = vld [vmem:[#allocation2 + $0x2a8] sm:$0xff]  ;;  %v5814_v22 = vcombine.high %v259_v16, %v263_v17  ;;  %v267_v24 = vld [vmem:[#allocation2 + $0x2c0] sm:$0xff]  ;;  %v5813_v28 = vcombine.low %v259_v16, %v263_v17 }
  0xcd   :  { %v5816_v23 = vcombine.high %v260_v18, %v264_v19  ;;  %v271_v25 = vld [vmem:[#allocation2 + $0x2e0] sm:$0xff]  ;;  %v268_v26 = vld [vmem:[#allocation2 + $0x2c8] sm:$0xff]  ;;  %v5815_v29 = vcombine.low %v260_v18, %v264_v19 }
  0xce   :  { %v272_v27 = vld [vmem:[#allocation2 + $0x2e8] sm:$0xff]  ;;  %v5822_v30 = vcombine.high %v267_v24, %v271_v25  ;;  %v275_v32 = vld [vmem:[#allocation2 + $0x300] sm:$0xff]  ;;  %v5821_v36 = vcombine.low %v267_v24, %v271_v25 }
  0xcf   :  { %2588 = vmatpush1.bf16.msra.mxu0 %v5773_v50  ;;  %2752 = vmatpush1.bf16.msra.mxu1 %v5775_v51  ;;  %v5824_v31 = vcombine.high %v268_v26, %v272_v27  ;;  %v279_v33 = vld [vmem:[#allocation2 + $0x320] sm:$0xff]  ;;  %v276_v34 = vld [vmem:[#allocation2 + $0x308] sm:$0xff]  ;;  %v5823_v37 = vcombine.low %v268_v26, %v272_v27 }
  0xd0   :  { %2589 = vmatprep.subr.bf16.mxu0 %v5782_v52  ;;  %2753 = vmatprep.subr.bf16.mxu1 %v5784_v54  ;;  %v280_v35 = vld [vmem:[#allocation2 + $0x328] sm:$0xff]  ;;  %v5830_v38 = vcombine.high %v275_v32, %v279_v33  ;;  %v283_v40 = vld [vmem:[#allocation2 + $0x340] sm:$0xff]  ;;  %v5829_v44 = vcombine.low %v275_v32, %v279_v33 }
  0xd1   :  { %v5832_v39 = vcombine.high %v276_v34, %v280_v35  ;;  %v287_v41 = vld [vmem:[#allocation2 + $0x360] sm:$0xff]  ;;  %v284_v42 = vld [vmem:[#allocation2 + $0x348] sm:$0xff]  ;;  %v5831_v45 = vcombine.low %v276_v34, %v280_v35 }
  0xd2   :  { %v288_v43 = vld [vmem:[#allocation2 + $0x368] sm:$0xff]  ;;  %v5838_v46 = vcombine.high %v283_v40, %v287_v41  ;;  %v291_v48 = vld [vmem:[#allocation2 + $0x380] sm:$0xff]  ;;  %v5837_v52 = vcombine.low %v283_v40, %v287_v41 }
  0xd3   :  { %2590 = vmatpush1.bf16.msra.mxu0 %v5781_v60  ;;  %2754 = vmatpush1.bf16.msra.mxu1 %v5783_v61  ;;  %v5840_v47 = vcombine.high %v284_v42, %v288_v43  ;;  %v295_v49 = vld [vmem:[#allocation2 + $0x3a0] sm:$0xff]  ;;  %v292_v50 = vld [vmem:[#allocation2 + $0x388] sm:$0xff]  ;;  %v5839_v53 = vcombine.low %v284_v42, %v288_v43 }
  0xd4   :  { %2591 = vmatprep.subr.bf16.mxu0 %v5790_v62  ;;  %2755 = vmatprep.subr.bf16.mxu1 %v5792_v63  ;;  %v296_v51 = vld [vmem:[#allocation2 + $0x3a8] sm:$0xff]  ;;  %v5846_v54 = vcombine.high %v291_v48, %v295_v49  ;;  %v299_v56 = vld [vmem:[#allocation2 + $0x3c0] sm:$0xff]  ;;  %v5845_v61 = vcombine.low %v291_v48, %v295_v49 }
  0xd5   :  { %v5848_v55 = vcombine.high %v292_v50, %v296_v51  ;;  %v303_v58 = vld [vmem:[#allocation2 + $0x3e0] sm:$0xff]  ;;  %v300_v59 = vld [vmem:[#allocation2 + $0x3c8] sm:$0xff]  ;;  %v5847_v62 = vcombine.low %v292_v50, %v296_v51 }
  0xd6   :  { %v304_v60 = vld [vmem:[#allocation2 + $0x3e8] sm:$0xff]  ;;  %v5854_v63 = vcombine.high %v299_v56, %v303_v58  ;;  %v307_v1 = vld [vmem:[#allocation2 + $0x400] sm:$0xff] }
  0xd7   :  { %2592 = vmatpush1.bf16.msra.mxu0 %v5789_v4  ;;  %2756 = vmatpush1.bf16.msra.mxu1 %v5791_v5  ;;  %v5856_v0 = vcombine.high %v300_v59, %v304_v60  ;;  %v311_v2 = vld [vmem:[#allocation2 + $0x420] sm:$0xff]  ;;  %v308_v3 = vld [vmem:[#allocation2 + $0x408] sm:$0xff]  ;;  %v5853_v5 = vcombine.low %v299_v56, %v303_v58 }
  0xd8   :  { %2593 = vmatprep.subr.bf16.mxu0 %v5798_v6  ;;  %2757 = vmatprep.subr.bf16.mxu1 %v5800_v7  ;;  %v312_v4 = vld [vmem:[#allocation2 + $0x428] sm:$0xff]  ;;  %v165_v6 = vld [vmem:[%s7657_s0] sm:$0xff]  ;;  %v5855_v7 = vcombine.low %v300_v59, %v304_v60  ;;  %v5862_v8 = vcombine.high %v307_v1, %v311_v2  ;;  %v5861_v16 = vcombine.low %v307_v1, %v311_v2 }
  0xd9   :  { %v5864_v9 = vcombine.high %v308_v3, %v312_v4  ;;  %v315_v10 = vld [vmem:[#allocation2 + $0x440] sm:$0xff]  ;;  %v5863_v17 = vcombine.low %v308_v3, %v312_v4  ;;  %v328_v24 = vld [vmem:[#allocation2 + $0x4a8] sm:$0xff] }
  0xda   :  { %v319_v11 = vld [vmem:[#allocation2 + $0x460] sm:$0xff]  ;;  %v336_v32 = vld [vmem:[#allocation2 + $0x4e8] sm:$0xff] }
  0xdb   :  { %2594 = vmatpush1.bf16.msra.mxu0 %v5797_v12  ;;  %2758 = vmatpush1.bf16.msra.mxu1 %v5799_v13  ;;  %v7528_v12 = vpack.c.bf16 %v165_v6, %v165_v6  ;;  %v316_v13 = vld [vmem:[#allocation2 + $0x448] sm:$0xff]  ;;  %v5870_v18 = vcombine.high %v315_v10, %v319_v11  ;;  %v323_v19 = vld [vmem:[#allocation2 + $0x480] sm:$0xff]  ;;  %v5869_v25 = vcombine.low %v315_v10, %v319_v11 }
  0xdc   :  { %2595 = vmatprep.subr.bf16.mxu0 %v5806_v14  ;;  %2759 = vmatprep.subr.bf16.mxu1 %v5808_v15  ;;  %v320_v14 = vld [vmem:[#allocation2 + $0x468] sm:$0xff]  ;;  %v168_v15 = vld [vmem:[%s7657_s0 + $0x18] sm:$0xff]  ;;  %v339_v34 = vld [vmem:[#allocation2 + $0x500] sm:$0xff] }
  0xdd   :  { %v5871_v26 = vcombine.low %v316_v13, %v320_v14  ;;  %v343_v35 = vld [vmem:[#allocation2 + $0x520] sm:$0xff]  ;;  %v360_v56 = vld [vmem:[#allocation2 + $0x5a8] sm:$0xff] }
  0xde   :  { %v347_v42 = vld [vmem:[#allocation2 + $0x540] sm:$0xff]  ;;  %v5893_v49 = vcombine.low %v339_v34, %v343_v35  ;;  %v368_v1 = vld [vmem:[#allocation2 + $0x5e8] sm:$0xff] }
  0xdf   :  { %2596 = vmatpush1.bf16.msra.mxu0 %v5805_v20  ;;  %2760 = vmatpush1.bf16.msra.mxu1 %v5807_v21  ;;  %v327_v20 = vld [vmem:[#allocation2 + $0x4a0] sm:$0xff]  ;;  %v5872_v21 = vcombine.high %v316_v13, %v320_v14 }
  0xe0   :  { %2597 = vmatprep.subr.bf16.mxu0 %v5814_v22  ;;  %2761 = vmatprep.subr.bf16.mxu1 %v5816_v23  ;;  %v7533_v22 = vpack.c.bf16 %v168_v15, %v168_v15  ;;  %v324_v23 = vld [vmem:[#allocation2 + $0x488] sm:$0xff]  ;;  %v5878_v27 = vcombine.high %v323_v19, %v327_v20  ;;  %v5877_v33 = vcombine.low %v323_v19, %v327_v20  ;;  %v351_v43 = vld [vmem:[#allocation2 + $0x560] sm:$0xff] }
  0xe1   :  { %v5902_v51 = vcombine.high %v347_v42, %v351_v43  ;;  %v5901_v58 = vcombine.low %v347_v42, %v351_v43  ;;  %v375_v6 = vld [vmem:[#allocation2 + $0x620] sm:$0xff]  ;;  %v408_v43 = vld [vmem:[#allocation2 + $0x728] sm:$0xff] }
  0xe2   :  { %v379_v14 = vld [vmem:[#allocation2 + $0x640] sm:$0xff] }
  0xe3   :  { %2598 = vmatpush1.bf16.msra.mxu0 %v5813_v28  ;;  %2762 = vmatpush1.bf16.msra.mxu1 %v5815_v29  ;;  %v5880_v28 = vcombine.high %v324_v23, %v328_v24  ;;  %v331_v29 = vld [vmem:[#allocation2 + $0x4c0] sm:$0xff] }
  0xe4   :  { %2599 = vmatprep.subr.bf16.mxu0 %v5822_v30  ;;  %2763 = vmatprep.subr.bf16.mxu1 %v5824_v31  ;;  %v335_v30 = vld [vmem:[#allocation2 + $0x4e0] sm:$0xff]  ;;  %v332_v31 = vld [vmem:[#allocation2 + $0x4c8] sm:$0xff] }
  0xe5   :  { %v5888_v40 = vcombine.high %v332_v31, %v336_v32  ;;  %v5885_v41 = vcombine.low %v331_v29, %v335_v30  ;;  %v383_v15 = vld [vmem:[#allocation2 + $0x660] sm:$0xff] }
  0xe7   :  { %2600 = vmatpush1.bf16.msra.mxu0 %v5821_v36  ;;  %2764 = vmatpush1.bf16.msra.mxu1 %v5823_v37  ;;  %v5879_v36 = vcombine.low %v324_v23, %v328_v24  ;;  %v5886_v37 = vcombine.high %v331_v29, %v335_v30  ;;  %v387_v23 = vld [vmem:[#allocation2 + $0x680] sm:$0xff] }
  0xe8   :  { %2601 = vmatprep.subr.bf16.mxu0 %v5830_v38  ;;  %2765 = vmatprep.subr.bf16.mxu1 %v5832_v39  ;;  %v340_v38 = vld [vmem:[#allocation2 + $0x508] sm:$0xff]  ;;  %v391_v24 = vld [vmem:[#allocation2 + $0x6a0] sm:$0xff] }
  0xe9   :  { %v344_v39 = vld [vmem:[#allocation2 + $0x528] sm:$0xff]  ;;  %v5942_v30 = vcombine.high %v387_v23, %v391_v24 }
  0xea   :  { %v5896_v48 = vcombine.high %v340_v38, %v344_v39  ;;  %v5895_v50 = vcombine.low %v340_v38, %v344_v39  ;;  %v403_v39 = vld [vmem:[#allocation2 + $0x700] sm:$0xff] }
  0xeb   :  { %2602 = vmatpush1.bf16.msra.mxu0 %v5829_v44  ;;  %2766 = vmatpush1.bf16.msra.mxu1 %v5831_v45  ;;  %v5887_v44 = vcombine.low %v332_v31, %v336_v32  ;;  %v5894_v45 = vcombine.high %v339_v34, %v343_v35  ;;  %v395_v31 = vld [vmem:[#allocation2 + $0x6c0] sm:$0xff]  ;;  %v400_v35 = vld [vmem:[#allocation2 + $0x6e8] sm:$0xff] }
  0xec   :  { %2603 = vmatprep.subr.bf16.mxu0 %v5838_v46  ;;  %2767 = vmatprep.subr.bf16.mxu1 %v5840_v47  ;;  %v348_v46 = vld [vmem:[#allocation2 + $0x548] sm:$0xff]  ;;  %v399_v32 = vld [vmem:[#allocation2 + $0x6e0] sm:$0xff] }
  0xed   :  { %v352_v47 = vld [vmem:[#allocation2 + $0x568] sm:$0xff]  ;;  %v5950_v38 = vcombine.high %v395_v31, %v399_v32 }
  0xee   :  { %v5903_v59 = vcombine.low %v348_v46, %v352_v47 }
  0xef   :  { %2604 = vmatpush1.bf16.msra.mxu0 %v5837_v52  ;;  %2768 = vmatpush1.bf16.msra.mxu1 %v5839_v53  ;;  %v355_v52 = vld [vmem:[#allocation2 + $0x580] sm:$0xff] }
  0xf0   :  { %2605 = vmatprep.subr.bf16.mxu0 %v5846_v54  ;;  %2769 = vmatprep.subr.bf16.mxu1 %v5848_v55  ;;  %v359_v53 = vld [vmem:[#allocation2 + $0x5a0] sm:$0xff]  ;;  %v356_v54 = vld [vmem:[#allocation2 + $0x588] sm:$0xff]  ;;  %v5904_v55 = vcombine.high %v348_v46, %v352_v47 }
  0xf1   :  { %v5910_v60 = vcombine.high %v355_v52, %v359_v53  ;;  %v5909_v2 = vcombine.low %v355_v52, %v359_v53  ;;  %v5911_v3 = vcombine.low %v356_v54, %v360_v56  ;;  %v411_v47 = vld [vmem:[#allocation2 + $0x740] sm:$0xff] }
  0xf3   :  { %2606 = vmatpush1.bf16.msra.mxu0 %v5845_v61  ;;  %2770 = vmatpush1.bf16.msra.mxu1 %v5847_v62  ;;  %v363_v61 = vld [vmem:[#allocation2 + $0x5c0] sm:$0xff] }
  0xf4   :  { %2607 = vmatprep.subr.bf16.mxu0 %v5854_v63  ;;  %2771 = vmatprep.subr.bf16.mxu1 %v5856_v0  ;;  %v367_v62 = vld [vmem:[#allocation2 + $0x5e0] sm:$0xff]  ;;  %v364_v63 = vld [vmem:[#allocation2 + $0x5c8] sm:$0xff]  ;;  %v5912_v0 = vcombine.high %v356_v54, %v360_v56 }
  0xf5   :  { %v5918_v4 = vcombine.high %v363_v61, %v367_v62  ;;  %v5917_v10 = vcombine.low %v363_v61, %v367_v62  ;;  %v5919_v11 = vcombine.low %v364_v63, %v368_v1  ;;  %v423_v56 = vld [vmem:[#allocation2 + $0x7a0] sm:$0xff] }
  0xf7   :  { %2608 = vmatpush1.bf16.msra.mxu0 %v5853_v5  ;;  %2772 = vmatpush1.bf16.msra.mxu1 %v5855_v7  ;;  %v371_v5 = vld [vmem:[#allocation2 + $0x600] sm:$0xff]  ;;  %v372_v7 = vld [vmem:[#allocation2 + $0x608] sm:$0xff] }
  0xf8   :  { %2618 = vmatprep.subr.bf16.mxu0 %v5862_v8  ;;  %2782 = vmatprep.subr.bf16.mxu1 %v5864_v9  ;;  %v5920_v8 = vcombine.high %v364_v63, %v368_v1  ;;  %v376_v9 = vld [vmem:[#allocation2 + $0x628] sm:$0xff]  ;;  %v5926_v13 = vcombine.high %v371_v5, %v375_v6  ;;  %v5925_v19 = vcombine.low %v371_v5, %v375_v6  ;;  %v431_v1 = vld [vmem:[#allocation2 + $0x7e0] sm:$0xff] }
  0xf9   :  { %v5927_v20 = vcombine.low %v372_v7, %v376_v9  ;;  %v435_v6 = vld [vmem:[#allocation2 + $0x800] sm:$0xff] }
  0xfa   :  { %2610 = vmatmul.mubr.bf16.vlgmr.msra.gmra.mrb[0].mxu0 %v7528_v12  ;;  %2774 = vmatmul.mubr.bf16.vlgmr.msra.gmra.mrb[0].mxu1 %v7528_v12 }
  0xfb   :  { %2619 = vmatpush1.bf16.msra.mxu0 %v5861_v16  ;;  %2783 = vmatpush1.bf16.msra.mxu1 %v5863_v17  ;;  %v380_v16 = vld [vmem:[#allocation2 + $0x648] sm:$0xff]  ;;  %v5928_v17 = vcombine.high %v372_v7, %v376_v9  ;;  %v439_v9 = vld [vmem:[#allocation2 + $0x820] sm:$0xff] }
  0xfc   :  { %2620 = vmatprep.subr.bf16.mxu0 %v5870_v18  ;;  %2784 = vmatprep.subr.bf16.mxu1 %v5872_v21  ;;  %v384_v18 = vld [vmem:[#allocation2 + $0x668] sm:$0xff]  ;;  %v5934_v21 = vcombine.high %v379_v14, %v383_v15 }
  0xfd   :  { %2650 = vmatprep.mubr.bf16.mxu0 %v7533_v22  ;;  %2814 = vmatprep.mubr.bf16.mxu1 %v7533_v22  ;;  %v5935_v29 = vcombine.low %v380_v16, %v384_v18 }
  0xff   :  { %2621 = vmatpush1.bf16.msra.mxu0 %v5869_v25  ;;  %2785 = vmatpush1.bf16.msra.mxu1 %v5871_v26  ;;  %v388_v25 = vld [vmem:[#allocation2 + $0x688] sm:$0xff]  ;;  %v5936_v26 = vcombine.high %v380_v16, %v384_v18  ;;  %v443_v16 = vld [vmem:[#allocation2 + $0x840] sm:$0xff]  ;;  %v5990_v18 = vcombine.high %v435_v6, %v439_v9 }
 0x100   :  { %2622 = vmatprep.subr.bf16.mxu0 %v5878_v27  ;;  %2786 = vmatprep.subr.bf16.mxu1 %v5880_v28  ;;  %v392_v27 = vld [vmem:[#allocation2 + $0x6a8] sm:$0xff]  ;;  %v5933_v28 = vcombine.low %v379_v14, %v383_v15  ;;  %v167_v14 = vld [vmem:[%s7657_s0 + $0x10] sm:$0xff] }
 0x101   :  { %v5944_v34 = vcombine.high %v388_v25, %v392_v27 }
 0x103   :  { %2623 = vmatpush1.bf16.msra.mxu0 %v5877_v33  ;;  %2787 = vmatpush1.bf16.msra.mxu1 %v5879_v36  ;;  %v396_v33 = vld [vmem:[#allocation2 + $0x6c8] sm:$0xff]  ;;  %v5941_v36 = vcombine.low %v387_v23, %v391_v24 }
 0x104   :  { %2624 = vmatprep.subr.bf16.mxu0 %v5886_v37  ;;  %2788 = vmatprep.subr.bf16.mxu1 %v5888_v40  ;;  %v5943_v37 = vcombine.low %v388_v25, %v392_v27  ;;  %v407_v40 = vld [vmem:[#allocation2 + $0x720] sm:$0xff]  ;;  %v5952_v42 = vcombine.high %v396_v33, %v400_v35  ;;  %v170_v24 = vld [vmem:[%s7657_s0 + $0x28] sm:$0xff]  ;;  %v7545_v25 = vpack.c.bf16 %v167_v14, %v167_v14 }
 0x105   :  { %v5958_v46 = vcombine.high %v403_v39, %v407_v40  ;;  %v5957_v52 = vcombine.low %v403_v39, %v407_v40  ;;  %v463_v39 = vld [vmem:[#allocation2 + $0x8e0] sm:$0xff]  ;;  %v460_v40 = vld [vmem:[#allocation2 + $0x8c8] sm:$0xff] }
 0x107   :  { %2625 = vmatpush1.bf16.msra.mxu0 %v5885_v41  ;;  %2789 = vmatpush1.bf16.msra.mxu1 %v5887_v44  ;;  %v404_v41 = vld [vmem:[#allocation2 + $0x708] sm:$0xff]  ;;  %v5949_v44 = vcombine.low %v395_v31, %v399_v32 }
 0x108   :  { %2626 = vmatprep.subr.bf16.mxu0 %v5894_v45  ;;  %2790 = vmatprep.subr.bf16.mxu1 %v5896_v48  ;;  %v5951_v45 = vcombine.low %v396_v33, %v400_v35  ;;  %v415_v48 = vld [vmem:[#allocation2 + $0x760] sm:$0xff]  ;;  %v5959_v53 = vcombine.low %v404_v41, %v408_v43  ;;  %v452_v31 = vld [vmem:[#allocation2 + $0x888] sm:$0xff] }
 0x109   :  { %v5966_v54 = vcombine.high %v411_v47, %v415_v48  ;;  %v5965_v61 = vcombine.low %v411_v47, %v415_v48  ;;  %v456_v33 = vld [vmem:[#allocation2 + $0x8a8] sm:$0xff]  ;;  %v471_v47 = vld [vmem:[#allocation2 + $0x920] sm:$0xff] }
 0x10a   :  { %v468_v48 = vld [vmem:[#allocation2 + $0x908] sm:$0xff] }
 0x10b   :  { %2627 = vmatpush1.bf16.msra.mxu0 %v5893_v49  ;;  %2791 = vmatpush1.bf16.msra.mxu1 %v5895_v50  ;;  %v412_v49 = vld [vmem:[#allocation2 + $0x748] sm:$0xff]  ;;  %v5960_v50 = vcombine.high %v404_v41, %v408_v43  ;;  %v6008_v41 = vcombine.high %v452_v31, %v456_v33 }
 0x10c   :  { %2628 = vmatprep.subr.bf16.mxu0 %v5902_v51  ;;  %2792 = vmatprep.subr.bf16.mxu1 %v5904_v55  ;;  %v416_v51 = vld [vmem:[#allocation2 + $0x768] sm:$0xff]  ;;  %v419_v55 = vld [vmem:[#allocation2 + $0x780] sm:$0xff] }
 0x10d   :  { %v5967_v62 = vcombine.low %v412_v49, %v416_v51  ;;  %v5974_v63 = vcombine.high %v419_v55, %v423_v56  ;;  %v5973_v5 = vcombine.low %v419_v55, %v423_v56  ;;  %v479_v55 = vld [vmem:[#allocation2 + $0x960] sm:$0xff]  ;;  %v476_v56 = vld [vmem:[#allocation2 + $0x948] sm:$0xff] }
 0x10f   :  { %2629 = vmatpush1.bf16.msra.mxu0 %v5901_v58  ;;  %2793 = vmatpush1.bf16.msra.mxu1 %v5903_v59  ;;  %v420_v58 = vld [vmem:[#allocation2 + $0x788] sm:$0xff]  ;;  %v5968_v59 = vcombine.high %v412_v49, %v416_v51 }
 0x110   :  { %2630 = vmatprep.subr.bf16.mxu0 %v5910_v60  ;;  %2794 = vmatprep.subr.bf16.mxu1 %v5912_v0  ;;  %v424_v60 = vld [vmem:[#allocation2 + $0x7a8] sm:$0xff]  ;;  %v427_v0 = vld [vmem:[#allocation2 + $0x7c0] sm:$0xff] }
 0x111   :  { %v5975_v7 = vcombine.low %v420_v58, %v424_v60  ;;  %v5981_v15 = vcombine.low %v427_v0, %v431_v1 }
 0x113   :  { %2631 = vmatpush1.bf16.msra.mxu0 %v5909_v2  ;;  %2795 = vmatpush1.bf16.msra.mxu1 %v5911_v3  ;;  %v428_v2 = vld [vmem:[#allocation2 + $0x7c8] sm:$0xff]  ;;  %v5976_v3 = vcombine.high %v420_v58, %v424_v60 }
 0x114   :  { %2632 = vmatprep.subr.bf16.mxu0 %v5918_v4  ;;  %2796 = vmatprep.subr.bf16.mxu1 %v5920_v8  ;;  %v432_v4 = vld [vmem:[#allocation2 + $0x7e8] sm:$0xff]  ;;  %v5982_v8 = vcombine.high %v427_v0, %v431_v1  ;;  %v487_v0 = vld [vmem:[#allocation2 + $0x9a0] sm:$0xff] }
 0x115   :  { %v484_v1 = vld [vmem:[#allocation2 + $0x988] sm:$0xff] }
 0x117   :  { %2633 = vmatpush1.bf16.msra.mxu0 %v5917_v10  ;;  %2797 = vmatpush1.bf16.msra.mxu1 %v5919_v11  ;;  %v436_v10 = vld [vmem:[#allocation2 + $0x808] sm:$0xff] }
 0x118   :  { %2634 = vmatprep.subr.bf16.mxu0 %v5926_v13  ;;  %2798 = vmatprep.subr.bf16.mxu1 %v5928_v17  ;;  %v440_v11 = vld [vmem:[#allocation2 + $0x828] sm:$0xff]  ;;  %v5984_v13 = vcombine.high %v428_v2, %v432_v4  ;;  %v5983_v17 = vcombine.low %v428_v2, %v432_v4 }
 0x119   :  { %v5992_v23 = vcombine.high %v436_v10, %v440_v11  ;;  %v5991_v27 = vcombine.low %v436_v10, %v440_v11  ;;  %v496_v11 = vld [vmem:[#allocation2 + $0x9e8] sm:$0xff] }
 0x11b   :  { %2635 = vmatpush1.bf16.msra.mxu0 %v5925_v19  ;;  %2799 = vmatpush1.bf16.msra.mxu1 %v5927_v20  ;;  %v447_v19 = vld [vmem:[#allocation2 + $0x860] sm:$0xff]  ;;  %v444_v20 = vld [vmem:[#allocation2 + $0x848] sm:$0xff] }
 0x11c   :  { %2636 = vmatprep.subr.bf16.mxu0 %v5934_v21  ;;  %2800 = vmatprep.subr.bf16.mxu1 %v5936_v26  ;;  %v448_v21 = vld [vmem:[#allocation2 + $0x868] sm:$0xff]  ;;  %v5989_v26 = vcombine.low %v435_v6, %v439_v9  ;;  %v5997_v35 = vcombine.low %v443_v16, %v447_v19 }
 0x11d   :  { %v6000_v32 = vcombine.high %v444_v20, %v448_v21  ;;  %v492_v9 = vld [vmem:[#allocation2 + $0x9c8] sm:$0xff] }
 0x11f   :  { %2637 = vmatpush1.bf16.msra.mxu0 %v5933_v28  ;;  %2801 = vmatpush1.bf16.msra.mxu1 %v5935_v29  ;;  %v5998_v28 = vcombine.high %v443_v16, %v447_v19  ;;  %v451_v29 = vld [vmem:[#allocation2 + $0x880] sm:$0xff]  ;;  %v6048_v19 = vcombine.high %v492_v9, %v496_v11 }
 0x120   :  { %2638 = vmatprep.subr.bf16.mxu0 %v5942_v30  ;;  %2802 = vmatprep.subr.bf16.mxu1 %v5944_v34  ;;  %v455_v30 = vld [vmem:[#allocation2 + $0x8a0] sm:$0xff]  ;;  %v7547_v34 = vpack.c.bf16 %v170_v24, %v170_v24 }
 0x121   :  { %v6005_v43 = vcombine.low %v451_v29, %v455_v30  ;;  %v499_v16 = vld [vmem:[#allocation2 + $0xa00] sm:$0xff] }
 0x123   :  { %2639 = vmatpush1.bf16.msra.mxu0 %v5941_v36  ;;  %2803 = vmatpush1.bf16.msra.mxu1 %v5943_v37  ;;  %v5999_v36 = vcombine.low %v444_v20, %v448_v21  ;;  %v6006_v37 = vcombine.high %v451_v29, %v455_v30  ;;  %v504_v20 = vld [vmem:[#allocation2 + $0xa28] sm:$0xff] }
 0x124   :  { %2640 = vmatprep.subr.bf16.mxu0 %v5950_v38  ;;  %2804 = vmatprep.subr.bf16.mxu1 %v5952_v42  ;;  %v459_v38 = vld [vmem:[#allocation2 + $0x8c0] sm:$0xff]  ;;  %v464_v42 = vld [vmem:[#allocation2 + $0x8e8] sm:$0xff] }
 0x125   :  { %v6016_v49 = vcombine.high %v460_v40, %v464_v42  ;;  %v6013_v51 = vcombine.low %v459_v38, %v463_v39  ;;  %v512_v30 = vld [vmem:[#allocation2 + $0xa68] sm:$0xff] }
 0x127   :  { %2641 = vmatpush1.bf16.msra.mxu0 %v5949_v44  ;;  %2805 = vmatpush1.bf16.msra.mxu1 %v5951_v45  ;;  %v6007_v44 = vcombine.low %v452_v31, %v456_v33  ;;  %v6014_v45 = vcombine.high %v459_v38, %v463_v39  ;;  %v520_v39 = vld [vmem:[#allocation2 + $0xaa8] sm:$0xff] }
 0x128   :  { %2642 = vmatprep.subr.bf16.mxu0 %v5958_v46  ;;  %2806 = vmatprep.subr.bf16.mxu1 %v5960_v50  ;;  %v467_v46 = vld [vmem:[#allocation2 + $0x900] sm:$0xff]  ;;  %v472_v50 = vld [vmem:[#allocation2 + $0x928] sm:$0xff] }
 0x129   :  { %v6024_v58 = vcombine.high %v468_v48, %v472_v50  ;;  %v6021_v60 = vcombine.low %v467_v46, %v471_v47 }
 0x12b   :  { %2643 = vmatpush1.bf16.msra.mxu0 %v5957_v52  ;;  %2807 = vmatpush1.bf16.msra.mxu1 %v5959_v53  ;;  %v6015_v52 = vcombine.low %v460_v40, %v464_v42  ;;  %v6022_v53 = vcombine.high %v467_v46, %v471_v47  ;;  %v528_v47 = vld [vmem:[#allocation2 + $0xae8] sm:$0xff] }
 0x12c   :  { %2644 = vmatprep.subr.bf16.mxu0 %v5966_v54  ;;  %2808 = vmatprep.subr.bf16.mxu1 %v5968_v59  ;;  %v475_v54 = vld [vmem:[#allocation2 + $0x940] sm:$0xff]  ;;  %v480_v59 = vld [vmem:[#allocation2 + $0x968] sm:$0xff] }
 0x12d   :  { %v6032_v2 = vcombine.high %v476_v56, %v480_v59  ;;  %v6029_v4 = vcombine.low %v475_v54, %v479_v55 }
 0x12f   :  { %2645 = vmatpush1.bf16.msra.mxu0 %v5965_v61  ;;  %2809 = vmatpush1.bf16.msra.mxu1 %v5967_v62  ;;  %v6023_v61 = vcombine.low %v468_v48, %v472_v50  ;;  %v6030_v62 = vcombine.high %v475_v54, %v479_v55  ;;  %v536_v55 = vld [vmem:[#allocation2 + $0xb28] sm:$0xff] }
 0x130   :  { %2646 = vmatprep.subr.bf16.mxu0 %v5974_v63  ;;  %2810 = vmatprep.subr.bf16.mxu1 %v5976_v3  ;;  %v483_v63 = vld [vmem:[#allocation2 + $0x980] sm:$0xff]  ;;  %v488_v3 = vld [vmem:[#allocation2 + $0x9a8] sm:$0xff] }
 0x131   :  { %v6038_v6 = vcombine.high %v483_v63, %v487_v0  ;;  %v6040_v10 = vcombine.high %v484_v1, %v488_v3  ;;  %v6039_v14 = vcombine.low %v484_v1, %v488_v3 }
 0x133   :  { %2647 = vmatpush1.bf16.msra.mxu0 %v5973_v5  ;;  %2811 = vmatpush1.bf16.msra.mxu1 %v5975_v7  ;;  %v6031_v5 = vcombine.low %v476_v56, %v480_v59  ;;  %v491_v7 = vld [vmem:[#allocation2 + $0x9c0] sm:$0xff] }
 0x134   :  { %2648 = vmatprep.subr.bf16.mxu0 %v5982_v8  ;;  %2812 = vmatprep.subr.bf16.mxu1 %v5984_v13  ;;  %v495_v8 = vld [vmem:[#allocation2 + $0x9e0] sm:$0xff]  ;;  %v6037_v13 = vcombine.low %v483_v63, %v487_v0  ;;  %v544_v0 = vld [vmem:[#allocation2 + $0xb68] sm:$0xff] }
 0x135   :  { %v6045_v21 = vcombine.low %v491_v7, %v495_v8 }
 0x137   :  { %2649 = vmatpush1.bf16.msra.mxu0 %v5981_v15  ;;  %2813 = vmatpush1.bf16.msra.mxu1 %v5983_v17  ;;  %v6046_v15 = vcombine.high %v491_v7, %v495_v8  ;;  %v503_v17 = vld [vmem:[#allocation2 + $0xa20] sm:$0xff]  ;;  %v552_v8 = vld [vmem:[#allocation2 + $0xba8] sm:$0xff] }
 0x138   :  { %2659 = vmatprep.subr.bf16.mxu0 %v5990_v18  ;;  %2823 = vmatprep.subr.bf16.mxu1 %v5992_v23  ;;  %v500_v18 = vld [vmem:[#allocation2 + $0xa08] sm:$0xff]  ;;  %v6047_v23 = vcombine.low %v492_v9, %v496_v11  ;;  %v6054_v24 = vcombine.high %v499_v16, %v503_v17  ;;  %v6053_v31 = vcombine.low %v499_v16, %v503_v17 }
 0x139   :  { %v6056_v29 = vcombine.high %v500_v18, %v504_v20  ;;  %v560_v17 = vld [vmem:[#allocation2 + $0xbe8] sm:$0xff] }
 0x13a   :  { %2651 = vmatmul.mubr.bf16.vlgmr.msra.gmra.mrb[0].mxu0 %v7545_v25  ;;  %2815 = vmatmul.mubr.bf16.vlgmr.msra.gmra.mrb[0].mxu1 %v7545_v25 }
 0x13b   :  { %2660 = vmatpush1.bf16.msra.mxu0 %v5989_v26  ;;  %2824 = vmatpush1.bf16.msra.mxu1 %v5991_v27  ;;  %v507_v26 = vld [vmem:[#allocation2 + $0xa40] sm:$0xff] }
 0x13c   :  { %2661 = vmatprep.subr.bf16.mxu0 %v5998_v28  ;;  %2825 = vmatprep.subr.bf16.mxu1 %v6000_v32  ;;  %v511_v27 = vld [vmem:[#allocation2 + $0xa60] sm:$0xff]  ;;  %v508_v28 = vld [vmem:[#allocation2 + $0xa48] sm:$0xff]  ;;  %v6055_v32 = vcombine.low %v500_v18, %v504_v20 }
 0x13d   :  { %2691 = vmatprep.mubr.bf16.mxu0 %v7547_v34  ;;  %2855 = vmatprep.mubr.bf16.mxu1 %v7547_v34  ;;  %v6062_v33 = vcombine.high %v507_v26, %v511_v27  ;;  %v6064_v38 = vcombine.high %v508_v28, %v512_v30  ;;  %v6061_v40 = vcombine.low %v507_v26, %v511_v27  ;;  %v169_v27 = vld [vmem:[%s7657_s0 + $0x20] sm:$0xff] }
 0x13f   :  { %2662 = vmatpush1.bf16.msra.mxu0 %v5997_v35  ;;  %2826 = vmatpush1.bf16.msra.mxu1 %v5999_v36  ;;  %v515_v35 = vld [vmem:[#allocation2 + $0xa80] sm:$0xff] }
 0x140   :  { %2663 = vmatprep.subr.bf16.mxu0 %v6006_v37  ;;  %2827 = vmatprep.subr.bf16.mxu1 %v6008_v41  ;;  %v519_v36 = vld [vmem:[#allocation2 + $0xaa0] sm:$0xff]  ;;  %v516_v37 = vld [vmem:[#allocation2 + $0xa88] sm:$0xff]  ;;  %v6063_v41 = vcombine.low %v508_v28, %v512_v30 }
 0x141   :  { %v6070_v42 = vcombine.high %v515_v35, %v519_v36  ;;  %v6072_v46 = vcombine.high %v516_v37, %v520_v39  ;;  %v6069_v48 = vcombine.low %v515_v35, %v519_v36  ;;  %v568_v28 = vld [vmem:[#allocation2 + $0xc28] sm:$0xff]  ;;  %v182_v36 = vld [vmem:[#allocation2 + $0x18] sm:$0xff] }
 0x143   :  { %2664 = vmatpush1.bf16.msra.mxu0 %v6005_v43  ;;  %2828 = vmatpush1.bf16.msra.mxu1 %v6007_v44  ;;  %v523_v43 = vld [vmem:[#allocation2 + $0xac0] sm:$0xff] }
 0x144   :  { %2665 = vmatprep.subr.bf16.mxu0 %v6014_v45  ;;  %2829 = vmatprep.subr.bf16.mxu1 %v6016_v49  ;;  %v527_v44 = vld [vmem:[#allocation2 + $0xae0] sm:$0xff]  ;;  %v524_v45 = vld [vmem:[#allocation2 + $0xac8] sm:$0xff]  ;;  %v6071_v49 = vcombine.low %v516_v37, %v520_v39  ;;  %v186_v37 = vld [vmem:[#allocation2 + $0x38] sm:$0xff] }
 0x145   :  { %v6078_v50 = vcombine.high %v523_v43, %v527_v44  ;;  %v6080_v54 = vcombine.high %v524_v45, %v528_v47  ;;  %v6077_v56 = vcombine.low %v523_v43, %v527_v44  ;;  %v7326_v43 = vmov 0   ;;  %v171_v44 = vld [vmem:[%s7657_s0 + $0x30] sm:$0xff] }
 0x147   :  { %2666 = vmatpush1.bf16.msra.mxu0 %v6013_v51  ;;  %2830 = vmatpush1.bf16.msra.mxu1 %v6015_v52  ;;  %v531_v51 = vld [vmem:[#allocation2 + $0xb00] sm:$0xff] }
 0x148   :  { %2667 = vmatprep.subr.bf16.mxu0 %v6022_v53  ;;  %2831 = vmatprep.subr.bf16.mxu1 %v6024_v58  ;;  %v535_v52 = vld [vmem:[#allocation2 + $0xb20] sm:$0xff]  ;;  %v532_v53 = vld [vmem:[#allocation2 + $0xb08] sm:$0xff]  ;;  %v6079_v58 = vcombine.low %v524_v45, %v528_v47  ;;  %v189_v45 = vld [vmem:[#allocation2 + $0x50] sm:$0xff] }
 0x149   :  { %v6086_v59 = vcombine.high %v531_v51, %v535_v52  ;;  %v6088_v63 = vcombine.high %v532_v53, %v536_v55  ;;  %v6085_v1 = vcombine.low %v531_v51, %v535_v52  ;;  %v190_v47 = vld [vmem:[#allocation2 + $0x58] sm:$0xff]  ;;  %v5739_v51 = vcombine.low %v182_v36, %v186_v37 }
 0x14b   :  { %2668 = vmatpush1.bf16.msra.mxu0 %v6021_v60  ;;  %2832 = vmatpush1.bf16.msra.mxu1 %v6023_v61  ;;  %v539_v60 = vld [vmem:[#allocation2 + $0xb40] sm:$0xff] }
 0x14c   :  { %2669 = vmatprep.subr.bf16.mxu0 %v6030_v62  ;;  %2833 = vmatprep.subr.bf16.mxu1 %v6032_v2  ;;  %v543_v61 = vld [vmem:[#allocation2 + $0xb60] sm:$0xff]  ;;  %v540_v62 = vld [vmem:[#allocation2 + $0xb48] sm:$0xff]  ;;  %v6087_v2 = vcombine.low %v532_v53, %v536_v55  ;;  %v197_v53 = vld [vmem:[#allocation2 + $0x90] sm:$0xff] }
 0x14d   :  { %v6094_v3 = vcombine.high %v539_v60, %v543_v61  ;;  %v6096_v7 = vcombine.high %v540_v62, %v544_v0  ;;  %v6093_v9 = vcombine.low %v539_v60, %v543_v61  ;;  %v198_v55 = vld [vmem:[#allocation2 + $0x98] sm:$0xff] }
 0x14f   :  { %2670 = vmatpush1.bf16.msra.mxu0 %v6029_v4  ;;  %2834 = vmatpush1.bf16.msra.mxu1 %v6031_v5  ;;  %v547_v4 = vld [vmem:[#allocation2 + $0xb80] sm:$0xff] }
 0x150   :  { %2671 = vmatprep.subr.bf16.mxu0 %v6038_v6  ;;  %2835 = vmatprep.subr.bf16.mxu1 %v6040_v10  ;;  %v551_v5 = vld [vmem:[#allocation2 + $0xba0] sm:$0xff]  ;;  %v548_v6 = vld [vmem:[#allocation2 + $0xb88] sm:$0xff]  ;;  %v6095_v10 = vcombine.low %v540_v62, %v544_v0  ;;  %v205_v62 = vld [vmem:[#allocation2 + $0xd0] sm:$0xff] }
 0x151   :  { %v6102_v11 = vcombine.high %v547_v4, %v551_v5  ;;  %v6104_v16 = vcombine.high %v548_v6, %v552_v8  ;;  %v6101_v18 = vcombine.low %v547_v4, %v551_v5  ;;  %v206_v0 = vld [vmem:[#allocation2 + $0xd8] sm:$0xff] }
 0x153   :  { %2672 = vmatpush1.bf16.msra.mxu0 %v6037_v13  ;;  %2836 = vmatpush1.bf16.msra.mxu1 %v6039_v14  ;;  %v555_v13 = vld [vmem:[#allocation2 + $0xbc0] sm:$0xff] }
 0x154   :  { %2673 = vmatprep.subr.bf16.mxu0 %v6046_v15  ;;  %2837 = vmatprep.subr.bf16.mxu1 %v6048_v19  ;;  %v559_v14 = vld [vmem:[#allocation2 + $0xbe0] sm:$0xff]  ;;  %v556_v15 = vld [vmem:[#allocation2 + $0xbc8] sm:$0xff]  ;;  %v6103_v19 = vcombine.low %v548_v6, %v552_v8  ;;  %v213_v6 = vld [vmem:[#allocation2 + $0x110] sm:$0xff] }
 0x155   :  { %v6110_v20 = vcombine.high %v555_v13, %v559_v14  ;;  %v6112_v26 = vcombine.high %v556_v15, %v560_v17  ;;  %v6111_v30 = vcombine.low %v556_v15, %v560_v17  ;;  %v214_v8 = vld [vmem:[#allocation2 + $0x118] sm:$0xff]  ;;  %v221_v15 = vld [vmem:[#allocation2 + $0x150] sm:$0xff] }
 0x157   :  { %2674 = vmatpush1.bf16.msra.mxu0 %v6045_v21  ;;  %2838 = vmatpush1.bf16.msra.mxu1 %v6047_v23  ;;  %v563_v21 = vld [vmem:[#allocation2 + $0xc00] sm:$0xff] }
 0x158   :  { %2675 = vmatprep.subr.bf16.mxu0 %v6054_v24  ;;  %2839 = vmatprep.subr.bf16.mxu1 %v6056_v29  ;;  %v567_v23 = vld [vmem:[#allocation2 + $0xc20] sm:$0xff]  ;;  %v564_v24 = vld [vmem:[#allocation2 + $0xc08] sm:$0xff]  ;;  %v6109_v29 = vcombine.low %v555_v13, %v559_v14 }
 0x159   :  { %v6120_v35 = vcombine.high %v564_v24, %v568_v28  ;;  %v6117_v39 = vcombine.low %v563_v21, %v567_v23 }
 0x15b   :  { %2676 = vmatpush1.bf16.msra.mxu0 %v6053_v31  ;;  %2840 = vmatpush1.bf16.msra.mxu1 %v6055_v32  ;;  %v6118_v31 = vcombine.high %v563_v21, %v567_v23  ;;  %v181_v32 = vld [vmem:[#allocation2 + $0x10] sm:$0xff] }
 0x15c   :  { %2677 = vmatprep.subr.bf16.mxu0 %v6062_v33  ;;  %2841 = vmatprep.subr.bf16.mxu1 %v6064_v38  ;;  %v185_v33 = vld [vmem:[#allocation2 + $0x30] sm:$0xff]  ;;  %v7556_v38 = vpack.c.bf16 %v169_v27, %v169_v27 }
 0x15d   :  { %v229_v23 = vld [vmem:[#allocation2 + $0x190] sm:$0xff] }
 0x15f   :  { %2678 = vmatpush1.bf16.msra.mxu0 %v6061_v40  ;;  %2842 = vmatpush1.bf16.msra.mxu1 %v6063_v41  ;;  %v6119_v40 = vcombine.low %v564_v24, %v568_v28  ;;  %v5738_v41 = vcombine.high %v181_v32, %v185_v33  ;;  %v233_v24 = vld [vmem:[#allocation2 + $0x1b0] sm:$0xff]  ;;  %v234_v28 = vld [vmem:[#allocation2 + $0x1b8] sm:$0xff] }
 0x160   :  { %2679 = vmatprep.subr.bf16.mxu0 %v6070_v42  ;;  %2843 = vmatprep.subr.bf16.mxu1 %v6072_v46  ;;  %v5740_v42 = vcombine.high %v182_v36, %v186_v37  ;;  %v193_v46 = vld [vmem:[#allocation2 + $0x70] sm:$0xff]  ;;  %v242_v37 = vld [vmem:[#allocation2 + $0x1f8] sm:$0xff] }
 0x161   :  { %v5746_v52 = vcombine.high %v189_v45, %v193_v46 }
 0x163   :  { %2680 = vmatpush1.bf16.msra.mxu0 %v6069_v48  ;;  %2844 = vmatpush1.bf16.msra.mxu1 %v6071_v49  ;;  %v194_v48 = vld [vmem:[#allocation2 + $0x78] sm:$0xff]  ;;  %v7565_v49 = vpack.c.bf16 %v171_v44, %v171_v44  ;;  %v249_v44 = vld [vmem:[#allocation2 + $0x230] sm:$0xff] }
 0x164   :  { %2681 = vmatprep.subr.bf16.mxu0 %v6078_v50  ;;  %2845 = vmatprep.subr.bf16.mxu1 %v6080_v54  ;;  %v5737_v50 = vcombine.low %v181_v32, %v185_v33  ;;  %v201_v54 = vld [vmem:[#allocation2 + $0xb0] sm:$0xff]  ;;  %v5747_v60 = vcombine.low %v190_v47, %v194_v48 }
 0x165   :  { %v5754_v61 = vcombine.high %v197_v53, %v201_v54  ;;  %v237_v32 = vld [vmem:[#allocation2 + $0x1d0] sm:$0xff] }
 0x166   :  { %v241_v33 = vld [vmem:[#allocation2 + $0x1f0] sm:$0xff] }
 0x167   :  { %2682 = vmatpush1.bf16.msra.mxu0 %v6077_v56  ;;  %2846 = vmatpush1.bf16.msra.mxu1 %v6079_v58  ;;  %v5748_v56 = vcombine.high %v190_v47, %v194_v48  ;;  %v202_v58 = vld [vmem:[#allocation2 + $0xb8] sm:$0xff]  ;;  %v5793_v48 = vcombine.low %v237_v32, %v241_v33 }
 0x168   :  { %2683 = vmatprep.subr.bf16.mxu0 %v6086_v59  ;;  %2847 = vmatprep.subr.bf16.mxu1 %v6088_v63  ;;  %v5745_v59 = vcombine.low %v189_v45, %v193_v46  ;;  %v209_v63 = vld [vmem:[#allocation2 + $0xf0] sm:$0xff]  ;;  %v5755_v4 = vcombine.low %v198_v55, %v202_v58  ;;  %v246_v45 = vld [vmem:[#allocation2 + $0x218] sm:$0xff] }
 0x169   :  { %v5762_v5 = vcombine.high %v205_v62, %v209_v63  ;;  %v250_v47 = vld [vmem:[#allocation2 + $0x238] sm:$0xff] }
 0x16b   :  { %2684 = vmatpush1.bf16.msra.mxu0 %v6085_v1  ;;  %2848 = vmatpush1.bf16.msra.mxu1 %v6087_v2  ;;  %v5756_v1 = vcombine.high %v198_v55, %v202_v58  ;;  %v210_v2 = vld [vmem:[#allocation2 + $0xf8] sm:$0xff]  ;;  %v5804_v55 = vcombine.high %v246_v45, %v250_v47 }
 0x16c   :  { %2685 = vmatprep.subr.bf16.mxu0 %v6094_v3  ;;  %2849 = vmatprep.subr.bf16.mxu1 %v6096_v7  ;;  %v5753_v3 = vcombine.low %v197_v53, %v201_v54  ;;  %v217_v7 = vld [vmem:[#allocation2 + $0x130] sm:$0xff]  ;;  %v5763_v13 = vcombine.low %v206_v0, %v210_v2  ;;  %v254_v54 = vld [vmem:[#allocation2 + $0x258] sm:$0xff] }
 0x16d   :  { %v5770_v14 = vcombine.high %v213_v6, %v217_v7  ;;  %v257_v53 = vld [vmem:[#allocation2 + $0x270] sm:$0xff] }
 0x16f   :  { %2686 = vmatpush1.bf16.msra.mxu0 %v6093_v9  ;;  %2850 = vmatpush1.bf16.msra.mxu1 %v6095_v10  ;;  %v5764_v9 = vcombine.high %v206_v0, %v210_v2  ;;  %v218_v10 = vld [vmem:[#allocation2 + $0x138] sm:$0xff] }
 0x170   :  { %2687 = vmatprep.subr.bf16.mxu0 %v6102_v11  ;;  %2851 = vmatprep.subr.bf16.mxu1 %v6104_v16  ;;  %v5761_v11 = vcombine.low %v205_v62, %v209_v63  ;;  %v222_v16 = vld [vmem:[#allocation2 + $0x158] sm:$0xff]  ;;  %v5772_v17 = vcombine.high %v214_v8, %v218_v10  ;;  %v265_v62 = vld [vmem:[#allocation2 + $0x2b0] sm:$0xff] }
 0x171   :  { %v262_v0 = vld [vmem:[#allocation2 + $0x298] sm:$0xff] }
 0x173   :  { %2688 = vmatpush1.bf16.msra.mxu0 %v6101_v18  ;;  %2852 = vmatpush1.bf16.msra.mxu1 %v6103_v19  ;;  %v226_v18 = vld [vmem:[#allocation2 + $0x178] sm:$0xff]  ;;  %v5769_v19 = vcombine.low %v213_v6, %v217_v7  ;;  %v269_v6 = vld [vmem:[#allocation2 + $0x2d0] sm:$0xff] }
 0x174   :  { %2689 = vmatprep.subr.bf16.mxu0 %v6110_v20  ;;  %2853 = vmatprep.subr.bf16.mxu1 %v6112_v26  ;;  %v5771_v20 = vcombine.low %v214_v8, %v218_v10  ;;  %v230_v26 = vld [vmem:[#allocation2 + $0x198] sm:$0xff]  ;;  %v5780_v27 = vcombine.high %v222_v16, %v226_v18  ;;  %v273_v7 = vld [vmem:[#allocation2 + $0x2f0] sm:$0xff] }
 0x175   :  { %v5788_v36 = vcombine.high %v230_v26, %v234_v28  ;;  %v270_v8 = vld [vmem:[#allocation2 + $0x2d8] sm:$0xff] }
 0x177   :  { %2690 = vmatpush1.bf16.msra.mxu0 %v6109_v29  ;;  %2854 = vmatpush1.bf16.msra.mxu1 %v6111_v30  ;;  %v5779_v30 = vcombine.low %v222_v16, %v226_v18  ;;  %v278_v16 = vld [vmem:[#allocation2 + $0x318] sm:$0xff]  ;;  %v5825_v18 = vcombine.low %v269_v6, %v273_v7 }
 0x178   :  { %2700 = vmatprep.subr.bf16.mxu0 %v6118_v31  ;;  %2864 = vmatprep.subr.bf16.mxu1 %v6120_v35  ;;  %v5786_v31 = vcombine.high %v229_v23, %v233_v24  ;;  %v238_v35 = vld [vmem:[#allocation2 + $0x1d8] sm:$0xff] }
 0x179   :  { %v5796_v46 = vcombine.high %v238_v35, %v242_v37 }
 0x17a   :  { %2692 = vmatmul.mubr.bf16.vlgmr.msra.gmra.mrb[0].mxu0 %v7556_v38  ;;  %2856 = vmatmul.mubr.bf16.vlgmr.msra.gmra.mrb[0].mxu1 %v7556_v38 }
 0x17b   :  { %2701 = vmatpush1.bf16.msra.mxu0 %v6117_v39  ;;  %2865 = vmatpush1.bf16.msra.mxu1 %v6119_v40  ;;  %v5785_v39 = vcombine.low %v229_v23, %v233_v24  ;;  %v5787_v40 = vcombine.low %v230_v26, %v234_v28  ;;  %v285_v23 = vld [vmem:[#allocation2 + $0x350] sm:$0xff]  ;;  %v286_v26 = vld [vmem:[#allocation2 + $0x358] sm:$0xff] }
 0x17c   :  { %2732 = vmatprep.mubr.bf16.mxu0 %v7326_v43  ;;  %2896 = vmatprep.mubr.bf16.mxu1 %v7326_v43  ;;  %v289_v24 = vld [vmem:[#allocation2 + $0x370] sm:$0xff] }
 0x17d   :  { %2905 = vmatprep.subr.bf16.mxu0 %v5738_v41  ;;  %3069 = vmatprep.subr.bf16.mxu1 %v5740_v42  ;;  %v5794_v41 = vcombine.high %v237_v32, %v241_v33  ;;  %v245_v42 = vld [vmem:[#allocation2 + $0x210] sm:$0xff] }
 0x17e   :  { %v5801_v58 = vcombine.low %v245_v42, %v249_v44  ;;  %v293_v32 = vld [vmem:[#allocation2 + $0x390] sm:$0xff] }
 0x17f   :  { %v297_v33 = vld [vmem:[#allocation2 + $0x3b0] sm:$0xff] }
 0x186   :  { %6125 = vmatmul.mubr.msk.bf16.vlgmr.msra.gmra.mrb[0].mxu0 %vm2573_vm0, %v7565_v49  ;;  %6126 = vmatmul.mubr.msk.bf16.vlgmr.msra.gmra.mrb[0].mxu1 %vm2573_vm0, %v7565_v49 }
 0x187   :  { %2906 = vmatpush1.bf16.msra.mxu0 %v5737_v50  ;;  %3070 = vmatpush1.bf16.msra.mxu1 %v5739_v51  ;;  %v5795_v50 = vcombine.low %v238_v35, %v242_v37  ;;  %v5802_v51 = vcombine.high %v245_v42, %v249_v44  ;;  %v294_v35 = vld [vmem:[#allocation2 + $0x398] sm:$0xff]  ;;  %v5841_v37 = vcombine.low %v285_v23, %v289_v24  ;;  %v301_v42 = vld [vmem:[#allocation2 + $0x3d0] sm:$0xff] }
 0x188   :  { %2907 = vmatprep.subr.bf16.mxu0 %v5746_v52  ;;  %3071 = vmatprep.subr.bf16.mxu1 %v5748_v56  ;;  %v253_v52 = vld [vmem:[#allocation2 + $0x250] sm:$0xff]  ;;  %v258_v56 = vld [vmem:[#allocation2 + $0x278] sm:$0xff] }
 0x189   :  { %2937 = vmatprep.mubr.bf16.mxu0 %v7521_v57  ;;  %3101 = vmatprep.mubr.bf16.mxu1 %v7521_v57  ;;  %v225_v57 = vld [vmem:[#allocation2 + $0x170] sm:$0xff]  ;;  %v5812_v63 = vcombine.high %v254_v54, %v258_v56  ;;  %v5809_v2 = vcombine.low %v253_v52, %v257_v53 }
 0x18a   :  { %v5778_v21 = vcombine.high %v221_v15, %v225_v57  ;;  %v5777_v29 = vcombine.low %v221_v15, %v225_v57  ;;  %v277_v15 = vld [vmem:[#allocation2 + $0x310] sm:$0xff] }
 0x18b   :  { %2908 = vmatpush1.bf16.msra.mxu0 %v5745_v59  ;;  %3072 = vmatpush1.bf16.msra.mxu1 %v5747_v60  ;;  %v5803_v59 = vcombine.low %v246_v45, %v250_v47  ;;  %v5810_v60 = vcombine.high %v253_v52, %v257_v53  ;;  %v281_v57 = vld [vmem:[#allocation2 + $0x330] sm:$0xff]  ;;  %v302_v45 = vld [vmem:[#allocation2 + $0x3d8] sm:$0xff]  ;;  %v5849_v47 = vcombine.low %v293_v32, %v297_v33 }
 0x18c   :  { %2909 = vmatprep.subr.bf16.mxu0 %v5754_v61  ;;  %3073 = vmatprep.subr.bf16.mxu1 %v5756_v1  ;;  %v261_v61 = vld [vmem:[#allocation2 + $0x290] sm:$0xff]  ;;  %v266_v1 = vld [vmem:[#allocation2 + $0x2b8] sm:$0xff]  ;;  %v5833_v28 = vcombine.low %v277_v15, %v281_v57 }
 0x18d   :  { %v5817_v10 = vcombine.low %v261_v61, %v265_v62  ;;  %v305_v44 = vld [vmem:[#allocation2 + $0x3f0] sm:$0xff] }
 0x18e   :  { %v309_v52 = vld [vmem:[#allocation2 + $0x410] sm:$0xff] }
 0x18f   :  { %2910 = vmatpush1.bf16.msra.mxu0 %v5753_v3  ;;  %3074 = vmatpush1.bf16.msra.mxu1 %v5755_v4  ;;  %v5811_v3 = vcombine.low %v254_v54, %v258_v56  ;;  %v5818_v4 = vcombine.high %v261_v61, %v265_v62  ;;  %v313_v53 = vld [vmem:[#allocation2 + $0x430] sm:$0xff]  ;;  %v310_v54 = vld [vmem:[#allocation2 + $0x418] sm:$0xff]  ;;  %v5857_v56 = vcombine.low %v301_v42, %v305_v44 }
 0x190   :  { %2911 = vmatprep.subr.bf16.mxu0 %v5762_v5  ;;  %3075 = vmatprep.subr.bf16.mxu1 %v5764_v9  ;;  %v5820_v5 = vcombine.high %v262_v0, %v266_v1  ;;  %v274_v9 = vld [vmem:[#allocation2 + $0x2f8] sm:$0xff]  ;;  %v317_v61 = vld [vmem:[#allocation2 + $0x450] sm:$0xff] }
 0x191   :  { %v321_v62 = vld [vmem:[#allocation2 + $0x470] sm:$0xff] }
 0x193   :  { %2912 = vmatpush1.bf16.msra.mxu0 %v5761_v11  ;;  %3076 = vmatpush1.bf16.msra.mxu1 %v5763_v13  ;;  %v5819_v11 = vcombine.low %v262_v0, %v266_v1  ;;  %v5826_v13 = vcombine.high %v269_v6, %v273_v7  ;;  %v322_v0 = vld [vmem:[#allocation2 + $0x478] sm:$0xff]  ;;  %v5865_v1 = vcombine.low %v309_v52, %v313_v53  ;;  %v329_v6 = vld [vmem:[#allocation2 + $0x4b0] sm:$0xff] }
 0x194   :  { %2913 = vmatprep.subr.bf16.mxu0 %v5770_v14  ;;  %3077 = vmatprep.subr.bf16.mxu1 %v5772_v17  ;;  %v5828_v14 = vcombine.high %v270_v8, %v274_v9  ;;  %v282_v17 = vld [vmem:[#allocation2 + $0x338] sm:$0xff] }
 0x195   :  { %v326_v7 = vld [vmem:[#allocation2 + $0x498] sm:$0xff] }
 0x197   :  { %2914 = vmatpush1.bf16.msra.mxu0 %v5769_v19  ;;  %3078 = vmatpush1.bf16.msra.mxu1 %v5771_v20  ;;  %v5827_v19 = vcombine.low %v270_v8, %v274_v9  ;;  %v5834_v20 = vcombine.high %v277_v15, %v281_v57  ;;  %v330_v8 = vld [vmem:[#allocation2 + $0x4b8] sm:$0xff]  ;;  %v5873_v9 = vcombine.low %v317_v61, %v321_v62  ;;  %v337_v15 = vld [vmem:[#allocation2 + $0x4f0] sm:$0xff] }
 0x198   :  { %2915 = vmatprep.subr.bf16.mxu0 %v5778_v21  ;;  %3079 = vmatprep.subr.bf16.mxu1 %v5780_v27  ;;  %v5836_v21 = vcombine.high %v278_v16, %v282_v17  ;;  %v290_v27 = vld [vmem:[#allocation2 + $0x378] sm:$0xff] }
 0x199   :  { %v334_v57 = vld [vmem:[#allocation2 + $0x4d8] sm:$0xff] }
 0x19b   :  { %2916 = vmatpush1.bf16.msra.mxu0 %v5777_v29  ;;  %3080 = vmatpush1.bf16.msra.mxu1 %v5779_v30  ;;  %v5835_v29 = vcombine.low %v278_v16, %v282_v17  ;;  %v5842_v30 = vcombine.high %v285_v23, %v289_v24  ;;  %v338_v16 = vld [vmem:[#allocation2 + $0x4f8] sm:$0xff] }
 0x19c   :  { %2917 = vmatprep.subr.bf16.mxu0 %v5786_v31  ;;  %3081 = vmatprep.subr.bf16.mxu1 %v5788_v36  ;;  %v5844_v31 = vcombine.high %v286_v26, %v290_v27  ;;  %v298_v36 = vld [vmem:[#allocation2 + $0x3b8] sm:$0xff] }
 0x19d   :  { %v342_v23 = vld [vmem:[#allocation2 + $0x518] sm:$0xff] }
 0x19e   :  { %v346_v24 = vld [vmem:[#allocation2 + $0x538] sm:$0xff] }
 0x19f   :  { %2918 = vmatpush1.bf16.msra.mxu0 %v5785_v39  ;;  %3082 = vmatpush1.bf16.msra.mxu1 %v5787_v40  ;;  %v5843_v39 = vcombine.low %v286_v26, %v290_v27  ;;  %v5850_v40 = vcombine.high %v293_v32, %v297_v33  ;;  %v5891_v27 = vcombine.low %v334_v57, %v338_v16  ;;  %v354_v32 = vld [vmem:[#allocation2 + $0x578] sm:$0xff] }
 0x1a0   :  { %2919 = vmatprep.subr.bf16.mxu0 %v5794_v41  ;;  %3083 = vmatprep.subr.bf16.mxu1 %v5796_v46  ;;  %v5852_v41 = vcombine.high %v294_v35, %v298_v36  ;;  %v306_v46 = vld [vmem:[#allocation2 + $0x3f8] sm:$0xff] }
 0x1a3   :  { %2920 = vmatpush1.bf16.msra.mxu0 %v5793_v48  ;;  %3084 = vmatpush1.bf16.msra.mxu1 %v5795_v50  ;;  %v5851_v48 = vcombine.low %v294_v35, %v298_v36  ;;  %v5858_v50 = vcombine.high %v301_v42, %v305_v44  ;;  %v5899_v35 = vcombine.low %v342_v23, %v346_v24  ;;  %v362_v42 = vld [vmem:[#allocation2 + $0x5b8] sm:$0xff] }
 0x1a4   :  { %2921 = vmatprep.subr.bf16.mxu0 %v5802_v51  ;;  %3085 = vmatprep.subr.bf16.mxu1 %v5804_v55  ;;  %v5860_v51 = vcombine.high %v302_v45, %v306_v46  ;;  %v314_v55 = vld [vmem:[#allocation2 + $0x438] sm:$0xff] }
 0x1a7   :  { %2922 = vmatpush1.bf16.msra.mxu0 %v5801_v58  ;;  %3086 = vmatpush1.bf16.msra.mxu1 %v5803_v59  ;;  %v5859_v58 = vcombine.low %v302_v45, %v306_v46  ;;  %v5866_v59 = vcombine.high %v309_v52, %v313_v53  ;;  %v370_v52 = vld [vmem:[#allocation2 + $0x5f8] sm:$0xff] }
 0x1a8   :  { %2923 = vmatprep.subr.bf16.mxu0 %v5810_v60  ;;  %3087 = vmatprep.subr.bf16.mxu1 %v5812_v63  ;;  %v5868_v60 = vcombine.high %v310_v54, %v314_v55  ;;  %v318_v63 = vld [vmem:[#allocation2 + $0x458] sm:$0xff] }
 0x1ab   :  { %2924 = vmatpush1.bf16.msra.mxu0 %v5809_v2  ;;  %3088 = vmatpush1.bf16.msra.mxu1 %v5811_v3  ;;  %v5867_v2 = vcombine.low %v310_v54, %v314_v55  ;;  %v5874_v3 = vcombine.high %v317_v61, %v321_v62  ;;  %v378_v61 = vld [vmem:[#allocation2 + $0x638] sm:$0xff] }
 0x1ac   :  { %2925 = vmatprep.subr.bf16.mxu0 %v5818_v4  ;;  %3089 = vmatprep.subr.bf16.mxu1 %v5820_v5  ;;  %v5876_v4 = vcombine.high %v318_v63, %v322_v0  ;;  %v325_v5 = vld [vmem:[#allocation2 + $0x490] sm:$0xff] }
 0x1ad   :  { %v5881_v17 = vcombine.low %v325_v5, %v329_v6 }
 0x1af   :  { %2926 = vmatpush1.bf16.msra.mxu0 %v5817_v10  ;;  %3090 = vmatpush1.bf16.msra.mxu1 %v5819_v11  ;;  %v5875_v10 = vcombine.low %v318_v63, %v322_v0  ;;  %v5882_v11 = vcombine.high %v325_v5, %v329_v6  ;;  %v386_v5 = vld [vmem:[#allocation2 + $0x678] sm:$0xff] }
 0x1b0   :  { %2927 = vmatprep.subr.bf16.mxu0 %v5826_v13  ;;  %3091 = vmatprep.subr.bf16.mxu1 %v5828_v14  ;;  %v5884_v13 = vcombine.high %v326_v7, %v330_v8  ;;  %v333_v14 = vld [vmem:[#allocation2 + $0x4d0] sm:$0xff] }
 0x1b1   :  { %v5889_v26 = vcombine.low %v333_v14, %v337_v15 }
 0x1b3   :  { %2928 = vmatpush1.bf16.msra.mxu0 %v5825_v18  ;;  %3092 = vmatpush1.bf16.msra.mxu1 %v5827_v19  ;;  %v5890_v18 = vcombine.high %v333_v14, %v337_v15  ;;  %v5892_v19 = vcombine.high %v334_v57, %v338_v16  ;;  %v394_v14 = vld [vmem:[#allocation2 + $0x6b8] sm:$0xff] }
 0x1b4   :  { %2929 = vmatprep.subr.bf16.mxu0 %v5834_v20  ;;  %3093 = vmatprep.subr.bf16.mxu1 %v5836_v21  ;;  %v341_v20 = vld [vmem:[#allocation2 + $0x510] sm:$0xff] }
 0x1b5   :  { %v345_v21 = vld [vmem:[#allocation2 + $0x530] sm:$0xff] }
 0x1b6   :  { %v5897_v33 = vcombine.low %v341_v20, %v345_v21 }
 0x1b7   :  { %2930 = vmatpush1.bf16.msra.mxu0 %v5833_v28  ;;  %3094 = vmatpush1.bf16.msra.mxu1 %v5835_v29  ;;  %v5898_v28 = vcombine.high %v341_v20, %v345_v21  ;;  %v349_v29 = vld [vmem:[#allocation2 + $0x550] sm:$0xff]  ;;  %v402_v20 = vld [vmem:[#allocation2 + $0x6f8] sm:$0xff] }
 0x1b8   :  { %2931 = vmatprep.subr.bf16.mxu0 %v5842_v30  ;;  %3095 = vmatprep.subr.bf16.mxu1 %v5844_v31  ;;  %v353_v30 = vld [vmem:[#allocation2 + $0x570] sm:$0xff]  ;;  %v350_v31 = vld [vmem:[#allocation2 + $0x558] sm:$0xff] }
 0x1b9   :  { %v5906_v36 = vcombine.high %v349_v29, %v353_v30  ;;  %v5905_v44 = vcombine.low %v349_v29, %v353_v30  ;;  %v5907_v45 = vcombine.low %v350_v31, %v354_v32  ;;  %v410_v29 = vld [vmem:[#allocation2 + $0x738] sm:$0xff] }
 0x1bb   :  { %2932 = vmatpush1.bf16.msra.mxu0 %v5841_v37  ;;  %3096 = vmatpush1.bf16.msra.mxu1 %v5843_v39  ;;  %v5908_v37 = vcombine.high %v350_v31, %v354_v32  ;;  %v357_v39 = vld [vmem:[#allocation2 + $0x590] sm:$0xff] }
 0x1bc   :  { %2933 = vmatprep.subr.bf16.mxu0 %v5850_v40  ;;  %3097 = vmatprep.subr.bf16.mxu1 %v5852_v41  ;;  %v361_v40 = vld [vmem:[#allocation2 + $0x5b0] sm:$0xff]  ;;  %v358_v41 = vld [vmem:[#allocation2 + $0x598] sm:$0xff] }
 0x1bd   :  { %v5914_v46 = vcombine.high %v357_v39, %v361_v40  ;;  %v5913_v53 = vcombine.low %v357_v39, %v361_v40  ;;  %v5915_v54 = vcombine.low %v358_v41, %v362_v42  ;;  %v418_v39 = vld [vmem:[#allocation2 + $0x778] sm:$0xff] }
 0x1bf   :  { %2934 = vmatpush1.bf16.msra.mxu0 %v5849_v47  ;;  %3098 = vmatpush1.bf16.msra.mxu1 %v5851_v48  ;;  %v5916_v47 = vcombine.high %v358_v41, %v362_v42  ;;  %v365_v48 = vld [vmem:[#allocation2 + $0x5d0] sm:$0xff] }
 0x1c0   :  { %2935 = vmatprep.subr.bf16.mxu0 %v5858_v50  ;;  %3099 = vmatprep.subr.bf16.mxu1 %v5860_v51  ;;  %v369_v50 = vld [vmem:[#allocation2 + $0x5f0] sm:$0xff]  ;;  %v366_v51 = vld [vmem:[#allocation2 + $0x5d8] sm:$0xff] }
 0x1c1   :  { %v5922_v55 = vcombine.high %v365_v48, %v369_v50  ;;  %v5921_v62 = vcombine.low %v365_v48, %v369_v50  ;;  %v5923_v63 = vcombine.low %v366_v51, %v370_v52  ;;  %v426_v48 = vld [vmem:[#allocation2 + $0x7b8] sm:$0xff] }
 0x1c3   :  { %2936 = vmatpush1.bf16.msra.mxu0 %v5857_v56  ;;  %3100 = vmatpush1.bf16.msra.mxu1 %v5859_v58  ;;  %v5924_v56 = vcombine.high %v366_v51, %v370_v52  ;;  %v373_v58 = vld [vmem:[#allocation2 + $0x610] sm:$0xff] }
 0x1c4   :  { %2946 = vmatprep.subr.bf16.mxu0 %v5866_v59  ;;  %3110 = vmatprep.subr.bf16.mxu1 %v5868_v60  ;;  %v377_v59 = vld [vmem:[#allocation2 + $0x630] sm:$0xff]  ;;  %v374_v60 = vld [vmem:[#allocation2 + $0x618] sm:$0xff] }
 0x1c5   :  { %v5930_v0 = vcombine.high %v373_v58, %v377_v59  ;;  %v5929_v6 = vcombine.low %v373_v58, %v377_v59  ;;  %v434_v58 = vld [vmem:[#allocation2 + $0x7f8] sm:$0xff] }
 0x1c6   :  { %2938 = vmatmul.mubr.bf16.vlgmr.msra.gmra.mrb[4].mxu0 %v7528_v12  ;;  %3102 = vmatmul.mubr.bf16.vlgmr.msra.gmra.mrb[4].mxu1 %v7528_v12  ;;  %v5883_v12 = vcombine.low %v326_v7, %v330_v8  ;;  %v5931_v7 = vcombine.low %v374_v60, %v378_v61 }
 0x1c7   :  { %2947 = vmatpush1.bf16.msra.mxu0 %v5865_v1  ;;  %3111 = vmatpush1.bf16.msra.mxu1 %v5867_v2  ;;  %v5932_v1 = vcombine.high %v374_v60, %v378_v61  ;;  %v381_v2 = vld [vmem:[#allocation2 + $0x650] sm:$0xff] }
 0x1c8   :  { %2948 = vmatprep.subr.bf16.mxu0 %v5874_v3  ;;  %3112 = vmatprep.subr.bf16.mxu1 %v5876_v4  ;;  %v385_v3 = vld [vmem:[#allocation2 + $0x670] sm:$0xff]  ;;  %v382_v4 = vld [vmem:[#allocation2 + $0x658] sm:$0xff] }
 0x1c9   :  { %2978 = vmatprep.mubr.bf16.mxu0 %v7533_v22  ;;  %3142 = vmatprep.mubr.bf16.mxu1 %v7533_v22  ;;  %v5900_v22 = vcombine.high %v342_v23, %v346_v24  ;;  %v5938_v8 = vcombine.high %v381_v2, %v385_v3  ;;  %v5937_v15 = vcombine.low %v381_v2, %v385_v3  ;;  %v442_v2 = vld [vmem:[#allocation2 + $0x838] sm:$0xff] }
 0x1ca   :  { %v5939_v57 = vcombine.low %v382_v4, %v386_v5 }
 0x1cb   :  { %2949 = vmatpush1.bf16.msra.mxu0 %v5873_v9  ;;  %3113 = vmatpush1.bf16.msra.mxu1 %v5875_v10  ;;  %v5940_v9 = vcombine.high %v382_v4, %v386_v5  ;;  %v389_v10 = vld [vmem:[#allocation2 + $0x690] sm:$0xff] }
 0x1cc   :  { %2950 = vmatprep.subr.bf16.mxu0 %v5882_v11  ;;  %3114 = vmatprep.subr.bf16.mxu1 %v5884_v13  ;;  %v393_v11 = vld [vmem:[#allocation2 + $0x6b0] sm:$0xff]  ;;  %v390_v13 = vld [vmem:[#allocation2 + $0x698] sm:$0xff] }
 0x1cd   :  { %v5946_v16 = vcombine.high %v389_v10, %v393_v11  ;;  %v5945_v21 = vcombine.low %v389_v10, %v393_v11  ;;  %v5947_v23 = vcombine.low %v390_v13, %v394_v14  ;;  %v450_v10 = vld [vmem:[#allocation2 + $0x878] sm:$0xff] }
 0x1cf   :  { %2951 = vmatpush1.bf16.msra.mxu0 %v5881_v17  ;;  %3115 = vmatpush1.bf16.msra.mxu1 %v5883_v12  ;;  %v5948_v17 = vcombine.high %v390_v13, %v394_v14  ;;  %v397_v12 = vld [vmem:[#allocation2 + $0x6d0] sm:$0xff] }
 0x1d0   :  { %2952 = vmatprep.subr.bf16.mxu0 %v5890_v18  ;;  %3116 = vmatprep.subr.bf16.mxu1 %v5892_v19  ;;  %v401_v18 = vld [vmem:[#allocation2 + $0x6f0] sm:$0xff]  ;;  %v398_v19 = vld [vmem:[#allocation2 + $0x6d8] sm:$0xff] }
 0x1d1   :  { %v5954_v24 = vcombine.high %v397_v12, %v401_v18  ;;  %v5953_v30 = vcombine.low %v397_v12, %v401_v18  ;;  %v5955_v31 = vcombine.low %v398_v19, %v402_v20  ;;  %v458_v12 = vld [vmem:[#allocation2 + $0x8b8] sm:$0xff] }
 0x1d3   :  { %2953 = vmatpush1.bf16.msra.mxu0 %v5889_v26  ;;  %3117 = vmatpush1.bf16.msra.mxu1 %v5891_v27  ;;  %v5956_v26 = vcombine.high %v398_v19, %v402_v20  ;;  %v405_v27 = vld [vmem:[#allocation2 + $0x710] sm:$0xff] }
 0x1d4   :  { %2954 = vmatprep.subr.bf16.mxu0 %v5898_v28  ;;  %3118 = vmatprep.subr.bf16.mxu1 %v5900_v22  ;;  %v409_v28 = vld [vmem:[#allocation2 + $0x730] sm:$0xff]  ;;  %v406_v22 = vld [vmem:[#allocation2 + $0x718] sm:$0xff] }
 0x1d5   :  { %v5962_v32 = vcombine.high %v405_v27, %v409_v28  ;;  %v5961_v40 = vcombine.low %v405_v27, %v409_v28  ;;  %v5963_v41 = vcombine.low %v406_v22, %v410_v29  ;;  %v466_v27 = vld [vmem:[#allocation2 + $0x8f8] sm:$0xff] }
 0x1d7   :  { %2955 = vmatpush1.bf16.msra.mxu0 %v5897_v33  ;;  %3119 = vmatpush1.bf16.msra.mxu1 %v5899_v35  ;;  %v5964_v33 = vcombine.high %v406_v22, %v410_v29  ;;  %v413_v35 = vld [vmem:[#allocation2 + $0x750] sm:$0xff] }
 0x1d8   :  { %2956 = vmatprep.subr.bf16.mxu0 %v5906_v36  ;;  %3120 = vmatprep.subr.bf16.mxu1 %v5908_v37  ;;  %v417_v36 = vld [vmem:[#allocation2 + $0x770] sm:$0xff]  ;;  %v414_v37 = vld [vmem:[#allocation2 + $0x758] sm:$0xff] }
 0x1d9   :  { %v5970_v42 = vcombine.high %v413_v35, %v417_v36  ;;  %v5969_v50 = vcombine.low %v413_v35, %v417_v36  ;;  %v5971_v51 = vcombine.low %v414_v37, %v418_v39 }
 0x1db   :  { %2957 = vmatpush1.bf16.msra.mxu0 %v5905_v44  ;;  %3121 = vmatpush1.bf16.msra.mxu1 %v5907_v45  ;;  %v5972_v44 = vcombine.high %v414_v37, %v418_v39  ;;  %v421_v45 = vld [vmem:[#allocation2 + $0x790] sm:$0xff] }
 0x1dc   :  { %2958 = vmatprep.subr.bf16.mxu0 %v5914_v46  ;;  %3122 = vmatprep.subr.bf16.mxu1 %v5916_v47  ;;  %v425_v46 = vld [vmem:[#allocation2 + $0x7b0] sm:$0xff]  ;;  %v422_v47 = vld [vmem:[#allocation2 + $0x798] sm:$0xff] }
 0x1dd   :  { %v5978_v52 = vcombine.high %v421_v45, %v425_v46  ;;  %v5977_v59 = vcombine.low %v421_v45, %v425_v46  ;;  %v5979_v60 = vcombine.low %v422_v47, %v426_v48  ;;  %v477_v39 = vld [vmem:[#allocation2 + $0x950] sm:$0xff] }
 0x1df   :  { %2959 = vmatpush1.bf16.msra.mxu0 %v5913_v53  ;;  %3123 = vmatpush1.bf16.msra.mxu1 %v5915_v54  ;;  %v5980_v53 = vcombine.high %v422_v47, %v426_v48  ;;  %v429_v54 = vld [vmem:[#allocation2 + $0x7d0] sm:$0xff] }
 0x1e0   :  { %2960 = vmatprep.subr.bf16.mxu0 %v5922_v55  ;;  %3124 = vmatprep.subr.bf16.mxu1 %v5924_v56  ;;  %v433_v55 = vld [vmem:[#allocation2 + $0x7f0] sm:$0xff]  ;;  %v430_v56 = vld [vmem:[#allocation2 + $0x7d8] sm:$0xff] }
 0x1e1   :  { %v5986_v61 = vcombine.high %v429_v54, %v433_v55  ;;  %v5985_v3 = vcombine.low %v429_v54, %v433_v55  ;;  %v5987_v4 = vcombine.low %v430_v56, %v434_v58  ;;  %v485_v48 = vld [vmem:[#allocation2 + $0x990] sm:$0xff] }
 0x1e3   :  { %2961 = vmatpush1.bf16.msra.mxu0 %v5921_v62  ;;  %3125 = vmatpush1.bf16.msra.mxu1 %v5923_v63  ;;  %v5988_v62 = vcombine.high %v430_v56, %v434_v58  ;;  %v437_v63 = vld [vmem:[#allocation2 + $0x810] sm:$0xff] }
 0x1e4   :  { %2962 = vmatprep.subr.bf16.mxu0 %v5930_v0  ;;  %3126 = vmatprep.subr.bf16.mxu1 %v5932_v1  ;;  %v441_v0 = vld [vmem:[#allocation2 + $0x830] sm:$0xff]  ;;  %v438_v1 = vld [vmem:[#allocation2 + $0x818] sm:$0xff] }
 0x1e5   :  { %v5994_v5 = vcombine.high %v437_v63, %v441_v0  ;;  %v5993_v11 = vcombine.low %v437_v63, %v441_v0  ;;  %v5995_v13 = vcombine.low %v438_v1, %v442_v2  ;;  %v493_v58 = vld [vmem:[#allocation2 + $0x9d0] sm:$0xff] }
 0x1e7   :  { %2963 = vmatpush1.bf16.msra.mxu0 %v5929_v6  ;;  %3127 = vmatpush1.bf16.msra.mxu1 %v5931_v7  ;;  %v5996_v6 = vcombine.high %v438_v1, %v442_v2  ;;  %v445_v7 = vld [vmem:[#allocation2 + $0x850] sm:$0xff] }
 0x1e8   :  { %2964 = vmatprep.subr.bf16.mxu0 %v5938_v8  ;;  %3128 = vmatprep.subr.bf16.mxu1 %v5940_v9  ;;  %v449_v8 = vld [vmem:[#allocation2 + $0x870] sm:$0xff]  ;;  %v446_v9 = vld [vmem:[#allocation2 + $0x858] sm:$0xff] }
 0x1e9   :  { %v6002_v14 = vcombine.high %v445_v7, %v449_v8  ;;  %v6001_v18 = vcombine.low %v445_v7, %v449_v8  ;;  %v6003_v19 = vcombine.low %v446_v9, %v450_v10  ;;  %v501_v2 = vld [vmem:[#allocation2 + $0xa10] sm:$0xff] }
 0x1eb   :  { %2965 = vmatpush1.bf16.msra.mxu0 %v5937_v15  ;;  %3129 = vmatpush1.bf16.msra.mxu1 %v5939_v57  ;;  %v6004_v15 = vcombine.high %v446_v9, %v450_v10  ;;  %v453_v57 = vld [vmem:[#allocation2 + $0x890] sm:$0xff] }
 0x1ec   :  { %2966 = vmatprep.subr.bf16.mxu0 %v5946_v16  ;;  %3130 = vmatprep.subr.bf16.mxu1 %v5948_v17  ;;  %v457_v16 = vld [vmem:[#allocation2 + $0x8b0] sm:$0xff]  ;;  %v454_v17 = vld [vmem:[#allocation2 + $0x898] sm:$0xff] }
 0x1ed   :  { %v6010_v20 = vcombine.high %v453_v57, %v457_v16  ;;  %v6009_v28 = vcombine.low %v453_v57, %v457_v16  ;;  %v509_v10 = vld [vmem:[#allocation2 + $0xa50] sm:$0xff] }
 0x1ef   :  { %2967 = vmatpush1.bf16.msra.mxu0 %v5945_v21  ;;  %3131 = vmatpush1.bf16.msra.mxu1 %v5947_v23  ;;  %v6012_v21 = vcombine.high %v454_v17, %v458_v12  ;;  %v461_v23 = vld [vmem:[#allocation2 + $0x8d0] sm:$0xff] }
 0x1f0   :  { %2968 = vmatprep.subr.bf16.mxu0 %v5954_v24  ;;  %3132 = vmatprep.subr.bf16.mxu1 %v5956_v26  ;;  %v465_v24 = vld [vmem:[#allocation2 + $0x8f0] sm:$0xff]  ;;  %v462_v26 = vld [vmem:[#allocation2 + $0x8d8] sm:$0xff] }
 0x1f1   :  { %v6018_v22 = vcombine.high %v461_v23, %v465_v24  ;;  %v6020_v29 = vcombine.high %v462_v26, %v466_v27  ;;  %v6017_v35 = vcombine.low %v461_v23, %v465_v24  ;;  %v6019_v36 = vcombine.low %v462_v26, %v466_v27  ;;  %v525_v27 = vld [vmem:[#allocation2 + $0xad0] sm:$0xff] }
 0x1f3   :  { %2969 = vmatpush1.bf16.msra.mxu0 %v5953_v30  ;;  %3133 = vmatpush1.bf16.msra.mxu1 %v5955_v31  ;;  %v469_v30 = vld [vmem:[#allocation2 + $0x910] sm:$0xff] }
 0x1f4   :  { %2970 = vmatprep.subr.bf16.mxu0 %v5962_v32  ;;  %3134 = vmatprep.subr.bf16.mxu1 %v5964_v33  ;;  %v473_v31 = vld [vmem:[#allocation2 + $0x930] sm:$0xff]  ;;  %v470_v32 = vld [vmem:[#allocation2 + $0x918] sm:$0xff] }
 0x1f5   :  { %v474_v33 = vld [vmem:[#allocation2 + $0x938] sm:$0xff]  ;;  %v6026_v37 = vcombine.high %v469_v30, %v473_v31 }
 0x1f6   :  { %v6027_v45 = vcombine.low %v470_v32, %v474_v33 }
 0x1f7   :  { %2971 = vmatpush1.bf16.msra.mxu0 %v5961_v40  ;;  %3135 = vmatpush1.bf16.msra.mxu1 %v5963_v41  ;;  %v481_v40 = vld [vmem:[#allocation2 + $0x970] sm:$0xff]  ;;  %v478_v41 = vld [vmem:[#allocation2 + $0x958] sm:$0xff] }
 0x1f8   :  { %2972 = vmatprep.subr.bf16.mxu0 %v5970_v42  ;;  %3136 = vmatprep.subr.bf16.mxu1 %v5972_v44  ;;  %v482_v42 = vld [vmem:[#allocation2 + $0x978] sm:$0xff]  ;;  %v6025_v44 = vcombine.low %v469_v30, %v473_v31  ;;  %v6034_v46 = vcombine.high %v477_v39, %v481_v40 }
 0x1f9   :  { %v6036_v47 = vcombine.high %v478_v41, %v482_v42  ;;  %v6035_v54 = vcombine.low %v478_v41, %v482_v42  ;;  %v541_v42 = vld [vmem:[#allocation2 + $0xb50] sm:$0xff] }
 0x1fb   :  { %2973 = vmatpush1.bf16.msra.mxu0 %v5969_v50  ;;  %3137 = vmatpush1.bf16.msra.mxu1 %v5971_v51  ;;  %v489_v50 = vld [vmem:[#allocation2 + $0x9b0] sm:$0xff]  ;;  %v486_v51 = vld [vmem:[#allocation2 + $0x998] sm:$0xff] }
 0x1fc   :  { %2974 = vmatprep.subr.bf16.mxu0 %v5978_v52  ;;  %3138 = vmatprep.subr.bf16.mxu1 %v5980_v53  ;;  %v490_v52 = vld [vmem:[#allocation2 + $0x9b8] sm:$0xff]  ;;  %v6033_v53 = vcombine.low %v477_v39, %v481_v40  ;;  %v6042_v55 = vcombine.high %v485_v48, %v489_v50 }
 0x1fd   :  { %v6044_v56 = vcombine.high %v486_v51, %v490_v52  ;;  %v6043_v63 = vcombine.low %v486_v51, %v490_v52  ;;  %v549_v52 = vld [vmem:[#allocation2 + $0xb90] sm:$0xff] }
 0x1ff   :  { %2975 = vmatpush1.bf16.msra.mxu0 %v5977_v59  ;;  %3139 = vmatpush1.bf16.msra.mxu1 %v5979_v60  ;;  %v497_v59 = vld [vmem:[#allocation2 + $0x9f0] sm:$0xff]  ;;  %v494_v60 = vld [vmem:[#allocation2 + $0x9d8] sm:$0xff] }
 0x200   :  { %2976 = vmatprep.subr.bf16.mxu0 %v5986_v61  ;;  %3140 = vmatprep.subr.bf16.mxu1 %v5988_v62  ;;  %v498_v61 = vld [vmem:[#allocation2 + $0x9f8] sm:$0xff]  ;;  %v6041_v62 = vcombine.low %v485_v48, %v489_v50  ;;  %v6050_v0 = vcombine.high %v493_v58, %v497_v59 }
 0x201   :  { %v6052_v1 = vcombine.high %v494_v60, %v498_v61  ;;  %v6051_v7 = vcombine.low %v494_v60, %v498_v61  ;;  %v557_v61 = vld [vmem:[#allocation2 + $0xbd0] sm:$0xff] }
 0x203   :  { %2977 = vmatpush1.bf16.msra.mxu0 %v5985_v3  ;;  %3141 = vmatpush1.bf16.msra.mxu1 %v5987_v4  ;;  %v505_v3 = vld [vmem:[#allocation2 + $0xa30] sm:$0xff]  ;;  %v502_v4 = vld [vmem:[#allocation2 + $0xa18] sm:$0xff] }
 0x204   :  { %2987 = vmatprep.subr.bf16.mxu0 %v5994_v5  ;;  %3151 = vmatprep.subr.bf16.mxu1 %v5996_v6  ;;  %v506_v5 = vld [vmem:[#allocation2 + $0xa38] sm:$0xff]  ;;  %v6049_v6 = vcombine.low %v493_v58, %v497_v59  ;;  %v6058_v8 = vcombine.high %v501_v2, %v505_v3 }
 0x205   :  { %v6060_v9 = vcombine.high %v502_v4, %v506_v5  ;;  %v6059_v57 = vcombine.low %v502_v4, %v506_v5  ;;  %v565_v5 = vld [vmem:[#allocation2 + $0xc10] sm:$0xff] }
 0x206   :  { %2979 = vmatmul.mubr.bf16.vlgmr.msra.gmra.mrb[4].mxu0 %v7545_v25  ;;  %3143 = vmatmul.mubr.bf16.vlgmr.msra.gmra.mrb[4].mxu1 %v7545_v25  ;;  %v6011_v25 = vcombine.low %v454_v17, %v458_v12  ;;  %v517_v12 = vld [vmem:[#allocation2 + $0xa90] sm:$0xff] }
 0x207   :  { %2988 = vmatpush1.bf16.msra.mxu0 %v5993_v11  ;;  %3152 = vmatpush1.bf16.msra.mxu1 %v5995_v13  ;;  %v513_v11 = vld [vmem:[#allocation2 + $0xa70] sm:$0xff]  ;;  %v510_v13 = vld [vmem:[#allocation2 + $0xa58] sm:$0xff] }
 0x208   :  { %2989 = vmatprep.subr.bf16.mxu0 %v6002_v14  ;;  %3153 = vmatprep.subr.bf16.mxu1 %v6004_v15  ;;  %v514_v14 = vld [vmem:[#allocation2 + $0xa78] sm:$0xff]  ;;  %v6057_v15 = vcombine.low %v501_v2, %v505_v3  ;;  %v6066_v16 = vcombine.high %v509_v10, %v513_v11 }
 0x209   :  { %3019 = vmatprep.mubr.bf16.mxu0 %v7547_v34  ;;  %3183 = vmatprep.mubr.bf16.mxu1 %v7547_v34  ;;  %v6028_v34 = vcombine.high %v470_v32, %v474_v33  ;;  %v6068_v17 = vcombine.high %v510_v13, %v514_v14  ;;  %v6067_v23 = vcombine.low %v510_v13, %v514_v14  ;;  %v533_v33 = vld [vmem:[#allocation2 + $0xb10] sm:$0xff] }
 0x20b   :  { %2990 = vmatpush1.bf16.msra.mxu0 %v6001_v18  ;;  %3154 = vmatpush1.bf16.msra.mxu1 %v6003_v19  ;;  %v521_v18 = vld [vmem:[#allocation2 + $0xab0] sm:$0xff]  ;;  %v518_v19 = vld [vmem:[#allocation2 + $0xa98] sm:$0xff] }
 0x20c   :  { %2991 = vmatprep.subr.bf16.mxu0 %v6010_v20  ;;  %3155 = vmatprep.subr.bf16.mxu1 %v6012_v21  ;;  %v522_v20 = vld [vmem:[#allocation2 + $0xab8] sm:$0xff]  ;;  %v6065_v21 = vcombine.low %v509_v10, %v513_v11  ;;  %v6074_v24 = vcombine.high %v517_v12, %v521_v18 }
 0x20d   :  { %v6076_v26 = vcombine.high %v518_v19, %v522_v20  ;;  %v6075_v30 = vcombine.low %v518_v19, %v522_v20  ;;  %v6644_v19 = vld [vmem:[#allocation6 + $0x8] ss:$16 sps:$4 sm:$0xff]   ;;  %v6649_v20 = vld [vmem:[#allocation6 + $0x24] ss:$16 sps:$4 sm:$0xff]  }
 0x20f   :  { %2992 = vmatpush1.bf16.msra.mxu0 %v6009_v28  ;;  %3156 = vmatpush1.bf16.msra.mxu1 %v6011_v25  ;;  %v529_v28 = vld [vmem:[#allocation2 + $0xaf0] sm:$0xff]  ;;  %v526_v25 = vld [vmem:[#allocation2 + $0xad8] sm:$0xff] }
 0x210   :  { %2993 = vmatprep.subr.bf16.mxu0 %v6018_v22  ;;  %3157 = vmatprep.subr.bf16.mxu1 %v6020_v29  ;;  %v530_v22 = vld [vmem:[#allocation2 + $0xaf8] sm:$0xff]  ;;  %v6073_v29 = vcombine.low %v517_v12, %v521_v18  ;;  %v6082_v31 = vcombine.high %v525_v27, %v529_v28 }
 0x211   :  { %v6084_v32 = vcombine.high %v526_v25, %v530_v22  ;;  %v6083_v39 = vcombine.low %v526_v25, %v530_v22  ;;  %v6641_v12 = vld [vmem:[#allocation6] ss:$16 sps:$4 sm:$0xff]   ;;  %v6661_v22 = vld [vmem:[#allocation6 + $0x64] ss:$16 sps:$4 sm:$0xff]  }
 0x213   :  { %2994 = vmatpush1.bf16.msra.mxu0 %v6017_v35  ;;  %3158 = vmatpush1.bf16.msra.mxu1 %v6019_v36  ;;  %v537_v35 = vld [vmem:[#allocation2 + $0xb30] sm:$0xff]  ;;  %v534_v36 = vld [vmem:[#allocation2 + $0xb18] sm:$0xff] }
 0x214   :  { %2995 = vmatprep.subr.bf16.mxu0 %v6026_v37  ;;  %3159 = vmatprep.subr.bf16.mxu1 %v6028_v34  ;;  %v538_v37 = vld [vmem:[#allocation2 + $0xb38] sm:$0xff]  ;;  %v6081_v34 = vcombine.low %v525_v27, %v529_v28  ;;  %v6090_v40 = vcombine.high %v533_v33, %v537_v35  ;;  %v6658_v27 = vld [vmem:[#allocation6 + $0x4c] ss:$16 sps:$4 sm:$0xff]  }
 0x215   :  { %v6092_v41 = vcombine.high %v534_v36, %v538_v37  ;;  %v6091_v48 = vcombine.low %v534_v36, %v538_v37  ;;  %v6653_v28 = vld [vmem:[#allocation6 + $0x40] ss:$16 sps:$4 sm:$0xff]  }
 0x216   :  { %v6659_v37 = vld [vmem:[#allocation6 + $0x60] ss:$16 sps:$4 sm:$0xff]  }
 0x217   :  { %2996 = vmatpush1.bf16.msra.mxu0 %v6025_v44  ;;  %3160 = vmatpush1.bf16.msra.mxu1 %v6027_v45  ;;  %v545_v44 = vld [vmem:[#allocation2 + $0xb70] sm:$0xff]  ;;  %v542_v45 = vld [vmem:[#allocation2 + $0xb58] sm:$0xff] }
 0x218   :  { %2997 = vmatprep.subr.bf16.mxu0 %v6034_v46  ;;  %3161 = vmatprep.subr.bf16.mxu1 %v6036_v47  ;;  %v546_v46 = vld [vmem:[#allocation2 + $0xb78] sm:$0xff]  ;;  %v6089_v47 = vcombine.low %v533_v33, %v537_v35  ;;  %v6098_v50 = vcombine.high %v541_v42, %v545_v44 }
 0x219   :  { %v6100_v51 = vcombine.high %v542_v45, %v546_v46  ;;  %v6099_v58 = vcombine.low %v542_v45, %v546_v46  ;;  %v6670_v45 = vld [vmem:[#allocation6 + $0x8c] ss:$16 sps:$4 sm:$0xff]  }
 0x21b   :  { %2998 = vmatpush1.bf16.msra.mxu0 %v6033_v53  ;;  %3162 = vmatpush1.bf16.msra.mxu1 %v6035_v54  ;;  %v553_v53 = vld [vmem:[#allocation2 + $0xbb0] sm:$0xff]  ;;  %v550_v54 = vld [vmem:[#allocation2 + $0xb98] sm:$0xff] }
 0x21c   :  { %2999 = vmatprep.subr.bf16.mxu0 %v6042_v55  ;;  %3163 = vmatprep.subr.bf16.mxu1 %v6044_v56  ;;  %v554_v55 = vld [vmem:[#allocation2 + $0xbb8] sm:$0xff]  ;;  %v6097_v56 = vcombine.low %v541_v42, %v545_v44  ;;  %v6106_v59 = vcombine.high %v549_v52, %v553_v53 }
 0x21d   :  { %v6108_v60 = vcombine.high %v550_v54, %v554_v55  ;;  %v6107_v2 = vcombine.low %v550_v54, %v554_v55  ;;  %v6679_v54 = vld [vmem:[#allocation6 + $0xc4] ss:$16 sps:$4 sm:$0xff]   ;;  %v6682_v55 = vld [vmem:[#allocation6 + $0xcc] ss:$16 sps:$4 sm:$0xff]  }
 0x21f   :  { %3000 = vmatpush1.bf16.msra.mxu0 %v6041_v62  ;;  %3164 = vmatpush1.bf16.msra.mxu1 %v6043_v63  ;;  %v561_v62 = vld [vmem:[#allocation2 + $0xbf0] sm:$0xff]  ;;  %v558_v63 = vld [vmem:[#allocation2 + $0xbd8] sm:$0xff] }
 0x220   :  { %3001 = vmatprep.subr.bf16.mxu0 %v6050_v0  ;;  %3165 = vmatprep.subr.bf16.mxu1 %v6052_v1  ;;  %v562_v0 = vld [vmem:[#allocation2 + $0xbf8] sm:$0xff]  ;;  %v6105_v1 = vcombine.low %v549_v52, %v553_v53  ;;  %v6114_v3 = vcombine.high %v557_v61, %v561_v62  ;;  %v6674_v53 = vld [vmem:[#allocation6 + $0xa8] ss:$16 sps:$4 sm:$0xff]  }
 0x221   :  { %v6116_v4 = vcombine.high %v558_v63, %v562_v0  ;;  %v6115_v10 = vcombine.low %v558_v63, %v562_v0  ;;  %v6671_v52 = vld [vmem:[#allocation6 + $0xa0] ss:$16 sps:$4 sm:$0xff]   ;;  %v6691_v63 = vld [vmem:[#allocation6 + $0x104] ss:$16 sps:$4 sm:$0xff]   ;;  %v6694_v0 = vld [vmem:[#allocation6 + $0x10c] ss:$16 sps:$4 sm:$0xff]  }
 0x223   :  { %3002 = vmatpush1.bf16.msra.mxu0 %v6049_v6  ;;  %3166 = vmatpush1.bf16.msra.mxu1 %v6051_v7  ;;  %v569_v6 = vld [vmem:[#allocation2 + $0xc30] sm:$0xff]  ;;  %v566_v7 = vld [vmem:[#allocation2 + $0xc18] sm:$0xff] }
 0x224   :  { %3003 = vmatprep.subr.bf16.mxu0 %v6058_v8  ;;  %3167 = vmatprep.subr.bf16.mxu1 %v6060_v9  ;;  %v570_v8 = vld [vmem:[#allocation2 + $0xc38] sm:$0xff]  ;;  %v6113_v9 = vcombine.low %v557_v61, %v561_v62  ;;  %v6122_v11 = vcombine.high %v565_v5, %v569_v6  ;;  %v6121_v14 = vcombine.low %v565_v5, %v569_v6  ;;  %v6686_v62 = vld [vmem:[#allocation6 + $0xe8] ss:$16 sps:$4 sm:$0xff]  }
 0x225   :  { %v6124_v13 = vcombine.high %v566_v7, %v570_v8  ;;  %v6683_v61 = vld [vmem:[#allocation6 + $0xe0] ss:$16 sps:$4 sm:$0xff]   ;;  %v6698_v6 = vld [vmem:[#allocation6 + $0x128] ss:$16 sps:$4 sm:$0xff]  }
 0x226   :  { %v6695_v5 = vld [vmem:[#allocation6 + $0x120] ss:$16 sps:$4 sm:$0xff]  }
 0x227   :  { %3004 = vmatpush1.bf16.msra.mxu0 %v6057_v15  ;;  %3168 = vmatpush1.bf16.msra.mxu1 %v6059_v57  ;;  %v6123_v15 = vcombine.low %v566_v7, %v570_v8  ;;  %v6643_v57 = vld [vmem:[#allocation6 + $0x4] ss:$16 sps:$4 sm:$0xff]   ;;  %v6706_v8 = vld [vmem:[#allocation6 + $0x14c] ss:$16 sps:$4 sm:$0xff]  }
 0x228   :  { %3005 = vmatprep.subr.bf16.mxu0 %v6066_v16  ;;  %3169 = vmatprep.subr.bf16.mxu1 %v6068_v17  ;;  %v6646_v16 = vld [vmem:[#allocation6 + $0xc] ss:$16 sps:$4 sm:$0xff]   ;;  %v573_v17 = vlaneseq  ;;  %v6703_v7 = vld [vmem:[#allocation6 + $0x144] ss:$16 sps:$4 sm:$0xff]  }
 0x22a   :  { %v7585_v18 = vshrl.u32 %v573_v17, 7  ;;  %v6713_v17 = vld [vmem:[#allocation6 + $0x180] ss:$16 sps:$4 sm:$0xff]  }
 0x22b   :  { %3006 = vmatpush1.bf16.msra.mxu0 %v6065_v21  ;;  %3170 = vmatpush1.bf16.msra.mxu1 %v6067_v23  ;;  %v6652_v21 = vld [vmem:[#allocation6 + $0x2c] ss:$16 sps:$4 sm:$0xff]  }
 0x22c   :  { %3007 = vmatprep.subr.bf16.mxu0 %v6074_v24  ;;  %3171 = vmatprep.subr.bf16.mxu1 %v6076_v26  ;;  %v579_v23 = vsub.s32 1, %v7585_v18  ;;  %v6655_v24 = vld [vmem:[#allocation6 + $0x44] ss:$16 sps:$4 sm:$0xff]   ;;  %v7592_v26 = vld [vmem:[#allocation4] sm:$0xff] }
 0x22e   :  { %v580_v25 = vrot.slane %v7592_v26, %v579_v23 }
 0x22f   :  { %3008 = vmatpush1.bf16.msra.mxu0 %v6073_v29  ;;  %3172 = vmatpush1.bf16.msra.mxu1 %v6075_v30  ;;  %v6664_v30 = vld [vmem:[#allocation6 + $0x6c] ss:$16 sps:$4 sm:$0xff]  }
 0x230   :  { %3009 = vmatprep.subr.bf16.mxu0 %v6082_v31  ;;  %3173 = vmatprep.subr.bf16.mxu1 %v6084_v32 }
 0x233   :  { %3010 = vmatpush1.bf16.msra.mxu0 %v6081_v34  ;;  %3174 = vmatpush1.bf16.msra.mxu1 %v6083_v39 }
 0x234   :  { %3011 = vmatprep.subr.bf16.mxu0 %v6090_v40  ;;  %3175 = vmatprep.subr.bf16.mxu1 %v6092_v41  ;;  %v6662_v40 = vld [vmem:[#allocation6 + $0x68] ss:$16 sps:$4 sm:$0xff]   ;;  %v6667_v41 = vld [vmem:[#allocation6 + $0x84] ss:$16 sps:$4 sm:$0xff]  }
 0x237   :  { %3012 = vmatpush1.bf16.msra.mxu0 %v6089_v47  ;;  %3176 = vmatpush1.bf16.msra.mxu1 %v6091_v48  ;;  %v6665_v47 = vld [vmem:[#allocation6 + $0x80] ss:$16 sps:$4 sm:$0xff]   ;;  %v6668_v48 = vld [vmem:[#allocation6 + $0x88] ss:$16 sps:$4 sm:$0xff]  }
 0x238   :  { %3013 = vmatprep.subr.bf16.mxu0 %v6098_v50  ;;  %3177 = vmatprep.subr.bf16.mxu1 %v6100_v51  ;;  %v6673_v50 = vld [vmem:[#allocation6 + $0xa4] ss:$16 sps:$4 sm:$0xff]   ;;  %v6676_v51 = vld [vmem:[#allocation6 + $0xac] ss:$16 sps:$4 sm:$0xff]  }
 0x23b   :  { %3014 = vmatpush1.bf16.msra.mxu0 %v6097_v56  ;;  %3178 = vmatpush1.bf16.msra.mxu1 %v6099_v58  ;;  %v6677_v56 = vld [vmem:[#allocation6 + $0xc0] ss:$16 sps:$4 sm:$0xff]   ;;  %v6680_v58 = vld [vmem:[#allocation6 + $0xc8] ss:$16 sps:$4 sm:$0xff]  }
 0x23c   :  { %3015 = vmatprep.subr.bf16.mxu0 %v6106_v59  ;;  %3179 = vmatprep.subr.bf16.mxu1 %v6108_v60  ;;  %v6685_v59 = vld [vmem:[#allocation6 + $0xe4] ss:$16 sps:$4 sm:$0xff]   ;;  %v6688_v60 = vld [vmem:[#allocation6 + $0xec] ss:$16 sps:$4 sm:$0xff]  }
 0x23f   :  { %3016 = vmatpush1.bf16.msra.mxu0 %v6105_v1  ;;  %3180 = vmatpush1.bf16.msra.mxu1 %v6107_v2  ;;  %v6689_v1 = vld [vmem:[#allocation6 + $0x100] ss:$16 sps:$4 sm:$0xff]   ;;  %v6692_v2 = vld [vmem:[#allocation6 + $0x108] ss:$16 sps:$4 sm:$0xff]  }
 0x240   :  { %3017 = vmatprep.subr.bf16.mxu0 %v6114_v3  ;;  %3181 = vmatprep.subr.bf16.mxu1 %v6116_v4  ;;  %v6697_v3 = vld [vmem:[#allocation6 + $0x124] ss:$16 sps:$4 sm:$0xff]   ;;  %v6700_v4 = vld [vmem:[#allocation6 + $0x12c] ss:$16 sps:$4 sm:$0xff]  }
 0x243   :  { %3018 = vmatpush1.bf16.msra.mxu0 %v6113_v9  ;;  %3182 = vmatpush1.bf16.msra.mxu1 %v6115_v10  ;;  %v6701_v9 = vld [vmem:[#allocation6 + $0x140] ss:$16 sps:$4 sm:$0xff]   ;;  %v6704_v10 = vld [vmem:[#allocation6 + $0x148] ss:$16 sps:$4 sm:$0xff]  }
 0x244   :  { %3028 = vmatprep.subr.bf16.mxu0 %v6122_v11  ;;  %3192 = vmatprep.subr.bf16.mxu1 %v6124_v13  ;;  %v6709_v11 = vld [vmem:[#allocation6 + $0x164] ss:$16 sps:$4 sm:$0xff]   ;;  %v6712_v13 = vld [vmem:[#allocation6 + $0x16c] ss:$16 sps:$4 sm:$0xff]  }
 0x246   :  { %3020 = vmatmul.mubr.bf16.vlgmr.msra.gmra.mrb[4].mxu0 %v7556_v38  ;;  %3184 = vmatmul.mubr.bf16.vlgmr.msra.gmra.mrb[4].mxu1 %v7556_v38  ;;  %v6647_v38 = vld [vmem:[#allocation6 + $0x20] ss:$16 sps:$4 sm:$0xff]  }
 0x247   :  { %3029 = vmatpush1.bf16.msra.mxu0 %v6121_v14  ;;  %3193 = vmatpush1.bf16.msra.mxu1 %v6123_v15  ;;  %v6707_v14 = vld [vmem:[#allocation6 + $0x160] ss:$16 sps:$4 sm:$0xff]   ;;  %v6710_v15 = vld [vmem:[#allocation6 + $0x168] ss:$16 sps:$4 sm:$0xff]  }
 0x248   :  { %3060 = vmatprep.mubr.bf16.mxu0 %v7326_v43  ;;  %3224 = vmatprep.mubr.bf16.mxu1 %v7326_v43  ;;  %v6650_v43 = vld [vmem:[#allocation6 + $0x28] ss:$16 sps:$4 sm:$0xff]  }
 0x249   :  { %4807 = vmatprep.subr.bf16.mxu0 %v6643_v57  ;;  %4971 = vmatprep.subr.bf16.mxu1 %v6646_v16  ;;  %v6715_v57 = vld [vmem:[#allocation6 + $0x184] ss:$16 sps:$4 sm:$0xff]   ;;  %v6718_v16 = vld [vmem:[#allocation6 + $0x18c] ss:$16 sps:$4 sm:$0xff]  }
 0x252   :  { %6127 = vmatmul.mubr.msk.bf16.vlgmr.msra.gmra.mrb[4].mxu0 %vm2573_vm0, %v7565_v49  ;;  %6128 = vmatmul.mubr.msk.bf16.vlgmr.msra.gmra.mrb[4].mxu1 %vm2573_vm0, %v7565_v49  ;;  %v6656_v49 = vld [vmem:[#allocation6 + $0x48] ss:$16 sps:$4 sm:$0xff]  }
 0x253   :  { %4808 = vmatpush1.bf16.msra.mxu0 %v6641_v12  ;;  %4972 = vmatpush1.bf16.msra.mxu1 %v6644_v19  ;;  %v575_v12 = vsub.s32 0, %v7585_v18  ;;  %v6716_v19 = vld [vmem:[#allocation6 + $0x188] ss:$16 sps:$4 sm:$0xff]  }
 0x254   :  { %4809 = vmatprep.subr.bf16.mxu0 %v6649_v20  ;;  %4973 = vmatprep.subr.bf16.mxu1 %v6652_v21  ;;  %v6721_v20 = vld [vmem:[#allocation6 + $0x1a4] ss:$16 sps:$4 sm:$0xff]   ;;  %v6724_v21 = vld [vmem:[#allocation6 + $0x1ac] ss:$16 sps:$4 sm:$0xff]  }
 0x257   :  { %4810 = vmatpush1.bf16.msra.mxu0 %v6647_v38  ;;  %4974 = vmatpush1.bf16.msra.mxu1 %v6650_v43  ;;  %v587_v38 = vsub.s32 3, %v7585_v18  ;;  %v6719_v43 = vld [vmem:[#allocation6 + $0x1a0] ss:$16 sps:$4 sm:$0xff]  }
 0x258   :  { %4811 = vmatprep.subr.bf16.mxu0 %v6655_v24  ;;  %4975 = vmatprep.subr.bf16.mxu1 %v6658_v27  ;;  %v576_v24 = vrot.slane %v7592_v26, %v575_v12  ;;  %v6722_v27 = vld [vmem:[#allocation6 + $0x1a8] ss:$16 sps:$4 sm:$0xff]  }
 0x259   :  { %v7597_v29 = vpop.f32.mrb[0].mxu0  ;;  %v7599_v31 = vpop.f32.mrb[0].mxu1 }
 0x25a   :  { %v2736_v32 = vpop.f32.mrb[1].mxu0  ;;  %v7601_v35 = vpop.f32.mrb[1].mxu1 }
 0x25b   :  { %4812 = vmatpush1.bf16.msra.mxu0 %v6653_v28  ;;  %v6539_v33 = vadd.f32 %v2736_v32, %v580_v25  ;;  %v2738_v36 = vpop.f32.mrb[2].mxu0  ;;  %4976 = vmatpush1.bf16.msra.mxu1 %v6656_v49  ;;  %v2902_v34 = vpop.f32.mrb[2].mxu1  ;;  %v6727_v28 = vld [vmem:[#allocation6 + $0x1c4] ss:$16 sps:$4 sm:$0xff]   ;;  %v6730_v25 = vld [vmem:[#allocation6 + $0x1cc] ss:$16 sps:$4 sm:$0xff]   ;;  %v588_v49 = vrot.slane %v7592_v26, %v587_v38 }
 0x25c   :  { %v2739_v39 = vpop.f32.mrb[3].mxu0  ;;  %4813 = vmatprep.subr.bf16.mxu0 %v6661_v22  ;;  %v2903_v44 = vpop.f32.mrb[3].mxu1  ;;  %4977 = vmatprep.subr.bf16.mxu1 %v6664_v30  ;;  %v6725_v22 = vld [vmem:[#allocation6 + $0x1c0] ss:$16 sps:$4 sm:$0xff]   ;;  %v6538_v30 = vadd.f32 %v7597_v29, %v576_v24  ;;  %v6728_v32 = vld [vmem:[#allocation6 + $0x1c8] ss:$16 sps:$4 sm:$0xff]  }
 0x25d   :  { %v3234_v42 = vmax.f32 %v6539_v33, 0.0  ;;  %v6733_v33 = vld [vmem:[#allocation6 + $0x1e4] ss:$16 sps:$4 sm:$0xff]   ;;  %v6736_v36 = vld [vmem:[#allocation6 + $0x1ec] ss:$16 sps:$4 sm:$0xff]  }
 0x25e   :  { %v6731_v34 = vld [vmem:[#allocation6 + $0x1e0] ss:$16 sps:$4 sm:$0xff]   ;;  %v3233_v39 = vmax.f32 %v6538_v30, 0.0  ;;  %v6802_v24 = vld [vmem:[#allocation6 + $0x34c] ss:$16 sps:$4 sm:$0xff]  }
 0x25f   :  { %v3242_v46 = vpack.c.bf16 %v3234_v42, %v3234_v42  ;;  %4814 = vmatpush1.bf16.msra.mxu0 %v6659_v37  ;;  %4978 = vmatpush1.bf16.msra.mxu1 %v6662_v40  ;;  %v6541_v37 = vadd.f32 %v7601_v35, %v588_v49  ;;  %v6734_v40 = vld [vmem:[#allocation6 + $0x1e8] ss:$16 sps:$4 sm:$0xff]   ;;  %v6742_v42 = vld [vmem:[#allocation6 + $0x20c] ss:$16 sps:$4 sm:$0xff]   ;;  %v6737_v29 = vld [vmem:[#allocation6 + $0x200] ss:$16 sps:$4 sm:$0xff]  }
 0x260   :  { %4815 = vmatprep.subr.bf16.mxu0 %v6667_v41  ;;  %4979 = vmatprep.subr.bf16.mxu1 %v6670_v45  ;;  %v6739_v41 = vld [vmem:[#allocation6 + $0x204] ss:$16 sps:$4 sm:$0xff]   ;;  %v3241_v45 = vpack.c.bf16 %v3233_v39, %v3233_v39  ;;  %v6748_v35 = vld [vmem:[#allocation6 + $0x22c] ss:$16 sps:$4 sm:$0xff]   ;;  %v6806_v30 = vld [vmem:[#allocation6 + $0x368] ss:$16 sps:$4 sm:$0xff]  }
 0x261   :  { %4839 = vmatprep.mubr.bf16.mxu0 %v3242_v46  ;;  %5003 = vmatprep.mubr.bf16.mxu1 %v3242_v46  ;;  %v3236_v44 = vmax.f32 %v6541_v37, 0.0  ;;  %v6740_v46 = vld [vmem:[#allocation6 + $0x208] ss:$16 sps:$4 sm:$0xff]   ;;  %v6808_v49 = vld [vmem:[#allocation6 + $0x36c] ss:$16 sps:$4 sm:$0xff]   ;;  %v583_v37 = vsub.s32 2, %v7585_v18 }
 0x262   :  { %v6817_v39 = vld [vmem:[#allocation6 + $0x3a4] ss:$16 sps:$4 sm:$0xff]  }
 0x263   :  { %4816 = vmatpush1.bf16.msra.mxu0 %v6665_v47  ;;  %4980 = vmatpush1.bf16.msra.mxu1 %v6668_v48  ;;  %v6745_v47 = vld [vmem:[#allocation6 + $0x224] ss:$16 sps:$4 sm:$0xff]   ;;  %v3244_v48 = vpack.c.bf16 %v3236_v44, %v3236_v44  ;;  %v6818_v44 = vld [vmem:[#allocation6 + $0x3a8] ss:$16 sps:$4 sm:$0xff]  }
 0x264   :  { %4817 = vmatprep.subr.bf16.mxu0 %v6673_v50  ;;  %4981 = vmatprep.subr.bf16.mxu1 %v6676_v51  ;;  %v6743_v50 = vld [vmem:[#allocation6 + $0x220] ss:$16 sps:$4 sm:$0xff]   ;;  %v6746_v51 = vld [vmem:[#allocation6 + $0x228] ss:$16 sps:$4 sm:$0xff]  }
 0x267   :  { %4818 = vmatpush1.bf16.msra.mxu0 %v6671_v52  ;;  %4982 = vmatpush1.bf16.msra.mxu1 %v6674_v53  ;;  %v6751_v52 = vld [vmem:[#allocation6 + $0x244] ss:$16 sps:$4 sm:$0xff]   ;;  %v6754_v53 = vld [vmem:[#allocation6 + $0x24c] ss:$16 sps:$4 sm:$0xff]  }
 0x268   :  { %4819 = vmatprep.subr.bf16.mxu0 %v6679_v54  ;;  %4983 = vmatprep.subr.bf16.mxu1 %v6682_v55  ;;  %v6749_v54 = vld [vmem:[#allocation6 + $0x240] ss:$16 sps:$4 sm:$0xff]   ;;  %v6752_v55 = vld [vmem:[#allocation6 + $0x248] ss:$16 sps:$4 sm:$0xff]  }
 0x26b   :  { %4820 = vmatpush1.bf16.msra.mxu0 %v6677_v56  ;;  %4984 = vmatpush1.bf16.msra.mxu1 %v6680_v58  ;;  %v6757_v56 = vld [vmem:[#allocation6 + $0x264] ss:$16 sps:$4 sm:$0xff]   ;;  %v6760_v58 = vld [vmem:[#allocation6 + $0x26c] ss:$16 sps:$4 sm:$0xff]  }
 0x26c   :  { %4821 = vmatprep.subr.bf16.mxu0 %v6685_v59  ;;  %4985 = vmatprep.subr.bf16.mxu1 %v6688_v60  ;;  %v6755_v59 = vld [vmem:[#allocation6 + $0x260] ss:$16 sps:$4 sm:$0xff]   ;;  %v6758_v60 = vld [vmem:[#allocation6 + $0x268] ss:$16 sps:$4 sm:$0xff]  }
 0x26f   :  { %4822 = vmatpush1.bf16.msra.mxu0 %v6683_v61  ;;  %4986 = vmatpush1.bf16.msra.mxu1 %v6686_v62  ;;  %v6763_v61 = vld [vmem:[#allocation6 + $0x284] ss:$16 sps:$4 sm:$0xff]   ;;  %v6766_v62 = vld [vmem:[#allocation6 + $0x28c] ss:$16 sps:$4 sm:$0xff]  }
 0x270   :  { %4823 = vmatprep.subr.bf16.mxu0 %v6691_v63  ;;  %4987 = vmatprep.subr.bf16.mxu1 %v6694_v0  ;;  %v6761_v63 = vld [vmem:[#allocation6 + $0x280] ss:$16 sps:$4 sm:$0xff]   ;;  %v6764_v0 = vld [vmem:[#allocation6 + $0x288] ss:$16 sps:$4 sm:$0xff]  }
 0x273   :  { %4824 = vmatpush1.bf16.msra.mxu0 %v6689_v1  ;;  %4988 = vmatpush1.bf16.msra.mxu1 %v6692_v2  ;;  %v6769_v1 = vld [vmem:[#allocation6 + $0x2a4] ss:$16 sps:$4 sm:$0xff]   ;;  %v6772_v2 = vld [vmem:[#allocation6 + $0x2ac] ss:$16 sps:$4 sm:$0xff]  }
 0x274   :  { %4825 = vmatprep.subr.bf16.mxu0 %v6697_v3  ;;  %4989 = vmatprep.subr.bf16.mxu1 %v6700_v4  ;;  %v6767_v3 = vld [vmem:[#allocation6 + $0x2a0] ss:$16 sps:$4 sm:$0xff]   ;;  %v6770_v4 = vld [vmem:[#allocation6 + $0x2a8] ss:$16 sps:$4 sm:$0xff]  }
 0x277   :  { %4826 = vmatpush1.bf16.msra.mxu0 %v6695_v5  ;;  %4990 = vmatpush1.bf16.msra.mxu1 %v6698_v6  ;;  %v6775_v5 = vld [vmem:[#allocation6 + $0x2c4] ss:$16 sps:$4 sm:$0xff]   ;;  %v6778_v6 = vld [vmem:[#allocation6 + $0x2cc] ss:$16 sps:$4 sm:$0xff]  }
 0x278   :  { %4827 = vmatprep.subr.bf16.mxu0 %v6703_v7  ;;  %4991 = vmatprep.subr.bf16.mxu1 %v6706_v8  ;;  %v6773_v7 = vld [vmem:[#allocation6 + $0x2c0] ss:$16 sps:$4 sm:$0xff]   ;;  %v6776_v8 = vld [vmem:[#allocation6 + $0x2c8] ss:$16 sps:$4 sm:$0xff]  }
 0x27b   :  { %4828 = vmatpush1.bf16.msra.mxu0 %v6701_v9  ;;  %4992 = vmatpush1.bf16.msra.mxu1 %v6704_v10  ;;  %v6781_v9 = vld [vmem:[#allocation6 + $0x2e4] ss:$16 sps:$4 sm:$0xff]   ;;  %v6784_v10 = vld [vmem:[#allocation6 + $0x2ec] ss:$16 sps:$4 sm:$0xff]  }
 0x27c   :  { %4829 = vmatprep.subr.bf16.mxu0 %v6709_v11  ;;  %4993 = vmatprep.subr.bf16.mxu1 %v6712_v13  ;;  %v6779_v11 = vld [vmem:[#allocation6 + $0x2e0] ss:$16 sps:$4 sm:$0xff]   ;;  %v6782_v13 = vld [vmem:[#allocation6 + $0x2e8] ss:$16 sps:$4 sm:$0xff]  }
 0x27f   :  { %4830 = vmatpush1.bf16.msra.mxu0 %v6707_v14  ;;  %4994 = vmatpush1.bf16.msra.mxu1 %v6710_v15  ;;  %v6787_v14 = vld [vmem:[#allocation6 + $0x304] ss:$16 sps:$4 sm:$0xff]   ;;  %v6790_v15 = vld [vmem:[#allocation6 + $0x30c] ss:$16 sps:$4 sm:$0xff]  }
 0x280   :  { %4831 = vmatprep.subr.bf16.mxu0 %v6715_v57  ;;  %4995 = vmatprep.subr.bf16.mxu1 %v6718_v16  ;;  %v6785_v57 = vld [vmem:[#allocation6 + $0x300] ss:$16 sps:$4 sm:$0xff]   ;;  %v6788_v16 = vld [vmem:[#allocation6 + $0x308] ss:$16 sps:$4 sm:$0xff]  }
 0x283   :  { %4832 = vmatpush1.bf16.msra.mxu0 %v6713_v17  ;;  %4996 = vmatpush1.bf16.msra.mxu1 %v6716_v19  ;;  %v6793_v17 = vld [vmem:[#allocation6 + $0x324] ss:$16 sps:$4 sm:$0xff]   ;;  %v6796_v19 = vld [vmem:[#allocation6 + $0x32c] ss:$16 sps:$4 sm:$0xff]  }
 0x284   :  { %4833 = vmatprep.subr.bf16.mxu0 %v6721_v20  ;;  %4997 = vmatprep.subr.bf16.mxu1 %v6724_v21  ;;  %v6791_v20 = vld [vmem:[#allocation6 + $0x320] ss:$16 sps:$4 sm:$0xff]   ;;  %v6794_v21 = vld [vmem:[#allocation6 + $0x328] ss:$16 sps:$4 sm:$0xff]  }
 0x287   :  { %4834 = vmatpush1.bf16.msra.mxu0 %v6719_v43  ;;  %4998 = vmatpush1.bf16.msra.mxu1 %v6722_v27  ;;  %v6799_v43 = vld [vmem:[#allocation6 + $0x344] ss:$16 sps:$4 sm:$0xff]   ;;  %v6797_v27 = vld [vmem:[#allocation6 + $0x340] ss:$16 sps:$4 sm:$0xff]  }
 0x288   :  { %4835 = vmatprep.subr.bf16.mxu0 %v6727_v28  ;;  %4999 = vmatprep.subr.bf16.mxu1 %v6730_v25  ;;  %v6800_v28 = vld [vmem:[#allocation6 + $0x348] ss:$16 sps:$4 sm:$0xff]   ;;  %v6805_v25 = vld [vmem:[#allocation6 + $0x364] ss:$16 sps:$4 sm:$0xff]  }
 0x28b   :  { %4836 = vmatpush1.bf16.msra.mxu0 %v6725_v22  ;;  %5000 = vmatpush1.bf16.msra.mxu1 %v6728_v32  ;;  %v6803_v22 = vld [vmem:[#allocation6 + $0x360] ss:$16 sps:$4 sm:$0xff]   ;;  %v6811_v32 = vld [vmem:[#allocation6 + $0x384] ss:$16 sps:$4 sm:$0xff]  }
 0x28c   :  { %4837 = vmatprep.subr.bf16.mxu0 %v6733_v33  ;;  %5001 = vmatprep.subr.bf16.mxu1 %v6736_v36  ;;  %v6814_v33 = vld [vmem:[#allocation6 + $0x38c] ss:$16 sps:$4 sm:$0xff]   ;;  %v6809_v36 = vld [vmem:[#allocation6 + $0x380] ss:$16 sps:$4 sm:$0xff]  }
 0x28f   :  { %4838 = vmatpush1.bf16.msra.mxu0 %v6731_v34  ;;  %5002 = vmatpush1.bf16.msra.mxu1 %v6734_v40  ;;  %v6812_v34 = vld [vmem:[#allocation6 + $0x388] ss:$16 sps:$4 sm:$0xff]   ;;  %v6820_v40 = vld [vmem:[#allocation6 + $0x3ac] ss:$16 sps:$4 sm:$0xff]  }
 0x290   :  { %4848 = vmatprep.subr.bf16.mxu0 %v6739_v41  ;;  %5012 = vmatprep.subr.bf16.mxu1 %v6742_v42  ;;  %v6815_v41 = vld [vmem:[#allocation6 + $0x3a0] ss:$16 sps:$4 sm:$0xff]   ;;  %v584_v42 = vrot.slane %v7592_v26, %v583_v37 }
 0x292   :  { %4840 = vmatmul.mubr.bf16.vlgmr.msra.gmra.mrb[8].mxu0 %v3241_v45  ;;  %5004 = vmatmul.mubr.bf16.vlgmr.msra.gmra.mrb[8].mxu1 %v3241_v45  ;;  %v6826_v45 = vld [vmem:[#allocation6 + $0x3cc] ss:$16 sps:$4 sm:$0xff]  }
 0x293   :  { %4849 = vmatpush1.bf16.msra.mxu0 %v6737_v29  ;;  %4880 = vmatprep.mubr.bf16.mxu0 %v3244_v48  ;;  %v6823_v29 = vld [vmem:[#allocation6 + $0x3c4] ss:$16 sps:$4 sm:$0xff]  }
 0x294   :  { %5013 = vmatpush1.bf16.msra.mxu1 %v6740_v46  ;;  %5044 = vmatprep.mubr.bf16.mxu1 %v3244_v48  ;;  %v6821_v46 = vld [vmem:[#allocation6 + $0x3c0] ss:$16 sps:$4 sm:$0xff]   ;;  %v6824_v48 = vld [vmem:[#allocation6 + $0x3c8] ss:$16 sps:$4 sm:$0xff]  }
 0x295   :  { %4850 = vmatprep.subr.bf16.mxu0 %v6745_v47  ;;  %5014 = vmatprep.subr.bf16.mxu1 %v6748_v35  ;;  %v6540_v47 = vadd.f32 %v7599_v31, %v584_v42  ;;  %v6829_v35 = vld [vmem:[#allocation6 + $0x3e4] ss:$16 sps:$4 sm:$0xff]   ;;  %v6836_v31 = vld [vmem:[#allocation6 + $0x408] ss:$16 sps:$4 sm:$0xff]   ;;  %v6904_v42 = vld [vmem:[#allocation6 + $0x56c] ss:$16 sps:$4 sm:$0xff]  }
 0x297   :  { %4851 = vmatpush1.bf16.msra.mxu0 %v6743_v50  ;;  %v6832_v50 = vld [vmem:[#allocation6 + $0x3ec] ss:$16 sps:$4 sm:$0xff]  }
 0x298   :  { %5015 = vmatpush1.bf16.msra.mxu1 %v6746_v51  ;;  %4852 = vmatprep.subr.bf16.mxu0 %v6751_v52  ;;  %v6827_v51 = vld [vmem:[#allocation6 + $0x3e0] ss:$16 sps:$4 sm:$0xff]   ;;  %v3235_v52 = vmax.f32 %v6540_v47, 0.0 }
 0x299   :  { %5016 = vmatprep.subr.bf16.mxu1 %v6754_v53  ;;  %v6830_v53 = vld [vmem:[#allocation6 + $0x3e8] ss:$16 sps:$4 sm:$0xff]   ;;  %v6905_v47 = vld [vmem:[#allocation6 + $0x580] ss:$16 sps:$4 sm:$0xff]  }
 0x29b   :  { %4853 = vmatpush1.bf16.msra.mxu0 %v6749_v54  ;;  %v6835_v54 = vld [vmem:[#allocation6 + $0x404] ss:$16 sps:$4 sm:$0xff]  }
 0x29c   :  { %5017 = vmatpush1.bf16.msra.mxu1 %v6752_v55  ;;  %4854 = vmatprep.subr.bf16.mxu0 %v6757_v56  ;;  %v6838_v55 = vld [vmem:[#allocation6 + $0x40c] ss:$16 sps:$4 sm:$0xff]   ;;  %v6833_v56 = vld [vmem:[#allocation6 + $0x400] ss:$16 sps:$4 sm:$0xff]  }
 0x29d   :  { %5018 = vmatprep.subr.bf16.mxu1 %v6760_v58  ;;  %v3243_v58 = vpack.c.bf16 %v3235_v52, %v3235_v52  ;;  %v6914_v52 = vld [vmem:[#allocation6 + $0x5a8] ss:$16 sps:$4 sm:$0xff]  }
 0x29f   :  { %4855 = vmatpush1.bf16.msra.mxu0 %v6755_v59  ;;  %v6841_v59 = vld [vmem:[#allocation6 + $0x424] ss:$16 sps:$4 sm:$0xff]  }
 0x2a0   :  { %5019 = vmatpush1.bf16.msra.mxu1 %v6758_v60  ;;  %4856 = vmatprep.subr.bf16.mxu0 %v6763_v61  ;;  %v6844_v60 = vld [vmem:[#allocation6 + $0x42c] ss:$16 sps:$4 sm:$0xff]   ;;  %v6839_v61 = vld [vmem:[#allocation6 + $0x420] ss:$16 sps:$4 sm:$0xff]  }
 0x2a1   :  { %5020 = vmatprep.subr.bf16.mxu1 %v6766_v62  ;;  %v6842_v62 = vld [vmem:[#allocation6 + $0x428] ss:$16 sps:$4 sm:$0xff]  }
 0x2a3   :  { %4857 = vmatpush1.bf16.msra.mxu0 %v6761_v63  ;;  %v6847_v63 = vld [vmem:[#allocation6 + $0x444] ss:$16 sps:$4 sm:$0xff]  }
 0x2a4   :  { %5021 = vmatpush1.bf16.msra.mxu1 %v6764_v0  ;;  %4858 = vmatprep.subr.bf16.mxu0 %v6769_v1  ;;  %v6850_v0 = vld [vmem:[#allocation6 + $0x44c] ss:$16 sps:$4 sm:$0xff]   ;;  %v6845_v1 = vld [vmem:[#allocation6 + $0x440] ss:$16 sps:$4 sm:$0xff]  }
 0x2a5   :  { %5022 = vmatprep.subr.bf16.mxu1 %v6772_v2  ;;  %v6848_v2 = vld [vmem:[#allocation6 + $0x448] ss:$16 sps:$4 sm:$0xff]  }
 0x2a7   :  { %4859 = vmatpush1.bf16.msra.mxu0 %v6767_v3  ;;  %v6853_v3 = vld [vmem:[#allocation6 + $0x464] ss:$16 sps:$4 sm:$0xff]  }
 0x2a8   :  { %5023 = vmatpush1.bf16.msra.mxu1 %v6770_v4  ;;  %4860 = vmatprep.subr.bf16.mxu0 %v6775_v5  ;;  %v6856_v4 = vld [vmem:[#allocation6 + $0x46c] ss:$16 sps:$4 sm:$0xff]   ;;  %v6851_v5 = vld [vmem:[#allocation6 + $0x460] ss:$16 sps:$4 sm:$0xff]  }
 0x2a9   :  { %5024 = vmatprep.subr.bf16.mxu1 %v6778_v6  ;;  %v6854_v6 = vld [vmem:[#allocation6 + $0x468] ss:$16 sps:$4 sm:$0xff]  }
 0x2ab   :  { %4861 = vmatpush1.bf16.msra.mxu0 %v6773_v7  ;;  %v6859_v7 = vld [vmem:[#allocation6 + $0x484] ss:$16 sps:$4 sm:$0xff]  }
 0x2ac   :  { %5025 = vmatpush1.bf16.msra.mxu1 %v6776_v8  ;;  %4862 = vmatprep.subr.bf16.mxu0 %v6781_v9  ;;  %v6862_v8 = vld [vmem:[#allocation6 + $0x48c] ss:$16 sps:$4 sm:$0xff]   ;;  %v6857_v9 = vld [vmem:[#allocation6 + $0x480] ss:$16 sps:$4 sm:$0xff]  }
 0x2ad   :  { %5026 = vmatprep.subr.bf16.mxu1 %v6784_v10  ;;  %v6860_v10 = vld [vmem:[#allocation6 + $0x488] ss:$16 sps:$4 sm:$0xff]  }
 0x2af   :  { %4863 = vmatpush1.bf16.msra.mxu0 %v6779_v11  ;;  %v6865_v11 = vld [vmem:[#allocation6 + $0x4a4] ss:$16 sps:$4 sm:$0xff]  }
 0x2b0   :  { %5027 = vmatpush1.bf16.msra.mxu1 %v6782_v13  ;;  %4864 = vmatprep.subr.bf16.mxu0 %v6787_v14  ;;  %v6868_v13 = vld [vmem:[#allocation6 + $0x4ac] ss:$16 sps:$4 sm:$0xff]   ;;  %v6863_v14 = vld [vmem:[#allocation6 + $0x4a0] ss:$16 sps:$4 sm:$0xff]  }
 0x2b1   :  { %5028 = vmatprep.subr.bf16.mxu1 %v6790_v15  ;;  %v6866_v15 = vld [vmem:[#allocation6 + $0x4a8] ss:$16 sps:$4 sm:$0xff]  }
 0x2b3   :  { %4865 = vmatpush1.bf16.msra.mxu0 %v6785_v57  ;;  %v6871_v57 = vld [vmem:[#allocation6 + $0x4c4] ss:$16 sps:$4 sm:$0xff]  }
 0x2b4   :  { %5029 = vmatpush1.bf16.msra.mxu1 %v6788_v16  ;;  %4866 = vmatprep.subr.bf16.mxu0 %v6793_v17  ;;  %v6874_v16 = vld [vmem:[#allocation6 + $0x4cc] ss:$16 sps:$4 sm:$0xff]   ;;  %v6869_v17 = vld [vmem:[#allocation6 + $0x4c0] ss:$16 sps:$4 sm:$0xff]  }
 0x2b5   :  { %5030 = vmatprep.subr.bf16.mxu1 %v6796_v19  ;;  %v6872_v19 = vld [vmem:[#allocation6 + $0x4c8] ss:$16 sps:$4 sm:$0xff]  }
 0x2b7   :  { %4867 = vmatpush1.bf16.msra.mxu0 %v6791_v20  ;;  %v6877_v20 = vld [vmem:[#allocation6 + $0x4e4] ss:$16 sps:$4 sm:$0xff]  }
 0x2b8   :  { %5031 = vmatpush1.bf16.msra.mxu1 %v6794_v21  ;;  %4868 = vmatprep.subr.bf16.mxu0 %v6799_v43  ;;  %v6880_v21 = vld [vmem:[#allocation6 + $0x4ec] ss:$16 sps:$4 sm:$0xff]   ;;  %v6875_v43 = vld [vmem:[#allocation6 + $0x4e0] ss:$16 sps:$4 sm:$0xff]  }
 0x2b9   :  { %5032 = vmatprep.subr.bf16.mxu1 %v6802_v24  ;;  %v6878_v24 = vld [vmem:[#allocation6 + $0x4e8] ss:$16 sps:$4 sm:$0xff]  }
 0x2bb   :  { %4869 = vmatpush1.bf16.msra.mxu0 %v6797_v27  ;;  %v6883_v27 = vld [vmem:[#allocation6 + $0x504] ss:$16 sps:$4 sm:$0xff]  }
 0x2bc   :  { %5033 = vmatpush1.bf16.msra.mxu1 %v6800_v28  ;;  %4870 = vmatprep.subr.bf16.mxu0 %v6805_v25  ;;  %v6886_v28 = vld [vmem:[#allocation6 + $0x50c] ss:$16 sps:$4 sm:$0xff]   ;;  %v6881_v25 = vld [vmem:[#allocation6 + $0x500] ss:$16 sps:$4 sm:$0xff]  }
 0x2bd   :  { %5034 = vmatprep.subr.bf16.mxu1 %v6808_v49  ;;  %v6884_v49 = vld [vmem:[#allocation6 + $0x508] ss:$16 sps:$4 sm:$0xff]  }
 0x2bf   :  { %4871 = vmatpush1.bf16.msra.mxu0 %v6803_v22  ;;  %v6889_v22 = vld [vmem:[#allocation6 + $0x524] ss:$16 sps:$4 sm:$0xff]  }
 0x2c0   :  { %5035 = vmatpush1.bf16.msra.mxu1 %v6806_v30  ;;  %4872 = vmatprep.subr.bf16.mxu0 %v6811_v32  ;;  %v6892_v30 = vld [vmem:[#allocation6 + $0x52c] ss:$16 sps:$4 sm:$0xff]   ;;  %v6887_v32 = vld [vmem:[#allocation6 + $0x520] ss:$16 sps:$4 sm:$0xff]  }
 0x2c1   :  { %5036 = vmatprep.subr.bf16.mxu1 %v6814_v33  ;;  %v6890_v33 = vld [vmem:[#allocation6 + $0x528] ss:$16 sps:$4 sm:$0xff]  }
 0x2c3   :  { %4873 = vmatpush1.bf16.msra.mxu0 %v6809_v36  ;;  %v6895_v36 = vld [vmem:[#allocation6 + $0x544] ss:$16 sps:$4 sm:$0xff]  }
 0x2c4   :  { %5037 = vmatpush1.bf16.msra.mxu1 %v6812_v34  ;;  %4874 = vmatprep.subr.bf16.mxu0 %v6817_v39  ;;  %v6898_v34 = vld [vmem:[#allocation6 + $0x54c] ss:$16 sps:$4 sm:$0xff]   ;;  %v6893_v39 = vld [vmem:[#allocation6 + $0x540] ss:$16 sps:$4 sm:$0xff]  }
 0x2c5   :  { %5038 = vmatprep.subr.bf16.mxu1 %v6820_v40  ;;  %v6896_v40 = vld [vmem:[#allocation6 + $0x548] ss:$16 sps:$4 sm:$0xff]  }
 0x2c7   :  { %4875 = vmatpush1.bf16.msra.mxu0 %v6815_v41  ;;  %v6901_v41 = vld [vmem:[#allocation6 + $0x564] ss:$16 sps:$4 sm:$0xff]  }
 0x2c8   :  { %5039 = vmatpush1.bf16.msra.mxu1 %v6818_v44  ;;  %4876 = vmatprep.subr.bf16.mxu0 %v6823_v29  ;;  %v6899_v44 = vld [vmem:[#allocation6 + $0x560] ss:$16 sps:$4 sm:$0xff]   ;;  %v6902_v29 = vld [vmem:[#allocation6 + $0x568] ss:$16 sps:$4 sm:$0xff]  }
 0x2c9   :  { %5040 = vmatprep.subr.bf16.mxu1 %v6826_v45  ;;  %v6907_v45 = vld [vmem:[#allocation6 + $0x584] ss:$16 sps:$4 sm:$0xff]  }
 0x2cb   :  { %4877 = vmatpush1.bf16.msra.mxu0 %v6821_v46  ;;  %v6910_v46 = vld [vmem:[#allocation6 + $0x58c] ss:$16 sps:$4 sm:$0xff]  }
 0x2cc   :  { %5041 = vmatpush1.bf16.msra.mxu1 %v6824_v48  ;;  %4878 = vmatprep.subr.bf16.mxu0 %v6829_v35  ;;  %v6908_v48 = vld [vmem:[#allocation6 + $0x588] ss:$16 sps:$4 sm:$0xff]   ;;  %v6913_v35 = vld [vmem:[#allocation6 + $0x5a4] ss:$16 sps:$4 sm:$0xff]  }
 0x2cd   :  { %5042 = vmatprep.subr.bf16.mxu1 %v6832_v50  ;;  %v6916_v50 = vld [vmem:[#allocation6 + $0x5ac] ss:$16 sps:$4 sm:$0xff]  }
 0x2cf   :  { %4879 = vmatpush1.bf16.msra.mxu0 %v6827_v51  ;;  %v6911_v51 = vld [vmem:[#allocation6 + $0x5a0] ss:$16 sps:$4 sm:$0xff]  }
 0x2d0   :  { %5043 = vmatpush1.bf16.msra.mxu1 %v6830_v53  ;;  %4889 = vmatprep.subr.bf16.mxu0 %v6835_v54  ;;  %v6919_v53 = vld [vmem:[#allocation6 + $0x5c4] ss:$16 sps:$4 sm:$0xff]   ;;  %v6922_v54 = vld [vmem:[#allocation6 + $0x5cc] ss:$16 sps:$4 sm:$0xff]  }
 0x2d1   :  { %5053 = vmatprep.subr.bf16.mxu1 %v6838_v55  ;;  %v6917_v55 = vld [vmem:[#allocation6 + $0x5c0] ss:$16 sps:$4 sm:$0xff]  }
 0x2d2   :  { %4881 = vmatmul.mubr.bf16.vlgmr.msra.gmra.mrb[8].mxu0 %v3243_v58 }
 0x2d3   :  { %5045 = vmatmul.mubr.bf16.vlgmr.msra.gmra.mrb[8].mxu1 %v3243_v58  ;;  %4890 = vmatpush1.bf16.msra.mxu0 %v6833_v56  ;;  %v6920_v56 = vld [vmem:[#allocation6 + $0x5c8] ss:$16 sps:$4 sm:$0xff]   ;;  %v6925_v58 = vld [vmem:[#allocation6 + $0x5e4] ss:$16 sps:$4 sm:$0xff]  }
 0x2d4   :  { %5054 = vmatpush1.bf16.msra.mxu1 %v6836_v31  ;;  %4891 = vmatprep.subr.bf16.mxu0 %v6841_v59  ;;  %v6928_v31 = vld [vmem:[#allocation6 + $0x5ec] ss:$16 sps:$4 sm:$0xff]   ;;  %v6923_v59 = vld [vmem:[#allocation6 + $0x5e0] ss:$16 sps:$4 sm:$0xff]  }
 0x2d5   :  { %5055 = vmatprep.subr.bf16.mxu1 %v6844_v60  ;;  %v6926_v60 = vld [vmem:[#allocation6 + $0x5e8] ss:$16 sps:$4 sm:$0xff]  }
 0x2d7   :  { %4892 = vmatpush1.bf16.msra.mxu0 %v6839_v61  ;;  %v6931_v61 = vld [vmem:[#allocation6 + $0x604] ss:$16 sps:$4 sm:$0xff]  }
 0x2d8   :  { %5056 = vmatpush1.bf16.msra.mxu1 %v6842_v62  ;;  %4893 = vmatprep.subr.bf16.mxu0 %v6847_v63  ;;  %v6934_v62 = vld [vmem:[#allocation6 + $0x60c] ss:$16 sps:$4 sm:$0xff]   ;;  %v591_v63 = vsub.s32 4, %v7585_v18 }
 0x2d9   :  { %5057 = vmatprep.subr.bf16.mxu1 %v6850_v0  ;;  %v595_v0 = vsub.s32 5, %v7585_v18 }
 0x2db   :  { %4894 = vmatpush1.bf16.msra.mxu0 %v6845_v1  ;;  %v603_v1 = vsub.s32 7, %v7585_v18 }
 0x2dc   :  { %5058 = vmatpush1.bf16.msra.mxu1 %v6848_v2  ;;  %4895 = vmatprep.subr.bf16.mxu0 %v6853_v3  ;;  %v592_v2 = vrot.slane %v7592_v26, %v591_v63  ;;  %v596_v3 = vrot.slane %v7592_v26, %v595_v0  ;;  %v6983_v63 = vld [vmem:[#allocation6 + $0x720] ss:$16 sps:$4 sm:$0xff]   ;;  %v6986_v0 = vld [vmem:[#allocation6 + $0x728] ss:$16 sps:$4 sm:$0xff]  }
 0x2dd   :  { %5059 = vmatprep.subr.bf16.mxu1 %v6856_v4  ;;  %v604_v4 = vrot.slane %v7592_v26, %v603_v1  ;;  %v6937_v26 = vld [vmem:[#allocation6 + $0x624] ss:$16 sps:$4 sm:$0xff]  }
 0x2de   :  { %v6991_v1 = vld [vmem:[#allocation6 + $0x744] ss:$16 sps:$4 sm:$0xff]  }
 0x2df   :  { %4896 = vmatpush1.bf16.msra.mxu0 %v6851_v5 }
 0x2e0   :  { %5060 = vmatpush1.bf16.msra.mxu1 %v6854_v6  ;;  %4897 = vmatprep.subr.bf16.mxu0 %v6859_v7 }
 0x2e1   :  { %5061 = vmatprep.subr.bf16.mxu1 %v6862_v8 }
 0x2e3   :  { %4898 = vmatpush1.bf16.msra.mxu0 %v6857_v9 }
 0x2e4   :  { %5062 = vmatpush1.bf16.msra.mxu1 %v6860_v10  ;;  %4899 = vmatprep.subr.bf16.mxu0 %v6865_v11 }
 0x2e5   :  { %5063 = vmatprep.subr.bf16.mxu1 %v6868_v13 }
 0x2e7   :  { %4900 = vmatpush1.bf16.msra.mxu0 %v6863_v14 }
 0x2e8   :  { %5064 = vmatpush1.bf16.msra.mxu1 %v6866_v15  ;;  %4901 = vmatprep.subr.bf16.mxu0 %v6871_v57 }
 0x2e9   :  { %5065 = vmatprep.subr.bf16.mxu1 %v6874_v16 }
 0x2eb   :  { %4902 = vmatpush1.bf16.msra.mxu0 %v6869_v17 }
 0x2ec   :  { %5066 = vmatpush1.bf16.msra.mxu1 %v6872_v19  ;;  %4903 = vmatprep.subr.bf16.mxu0 %v6877_v20 }
 0x2ed   :  { %5067 = vmatprep.subr.bf16.mxu1 %v6880_v21  ;;  %v6929_v21 = vld [vmem:[#allocation6 + $0x600] ss:$16 sps:$4 sm:$0xff]  }
 0x2ef   :  { %4904 = vmatpush1.bf16.msra.mxu0 %v6875_v43  ;;  %v6932_v43 = vld [vmem:[#allocation6 + $0x608] ss:$16 sps:$4 sm:$0xff]  }
 0x2f0   :  { %5068 = vmatpush1.bf16.msra.mxu1 %v6878_v24  ;;  %4905 = vmatprep.subr.bf16.mxu0 %v6883_v27  ;;  %v6940_v27 = vld [vmem:[#allocation6 + $0x62c] ss:$16 sps:$4 sm:$0xff]  }
 0x2f1   :  { %5069 = vmatprep.subr.bf16.mxu1 %v6886_v28 }
 0x2f3   :  { %4906 = vmatpush1.bf16.msra.mxu0 %v6881_v25  ;;  %v6935_v25 = vld [vmem:[#allocation6 + $0x620] ss:$16 sps:$4 sm:$0xff]  }
 0x2f4   :  { %5070 = vmatpush1.bf16.msra.mxu1 %v6884_v49  ;;  %4907 = vmatprep.subr.bf16.mxu0 %v6889_v22  ;;  %v6938_v49 = vld [vmem:[#allocation6 + $0x628] ss:$16 sps:$4 sm:$0xff]   ;;  %v6943_v22 = vld [vmem:[#allocation6 + $0x644] ss:$16 sps:$4 sm:$0xff]  }
 0x2f5   :  { %5071 = vmatprep.subr.bf16.mxu1 %v6892_v30  ;;  %v6946_v30 = vld [vmem:[#allocation6 + $0x64c] ss:$16 sps:$4 sm:$0xff]  }
 0x2f7   :  { %4908 = vmatpush1.bf16.msra.mxu0 %v6887_v32  ;;  %v6941_v32 = vld [vmem:[#allocation6 + $0x640] ss:$16 sps:$4 sm:$0xff]  }
 0x2f8   :  { %5072 = vmatpush1.bf16.msra.mxu1 %v6890_v33  ;;  %4909 = vmatprep.subr.bf16.mxu0 %v6895_v36  ;;  %v6944_v33 = vld [vmem:[#allocation6 + $0x648] ss:$16 sps:$4 sm:$0xff]   ;;  %v6949_v36 = vld [vmem:[#allocation6 + $0x664] ss:$16 sps:$4 sm:$0xff]  }
 0x2f9   :  { %5073 = vmatprep.subr.bf16.mxu1 %v6898_v34  ;;  %v6952_v34 = vld [vmem:[#allocation6 + $0x66c] ss:$16 sps:$4 sm:$0xff]  }
 0x2fb   :  { %4910 = vmatpush1.bf16.msra.mxu0 %v6893_v39  ;;  %v6947_v39 = vld [vmem:[#allocation6 + $0x660] ss:$16 sps:$4 sm:$0xff]  }
 0x2fc   :  { %5074 = vmatpush1.bf16.msra.mxu1 %v6896_v40  ;;  %4911 = vmatprep.subr.bf16.mxu0 %v6901_v41  ;;  %v6950_v40 = vld [vmem:[#allocation6 + $0x668] ss:$16 sps:$4 sm:$0xff]   ;;  %v6955_v41 = vld [vmem:[#allocation6 + $0x684] ss:$16 sps:$4 sm:$0xff]  }
 0x2fd   :  { %5075 = vmatprep.subr.bf16.mxu1 %v6904_v42  ;;  %v6958_v42 = vld [vmem:[#allocation6 + $0x68c] ss:$16 sps:$4 sm:$0xff]  }
 0x2ff   :  { %4912 = vmatpush1.bf16.msra.mxu0 %v6899_v44  ;;  %v6953_v44 = vld [vmem:[#allocation6 + $0x680] ss:$16 sps:$4 sm:$0xff]  }
 0x300   :  { %5076 = vmatpush1.bf16.msra.mxu1 %v6902_v29  ;;  %4913 = vmatprep.subr.bf16.mxu0 %v6907_v45  ;;  %v6956_v29 = vld [vmem:[#allocation6 + $0x688] ss:$16 sps:$4 sm:$0xff]   ;;  %v6961_v45 = vld [vmem:[#allocation6 + $0x6a4] ss:$16 sps:$4 sm:$0xff]  }
 0x301   :  { %5077 = vmatprep.subr.bf16.mxu1 %v6910_v46  ;;  %v6964_v46 = vld [vmem:[#allocation6 + $0x6ac] ss:$16 sps:$4 sm:$0xff]  }
 0x303   :  { %4914 = vmatpush1.bf16.msra.mxu0 %v6905_v47  ;;  %v6959_v47 = vld [vmem:[#allocation6 + $0x6a0] ss:$16 sps:$4 sm:$0xff]  }
 0x304   :  { %5078 = vmatpush1.bf16.msra.mxu1 %v6908_v48  ;;  %4915 = vmatprep.subr.bf16.mxu0 %v6913_v35  ;;  %v6962_v48 = vld [vmem:[#allocation6 + $0x6a8] ss:$16 sps:$4 sm:$0xff]   ;;  %v6967_v35 = vld [vmem:[#allocation6 + $0x6c4] ss:$16 sps:$4 sm:$0xff]  }
 0x305   :  { %5079 = vmatprep.subr.bf16.mxu1 %v6916_v50  ;;  %v6970_v50 = vld [vmem:[#allocation6 + $0x6cc] ss:$16 sps:$4 sm:$0xff]  }
 0x307   :  { %4916 = vmatpush1.bf16.msra.mxu0 %v6911_v51  ;;  %v6965_v51 = vld [vmem:[#allocation6 + $0x6c0] ss:$16 sps:$4 sm:$0xff]  }
 0x308   :  { %5080 = vmatpush1.bf16.msra.mxu1 %v6914_v52  ;;  %4917 = vmatprep.subr.bf16.mxu0 %v6919_v53  ;;  %v6968_v52 = vld [vmem:[#allocation6 + $0x6c8] ss:$16 sps:$4 sm:$0xff]   ;;  %v6973_v53 = vld [vmem:[#allocation6 + $0x6e4] ss:$16 sps:$4 sm:$0xff]  }
 0x309   :  { %5081 = vmatprep.subr.bf16.mxu1 %v6922_v54  ;;  %v6976_v54 = vld [vmem:[#allocation6 + $0x6ec] ss:$16 sps:$4 sm:$0xff]  }
 0x30b   :  { %4918 = vmatpush1.bf16.msra.mxu0 %v6917_v55  ;;  %v6971_v55 = vld [vmem:[#allocation6 + $0x6e0] ss:$16 sps:$4 sm:$0xff]  }
 0x30c   :  { %5082 = vmatpush1.bf16.msra.mxu1 %v6920_v56  ;;  %4919 = vmatprep.subr.bf16.mxu0 %v6925_v58  ;;  %v6974_v56 = vld [vmem:[#allocation6 + $0x6e8] ss:$16 sps:$4 sm:$0xff]   ;;  %v6979_v58 = vld [vmem:[#allocation6 + $0x704] ss:$16 sps:$4 sm:$0xff]  }
 0x30d   :  { %5083 = vmatprep.subr.bf16.mxu1 %v6928_v31  ;;  %v6982_v31 = vld [vmem:[#allocation6 + $0x70c] ss:$16 sps:$4 sm:$0xff]  }
 0x30f   :  { %4920 = vmatpush1.bf16.msra.mxu0 %v6923_v59  ;;  %v6977_v59 = vld [vmem:[#allocation6 + $0x700] ss:$16 sps:$4 sm:$0xff]  }
 0x310   :  { %5084 = vmatpush1.bf16.msra.mxu1 %v6926_v60  ;;  %4930 = vmatprep.subr.bf16.mxu0 %v6931_v61  ;;  %v6980_v60 = vld [vmem:[#allocation6 + $0x708] ss:$16 sps:$4 sm:$0xff]   ;;  %v6985_v61 = vld [vmem:[#allocation6 + $0x724] ss:$16 sps:$4 sm:$0xff]  }
 0x311   :  { %5094 = vmatprep.subr.bf16.mxu1 %v6934_v62  ;;  %v6988_v62 = vld [vmem:[#allocation6 + $0x72c] ss:$16 sps:$4 sm:$0xff]  }
 0x325   :  { %v3062_v5 = vpop.f32.mrb[4].mxu0  ;;  %v7624_v7 = vpop.f32.mrb[4].mxu1 }
 0x326   :  { %v6542_v6 = vadd.f32 %v3062_v5, %v592_v2  ;;  %v3064_v8 = vpop.f32.mrb[5].mxu0  ;;  %v3228_v10 = vpop.f32.mrb[5].mxu1  ;;  %v6994_v2 = vld [vmem:[#allocation6 + $0x74c] ss:$16 sps:$4 sm:$0xff]   ;;  %v6997_v5 = vld [vmem:[#allocation6 + $0x764] ss:$16 sps:$4 sm:$0xff]  }
 0x327   :  { %v6543_v9 = vadd.f32 %v3064_v8, %v596_v3  ;;  %v3066_v11 = vpop.f32.mrb[6].mxu0  ;;  %v6545_v14 = vadd.f32 %v3228_v10, %v604_v4  ;;  %v3230_v15 = vpop.f32.mrb[6].mxu1  ;;  %v6989_v3 = vld [vmem:[#allocation6 + $0x740] ss:$16 sps:$4 sm:$0xff]   ;;  %v6992_v4 = vld [vmem:[#allocation6 + $0x748] ss:$16 sps:$4 sm:$0xff]  }
 0x328   :  { %v3237_v13 = vmax.f32 %v6542_v6, 0.0  ;;  %v3067_v57 = vpop.f32.mrb[7].mxu0  ;;  %v3231_v17 = vpop.f32.mrb[7].mxu1  ;;  %v7000_v6 = vld [vmem:[#allocation6 + $0x76c] ss:$16 sps:$4 sm:$0xff]   ;;  %v599_v15 = vsub.s32 6, %v7585_v18 }
 0x329   :  { %v3238_v16 = vmax.f32 %v6543_v9, 0.0  ;;  %v3240_v19 = vmax.f32 %v6545_v14, 0.0  ;;  %v6995_v8 = vld [vmem:[#allocation6 + $0x760] ss:$16 sps:$4 sm:$0xff]   ;;  %v6998_v9 = vld [vmem:[#allocation6 + $0x768] ss:$16 sps:$4 sm:$0xff]  }
 0x32a   :  { %v3245_v24 = vpack.c.bf16 %v3237_v13, %v3237_v13  ;;  %v7003_v10 = vld [vmem:[#allocation6 + $0x784] ss:$16 sps:$4 sm:$0xff]   ;;  %v7006_v11 = vld [vmem:[#allocation6 + $0x78c] ss:$16 sps:$4 sm:$0xff]   ;;  %v7001_v13 = vld [vmem:[#allocation6 + $0x780] ss:$16 sps:$4 sm:$0xff]  }
 0x32b   :  { %v3246_v20 = vpack.c.bf16 %v3238_v16, %v3238_v16  ;;  %v3248_v28 = vpack.c.bf16 %v3240_v19, %v3240_v19  ;;  %v7004_v14 = vld [vmem:[#allocation6 + $0x788] ss:$16 sps:$4 sm:$0xff]   ;;  %v7009_v57 = vld [vmem:[#allocation6 + $0x7a4] ss:$16 sps:$4 sm:$0xff]   ;;  %v7012_v16 = vld [vmem:[#allocation6 + $0x7ac] ss:$16 sps:$4 sm:$0xff]  }
 0x32c   :  { %v7007_v17 = vld [vmem:[#allocation6 + $0x7a0] ss:$16 sps:$4 sm:$0xff]   ;;  %v7010_v19 = vld [vmem:[#allocation6 + $0x7a8] ss:$16 sps:$4 sm:$0xff]  }
 0x32d   :  { %4921 = vmatprep.mubr.bf16.mxu0 %v3246_v20  ;;  %5085 = vmatprep.mubr.bf16.mxu1 %v3246_v20  ;;  %v7077_v20 = vld [vmem:[#allocation4] sm:$0xff]  ;;  %v7057_v18 = vld [vmem:[#allocation12] sm:$0xff]  }
 0x32e   :  { %4922 = vmatmul.mubr.bf16.vlgmr.msra.gmra.mrb[8].mxu0 %v3245_v24  ;;  %5086 = vmatmul.mubr.bf16.vlgmr.msra.gmra.mrb[8].mxu1 %v3245_v24  ;;  %v7018_v24 = vld [vmem:[#allocation6 + $0x7cc] ss:$16 sps:$4 sm:$0xff]  }
 0x32f   :  { %4931 = vmatpush1.bf16.msra.mxu0 %v6929_v21  ;;  %5095 = vmatpush1.bf16.msra.mxu1 %v6932_v43  ;;  %v600_v21 = vrot.slane %v7077_v20, %v599_v15  ;;  %v7015_v43 = vld [vmem:[#allocation6 + $0x7c4] ss:$16 sps:$4 sm:$0xff]  }
 0x330   :  { %4962 = vmatprep.mubr.bf16.mxu0 %v3248_v28  ;;  %5126 = vmatprep.mubr.bf16.mxu1 %v3248_v28 }
 0x331   :  { %4932 = vmatprep.subr.bf16.mxu0 %v6937_v26  ;;  %5096 = vmatprep.subr.bf16.mxu1 %v6940_v27  ;;  %v7013_v26 = vld [vmem:[#allocation6 + $0x7c0] ss:$16 sps:$4 sm:$0xff]   ;;  %v7016_v27 = vld [vmem:[#allocation6 + $0x7c8] ss:$16 sps:$4 sm:$0xff]   ;;  %v6544_v28 = vadd.f32 %v7624_v7, %v600_v21 }
 0x332   :  { %v7029_v7 = vld [vmem:[#allocation9 + $0x48] sm:$0xff]  }
 0x333   :  { %4933 = vmatpush1.bf16.msra.mxu0 %v6935_v25  ;;  %5097 = vmatpush1.bf16.msra.mxu1 %v6938_v49  ;;  %v7021_v25 = vld [vmem:[#allocation6 + $0x7e4] ss:$16 sps:$4 sm:$0xff]   ;;  %v7024_v49 = vld [vmem:[#allocation6 + $0x7ec] ss:$16 sps:$4 sm:$0xff]  }
 0x334   :  { %4934 = vmatprep.subr.bf16.mxu0 %v6943_v22  ;;  %5098 = vmatprep.subr.bf16.mxu1 %v6946_v30  ;;  %v7019_v22 = vld [vmem:[#allocation6 + $0x7e0] ss:$16 sps:$4 sm:$0xff]   ;;  %v7022_v30 = vld [vmem:[#allocation6 + $0x7e8] ss:$16 sps:$4 sm:$0xff]  }
 0x337   :  { %4935 = vmatpush1.bf16.msra.mxu0 %v6941_v32  ;;  %5099 = vmatpush1.bf16.msra.mxu1 %v6944_v33  ;;  %v3239_v32 = vmax.f32 %v6544_v28, 0.0  ;;  %v7025_v33 = vld [vmem:[#allocation9 + $0x40] sm:$0xff]  }
 0x338   :  { %4936 = vmatprep.subr.bf16.mxu0 %v6949_v36  ;;  %5100 = vmatprep.subr.bf16.mxu1 %v6952_v34  ;;  %v7026_v36 = vld [vmem:[#allocation9 + $0xc0] sm:$0xff]  }
 0x339   :  { %v7027_v34 = vld [vmem:[#allocation9] sm:$0xff]  }
 0x33b   :  { %4937 = vmatpush1.bf16.msra.mxu0 %v6947_v39  ;;  %5101 = vmatpush1.bf16.msra.mxu1 %v6950_v40  ;;  %v7028_v39 = vld [vmem:[#allocation9 + $0x80] sm:$0xff]   ;;  %v3247_v40 = vpack.c.bf16 %v3239_v32, %v3239_v32 }
 0x33c   :  { %4938 = vmatprep.subr.bf16.mxu0 %v6955_v41  ;;  %5102 = vmatprep.subr.bf16.mxu1 %v6958_v42  ;;  %v7030_v41 = vld [vmem:[#allocation9 + $0xc8] sm:$0xff]  }
 0x33d   :  { %v7031_v42 = vld [vmem:[#allocation9 + $0x8] sm:$0xff]  }
 0x33e   :  { %v7061_v32 = vld [vmem:[#allocation12 + $0x20] sm:$0xff]  }
 0x33f   :  { %4939 = vmatpush1.bf16.msra.mxu0 %v6953_v44  ;;  %5103 = vmatpush1.bf16.msra.mxu1 %v6956_v29  ;;  %v7032_v44 = vld [vmem:[#allocation9 + $0x88] sm:$0xff]   ;;  %v7033_v29 = vld [vmem:[#allocation9 + $0x50] sm:$0xff]  }
 0x340   :  { %4940 = vmatprep.subr.bf16.mxu0 %v6961_v45  ;;  %5104 = vmatprep.subr.bf16.mxu1 %v6964_v46  ;;  %v7034_v45 = vld [vmem:[#allocation9 + $0xd0] sm:$0xff]  }
 0x341   :  { %v7035_v46 = vld [vmem:[#allocation9 + $0x10] sm:$0xff]  }
 0x343   :  { %4941 = vmatpush1.bf16.msra.mxu0 %v6959_v47  ;;  %5105 = vmatpush1.bf16.msra.mxu1 %v6962_v48  ;;  %v7036_v47 = vld [vmem:[#allocation9 + $0x90] sm:$0xff]   ;;  %v7037_v48 = vld [vmem:[#allocation9 + $0x58] sm:$0xff]  }
 0x344   :  { %4942 = vmatprep.subr.bf16.mxu0 %v6967_v35  ;;  %5106 = vmatprep.subr.bf16.mxu1 %v6970_v50  ;;  %v7038_v35 = vld [vmem:[#allocation9 + $0xd8] sm:$0xff]  }
 0x345   :  { %v7039_v50 = vld [vmem:[#allocation9 + $0x18] sm:$0xff]  }
 0x347   :  { %4943 = vmatpush1.bf16.msra.mxu0 %v6965_v51  ;;  %5107 = vmatpush1.bf16.msra.mxu1 %v6968_v52  ;;  %v7040_v51 = vld [vmem:[#allocation9 + $0x98] sm:$0xff]   ;;  %v7041_v52 = vld [vmem:[#allocation9 + $0x60] sm:$0xff]  }
 0x348   :  { %4944 = vmatprep.subr.bf16.mxu0 %v6973_v53  ;;  %5108 = vmatprep.subr.bf16.mxu1 %v6976_v54  ;;  %v7042_v53 = vld [vmem:[#allocation9 + $0xe0] sm:$0xff]  }
 0x349   :  { %v7043_v54 = vld [vmem:[#allocation9 + $0x20] sm:$0xff]  }
 0x34b   :  { %4945 = vmatpush1.bf16.msra.mxu0 %v6971_v55  ;;  %5109 = vmatpush1.bf16.msra.mxu1 %v6974_v56  ;;  %v7044_v55 = vld [vmem:[#allocation9 + $0xa0] sm:$0xff]   ;;  %v7045_v56 = vld [vmem:[#allocation9 + $0x68] sm:$0xff]  }
 0x34c   :  { %4946 = vmatprep.subr.bf16.mxu0 %v6979_v58  ;;  %5110 = vmatprep.subr.bf16.mxu1 %v6982_v31  ;;  %v7046_v58 = vld [vmem:[#allocation9 + $0xe8] sm:$0xff]  }
 0x34d   :  { %v7047_v31 = vld [vmem:[#allocation9 + $0x28] sm:$0xff]  }
 0x34f   :  { %4947 = vmatpush1.bf16.msra.mxu0 %v6977_v59  ;;  %5111 = vmatpush1.bf16.msra.mxu1 %v6980_v60  ;;  %v7048_v59 = vld [vmem:[#allocation9 + $0xa8] sm:$0xff]   ;;  %v7049_v60 = vld [vmem:[#allocation9 + $0x70] sm:$0xff]  }
 0x350   :  { %4948 = vmatprep.subr.bf16.mxu0 %v6985_v61  ;;  %5112 = vmatprep.subr.bf16.mxu1 %v6988_v62  ;;  %v7050_v61 = vld [vmem:[#allocation9 + $0xf0] sm:$0xff]  }
 0x351   :  { %v7051_v62 = vld [vmem:[#allocation9 + $0x30] sm:$0xff]  }
 0x353   :  { %4949 = vmatpush1.bf16.msra.mxu0 %v6983_v63  ;;  %5113 = vmatpush1.bf16.msra.mxu1 %v6986_v0  ;;  %v7052_v63 = vld [vmem:[#allocation9 + $0xb0] sm:$0xff]   ;;  %v7053_v0 = vld [vmem:[#allocation9 + $0x78] sm:$0xff]  }
 0x354   :  { %4950 = vmatprep.subr.bf16.mxu0 %v6991_v1  ;;  %5114 = vmatprep.subr.bf16.mxu1 %v6994_v2  ;;  %v7054_v1 = vld [vmem:[#allocation9 + $0xf8] sm:$0xff]  }
 0x355   :  { %v7055_v2 = vld [vmem:[#allocation9 + $0x38] sm:$0xff]  }
 0x357   :  { %4951 = vmatpush1.bf16.msra.mxu0 %v6989_v3  ;;  %5115 = vmatpush1.bf16.msra.mxu1 %v6992_v4  ;;  %v7056_v3 = vld [vmem:[#allocation9 + $0xb8] sm:$0xff]   ;;  %v7327_v4 = vmov 0.0  }
 0x358   :  { %4952 = vmatprep.subr.bf16.mxu0 %v6997_v5  ;;  %5116 = vmatprep.subr.bf16.mxu1 %v7000_v6  ;;  %v3505_v5 = vld [vmem:[#allocation7] sm:$0xf] }
 0x359   :  { %v3510_v6 = vrot.slane %v3505_v5, %v575_v12 }
 0x35b   :  { %4953 = vmatpush1.bf16.msra.mxu0 %v6995_v8  ;;  %5117 = vmatpush1.bf16.msra.mxu1 %v6998_v9  ;;  %v3518_v8 = vrot.slane %v3505_v5, %v583_v37  ;;  %v3514_v9 = vrot.slane %v3505_v5, %v579_v23 }
 0x35c   :  { %4954 = vmatprep.subr.bf16.mxu0 %v7003_v10  ;;  %5118 = vmatprep.subr.bf16.mxu1 %v7006_v11  ;;  %v3522_v10 = vrot.slane %v3505_v5, %v587_v38 }
 0x35f   :  { %4955 = vmatpush1.bf16.msra.mxu0 %v7001_v13  ;;  %5119 = vmatpush1.bf16.msra.mxu1 %v7004_v14 }
 0x360   :  { %4956 = vmatprep.subr.bf16.mxu0 %v7009_v57  ;;  %5120 = vmatprep.subr.bf16.mxu1 %v7012_v16 }
 0x363   :  { %4957 = vmatpush1.bf16.msra.mxu0 %v7007_v17  ;;  %5121 = vmatpush1.bf16.msra.mxu1 %v7010_v19 }
 0x364   :  { %4958 = vmatprep.subr.bf16.mxu0 %v7015_v43  ;;  %5122 = vmatprep.subr.bf16.mxu1 %v7018_v24 }
 0x367   :  { %4959 = vmatpush1.bf16.msra.mxu0 %v7013_v26  ;;  %5123 = vmatpush1.bf16.msra.mxu1 %v7016_v27 }
 0x368   :  { %4960 = vmatprep.subr.bf16.mxu0 %v7021_v25  ;;  %5124 = vmatprep.subr.bf16.mxu1 %v7024_v49  ;;  %v7058_v49 = vld [vmem:[#allocation12 + $0x8] sm:$0xff]  }
 0x36b   :  { %4961 = vmatpush1.bf16.msra.mxu0 %v7019_v22  ;;  %5125 = vmatpush1.bf16.msra.mxu1 %v7022_v30  ;;  %v7059_v22 = vld [vmem:[#allocation12 + $0x10] sm:$0xff]   ;;  %v7060_v30 = vld [vmem:[#allocation12 + $0x18] sm:$0xff]  }
 0x36c   :  { %6436 = vmatprep.subr.bf16.mxu0 %v7025_v33  ;;  %6458 = vmatprep.subr.bf16.mxu1 %v7026_v36  ;;  %v7062_v33 = vld [vmem:[#allocation12 + $0x28] sm:$0xff]   ;;  %v7063_v36 = vld [vmem:[#allocation12 + $0x30] sm:$0xff]  }
 0x36e   :  { %4963 = vmatmul.mubr.bf16.vlgmr.msra.gmra.mrb[8].mxu0 %v3247_v40  ;;  %5127 = vmatmul.mubr.bf16.vlgmr.msra.gmra.mrb[8].mxu1 %v3247_v40  ;;  %v7066_v40 = vld [vmem:[#allocation15 + $0x8] sm:$0xff]  }
 0x36f   :  { %6437 = vmatpush3.bf16.msra.mxu0 %v7027_v34  ;;  %6459 = vmatpush3.bf16.msra.mxu1 %v7028_v39  ;;  %v7064_v34 = vld [vmem:[#allocation12 + $0x38] sm:$0xff]   ;;  %v7065_v39 = vld [vmem:[#allocation15] sm:$0xff]  }
 0x370   :  { %6438 = vmatprep.subr.bf16.mxu0 %v7029_v7  ;;  %6460 = vmatprep.subr.bf16.mxu1 %v7030_v41  ;;  %v7067_v7 = vld [vmem:[#allocation15 + $0x10] sm:$0xff]   ;;  %v7068_v41 = vld [vmem:[#allocation15 + $0x18] sm:$0xff]  }
 0x373   :  { %6439 = vmatpush3.bf16.msra.mxu0 %v7031_v42  ;;  %6461 = vmatpush3.bf16.msra.mxu1 %v7032_v44  ;;  %v7069_v42 = vld [vmem:[#allocation15 + $0x20] sm:$0xff]   ;;  %v7070_v44 = vld [vmem:[#allocation15 + $0x28] sm:$0xff]  }
 0x374   :  { %6440 = vmatprep.subr.bf16.mxu0 %v7033_v29  ;;  %6462 = vmatprep.subr.bf16.mxu1 %v7034_v45 }
 0x377   :  { %6441 = vmatpush3.bf16.msra.mxu0 %v7035_v46  ;;  %6463 = vmatpush3.bf16.msra.mxu1 %v7036_v47  ;;  %v6385_v46 = vld [vmem:[#allocation10] ss:$0 sm:$0xff] }
 0x378   :  { %6442 = vmatprep.subr.bf16.mxu0 %v7037_v48  ;;  %6464 = vmatprep.subr.bf16.mxu1 %v7038_v35 }
 0x37b   :  { %6443 = vmatpush3.bf16.msra.mxu0 %v7039_v50  ;;  %6465 = vmatpush3.bf16.msra.mxu1 %v7040_v51 }
 0x37c   :  { %6444 = vmatprep.subr.bf16.mxu0 %v7041_v52  ;;  %6466 = vmatprep.subr.bf16.mxu1 %v7042_v53 }
 0x37f   :  { %6445 = vmatpush3.bf16.msra.mxu0 %v7043_v54  ;;  %6467 = vmatpush3.bf16.msra.mxu1 %v7044_v55 }
 0x380   :  { %6446 = vmatprep.subr.bf16.mxu0 %v7045_v56  ;;  %6468 = vmatprep.subr.bf16.mxu1 %v7046_v58 }
 0x383   :  { %6447 = vmatpush3.bf16.msra.mxu0 %v7047_v31  ;;  %6469 = vmatpush3.bf16.msra.mxu1 %v7048_v59  ;;  %v7071_v59 = vld [vmem:[#allocation15 + $0x30] sm:$0xff]  }
 0x384   :  { %6448 = vmatprep.subr.bf16.mxu0 %v7049_v60  ;;  %6470 = vmatprep.subr.bf16.mxu1 %v7050_v61  ;;  %v7072_v60 = vld [vmem:[#allocation15 + $0x38] sm:$0xff]  }
 0x385   :  { %v6418_v61 = vld [vmem:[#allocation13] ss:$0 sm:$0xff] }
 0x387   :  { %6449 = vmatpush3.bf16.msra.mxu0 %v7051_v62  ;;  %6471 = vmatpush3.bf16.msra.mxu1 %v7052_v63 }
 0x388   :  { %6450 = vmatprep.subr.bf16.mxu0 %v7053_v0  ;;  %6472 = vmatprep.subr.bf16.mxu1 %v7054_v1 }
 0x38b   :  { %6451 = vmatpush3.bf16.msra.mxu0 %v7055_v2  ;;  %6473 = vmatpush3.bf16.msra.mxu1 %v7056_v3 }
 0x38c   :  { %6498 = vmatprep.subr.bf16.mxu0 %v7327_v4  ;;  %6518 = vmatprep.subr.bf16.mxu1 %v7327_v4 }
 0x441   :  { %v4964_v11 = vpop.f32.mrb[8].mxu0  ;;  %v5128_v13 = vpop.f32.mrb[8].mxu1 }
 0x442   :  { %v6546_v14 = vadd.f32 %v4964_v11, %v3510_v6  ;;  %v6548_v15 = vadd.f32 %v5128_v13, %v3518_v8  ;;  %v4966_v57 = vpop.f32.mrb[9].mxu0  ;;  %v5130_v16 = vpop.f32.mrb[9].mxu1  ;;  %v6427_v6 = vld [vmem:[#allocation16] ss:$0 sm:$0xff] }
 0x443   :  { %v6547_v17 = vadd.f32 %v4966_v57, %v3514_v9  ;;  %v6549_v19 = vadd.f32 %v5130_v16, %v3522_v10  ;;  %v4968_v20 = vpop.f32.mrb[10].mxu0  ;;  %v5132_v21 = vpop.f32.mrb[10].mxu1 }
 0x444   :  { %v5135_v12 = vmax.f32 %v6546_v14, 0.0  ;;  %v5137_v43 = vmax.f32 %v6548_v15, 0.0  ;;  %v4969_v24 = vpop.f32.mrb[11].mxu0  ;;  %v5133_v37 = vpop.f32.mrb[11].mxu1 }
 0x445   :  { %v5136_v26 = vmax.f32 %v6547_v17, 0.0  ;;  %v5138_v27 = vmax.f32 %v6549_v19, 0.0 }
 0x446   :  { %v5139_v38 = vpack.c.bf16 %v5135_v12, %v5135_v12  ;;  %v5141_v25 = vpack.c.bf16 %v5137_v43, %v5137_v43 }
 0x447   :  { %v5140_v23 = vpack.c.bf16 %v5136_v26, %v5136_v26  ;;  %v5142_v28 = vpack.c.bf16 %v5138_v27, %v5138_v27 }
 0x449   :  { %5438 = vmatprep.mubr.bf16.mxu0 %v5140_v23  ;;  %5478 = vmatprep.mubr.bf16.mxu1 %v5142_v28 }
 0x44a   :  { %5439 = vmatmul.mubr.bf16.vlgmr.msra.gmra.mrb[12].mxu0 %v5139_v38  ;;  %5479 = vmatmul.mubr.bf16.vlgmr.msra.gmra.mrb[12].mxu1 %v5141_v25 }
 0x44b   :  { %6499 = vmatpush3.bf16.msra.mxu0 %v7057_v18  ;;  %6514 = vmatprep.mubr.msk.bf16.mxu0 %vm7328_vm1, %v7327_v4 }
 0x44c   :  { %6500 = vmatprep.subr.bf16.mxu0 %v7327_v4  ;;  %6534 = vmatprep.mubr.msk.bf16.mxu1 %vm7328_vm1, %v7327_v4 }
 0x44d   :  { %6519 = vmatpush3.bf16.msra.mxu1 %v7065_v39 }
 0x44e   :  { %6520 = vmatprep.subr.bf16.mxu1 %v7327_v4 }
 0x44f   :  { %6501 = vmatpush3.bf16.msra.mxu0 %v7058_v49 }
 0x450   :  { %6502 = vmatprep.subr.bf16.mxu0 %v7327_v4 }
 0x451   :  { %6521 = vmatpush3.bf16.msra.mxu1 %v7066_v40 }
 0x452   :  { %6522 = vmatprep.subr.bf16.mxu1 %v7327_v4 }
 0x453   :  { %6503 = vmatpush3.bf16.msra.mxu0 %v7059_v22 }
 0x454   :  { %6504 = vmatprep.subr.bf16.mxu0 %v7327_v4 }
 0x455   :  { %6523 = vmatpush3.bf16.msra.mxu1 %v7067_v7 }
 0x456   :  { %6524 = vmatprep.subr.bf16.mxu1 %v7327_v4 }
 0x457   :  { %6505 = vmatpush3.bf16.msra.mxu0 %v7060_v30 }
 0x458   :  { %6506 = vmatprep.subr.bf16.mxu0 %v7327_v4 }
 0x459   :  { %6525 = vmatpush3.bf16.msra.mxu1 %v7068_v41 }
 0x45a   :  { %6526 = vmatprep.subr.bf16.mxu1 %v7327_v4 }
 0x45b   :  { %6507 = vmatpush3.bf16.msra.mxu0 %v7061_v32 }
 0x45c   :  { %6508 = vmatprep.subr.bf16.mxu0 %v7327_v4 }
 0x45d   :  { %6527 = vmatpush3.bf16.msra.mxu1 %v7069_v42 }
 0x45e   :  { %6528 = vmatprep.subr.bf16.mxu1 %v7327_v4 }
 0x45f   :  { %6509 = vmatpush3.bf16.msra.mxu0 %v7062_v33 }
 0x460   :  { %6510 = vmatprep.subr.bf16.mxu0 %v7327_v4 }
 0x461   :  { %6529 = vmatpush3.bf16.msra.mxu1 %v7070_v44 }
 0x462   :  { %6530 = vmatprep.subr.bf16.mxu1 %v7327_v4 }
 0x463   :  { %6511 = vmatpush3.bf16.msra.mxu0 %v7063_v36 }
 0x464   :  { %6512 = vmatprep.subr.bf16.mxu0 %v7327_v4 }
 0x465   :  { %6531 = vmatpush3.bf16.msra.mxu1 %v7071_v59 }
 0x466   :  { %6532 = vmatprep.subr.bf16.mxu1 %v7327_v4 }
 0x467   :  { %6513 = vmatpush3.bf16.msra.mxu0 %v7064_v34 }
 0x469   :  { %6533 = vmatpush3.bf16.msra.mxu1 %v7072_v60 }
 0x51d   :  { %v6452_v29 = vpop.f32.mrb[12].mxu0  ;;  %v6474_v45 = vpop.f32.mrb[12].mxu1 }
 0x51e   :  { %v6453_v47 = vpop.f32.mrb[13].mxu0  ;;  %v6475_v48 = vpop.f32.mrb[13].mxu1 }
 0x51f   :  { %v6454_v35 = vadd.f32 %v6453_v47, %v6452_v29  ;;  %v6476_v50 = vadd.f32 %v6475_v48, %v6474_v45  ;;  %v6455_v51 = vpop.f32.mrb[14].mxu0  ;;  %v6477_v52 = vpop.f32.mrb[14].mxu1 }
 0x520   :  { %v6456_v53 = vpop.f32.mrb[15].mxu0  ;;  %v6478_v54 = vpop.f32.mrb[15].mxu1 }
 0x521   :  { %v5441_v55 = vadd.f32 %v6454_v35, %v6385_v46 }
 0x523   :  { %v5481_v56 = vadd.f32 %v6476_v50, %v5441_v55 }
 0x525   :  { %v5486_v58 = vmax.f32 %v5481_v56, 0.0 }
 0x527   :  { %v5487_v31 = vpack.c.bf16 %v5486_v58, %v5486_v58 }
 0x529   :  { %6515 = vmatmul.mubr.bf16.vlgmr.msra.gmra.mrb[16].mxu0 %v5487_v31 }
 0x5fc   :  { %v5593_v62 = vpop.f32.mrb[16].mxu0 }
 0x5fd   :  { %v5594_v63 = vadd.f32 %v6418_v61, %v5593_v62  ;;  %v6516_v0 = vpop.f32.mrb[17].mxu0 }
 0x5fe   :  { %v5596_v1 = vpop.f32.mrb[18].mxu0 }
 0x5ff   :  { %v5599_v2 = vmax.f32 %v5594_v63, 0.0  ;;  %v6517_v3 = vpop.f32.mrb[19].mxu0 }
 0x601   :  { %v5600_v5 = vpack.c.bf16 %v5599_v2, %v5599_v2 }
 0x603   :  { %6535 = vmatmul.mubr.bf16.vlgmr.msra.gmra.mrb[16].mxu1 %v5600_v5 }
 0x6d6   :  { %v5706_v8 = vpop.f32.mrb[16].mxu1 }
 0x6d7   :  { %v5707_v9 = vadd.f32 %v6427_v6, %v5706_v8  ;;  %v6536_v10 = vpop.f32.mrb[17].mxu1 }
 0x6d8   :  { %v5709_v11 = vpop.f32.mrb[18].mxu1 }
 0x6d9   :  { %5712 = vmax.xlane.f32.xlu0 %v5707_v9  ;;  %v6537_v13 = vpop.f32.mrb[19].mxu1 }
 0x766   :  { %v5713_v14 = vpop.xlane.xlu0 %5712 }
 0x767   :  { %v5714_v4 = vsub.f32 %v5707_v9, %v5713_v14 }
 0x769   :  { %v5715_v15 = vmul.f32 1.442695, %v5714_v4 }
 0x76b   :  { %7073 = vpow2.f32 %v5715_v15 }
 0x775   :  { %v7074_v57 = vpop.eup %7073 }
 0x776   :  { %5717 = vadd.xlane.f32.xlu0 %v7074_v57 }
 0x803   :  { %v5718_v16 = vpop.xlane.xlu0 %5717 }
 0x804   :  { %7075 = vlog2.f32 %v5718_v16 }
 0x80e   :  { %v7076_v17 = vpop.eup %7075 }
 0x80f   :  { %v5720_v19 = vmul.f32 0.6931472, %v7076_v17 }
 0x811   :  { %v5721_v20 = vsub.f32 %v5714_v4, %v5720_v19 }
 0x813   :  { %5722 = vst [vmem:[%s7668_s11] sm:$0xff] %v5721_v20 }
 0x814   :  { %5727 = vsyncpa [#allocation3], 1 }
 0x815   :  { %5728 = vsyncpa [#allocation5], 1 }
 0x816   :  { %5729 = vsyncpa [#allocation8], 1 }
 0x817   :  { %5730 = vsyncpa [#allocation11], 1 }
 0x818   :  { %5731 = vsyncpa [#allocation14], 1 }
 0x819   :  { %5732 = vsyncpa [#allocation17], 1 }

// kernel: mlp_forward_pallas.1
= control target key start
LH: loop header
LB: loop body
LE: loop exit
PB: predicated region body
PF: predicated region fallthrough
CT: control target
= control target key end

     0   :  { %16 = vsyncpa [#allocation3], 0  ;;  %s7657_s0 = inlined_call_operand.vmem [shape: f32[8,784], index: 0, kind: input, shape index: {}]   ;;  %s7658_s1 = inlined_call_operand.hbm [shape: bf16[784,1024], index: 1, kind: input, shape index: {}]   ;;  %s7659_s2 = inlined_call_operand.hbm [shape: f32[1,1024], index: 2, kind: input, shape index: {}]   ;;  %s7660_s3 = inlined_call_operand.hbm [shape: bf16[1024,512], index: 3, kind: input, shape index: {}]   ;;  %s7661_s4 = inlined_call_operand.hbm [shape: f32[1,512], index: 4, kind: input, shape index: {}]   ;;  %s7662_s5 = inlined_call_operand.hbm [shape: bf16[512,128], index: 5, kind: input, shape index: {}]   ;;  %s7663_s6 = inlined_call_operand.hbm [shape: f32[1,128], index: 6, kind: input, shape index: {}]   ;;  %s7664_s7 = inlined_call_operand.hbm [shape: bf16[128,128], index: 7, kind: input, shape index: {}]   ;;  %s7665_s8 = inlined_call_operand.hbm [shape: f32[1,128], index: 8, kind: input, shape index: {}]   ;;  %s7666_s9 = inlined_call_operand.hbm [shape: bf16[128,128], index: 9, kind: input, shape index: {}]   ;;  %s7667_s10 = inlined_call_operand.hbm [shape: f32[1,128], index: 10, kind: input, shape index: {}]   ;;  %s7668_s11 = inlined_call_operand.vmem [shape: f32[8,128], index: 11, kind: output, shape index: {}]  }
   0x1   :  { %17 = vsyncpa [#allocation5], 0 }
   0x2   :  { %18 = vsyncpa [#allocation8], 0 }
   0x3   :  { %19 = vsyncpa [#allocation11], 0 }
   0x4   :  { %20 = vsyncpa [#allocation14], 0 }
   0x5   :  { %21 = vsyncpa [#allocation17], 0  ;;  %s7310_s17 = smov [#allocation4]   ;;  %s7311_s19 = smov [#allocation7]  }
   0x6   :  { %s42_s18 = sshll.u32 %s7310_s17, 4  ;;  %s64_s20 = sshll.u32 %s7311_s19, 4  ;;  %s43_s18 = int_to_ptr.vmem [resolvable:$true] %s42_s18  ;;  %s65_s20 = int_to_ptr.vmem [resolvable:$true] %s64_s20 }
   0x7   :  { %s7078_s23 = scalar_lea.hbm %s7659_s2, 128 }
   0x8   :  { %p7079_p0 = scmp.ne.s32.totalorder %s7659_s2, %s7078_s23  ;;  %p7082_p1 = scmp.lt.u32.totalorder %s7078_s23, %s7659_s2 }
   0xa   :  { %p7084_p2 = pnand %p7082_p1, %p7079_p0 }
   0xc   :  { %7087 = shalt.err (!%p7084_p2)
}
   0xd   :  { %s7088_s28 = scalar_lea.vmem %s43_s18, 128  ;;  %p7093_p4 = scmp.lt.s32.totalorder %s43_s18, %s43_s18 }
   0xe   :  { %p7089_p3 = scmp.ne.s32.totalorder %s43_s18, %s7088_s28  ;;  %p7094_p5 = scmp.lt.s32.totalorder %s7088_s28, %s7088_s28 }
  0x10   :  { %p7095_p6 = por %p7094_p5, %p7093_p4 }
  0x12   :  { %p7096_p7 = pnand %p7095_p6, %p7089_p3 }
  0x14   :  { %7099 = shalt.err (!%p7096_p7)
}
  0x15   :  { %45 = dma.hbm_to_vmem [thread:$0]  %s7659_s2, 128, %s43_s18, [#allocation5]  }
  0x16   :  { %s7100_s14 = scalar_lea.hbm %s7661_s4, 64 }
  0x17   :  { %p7101_p8 = scmp.ne.s32.totalorder %s7661_s4, %s7100_s14  ;;  %p7104_p9 = scmp.lt.u32.totalorder %s7100_s14, %s7661_s4 }
  0x19   :  { %p7106_p10 = pnand %p7104_p9, %p7101_p8 }
  0x1b   :  { %7109 = shalt.err (!%p7106_p10)
}
  0x1c   :  { %s7110_s21 = scalar_lea.vmem %s65_s20, 64  ;;  %p7115_p12 = scmp.lt.s32.totalorder %s65_s20, %s65_s20 }
  0x1d   :  { %p7111_p11 = scmp.ne.s32.totalorder %s65_s20, %s7110_s21  ;;  %p7116_p13 = scmp.lt.s32.totalorder %s7110_s21, %s7110_s21 }
  0x1f   :  { %p7117_p0 = por %p7116_p13, %p7115_p12 }
  0x21   :  { %p7118_p1 = pnand %p7117_p0, %p7111_p11 }
  0x23   :  { %7121 = shalt.err (!%p7118_p1)
}
  0x24   :  { %67 = dma.hbm_to_vmem [thread:$0]  %s7661_s4, 64, %s65_s20, [#allocation8]  }
  0x25   :  { %s7312_s22 = smov [#allocation10]   ;;  %s7313_s24 = smov [#allocation13]  }
  0x26   :  { %s86_s23 = sshll.u32 %s7312_s22, 4  ;;  %s108_s25 = sshll.u32 %s7313_s24, 4  ;;  %s87_s23 = int_to_ptr.vmem [resolvable:$true] %s86_s23  ;;  %s109_s25 = int_to_ptr.vmem [resolvable:$true] %s108_s25 }
  0x27   :  { %s7122_s28 = scalar_lea.hbm %s7663_s6, 16 }
  0x28   :  { %p7123_p2 = scmp.ne.s32.totalorder %s7663_s6, %s7122_s28  ;;  %p7126_p3 = scmp.lt.u32.totalorder %s7122_s28, %s7663_s6 }
  0x2a   :  { %p7128_p4 = pnand %p7126_p3, %p7123_p2 }
  0x2c   :  { %7131 = shalt.err (!%p7128_p4)
}
  0x2d   :  { %s7132_s4 = scalar_lea.vmem %s87_s23, 16  ;;  %s7136_s20 = scalar_lea.vmem %s87_s23, 32 }
  0x2e   :  { %p7133_p5 = scmp.ne.s32.totalorder %s87_s23, %s7132_s4  ;;  %p7137_p6 = scmp.lt.s32.totalorder %s87_s23, %s87_s23 }
  0x2f   :  { %p7138_p7 = scmp.lt.s32.totalorder %s7136_s20, %s7132_s4 }
  0x31   :  { %p7139_p8 = por %p7138_p7, %p7137_p6 }
  0x33   :  { %p7140_p9 = pnand %p7139_p8, %p7133_p5 }
  0x35   :  { %7143 = shalt.err (!%p7140_p9)
}
  0x36   :  { %89 = dma.hbm_to_vmem [thread:$0]  %s7663_s6, 16, %s87_s23, [#allocation11]  }
  0x37   :  { %s7144_s19 = scalar_lea.hbm %s7665_s8, 16 }
  0x38   :  { %p7145_p10 = scmp.ne.s32.totalorder %s7665_s8, %s7144_s19  ;;  %p7148_p11 = scmp.lt.u32.totalorder %s7144_s19, %s7665_s8 }
  0x3a   :  { %p7150_p12 = pnand %p7148_p11, %p7145_p10 }
  0x3c   :  { %7153 = shalt.err (!%p7150_p12)
}
  0x3d   :  { %s7154_s24 = scalar_lea.vmem %s109_s25, 16  ;;  %s7158_s26 = scalar_lea.vmem %s109_s25, 32 }
  0x3e   :  { %p7155_p13 = scmp.ne.s32.totalorder %s109_s25, %s7154_s24  ;;  %p7159_p0 = scmp.lt.s32.totalorder %s109_s25, %s109_s25 }
  0x3f   :  { %p7160_p1 = scmp.lt.s32.totalorder %s7158_s26, %s7154_s24 }
  0x41   :  { %p7161_p2 = por %p7160_p1, %p7159_p0 }
  0x43   :  { %p7162_p3 = pnand %p7161_p2, %p7155_p13 }
  0x45   :  { %7165 = shalt.err (!%p7162_p3)
}
  0x46   :  { %111 = dma.hbm_to_vmem [thread:$0]  %s7665_s8, 16, %s109_s25, [#allocation14]  }
  0x47   :  { %s7314_s27 = smov [#allocation2]   ;;  %s7166_s12 = scalar_lea.hbm %s7658_s1, 50176 }
  0x48   :  { %s29_s28 = sshll.u32 %s7314_s27, 4  ;;  %p7167_p4 = scmp.ne.s32.totalorder %s7658_s1, %s7166_s12  ;;  %s30_s28 = int_to_ptr.vmem [resolvable:$true] %s29_s28 }
  0x49   :  { %p7170_p5 = scmp.lt.u32.totalorder %s7166_s12, %s7658_s1 }
  0x4b   :  { %p7172_p6 = pnand %p7170_p5, %p7167_p4 }
  0x4d   :  { %7175 = shalt.err (!%p7172_p6)
}
  0x4e   :  { %s7176_s15 = scalar_lea.vmem %s30_s28, 50176  ;;  %p7181_p8 = scmp.lt.s32.totalorder %s30_s28, %s30_s28 }
  0x4f   :  { %p7177_p7 = scmp.ne.s32.totalorder %s30_s28, %s7176_s15  ;;  %p7182_p9 = scmp.lt.s32.totalorder %s7176_s15, %s7176_s15 }
  0x51   :  { %p7183_p10 = por %p7182_p9, %p7181_p8 }
  0x53   :  { %p7184_p11 = pnand %p7183_p10, %p7177_p7 }
  0x55   :  { %7187 = shalt.err (!%p7184_p11)
}
  0x56   :  { %s7315_s8 = smov 512   ;;  %s7316_s25 = smov 32  }
  0x57   :  { %35 = dma.hbm_to_vmem [thread:$0]  %s7658_s1, 50176, %s30_s28, [#allocation3], %s7315_s8, %s7315_s8, %s7316_s25  }
  0x58   :  { %s7317_s19 = smov [#allocation6]   ;;  %s7188_s22 = scalar_lea.hbm %s7660_s3, 32768 }
  0x59   :  { %s51_s21 = sshll.u32 %s7317_s19, 4  ;;  %p7189_p12 = scmp.ne.s32.totalorder %s7660_s3, %s7188_s22  ;;  %s52_s21 = int_to_ptr.vmem [resolvable:$true] %s51_s21 }
  0x5a   :  { %p7192_p13 = scmp.lt.u32.totalorder %s7188_s22, %s7660_s3 }
  0x5c   :  { %p7194_p0 = pnand %p7192_p13, %p7189_p12 }
  0x5e   :  { %7197 = shalt.err (!%p7194_p0)
}
  0x5f   :  { %s7198_s27 = scalar_lea.vmem %s52_s21, 32768  ;;  %p7203_p2 = scmp.lt.s32.totalorder %s52_s21, %s52_s21 }
  0x60   :  { %p7199_p1 = scmp.ne.s32.totalorder %s52_s21, %s7198_s27  ;;  %p7204_p3 = scmp.lt.s32.totalorder %s7198_s27, %s7198_s27 }
  0x62   :  { %p7205_p4 = por %p7204_p3, %p7203_p2 }
  0x64   :  { %p7206_p5 = pnand %p7205_p4, %p7199_p1 }
  0x66   :  { %7209 = shalt.err (!%p7206_p5)
}
  0x67   :  { %s7318_s1 = smov 256   ;;  %s7319_s28 = smov 16  }
  0x68   :  { %57 = dma.hbm_to_vmem [thread:$0]  %s7660_s3, 32768, %s52_s21, [#allocation5], %s7318_s1, %s7318_s1, %s7319_s28  }
  0x69   :  { %s7320_s12 = smov [#allocation9]   ;;  %s7210_s14 = scalar_lea.hbm %s7662_s5, 4096 }
  0x6a   :  { %s73_s13 = sshll.u32 %s7320_s12, 4  ;;  %p7211_p6 = scmp.ne.s32.totalorder %s7662_s5, %s7210_s14  ;;  %s74_s13 = int_to_ptr.vmem [resolvable:$true] %s73_s13 }
  0x6b   :  { %p7214_p7 = scmp.lt.u32.totalorder %s7210_s14, %s7662_s5 }
  0x6d   :  { %p7216_p8 = pnand %p7214_p7, %p7211_p6 }
  0x6f   :  { %7219 = shalt.err (!%p7216_p8)
}
  0x70   :  { %s7220_s17 = scalar_lea.vmem %s74_s13, 4096  ;;  %p7225_p10 = scmp.lt.s32.totalorder %s74_s13, %s74_s13 }
  0x71   :  { %p7221_p9 = scmp.ne.s32.totalorder %s74_s13, %s7220_s17  ;;  %p7226_p11 = scmp.lt.s32.totalorder %s7220_s17, %s7220_s17 }
  0x73   :  { %p7227_p12 = por %p7226_p11, %p7225_p10 }
  0x75   :  { %p7228_p13 = pnand %p7227_p12, %p7221_p9 }
  0x77   :  { %7231 = shalt.err (!%p7228_p13)
}
  0x78   :  { %s7321_s3 = smov 64   ;;  %s7322_s19 = smov 4  }
  0x79   :  { %79 = dma.hbm_to_vmem [thread:$0]  %s7662_s5, 4096, %s74_s13, [#allocation8], %s7321_s3, %s7321_s3, %s7322_s19  }
  0x7a   :  { %s7323_s18 = smov [#allocation12]   ;;  %s7324_s24 = smov [#allocation15]  }
  0x7b   :  { %s95_s22 = sshll.u32 %s7323_s18, 4  ;;  %s117_s26 = sshll.u32 %s7324_s24, 4  ;;  %s96_s22 = int_to_ptr.vmem [resolvable:$true] %s95_s22  ;;  %s118_s26 = int_to_ptr.vmem [resolvable:$true] %s117_s26 }
  0x7c   :  { %s7232_s27 = scalar_lea.hbm %s7664_s7, 1024 }
  0x7d   :  { %p7233_p0 = scmp.ne.s32.totalorder %s7664_s7, %s7232_s27  ;;  %p7236_p1 = scmp.lt.u32.totalorder %s7232_s27, %s7664_s7 }
  0x7f   :  { %p7238_p2 = pnand %p7236_p1, %p7233_p0 }
  0x81   :  { %7241 = shalt.err (!%p7238_p2)
}
  0x82   :  { %s7242_s5 = scalar_lea.vmem %s96_s22, 1024  ;;  %p7247_p4 = scmp.lt.s32.totalorder %s96_s22, %s96_s22 }
  0x83   :  { %p7243_p3 = scmp.ne.s32.totalorder %s96_s22, %s7242_s5  ;;  %p7248_p5 = scmp.lt.s32.totalorder %s7242_s5, %s7242_s5 }
  0x85   :  { %p7249_p6 = por %p7248_p5, %p7247_p4 }
  0x87   :  { %p7250_p7 = pnand %p7249_p6, %p7243_p3 }
  0x89   :  { %7253 = shalt.err (!%p7250_p7)
}
  0x8a   :  { %101 = dma.hbm_to_vmem [thread:$0]  %s7664_s7, 1024, %s96_s22, [#allocation11], %s7321_s3, %s7321_s3, %s7322_s19  }
  0x8b   :  { %s7254_s14 = scalar_lea.hbm %s7666_s9, 1024 }
  0x8c   :  { %p7255_p8 = scmp.ne.s32.totalorder %s7666_s9, %s7254_s14  ;;  %p7258_p9 = scmp.lt.u32.totalorder %s7254_s14, %s7666_s9 }
  0x8e   :  { %p7260_p10 = pnand %p7258_p9, %p7255_p8 }
  0x90   :  { %7263 = shalt.err (!%p7260_p10)
}
  0x91   :  { %s7264_s17 = scalar_lea.vmem %s118_s26, 1024  ;;  %p7269_p12 = scmp.lt.s32.totalorder %s118_s26, %s118_s26 }
  0x92   :  { %p7265_p11 = scmp.ne.s32.totalorder %s118_s26, %s7264_s17  ;;  %p7270_p13 = scmp.lt.s32.totalorder %s7264_s17, %s7264_s17 }
  0x94   :  { %p7271_p0 = por %p7270_p13, %p7269_p12 }
  0x96   :  { %p7272_p1 = pnand %p7271_p0, %p7265_p11 }
  0x98   :  { %7275 = shalt.err (!%p7272_p1)
}
  0x99   :  { %123 = dma.hbm_to_vmem [thread:$0]  %s7666_s9, 1024, %s118_s26, [#allocation14], %s7321_s3, %s7321_s3, %s7322_s19  }
  0x9a   :  { %s7325_s2 = smov [#allocation16]   ;;  %s7276_s6 = scalar_lea.hbm %s7667_s10, 16 }
  0x9b   :  { %s130_s18 = sshll.u32 %s7325_s2, 4  ;;  %p7277_p2 = scmp.ne.s32.totalorder %s7667_s10, %s7276_s6  ;;  %s131_s18 = int_to_ptr.vmem [resolvable:$true] %s130_s18 }
  0x9c   :  { %p7280_p3 = scmp.lt.u32.totalorder %s7276_s6, %s7667_s10 }
  0x9e   :  { %p7282_p4 = pnand %p7280_p3, %p7277_p2 }
  0xa0   :  { %7285 = shalt.err (!%p7282_p4)
}
  0xa1   :  { %s7286_s29 = scalar_lea.vmem %s131_s18, 16  ;;  %s7290_s9 = scalar_lea.vmem %s131_s18, 32 }
  0xa2   :  { %p7287_p5 = scmp.ne.s32.totalorder %s131_s18, %s7286_s29  ;;  %p7291_p6 = scmp.lt.s32.totalorder %s131_s18, %s131_s18 }
  0xa3   :  { %p7292_p7 = scmp.lt.s32.totalorder %s7290_s9, %s7286_s29 }
  0xa5   :  { %p7293_p8 = por %p7292_p7, %p7291_p6 }
  0xa7   :  { %p7294_p9 = pnand %p7293_p8, %p7287_p5 }
  0xa9   :  { %7297 = shalt.err (!%p7294_p9)
}
  0xaa   :  { %133 = dma.hbm_to_vmem [thread:$0]  %s7667_s10, 16, %s131_s18, [#allocation17]  }
  0xab   :  { %7298 = dma.done.wait [#allocation3], 50176  }
  0xac   :  { %7299 = vsyncadd [#allocation3], 4294917120 }
  0xad   :  { %7300 = dma.done.wait [#allocation5], 32896  }
  0xae   :  { %7301 = vsyncadd [#allocation5], 4294934400 }
  0xaf   :  { %7302 = dma.done.wait [#allocation8], 4160  }
  0xb0   :  { %7303 = vsyncadd [#allocation8], 4294963136 }
  0xb1   :  { %7304 = dma.done.wait [#allocation11], 1040  }
  0xb2   :  { %7305 = vsyncadd [#allocation11], 4294966256 }
  0xb3   :  { %7306 = dma.done.wait [#allocation14], 1040  }
  0xb4   :  { %7307 = vsyncadd [#allocation14], 4294966256 }
  0xb5   :  { %7308 = dma.done.wait [#allocation17], 16  }
  0xb6   :  { %7309 = vsyncadd [#allocation17], 4294967280  ;;  %v179_v0 = vld [vmem:[#allocation2] sm:$0xff]  ;;  %v180_v2 = vld [vmem:[#allocation2 + $0x8] sm:$0xff]  ;;  %vm2573_vm0 = vcmask 130048   ;;  %vm7328_vm1 = vmmov 0  }
  0xb7   :  { %v183_v1 = vld [vmem:[#allocation2 + $0x20] sm:$0xff]  ;;  %v184_v4 = vld [vmem:[#allocation2 + $0x28] sm:$0xff] }
  0xb8   :  { %v5734_v3 = vcombine.high %v179_v0, %v183_v1  ;;  %v5733_v5 = vcombine.low %v179_v0, %v183_v1  ;;  %v187_v6 = vld [vmem:[#allocation2 + $0x40] sm:$0xff]  ;;  %v5736_v8 = vcombine.high %v180_v2, %v184_v4  ;;  %v5735_v9 = vcombine.low %v180_v2, %v184_v4  ;;  %v188_v11 = vld [vmem:[#allocation2 + $0x48] sm:$0xff] }
  0xb9   :  { %v191_v7 = vld [vmem:[#allocation2 + $0x60] sm:$0xff]  ;;  %v192_v12 = vld [vmem:[#allocation2 + $0x68] sm:$0xff] }
  0xba   :  { %v5742_v10 = vcombine.high %v187_v6, %v191_v7  ;;  %v195_v13 = vld [vmem:[#allocation2 + $0x80] sm:$0xff]  ;;  %2577 = vmatprep.subr.bf16.mxu0 %v5734_v3  ;;  %v5744_v14 = vcombine.high %v188_v11, %v192_v12  ;;  %v196_v16 = vld [vmem:[#allocation2 + $0x88] sm:$0xff]  ;;  %2741 = vmatprep.subr.bf16.mxu1 %v5736_v8  ;;  %v5741_v18 = vcombine.low %v187_v6, %v191_v7 }
  0xbb   :  { %v199_v15 = vld [vmem:[#allocation2 + $0xa0] sm:$0xff]  ;;  %v200_v17 = vld [vmem:[#allocation2 + $0xa8] sm:$0xff]  ;;  %2578 = vmatpush1.bf16.msra.mxu0 %v5733_v5  ;;  %2742 = vmatpush1.bf16.msra.mxu1 %v5735_v9  ;;  %v5743_v19 = vcombine.low %v188_v11, %v192_v12 }
  0xbc   :  { %2579 = vmatprep.subr.bf16.mxu0 %v5742_v10  ;;  %v5750_v20 = vcombine.high %v195_v13, %v199_v15  ;;  %2743 = vmatprep.subr.bf16.mxu1 %v5744_v14  ;;  %v5752_v21 = vcombine.high %v196_v16, %v200_v17  ;;  %v203_v22 = vld [vmem:[#allocation2 + $0xc0] sm:$0xff]  ;;  %v204_v24 = vld [vmem:[#allocation2 + $0xc8] sm:$0xff]  ;;  %v5749_v26 = vcombine.low %v195_v13, %v199_v15 }
  0xbd   :  { %v207_v23 = vld [vmem:[#allocation2 + $0xe0] sm:$0xff]  ;;  %v208_v25 = vld [vmem:[#allocation2 + $0xe8] sm:$0xff]  ;;  %v5751_v27 = vcombine.low %v196_v16, %v200_v17 }
  0xbe   :  { %v5758_v28 = vcombine.high %v203_v22, %v207_v23  ;;  %v5760_v29 = vcombine.high %v204_v24, %v208_v25  ;;  %v211_v30 = vld [vmem:[#allocation2 + $0x100] sm:$0xff]  ;;  %v212_v32 = vld [vmem:[#allocation2 + $0x108] sm:$0xff]  ;;  %v5757_v34 = vcombine.low %v203_v22, %v207_v23  ;;  %v5759_v35 = vcombine.low %v204_v24, %v208_v25 }
  0xbf   :  { %2580 = vmatpush1.bf16.msra.mxu0 %v5741_v18  ;;  %2744 = vmatpush1.bf16.msra.mxu1 %v5743_v19  ;;  %v215_v31 = vld [vmem:[#allocation2 + $0x120] sm:$0xff]  ;;  %v216_v33 = vld [vmem:[#allocation2 + $0x128] sm:$0xff] }
  0xc0   :  { %2581 = vmatprep.subr.bf16.mxu0 %v5750_v20  ;;  %2745 = vmatprep.subr.bf16.mxu1 %v5752_v21  ;;  %v5766_v36 = vcombine.high %v211_v30, %v215_v31  ;;  %v5768_v37 = vcombine.high %v212_v32, %v216_v33  ;;  %v219_v38 = vld [vmem:[#allocation2 + $0x140] sm:$0xff]  ;;  %v220_v40 = vld [vmem:[#allocation2 + $0x148] sm:$0xff]  ;;  %v5765_v42 = vcombine.low %v211_v30, %v215_v31 }
  0xc1   :  { %v223_v39 = vld [vmem:[#allocation2 + $0x160] sm:$0xff]  ;;  %v224_v41 = vld [vmem:[#allocation2 + $0x168] sm:$0xff]  ;;  %v5767_v43 = vcombine.low %v212_v32, %v216_v33 }
  0xc2   :  { %v5774_v44 = vcombine.high %v219_v38, %v223_v39  ;;  %v5776_v45 = vcombine.high %v220_v40, %v224_v41  ;;  %v227_v46 = vld [vmem:[#allocation2 + $0x180] sm:$0xff]  ;;  %v228_v48 = vld [vmem:[#allocation2 + $0x188] sm:$0xff]  ;;  %v5773_v50 = vcombine.low %v219_v38, %v223_v39  ;;  %v5775_v51 = vcombine.low %v220_v40, %v224_v41 }
  0xc3   :  { %2582 = vmatpush1.bf16.msra.mxu0 %v5749_v26  ;;  %2746 = vmatpush1.bf16.msra.mxu1 %v5751_v27  ;;  %v231_v47 = vld [vmem:[#allocation2 + $0x1a0] sm:$0xff]  ;;  %v232_v49 = vld [vmem:[#allocation2 + $0x1a8] sm:$0xff] }
  0xc4   :  { %2583 = vmatprep.subr.bf16.mxu0 %v5758_v28  ;;  %2747 = vmatprep.subr.bf16.mxu1 %v5760_v29  ;;  %v5782_v52 = vcombine.high %v227_v46, %v231_v47  ;;  %v166_v53 = vld [vmem:[%s7657_s0 + $0x8] sm:$0xff]  ;;  %v5784_v54 = vcombine.high %v228_v48, %v232_v49  ;;  %v235_v55 = vld [vmem:[#allocation2 + $0x1c0] sm:$0xff]  ;;  %v5781_v60 = vcombine.low %v227_v46, %v231_v47 }
  0xc5   :  { %v239_v56 = vld [vmem:[#allocation2 + $0x1e0] sm:$0xff]  ;;  %v7521_v57 = vpack.c.bf16 %v166_v53, %v166_v53  ;;  %v236_v58 = vld [vmem:[#allocation2 + $0x1c8] sm:$0xff]  ;;  %v5783_v61 = vcombine.low %v228_v48, %v232_v49 }
  0xc6   :  { %v240_v59 = vld [vmem:[#allocation2 + $0x1e8] sm:$0xff]  ;;  %v5790_v62 = vcombine.high %v235_v55, %v239_v56  ;;  %v243_v0 = vld [vmem:[#allocation2 + $0x200] sm:$0xff]  ;;  %v5789_v4 = vcombine.low %v235_v55, %v239_v56 }
  0xc7   :  { %2584 = vmatpush1.bf16.msra.mxu0 %v5757_v34  ;;  %2748 = vmatpush1.bf16.msra.mxu1 %v5759_v35  ;;  %v5792_v63 = vcombine.high %v236_v58, %v240_v59  ;;  %v247_v1 = vld [vmem:[#allocation2 + $0x220] sm:$0xff]  ;;  %v244_v2 = vld [vmem:[#allocation2 + $0x208] sm:$0xff]  ;;  %v5791_v5 = vcombine.low %v236_v58, %v240_v59 }
  0xc8   :  { %2585 = vmatprep.subr.bf16.mxu0 %v5766_v36  ;;  %2749 = vmatprep.subr.bf16.mxu1 %v5768_v37  ;;  %v248_v3 = vld [vmem:[#allocation2 + $0x228] sm:$0xff]  ;;  %v5798_v6 = vcombine.high %v243_v0, %v247_v1  ;;  %v251_v8 = vld [vmem:[#allocation2 + $0x240] sm:$0xff]  ;;  %v5797_v12 = vcombine.low %v243_v0, %v247_v1 }
  0xc9   :  { %2609 = vmatprep.mubr.bf16.mxu0 %v7521_v57  ;;  %2773 = vmatprep.mubr.bf16.mxu1 %v7521_v57  ;;  %v5800_v7 = vcombine.high %v244_v2, %v248_v3  ;;  %v255_v9 = vld [vmem:[#allocation2 + $0x260] sm:$0xff]  ;;  %v252_v10 = vld [vmem:[#allocation2 + $0x248] sm:$0xff]  ;;  %v5799_v13 = vcombine.low %v244_v2, %v248_v3 }
  0xca   :  { %v256_v11 = vld [vmem:[#allocation2 + $0x268] sm:$0xff]  ;;  %v5806_v14 = vcombine.high %v251_v8, %v255_v9  ;;  %v259_v16 = vld [vmem:[#allocation2 + $0x280] sm:$0xff]  ;;  %v5805_v20 = vcombine.low %v251_v8, %v255_v9 }
  0xcb   :  { %2586 = vmatpush1.bf16.msra.mxu0 %v5765_v42  ;;  %2750 = vmatpush1.bf16.msra.mxu1 %v5767_v43  ;;  %v5808_v15 = vcombine.high %v252_v10, %v256_v11  ;;  %v263_v17 = vld [vmem:[#allocation2 + $0x2a0] sm:$0xff]  ;;  %v260_v18 = vld [vmem:[#allocation2 + $0x288] sm:$0xff]  ;;  %v5807_v21 = vcombine.low %v252_v10, %v256_v11 }
  0xcc   :  { %2587 = vmatprep.subr.bf16.mxu0 %v5774_v44  ;;  %2751 = vmatprep.subr.bf16.mxu1 %v5776_v45  ;;  %v264_v19 = vld [vmem:[#allocation2 + $0x2a8] sm:$0xff]  ;;  %v5814_v22 = vcombine.high %v259_v16, %v263_v17  ;;  %v267_v24 = vld [vmem:[#allocation2 + $0x2c0] sm:$0xff]  ;;  %v5813_v28 = vcombine.low %v259_v16, %v263_v17 }
  0xcd   :  { %v5816_v23 = vcombine.high %v260_v18, %v264_v19  ;;  %v271_v25 = vld [vmem:[#allocation2 + $0x2e0] sm:$0xff]  ;;  %v268_v26 = vld [vmem:[#allocation2 + $0x2c8] sm:$0xff]  ;;  %v5815_v29 = vcombine.low %v260_v18, %v264_v19 }
  0xce   :  { %v272_v27 = vld [vmem:[#allocation2 + $0x2e8] sm:$0xff]  ;;  %v5822_v30 = vcombine.high %v267_v24, %v271_v25  ;;  %v275_v32 = vld [vmem:[#allocation2 + $0x300] sm:$0xff]  ;;  %v5821_v36 = vcombine.low %v267_v24, %v271_v25 }
  0xcf   :  { %2588 = vmatpush1.bf16.msra.mxu0 %v5773_v50  ;;  %2752 = vmatpush1.bf16.msra.mxu1 %v5775_v51  ;;  %v5824_v31 = vcombine.high %v268_v26, %v272_v27  ;;  %v279_v33 = vld [vmem:[#allocation2 + $0x320] sm:$0xff]  ;;  %v276_v34 = vld [vmem:[#allocation2 + $0x308] sm:$0xff]  ;;  %v5823_v37 = vcombine.low %v268_v26, %v272_v27 }
  0xd0   :  { %2589 = vmatprep.subr.bf16.mxu0 %v5782_v52  ;;  %2753 = vmatprep.subr.bf16.mxu1 %v5784_v54  ;;  %v280_v35 = vld [vmem:[#allocation2 + $0x328] sm:$0xff]  ;;  %v5830_v38 = vcombine.high %v275_v32, %v279_v33  ;;  %v283_v40 = vld [vmem:[#allocation2 + $0x340] sm:$0xff]  ;;  %v5829_v44 = vcombine.low %v275_v32, %v279_v33 }
  0xd1   :  { %v5832_v39 = vcombine.high %v276_v34, %v280_v35  ;;  %v287_v41 = vld [vmem:[#allocation2 + $0x360] sm:$0xff]  ;;  %v284_v42 = vld [vmem:[#allocation2 + $0x348] sm:$0xff]  ;;  %v5831_v45 = vcombine.low %v276_v34, %v280_v35 }
  0xd2   :  { %v288_v43 = vld [vmem:[#allocation2 + $0x368] sm:$0xff]  ;;  %v5838_v46 = vcombine.high %v283_v40, %v287_v41  ;;  %v291_v48 = vld [vmem:[#allocation2 + $0x380] sm:$0xff]  ;;  %v5837_v52 = vcombine.low %v283_v40, %v287_v41 }
  0xd3   :  { %2590 = vmatpush1.bf16.msra.mxu0 %v5781_v60  ;;  %2754 = vmatpush1.bf16.msra.mxu1 %v5783_v61  ;;  %v5840_v47 = vcombine.high %v284_v42, %v288_v43  ;;  %v295_v49 = vld [vmem:[#allocation2 + $0x3a0] sm:$0xff]  ;;  %v292_v50 = vld [vmem:[#allocation2 + $0x388] sm:$0xff]  ;;  %v5839_v53 = vcombine.low %v284_v42, %v288_v43 }
  0xd4   :  { %2591 = vmatprep.subr.bf16.mxu0 %v5790_v62  ;;  %2755 = vmatprep.subr.bf16.mxu1 %v5792_v63  ;;  %v296_v51 = vld [vmem:[#allocation2 + $0x3a8] sm:$0xff]  ;;  %v5846_v54 = vcombine.high %v291_v48, %v295_v49  ;;  %v299_v56 = vld [vmem:[#allocation2 + $0x3c0] sm:$0xff]  ;;  %v5845_v61 = vcombine.low %v291_v48, %v295_v49 }
  0xd5   :  { %v5848_v55 = vcombine.high %v292_v50, %v296_v51  ;;  %v303_v58 = vld [vmem:[#allocation2 + $0x3e0] sm:$0xff]  ;;  %v300_v59 = vld [vmem:[#allocation2 + $0x3c8] sm:$0xff]  ;;  %v5847_v62 = vcombine.low %v292_v50, %v296_v51 }
  0xd6   :  { %v304_v60 = vld [vmem:[#allocation2 + $0x3e8] sm:$0xff]  ;;  %v5854_v63 = vcombine.high %v299_v56, %v303_v58  ;;  %v307_v1 = vld [vmem:[#allocation2 + $0x400] sm:$0xff] }
  0xd7   :  { %2592 = vmatpush1.bf16.msra.mxu0 %v5789_v4  ;;  %2756 = vmatpush1.bf16.msra.mxu1 %v5791_v5  ;;  %v5856_v0 = vcombine.high %v300_v59, %v304_v60  ;;  %v311_v2 = vld [vmem:[#allocation2 + $0x420] sm:$0xff]  ;;  %v308_v3 = vld [vmem:[#allocation2 + $0x408] sm:$0xff]  ;;  %v5853_v5 = vcombine.low %v299_v56, %v303_v58 }
  0xd8   :  { %2593 = vmatprep.subr.bf16.mxu0 %v5798_v6  ;;  %2757 = vmatprep.subr.bf16.mxu1 %v5800_v7  ;;  %v312_v4 = vld [vmem:[#allocation2 + $0x428] sm:$0xff]  ;;  %v165_v6 = vld [vmem:[%s7657_s0] sm:$0xff]  ;;  %v5855_v7 = vcombine.low %v300_v59, %v304_v60  ;;  %v5862_v8 = vcombine.high %v307_v1, %v311_v2  ;;  %v5861_v16 = vcombine.low %v307_v1, %v311_v2 }
  0xd9   :  { %v5864_v9 = vcombine.high %v308_v3, %v312_v4  ;;  %v315_v10 = vld [vmem:[#allocation2 + $0x440] sm:$0xff]  ;;  %v5863_v17 = vcombine.low %v308_v3, %v312_v4  ;;  %v328_v24 = vld [vmem:[#allocation2 + $0x4a8] sm:$0xff] }
  0xda   :  { %v319_v11 = vld [vmem:[#allocation2 + $0x460] sm:$0xff]  ;;  %v336_v32 = vld [vmem:[#allocation2 + $0x4e8] sm:$0xff] }
  0xdb   :  { %2594 = vmatpush1.bf16.msra.mxu0 %v5797_v12  ;;  %2758 = vmatpush1.bf16.msra.mxu1 %v5799_v13  ;;  %v7528_v12 = vpack.c.bf16 %v165_v6, %v165_v6  ;;  %v316_v13 = vld [vmem:[#allocation2 + $0x448] sm:$0xff]  ;;  %v5870_v18 = vcombine.high %v315_v10, %v319_v11  ;;  %v323_v19 = vld [vmem:[#allocation2 + $0x480] sm:$0xff]  ;;  %v5869_v25 = vcombine.low %v315_v10, %v319_v11 }
  0xdc   :  { %2595 = vmatprep.subr.bf16.mxu0 %v5806_v14  ;;  %2759 = vmatprep.subr.bf16.mxu1 %v5808_v15  ;;  %v320_v14 = vld [vmem:[#allocation2 + $0x468] sm:$0xff]  ;;  %v168_v15 = vld [vmem:[%s7657_s0 + $0x18] sm:$0xff]  ;;  %v339_v34 = vld [vmem:[#allocation2 + $0x500] sm:$0xff] }
  0xdd   :  { %v5871_v26 = vcombine.low %v316_v13, %v320_v14  ;;  %v343_v35 = vld [vmem:[#allocation2 + $0x520] sm:$0xff]  ;;  %v360_v56 = vld [vmem:[#allocation2 + $0x5a8] sm:$0xff] }
  0xde   :  { %v347_v42 = vld [vmem:[#allocation2 + $0x540] sm:$0xff]  ;;  %v5893_v49 = vcombine.low %v339_v34, %v343_v35  ;;  %v368_v1 = vld [vmem:[#allocation2 + $0x5e8] sm:$0xff] }
  0xdf   :  { %2596 = vmatpush1.bf16.msra.mxu0 %v5805_v20  ;;  %2760 = vmatpush1.bf16.msra.mxu1 %v5807_v21  ;;  %v327_v20 = vld [vmem:[#allocation2 + $0x4a0] sm:$0xff]  ;;  %v5872_v21 = vcombine.high %v316_v13, %v320_v14 }
  0xe0   :  { %2597 = vmatprep.subr.bf16.mxu0 %v5814_v22  ;;  %2761 = vmatprep.subr.bf16.mxu1 %v5816_v23  ;;  %v7533_v22 = vpack.c.bf16 %v168_v15, %v168_v15  ;;  %v324_v23 = vld [vmem:[#allocation2 + $0x488] sm:$0xff]  ;;  %v5878_v27 = vcombine.high %v323_v19, %v327_v20  ;;  %v5877_v33 = vcombine.low %v323_v19, %v327_v20  ;;  %v351_v43 = vld [vmem:[#allocation2 + $0x560] sm:$0xff] }
  0xe1   :  { %v5902_v51 = vcombine.high %v347_v42, %v351_v43  ;;  %v5901_v58 = vcombine.low %v347_v42, %v351_v43  ;;  %v375_v6 = vld [vmem:[#allocation2 + $0x620] sm:$0xff]  ;;  %v408_v43 = vld [vmem:[#allocation2 + $0x728] sm:$0xff] }
  0xe2   :  { %v379_v14 = vld [vmem:[#allocation2 + $0x640] sm:$0xff] }
  0xe3   :  { %2598 = vmatpush1.bf16.msra.mxu0 %v5813_v28  ;;  %2762 = vmatpush1.bf16.msra.mxu1 %v5815_v29  ;;  %v5880_v28 = vcombine.high %v324_v23, %v328_v24  ;;  %v331_v29 = vld [vmem:[#allocation2 + $0x4c0] sm:$0xff] }
  0xe4   :  { %2599 = vmatprep.subr.bf16.mxu0 %v5822_v30  ;;  %2763 = vmatprep.subr.bf16.mxu1 %v5824_v31  ;;  %v335_v30 = vld [vmem:[#allocation2 + $0x4e0] sm:$0xff]  ;;  %v332_v31 = vld [vmem:[#allocation2 + $0x4c8] sm:$0xff] }
  0xe5   :  { %v5888_v40 = vcombine.high %v332_v31, %v336_v32  ;;  %v5885_v41 = vcombine.low %v331_v29, %v335_v30  ;;  %v383_v15 = vld [vmem:[#allocation2 + $0x660] sm:$0xff] }
  0xe7   :  { %2600 = vmatpush1.bf16.msra.mxu0 %v5821_v36  ;;  %2764 = vmatpush1.bf16.msra.mxu1 %v5823_v37  ;;  %v5879_v36 = vcombine.low %v324_v23, %v328_v24  ;;  %v5886_v37 = vcombine.high %v331_v29, %v335_v30  ;;  %v387_v23 = vld [vmem:[#allocation2 + $0x680] sm:$0xff] }
  0xe8   :  { %2601 = vmatprep.subr.bf16.mxu0 %v5830_v38  ;;  %2765 = vmatprep.subr.bf16.mxu1 %v5832_v39  ;;  %v340_v38 = vld [vmem:[#allocation2 + $0x508] sm:$0xff]  ;;  %v391_v24 = vld [vmem:[#allocation2 + $0x6a0] sm:$0xff] }
  0xe9   :  { %v344_v39 = vld [vmem:[#allocation2 + $0x528] sm:$0xff]  ;;  %v5942_v30 = vcombine.high %v387_v23, %v391_v24 }
  0xea   :  { %v5896_v48 = vcombine.high %v340_v38, %v344_v39  ;;  %v5895_v50 = vcombine.low %v340_v38, %v344_v39  ;;  %v403_v39 = vld [vmem:[#allocation2 + $0x700] sm:$0xff] }
  0xeb   :  { %2602 = vmatpush1.bf16.msra.mxu0 %v5829_v44  ;;  %2766 = vmatpush1.bf16.msra.mxu1 %v5831_v45  ;;  %v5887_v44 = vcombine.low %v332_v31, %v336_v32  ;;  %v5894_v45 = vcombine.high %v339_v34, %v343_v35  ;;  %v395_v31 = vld [vmem:[#allocation2 + $0x6c0] sm:$0xff]  ;;  %v400_v35 = vld [vmem:[#allocation2 + $0x6e8] sm:$0xff] }
  0xec   :  { %2603 = vmatprep.subr.bf16.mxu0 %v5838_v46  ;;  %2767 = vmatprep.subr.bf16.mxu1 %v5840_v47  ;;  %v348_v46 = vld [vmem:[#allocation2 + $0x548] sm:$0xff]  ;;  %v399_v32 = vld [vmem:[#allocation2 + $0x6e0] sm:$0xff] }
  0xed   :  { %v352_v47 = vld [vmem:[#allocation2 + $0x568] sm:$0xff]  ;;  %v5950_v38 = vcombine.high %v395_v31, %v399_v32 }
  0xee   :  { %v5903_v59 = vcombine.low %v348_v46, %v352_v47 }
  0xef   :  { %2604 = vmatpush1.bf16.msra.mxu0 %v5837_v52  ;;  %2768 = vmatpush1.bf16.msra.mxu1 %v5839_v53  ;;  %v355_v52 = vld [vmem:[#allocation2 + $0x580] sm:$0xff] }
  0xf0   :  { %2605 = vmatprep.subr.bf16.mxu0 %v5846_v54  ;;  %2769 = vmatprep.subr.bf16.mxu1 %v5848_v55  ;;  %v359_v53 = vld [vmem:[#allocation2 + $0x5a0] sm:$0xff]  ;;  %v356_v54 = vld [vmem:[#allocation2 + $0x588] sm:$0xff]  ;;  %v5904_v55 = vcombine.high %v348_v46, %v352_v47 }
  0xf1   :  { %v5910_v60 = vcombine.high %v355_v52, %v359_v53  ;;  %v5909_v2 = vcombine.low %v355_v52, %v359_v53  ;;  %v5911_v3 = vcombine.low %v356_v54, %v360_v56  ;;  %v411_v47 = vld [vmem:[#allocation2 + $0x740] sm:$0xff] }
  0xf3   :  { %2606 = vmatpush1.bf16.msra.mxu0 %v5845_v61  ;;  %2770 = vmatpush1.bf16.msra.mxu1 %v5847_v62  ;;  %v363_v61 = vld [vmem:[#allocation2 + $0x5c0] sm:$0xff] }
  0xf4   :  { %2607 = vmatprep.subr.bf16.mxu0 %v5854_v63  ;;  %2771 = vmatprep.subr.bf16.mxu1 %v5856_v0  ;;  %v367_v62 = vld [vmem:[#allocation2 + $0x5e0] sm:$0xff]  ;;  %v364_v63 = vld [vmem:[#allocation2 + $0x5c8] sm:$0xff]  ;;  %v5912_v0 = vcombine.high %v356_v54, %v360_v56 }
  0xf5   :  { %v5918_v4 = vcombine.high %v363_v61, %v367_v62  ;;  %v5917_v10 = vcombine.low %v363_v61, %v367_v62  ;;  %v5919_v11 = vcombine.low %v364_v63, %v368_v1  ;;  %v423_v56 = vld [vmem:[#allocation2 + $0x7a0] sm:$0xff] }
  0xf7   :  { %2608 = vmatpush1.bf16.msra.mxu0 %v5853_v5  ;;  %2772 = vmatpush1.bf16.msra.mxu1 %v5855_v7  ;;  %v371_v5 = vld [vmem:[#allocation2 + $0x600] sm:$0xff]  ;;  %v372_v7 = vld [vmem:[#allocation2 + $0x608] sm:$0xff] }
  0xf8   :  { %2618 = vmatprep.subr.bf16.mxu0 %v5862_v8  ;;  %2782 = vmatprep.subr.bf16.mxu1 %v5864_v9  ;;  %v5920_v8 = vcombine.high %v364_v63, %v368_v1  ;;  %v376_v9 = vld [vmem:[#allocation2 + $0x628] sm:$0xff]  ;;  %v5926_v13 = vcombine.high %v371_v5, %v375_v6  ;;  %v5925_v19 = vcombine.low %v371_v5, %v375_v6  ;;  %v431_v1 = vld [vmem:[#allocation2 + $0x7e0] sm:$0xff] }
  0xf9   :  { %v5927_v20 = vcombine.low %v372_v7, %v376_v9  ;;  %v435_v6 = vld [vmem:[#allocation2 + $0x800] sm:$0xff] }
  0xfa   :  { %2610 = vmatmul.mubr.bf16.vlgmr.msra.gmra.mrb[0].mxu0 %v7528_v12  ;;  %2774 = vmatmul.mubr.bf16.vlgmr.msra.gmra.mrb[0].mxu1 %v7528_v12 }
  0xfb   :  { %2619 = vmatpush1.bf16.msra.mxu0 %v5861_v16  ;;  %2783 = vmatpush1.bf16.msra.mxu1 %v5863_v17  ;;  %v380_v16 = vld [vmem:[#allocation2 + $0x648] sm:$0xff]  ;;  %v5928_v17 = vcombine.high %v372_v7, %v376_v9  ;;  %v439_v9 = vld [vmem:[#allocation2 + $0x820] sm:$0xff] }
  0xfc   :  { %2620 = vmatprep.subr.bf16.mxu0 %v5870_v18  ;;  %2784 = vmatprep.subr.bf16.mxu1 %v5872_v21  ;;  %v384_v18 = vld [vmem:[#allocation2 + $0x668] sm:$0xff]  ;;  %v5934_v21 = vcombine.high %v379_v14, %v383_v15 }
  0xfd   :  { %2650 = vmatprep.mubr.bf16.mxu0 %v7533_v22  ;;  %2814 = vmatprep.mubr.bf16.mxu1 %v7533_v22  ;;  %v5935_v29 = vcombine.low %v380_v16, %v384_v18 }
  0xff   :  { %2621 = vmatpush1.bf16.msra.mxu0 %v5869_v25  ;;  %2785 = vmatpush1.bf16.msra.mxu1 %v5871_v26  ;;  %v388_v25 = vld [vmem:[#allocation2 + $0x688] sm:$0xff]  ;;  %v5936_v26 = vcombine.high %v380_v16, %v384_v18  ;;  %v443_v16 = vld [vmem:[#allocation2 + $0x840] sm:$0xff]  ;;  %v5990_v18 = vcombine.high %v435_v6, %v439_v9 }
 0x100   :  { %2622 = vmatprep.subr.bf16.mxu0 %v5878_v27  ;;  %2786 = vmatprep.subr.bf16.mxu1 %v5880_v28  ;;  %v392_v27 = vld [vmem:[#allocation2 + $0x6a8] sm:$0xff]  ;;  %v5933_v28 = vcombine.low %v379_v14, %v383_v15  ;;  %v167_v14 = vld [vmem:[%s7657_s0 + $0x10] sm:$0xff] }
 0x101   :  { %v5944_v34 = vcombine.high %v388_v25, %v392_v27 }
 0x103   :  { %2623 = vmatpush1.bf16.msra.mxu0 %v5877_v33  ;;  %2787 = vmatpush1.bf16.msra.mxu1 %v5879_v36  ;;  %v396_v33 = vld [vmem:[#allocation2 + $0x6c8] sm:$0xff]  ;;  %v5941_v36 = vcombine.low %v387_v23, %v391_v24 }
 0x104   :  { %2624 = vmatprep.subr.bf16.mxu0 %v5886_v37  ;;  %2788 = vmatprep.subr.bf16.mxu1 %v5888_v40  ;;  %v5943_v37 = vcombine.low %v388_v25, %v392_v27  ;;  %v407_v40 = vld [vmem:[#allocation2 + $0x720] sm:$0xff]  ;;  %v5952_v42 = vcombine.high %v396_v33, %v400_v35  ;;  %v170_v24 = vld [vmem:[%s7657_s0 + $0x28] sm:$0xff]  ;;  %v7545_v25 = vpack.c.bf16 %v167_v14, %v167_v14 }
 0x105   :  { %v5958_v46 = vcombine.high %v403_v39, %v407_v40  ;;  %v5957_v52 = vcombine.low %v403_v39, %v407_v40  ;;  %v463_v39 = vld [vmem:[#allocation2 + $0x8e0] sm:$0xff]  ;;  %v460_v40 = vld [vmem:[#allocation2 + $0x8c8] sm:$0xff] }
 0x107   :  { %2625 = vmatpush1.bf16.msra.mxu0 %v5885_v41  ;;  %2789 = vmatpush1.bf16.msra.mxu1 %v5887_v44  ;;  %v404_v41 = vld [vmem:[#allocation2 + $0x708] sm:$0xff]  ;;  %v5949_v44 = vcombine.low %v395_v31, %v399_v32 }
 0x108   :  { %2626 = vmatprep.subr.bf16.mxu0 %v5894_v45  ;;  %2790 = vmatprep.subr.bf16.mxu1 %v5896_v48  ;;  %v5951_v45 = vcombine.low %v396_v33, %v400_v35  ;;  %v415_v48 = vld [vmem:[#allocation2 + $0x760] sm:$0xff]  ;;  %v5959_v53 = vcombine.low %v404_v41, %v408_v43  ;;  %v452_v31 = vld [vmem:[#allocation2 + $0x888] sm:$0xff] }
 0x109   :  { %v5966_v54 = vcombine.high %v411_v47, %v415_v48  ;;  %v5965_v61 = vcombine.low %v411_v47, %v415_v48  ;;  %v456_v33 = vld [vmem:[#allocation2 + $0x8a8] sm:$0xff]  ;;  %v471_v47 = vld [vmem:[#allocation2 + $0x920] sm:$0xff] }
 0x10a   :  { %v468_v48 = vld [vmem:[#allocation2 + $0x908] sm:$0xff] }
 0x10b   :  { %2627 = vmatpush1.bf16.msra.mxu0 %v5893_v49  ;;  %2791 = vmatpush1.bf16.msra.mxu1 %v5895_v50  ;;  %v412_v49 = vld [vmem:[#allocation2 + $0x748] sm:$0xff]  ;;  %v5960_v50 = vcombine.high %v404_v41, %v408_v43  ;;  %v6008_v41 = vcombine.high %v452_v31, %v456_v33 }
 0x10c   :  { %2628 = vmatprep.subr.bf16.mxu0 %v5902_v51  ;;  %2792 = vmatprep.subr.bf16.mxu1 %v5904_v55  ;;  %v416_v51 = vld [vmem:[#allocation2 + $0x768] sm:$0xff]  ;;  %v419_v55 = vld [vmem:[#allocation2 + $0x780] sm:$0xff] }
 0x10d   :  { %v5967_v62 = vcombine.low %v412_v49, %v416_v51  ;;  %v5974_v63 = vcombine.high %v419_v55, %v423_v56  ;;  %v5973_v5 = vcombine.low %v419_v55, %v423_v56  ;;  %v479_v55 = vld [vmem:[#allocation2 + $0x960] sm:$0xff]  ;;  %v476_v56 = vld [vmem:[#allocation2 + $0x948] sm:$0xff] }
 0x10f   :  { %2629 = vmatpush1.bf16.msra.mxu0 %v5901_v58  ;;  %2793 = vmatpush1.bf16.msra.mxu1 %v5903_v59  ;;  %v420_v58 = vld [vmem:[#allocation2 + $0x788] sm:$0xff]  ;;  %v5968_v59 = vcombine.high %v412_v49, %v416_v51 }
 0x110   :  { %2630 = vmatprep.subr.bf16.mxu0 %v5910_v60  ;;  %2794 = vmatprep.subr.bf16.mxu1 %v5912_v0  ;;  %v424_v60 = vld [vmem:[#allocation2 + $0x7a8] sm:$0xff]  ;;  %v427_v0 = vld [vmem:[#allocation2 + $0x7c0] sm:$0xff] }
 0x111   :  { %v5975_v7 = vcombine.low %v420_v58, %v424_v60  ;;  %v5981_v15 = vcombine.low %v427_v0, %v431_v1 }
 0x113   :  { %2631 = vmatpush1.bf16.msra.mxu0 %v5909_v2  ;;  %2795 = vmatpush1.bf16.msra.mxu1 %v5911_v3  ;;  %v428_v2 = vld [vmem:[#allocation2 + $0x7c8] sm:$0xff]  ;;  %v5976_v3 = vcombine.high %v420_v58, %v424_v60 }
 0x114   :  { %2632 = vmatprep.subr.bf16.mxu0 %v5918_v4  ;;  %2796 = vmatprep.subr.bf16.mxu1 %v5920_v8  ;;  %v432_v4 = vld [vmem:[#allocation2 + $0x7e8] sm:$0xff]  ;;  %v5982_v8 = vcombine.high %v427_v0, %v431_v1  ;;  %v487_v0 = vld [vmem:[#allocation2 + $0x9a0] sm:$0xff] }
 0x115   :  { %v484_v1 = vld [vmem:[#allocation2 + $0x988] sm:$0xff] }
 0x117   :  { %2633 = vmatpush1.bf16.msra.mxu0 %v5917_v10  ;;  %2797 = vmatpush1.bf16.msra.mxu1 %v5919_v11  ;;  %v436_v10 = vld [vmem:[#allocation2 + $0x808] sm:$0xff] }
 0x118   :  { %2634 = vmatprep.subr.bf16.mxu0 %v5926_v13  ;;  %2798 = vmatprep.subr.bf16.mxu1 %v5928_v17  ;;  %v440_v11 = vld [vmem:[#allocation2 + $0x828] sm:$0xff]  ;;  %v5984_v13 = vcombine.high %v428_v2, %v432_v4  ;;  %v5983_v17 = vcombine.low %v428_v2, %v432_v4 }
 0x119   :  { %v5992_v23 = vcombine.high %v436_v10, %v440_v11  ;;  %v5991_v27 = vcombine.low %v436_v10, %v440_v11  ;;  %v496_v11 = vld [vmem:[#allocation2 + $0x9e8] sm:$0xff] }
 0x11b   :  { %2635 = vmatpush1.bf16.msra.mxu0 %v5925_v19  ;;  %2799 = vmatpush1.bf16.msra.mxu1 %v5927_v20  ;;  %v447_v19 = vld [vmem:[#allocation2 + $0x860] sm:$0xff]  ;;  %v444_v20 = vld [vmem:[#allocation2 + $0x848] sm:$0xff] }
 0x11c   :  { %2636 = vmatprep.subr.bf16.mxu0 %v5934_v21  ;;  %2800 = vmatprep.subr.bf16.mxu1 %v5936_v26  ;;  %v448_v21 = vld [vmem:[#allocation2 + $0x868] sm:$0xff]  ;;  %v5989_v26 = vcombine.low %v435_v6, %v439_v9  ;;  %v5997_v35 = vcombine.low %v443_v16, %v447_v19 }
 0x11d   :  { %v6000_v32 = vcombine.high %v444_v20, %v448_v21  ;;  %v492_v9 = vld [vmem:[#allocation2 + $0x9c8] sm:$0xff] }
 0x11f   :  { %2637 = vmatpush1.bf16.msra.mxu0 %v5933_v28  ;;  %2801 = vmatpush1.bf16.msra.mxu1 %v5935_v29  ;;  %v5998_v28 = vcombine.high %v443_v16, %v447_v19  ;;  %v451_v29 = vld [vmem:[#allocation2 + $0x880] sm:$0xff]  ;;  %v6048_v19 = vcombine.high %v492_v9, %v496_v11 }
 0x120   :  { %2638 = vmatprep.subr.bf16.mxu0 %v5942_v30  ;;  %2802 = vmatprep.subr.bf16.mxu1 %v5944_v34  ;;  %v455_v30 = vld [vmem:[#allocation2 + $0x8a0] sm:$0xff]  ;;  %v7547_v34 = vpack.c.bf16 %v170_v24, %v170_v24 }
 0x121   :  { %v6005_v43 = vcombine.low %v451_v29, %v455_v30  ;;  %v499_v16 = vld [vmem:[#allocation2 + $0xa00] sm:$0xff] }
 0x123   :  { %2639 = vmatpush1.bf16.msra.mxu0 %v5941_v36  ;;  %2803 = vmatpush1.bf16.msra.mxu1 %v5943_v37  ;;  %v5999_v36 = vcombine.low %v444_v20, %v448_v21  ;;  %v6006_v37 = vcombine.high %v451_v29, %v455_v30  ;;  %v504_v20 = vld [vmem:[#allocation2 + $0xa28] sm:$0xff] }
 0x124   :  { %2640 = vmatprep.subr.bf16.mxu0 %v5950_v38  ;;  %2804 = vmatprep.subr.bf16.mxu1 %v5952_v42  ;;  %v459_v38 = vld [vmem:[#allocation2 + $0x8c0] sm:$0xff]  ;;  %v464_v42 = vld [vmem:[#allocation2 + $0x8e8] sm:$0xff] }
 0x125   :  { %v6016_v49 = vcombine.high %v460_v40, %v464_v42  ;;  %v6013_v51 = vcombine.low %v459_v38, %v463_v39  ;;  %v512_v30 = vld [vmem:[#allocation2 + $0xa68] sm:$0xff] }
 0x127   :  { %2641 = vmatpush1.bf16.msra.mxu0 %v5949_v44  ;;  %2805 = vmatpush1.bf16.msra.mxu1 %v5951_v45  ;;  %v6007_v44 = vcombine.low %v452_v31, %v456_v33  ;;  %v6014_v45 = vcombine.high %v459_v38, %v463_v39  ;;  %v520_v39 = vld [vmem:[#allocation2 + $0xaa8] sm:$0xff] }
 0x128   :  { %2642 = vmatprep.subr.bf16.mxu0 %v5958_v46  ;;  %2806 = vmatprep.subr.bf16.mxu1 %v5960_v50  ;;  %v467_v46 = vld [vmem:[#allocation2 + $0x900] sm:$0xff]  ;;  %v472_v50 = vld [vmem:[#allocation2 + $0x928] sm:$0xff] }
 0x129   :  { %v6024_v58 = vcombine.high %v468_v48, %v472_v50  ;;  %v6021_v60 = vcombine.low %v467_v46, %v471_v47 }
 0x12b   :  { %2643 = vmatpush1.bf16.msra.mxu0 %v5957_v52  ;;  %2807 = vmatpush1.bf16.msra.mxu1 %v5959_v53  ;;  %v6015_v52 = vcombine.low %v460_v40, %v464_v42  ;;  %v6022_v53 = vcombine.high %v467_v46, %v471_v47  ;;  %v528_v47 = vld [vmem:[#allocation2 + $0xae8] sm:$0xff] }
 0x12c   :  { %2644 = vmatprep.subr.bf16.mxu0 %v5966_v54  ;;  %2808 = vmatprep.subr.bf16.mxu1 %v5968_v59  ;;  %v475_v54 = vld [vmem:[#allocation2 + $0x940] sm:$0xff]  ;;  %v480_v59 = vld [vmem:[#allocation2 + $0x968] sm:$0xff] }
 0x12d   :  { %v6032_v2 = vcombine.high %v476_v56, %v480_v59  ;;  %v6029_v4 = vcombine.low %v475_v54, %v479_v55 }
 0x12f   :  { %2645 = vmatpush1.bf16.msra.mxu0 %v5965_v61  ;;  %2809 = vmatpush1.bf16.msra.mxu1 %v5967_v62  ;;  %v6023_v61 = vcombine.low %v468_v48, %v472_v50  ;;  %v6030_v62 = vcombine.high %v475_v54, %v479_v55  ;;  %v536_v55 = vld [vmem:[#allocation2 + $0xb28] sm:$0xff] }
 0x130   :  { %2646 = vmatprep.subr.bf16.mxu0 %v5974_v63  ;;  %2810 = vmatprep.subr.bf16.mxu1 %v5976_v3  ;;  %v483_v63 = vld [vmem:[#allocation2 + $0x980] sm:$0xff]  ;;  %v488_v3 = vld [vmem:[#allocation2 + $0x9a8] sm:$0xff] }
 0x131   :  { %v6038_v6 = vcombine.high %v483_v63, %v487_v0  ;;  %v6040_v10 = vcombine.high %v484_v1, %v488_v3  ;;  %v6039_v14 = vcombine.low %v484_v1, %v488_v3 }
 0x133   :  { %2647 = vmatpush1.bf16.msra.mxu0 %v5973_v5  ;;  %2811 = vmatpush1.bf16.msra.mxu1 %v5975_v7  ;;  %v6031_v5 = vcombine.low %v476_v56, %v480_v59  ;;  %v491_v7 = vld [vmem:[#allocation2 + $0x9c0] sm:$0xff] }
 0x134   :  { %2648 = vmatprep.subr.bf16.mxu0 %v5982_v8  ;;  %2812 = vmatprep.subr.bf16.mxu1 %v5984_v13  ;;  %v495_v8 = vld [vmem:[#allocation2 + $0x9e0] sm:$0xff]  ;;  %v6037_v13 = vcombine.low %v483_v63, %v487_v0  ;;  %v544_v0 = vld [vmem:[#allocation2 + $0xb68] sm:$0xff] }
 0x135   :  { %v6045_v21 = vcombine.low %v491_v7, %v495_v8 }
 0x137   :  { %2649 = vmatpush1.bf16.msra.mxu0 %v5981_v15  ;;  %2813 = vmatpush1.bf16.msra.mxu1 %v5983_v17  ;;  %v6046_v15 = vcombine.high %v491_v7, %v495_v8  ;;  %v503_v17 = vld [vmem:[#allocation2 + $0xa20] sm:$0xff]  ;;  %v552_v8 = vld [vmem:[#allocation2 + $0xba8] sm:$0xff] }
 0x138   :  { %2659 = vmatprep.subr.bf16.mxu0 %v5990_v18  ;;  %2823 = vmatprep.subr.bf16.mxu1 %v5992_v23  ;;  %v500_v18 = vld [vmem:[#allocation2 + $0xa08] sm:$0xff]  ;;  %v6047_v23 = vcombine.low %v492_v9, %v496_v11  ;;  %v6054_v24 = vcombine.high %v499_v16, %v503_v17  ;;  %v6053_v31 = vcombine.low %v499_v16, %v503_v17 }
 0x139   :  { %v6056_v29 = vcombine.high %v500_v18, %v504_v20  ;;  %v560_v17 = vld [vmem:[#allocation2 + $0xbe8] sm:$0xff] }
 0x13a   :  { %2651 = vmatmul.mubr.bf16.vlgmr.msra.gmra.mrb[0].mxu0 %v7545_v25  ;;  %2815 = vmatmul.mubr.bf16.vlgmr.msra.gmra.mrb[0].mxu1 %v7545_v25 }
 0x13b   :  { %2660 = vmatpush1.bf16.msra.mxu0 %v5989_v26  ;;  %2824 = vmatpush1.bf16.msra.mxu1 %v5991_v27  ;;  %v507_v26 = vld [vmem:[#allocation2 + $0xa40] sm:$0xff] }
 0x13c   :  { %2661 = vmatprep.subr.bf16.mxu0 %v5998_v28  ;;  %2825 = vmatprep.subr.bf16.mxu1 %v6000_v32  ;;  %v511_v27 = vld [vmem:[#allocation2 + $0xa60] sm:$0xff]  ;;  %v508_v28 = vld [vmem:[#allocation2 + $0xa48] sm:$0xff]  ;;  %v6055_v32 = vcombine.low %v500_v18, %v504_v20 }
 0x13d   :  { %2691 = vmatprep.mubr.bf16.mxu0 %v7547_v34  ;;  %2855 = vmatprep.mubr.bf16.mxu1 %v7547_v34  ;;  %v6062_v33 = vcombine.high %v507_v26, %v511_v27  ;;  %v6064_v38 = vcombine.high %v508_v28, %v512_v30  ;;  %v6061_v40 = vcombine.low %v507_v26, %v511_v27  ;;  %v169_v27 = vld [vmem:[%s7657_s0 + $0x20] sm:$0xff] }
 0x13f   :  { %2662 = vmatpush1.bf16.msra.mxu0 %v5997_v35  ;;  %2826 = vmatpush1.bf16.msra.mxu1 %v5999_v36  ;;  %v515_v35 = vld [vmem:[#allocation2 + $0xa80] sm:$0xff] }
 0x140   :  { %2663 = vmatprep.subr.bf16.mxu0 %v6006_v37  ;;  %2827 = vmatprep.subr.bf16.mxu1 %v6008_v41  ;;  %v519_v36 = vld [vmem:[#allocation2 + $0xaa0] sm:$0xff]  ;;  %v516_v37 = vld [vmem:[#allocation2 + $0xa88] sm:$0xff]  ;;  %v6063_v41 = vcombine.low %v508_v28, %v512_v30 }
 0x141   :  { %v6070_v42 = vcombine.high %v515_v35, %v519_v36  ;;  %v6072_v46 = vcombine.high %v516_v37, %v520_v39  ;;  %v6069_v48 = vcombine.low %v515_v35, %v519_v36  ;;  %v568_v28 = vld [vmem:[#allocation2 + $0xc28] sm:$0xff]  ;;  %v182_v36 = vld [vmem:[#allocation2 + $0x18] sm:$0xff] }
 0x143   :  { %2664 = vmatpush1.bf16.msra.mxu0 %v6005_v43  ;;  %2828 = vmatpush1.bf16.msra.mxu1 %v6007_v44  ;;  %v523_v43 = vld [vmem:[#allocation2 + $0xac0] sm:$0xff] }
 0x144   :  { %2665 = vmatprep.subr.bf16.mxu0 %v6014_v45  ;;  %2829 = vmatprep.subr.bf16.mxu1 %v6016_v49  ;;  %v527_v44 = vld [vmem:[#allocation2 + $0xae0] sm:$0xff]  ;;  %v524_v45 = vld [vmem:[#allocation2 + $0xac8] sm:$0xff]  ;;  %v6071_v49 = vcombine.low %v516_v37, %v520_v39  ;;  %v186_v37 = vld [vmem:[#allocation2 + $0x38] sm:$0xff] }
 0x145   :  { %v6078_v50 = vcombine.high %v523_v43, %v527_v44  ;;  %v6080_v54 = vcombine.high %v524_v45, %v528_v47  ;;  %v6077_v56 = vcombine.low %v523_v43, %v527_v44  ;;  %v7326_v43 = vmov 0   ;;  %v171_v44 = vld [vmem:[%s7657_s0 + $0x30] sm:$0xff] }
 0x147   :  { %2666 = vmatpush1.bf16.msra.mxu0 %v6013_v51  ;;  %2830 = vmatpush1.bf16.msra.mxu1 %v6015_v52  ;;  %v531_v51 = vld [vmem:[#allocation2 + $0xb00] sm:$0xff] }
 0x148   :  { %2667 = vmatprep.subr.bf16.mxu0 %v6022_v53  ;;  %2831 = vmatprep.subr.bf16.mxu1 %v6024_v58  ;;  %v535_v52 = vld [vmem:[#allocation2 + $0xb20] sm:$0xff]  ;;  %v532_v53 = vld [vmem:[#allocation2 + $0xb08] sm:$0xff]  ;;  %v6079_v58 = vcombine.low %v524_v45, %v528_v47  ;;  %v189_v45 = vld [vmem:[#allocation2 + $0x50] sm:$0xff] }
 0x149   :  { %v6086_v59 = vcombine.high %v531_v51, %v535_v52  ;;  %v6088_v63 = vcombine.high %v532_v53, %v536_v55  ;;  %v6085_v1 = vcombine.low %v531_v51, %v535_v52  ;;  %v190_v47 = vld [vmem:[#allocation2 + $0x58] sm:$0xff]  ;;  %v5739_v51 = vcombine.low %v182_v36, %v186_v37 }
 0x14b   :  { %2668 = vmatpush1.bf16.msra.mxu0 %v6021_v60  ;;  %2832 = vmatpush1.bf16.msra.mxu1 %v6023_v61  ;;  %v539_v60 = vld [vmem:[#allocation2 + $0xb40] sm:$0xff] }
 0x14c   :  { %2669 = vmatprep.subr.bf16.mxu0 %v6030_v62  ;;  %2833 = vmatprep.subr.bf16.mxu1 %v6032_v2  ;;  %v543_v61 = vld [vmem:[#allocation2 + $0xb60] sm:$0xff]  ;;  %v540_v62 = vld [vmem:[#allocation2 + $0xb48] sm:$0xff]  ;;  %v6087_v2 = vcombine.low %v532_v53, %v536_v55  ;;  %v197_v53 = vld [vmem:[#allocation2 + $0x90] sm:$0xff] }
 0x14d   :  { %v6094_v3 = vcombine.high %v539_v60, %v543_v61  ;;  %v6096_v7 = vcombine.high %v540_v62, %v544_v0  ;;  %v6093_v9 = vcombine.low %v539_v60, %v543_v61  ;;  %v198_v55 = vld [vmem:[#allocation2 + $0x98] sm:$0xff] }
 0x14f   :  { %2670 = vmatpush1.bf16.msra.mxu0 %v6029_v4  ;;  %2834 = vmatpush1.bf16.msra.mxu1 %v6031_v5  ;;  %v547_v4 = vld [vmem:[#allocation2 + $0xb80] sm:$0xff] }
 0x150   :  { %2671 = vmatprep.subr.bf16.mxu0 %v6038_v6  ;;  %2835 = vmatprep.subr.bf16.mxu1 %v6040_v10  ;;  %v551_v5 = vld [vmem:[#allocation2 + $0xba0] sm:$0xff]  ;;  %v548_v6 = vld [vmem:[#allocation2 + $0xb88] sm:$0xff]  ;;  %v6095_v10 = vcombine.low %v540_v62, %v544_v0  ;;  %v205_v62 = vld [vmem:[#allocation2 + $0xd0] sm:$0xff] }
 0x151   :  { %v6102_v11 = vcombine.high %v547_v4, %v551_v5  ;;  %v6104_v16 = vcombine.high %v548_v6, %v552_v8  ;;  %v6101_v18 = vcombine.low %v547_v4, %v551_v5  ;;  %v206_v0 = vld [vmem:[#allocation2 + $0xd8] sm:$0xff] }
 0x153   :  { %2672 = vmatpush1.bf16.msra.mxu0 %v6037_v13  ;;  %2836 = vmatpush1.bf16.msra.mxu1 %v6039_v14  ;;  %v555_v13 = vld [vmem:[#allocation2 + $0xbc0] sm:$0xff] }
 0x154   :  { %2673 = vmatprep.subr.bf16.mxu0 %v6046_v15  ;;  %2837 = vmatprep.subr.bf16.mxu1 %v6048_v19  ;;  %v559_v14 = vld [vmem:[#allocation2 + $0xbe0] sm:$0xff]  ;;  %v556_v15 = vld [vmem:[#allocation2 + $0xbc8] sm:$0xff]  ;;  %v6103_v19 = vcombine.low %v548_v6, %v552_v8  ;;  %v213_v6 = vld [vmem:[#allocation2 + $0x110] sm:$0xff] }
 0x155   :  { %v6110_v20 = vcombine.high %v555_v13, %v559_v14  ;;  %v6112_v26 = vcombine.high %v556_v15, %v560_v17  ;;  %v6111_v30 = vcombine.low %v556_v15, %v560_v17  ;;  %v214_v8 = vld [vmem:[#allocation2 + $0x118] sm:$0xff]  ;;  %v221_v15 = vld [vmem:[#allocation2 + $0x150] sm:$0xff] }
 0x157   :  { %2674 = vmatpush1.bf16.msra.mxu0 %v6045_v21  ;;  %2838 = vmatpush1.bf16.msra.mxu1 %v6047_v23  ;;  %v563_v21 = vld [vmem:[#allocation2 + $0xc00] sm:$0xff] }
 0x158   :  { %2675 = vmatprep.subr.bf16.mxu0 %v6054_v24  ;;  %2839 = vmatprep.subr.bf16.mxu1 %v6056_v29  ;;  %v567_v23 = vld [vmem:[#allocation2 + $0xc20] sm:$0xff]  ;;  %v564_v24 = vld [vmem:[#allocation2 + $0xc08] sm:$0xff]  ;;  %v6109_v29 = vcombine.low %v555_v13, %v559_v14 }
 0x159   :  { %v6120_v35 = vcombine.high %v564_v24, %v568_v28  ;;  %v6117_v39 = vcombine.low %v563_v21, %v567_v23 }
 0x15b   :  { %2676 = vmatpush1.bf16.msra.mxu0 %v6053_v31  ;;  %2840 = vmatpush1.bf16.msra.mxu1 %v6055_v32  ;;  %v6118_v31 = vcombine.high %v563_v21, %v567_v23  ;;  %v181_v32 = vld [vmem:[#allocation2 + $0x10] sm:$0xff] }
 0x15c   :  { %2677 = vmatprep.subr.bf16.mxu0 %v6062_v33  ;;  %2841 = vmatprep.subr.bf16.mxu1 %v6064_v38  ;;  %v185_v33 = vld [vmem:[#allocation2 + $0x30] sm:$0xff]  ;;  %v7556_v38 = vpack.c.bf16 %v169_v27, %v169_v27 }
 0x15d   :  { %v229_v23 = vld [vmem:[#allocation2 + $0x190] sm:$0xff] }
 0x15f   :  { %2678 = vmatpush1.bf16.msra.mxu0 %v6061_v40  ;;  %2842 = vmatpush1.bf16.msra.mxu1 %v6063_v41  ;;  %v6119_v40 = vcombine.low %v564_v24, %v568_v28  ;;  %v5738_v41 = vcombine.high %v181_v32, %v185_v33  ;;  %v233_v24 = vld [vmem:[#allocation2 + $0x1b0] sm:$0xff]  ;;  %v234_v28 = vld [vmem:[#allocation2 + $0x1b8] sm:$0xff] }
 0x160   :  { %2679 = vmatprep.subr.bf16.mxu0 %v6070_v42  ;;  %2843 = vmatprep.subr.bf16.mxu1 %v6072_v46  ;;  %v5740_v42 = vcombine.high %v182_v36, %v186_v37  ;;  %v193_v46 = vld [vmem:[#allocation2 + $0x70] sm:$0xff]  ;;  %v242_v37 = vld [vmem:[#allocation2 + $0x1f8] sm:$0xff] }
 0x161   :  { %v5746_v52 = vcombine.high %v189_v45, %v193_v46 }
 0x163   :  { %2680 = vmatpush1.bf16.msra.mxu0 %v6069_v48  ;;  %2844 = vmatpush1.bf16.msra.mxu1 %v6071_v49  ;;  %v194_v48 = vld [vmem:[#allocation2 + $0x78] sm:$0xff]  ;;  %v7565_v49 = vpack.c.bf16 %v171_v44, %v171_v44  ;;  %v249_v44 = vld [vmem:[#allocation2 + $0x230] sm:$0xff] }
 0x164   :  { %2681 = vmatprep.subr.bf16.mxu0 %v6078_v50  ;;  %2845 = vmatprep.subr.bf16.mxu1 %v6080_v54  ;;  %v5737_v50 = vcombine.low %v181_v32, %v185_v33  ;;  %v201_v54 = vld [vmem:[#allocation2 + $0xb0] sm:$0xff]  ;;  %v5747_v60 = vcombine.low %v190_v47, %v194_v48 }
 0x165   :  { %v5754_v61 = vcombine.high %v197_v53, %v201_v54  ;;  %v237_v32 = vld [vmem:[#allocation2 + $0x1d0] sm:$0xff] }
 0x166   :  { %v241_v33 = vld [vmem:[#allocation2 + $0x1f0] sm:$0xff] }
 0x167   :  { %2682 = vmatpush1.bf16.msra.mxu0 %v6077_v56  ;;  %2846 = vmatpush1.bf16.msra.mxu1 %v6079_v58  ;;  %v5748_v56 = vcombine.high %v190_v47, %v194_v48  ;;  %v202_v58 = vld [vmem:[#allocation2 + $0xb8] sm:$0xff]  ;;  %v5793_v48 = vcombine.low %v237_v32, %v241_v33 }
 0x168   :  { %2683 = vmatprep.subr.bf16.mxu0 %v6086_v59  ;;  %2847 = vmatprep.subr.bf16.mxu1 %v6088_v63  ;;  %v5745_v59 = vcombine.low %v189_v45, %v193_v46  ;;  %v209_v63 = vld [vmem:[#allocation2 + $0xf0] sm:$0xff]  ;;  %v5755_v4 = vcombine.low %v198_v55, %v202_v58  ;;  %v246_v45 = vld [vmem:[#allocation2 + $0x218] sm:$0xff] }
 0x169   :  { %v5762_v5 = vcombine.high %v205_v62, %v209_v63  ;;  %v250_v47 = vld [vmem:[#allocation2 + $0x238] sm:$0xff] }
 0x16b   :  { %2684 = vmatpush1.bf16.msra.mxu0 %v6085_v1  ;;  %2848 = vmatpush1.bf16.msra.mxu1 %v6087_v2  ;;  %v5756_v1 = vcombine.high %v198_v55, %v202_v58  ;;  %v210_v2 = vld [vmem:[#allocation2 + $0xf8] sm:$0xff]  ;;  %v5804_v55 = vcombine.high %v246_v45, %v250_v47 }
 0x16c   :  { %2685 = vmatprep.subr.bf16.mxu0 %v6094_v3  ;;  %2849 = vmatprep.subr.bf16.mxu1 %v6096_v7  ;;  %v5753_v3 = vcombine.low %v197_v53, %v201_v54  ;;  %v217_v7 = vld [vmem:[#allocation2 + $0x130] sm:$0xff]  ;;  %v5763_v13 = vcombine.low %v206_v0, %v210_v2  ;;  %v254_v54 = vld [vmem:[#allocation2 + $0x258] sm:$0xff] }
 0x16d   :  { %v5770_v14 = vcombine.high %v213_v6, %v217_v7  ;;  %v257_v53 = vld [vmem:[#allocation2 + $0x270] sm:$0xff] }
 0x16f   :  { %2686 = vmatpush1.bf16.msra.mxu0 %v6093_v9  ;;  %2850 = vmatpush1.bf16.msra.mxu1 %v6095_v10  ;;  %v5764_v9 = vcombine.high %v206_v0, %v210_v2  ;;  %v218_v10 = vld [vmem:[#allocation2 + $0x138] sm:$0xff] }
 0x170   :  { %2687 = vmatprep.subr.bf16.mxu0 %v6102_v11  ;;  %2851 = vmatprep.subr.bf16.mxu1 %v6104_v16  ;;  %v5761_v11 = vcombine.low %v205_v62, %v209_v63  ;;  %v222_v16 = vld [vmem:[#allocation2 + $0x158] sm:$0xff]  ;;  %v5772_v17 = vcombine.high %v214_v8, %v218_v10  ;;  %v265_v62 = vld [vmem:[#allocation2 + $0x2b0] sm:$0xff] }
 0x171   :  { %v262_v0 = vld [vmem:[#allocation2 + $0x298] sm:$0xff] }
 0x173   :  { %2688 = vmatpush1.bf16.msra.mxu0 %v6101_v18  ;;  %2852 = vmatpush1.bf16.msra.mxu1 %v6103_v19  ;;  %v226_v18 = vld [vmem:[#allocation2 + $0x178] sm:$0xff]  ;;  %v5769_v19 = vcombine.low %v213_v6, %v217_v7  ;;  %v269_v6 = vld [vmem:[#allocation2 + $0x2d0] sm:$0xff] }
 0x174   :  { %2689 = vmatprep.subr.bf16.mxu0 %v6110_v20  ;;  %2853 = vmatprep.subr.bf16.mxu1 %v6112_v26  ;;  %v5771_v20 = vcombine.low %v214_v8, %v218_v10  ;;  %v230_v26 = vld [vmem:[#allocation2 + $0x198] sm:$0xff]  ;;  %v5780_v27 = vcombine.high %v222_v16, %v226_v18  ;;  %v273_v7 = vld [vmem:[#allocation2 + $0x2f0] sm:$0xff] }
 0x175   :  { %v5788_v36 = vcombine.high %v230_v26, %v234_v28  ;;  %v270_v8 = vld [vmem:[#allocation2 + $0x2d8] sm:$0xff] }
 0x177   :  { %2690 = vmatpush1.bf16.msra.mxu0 %v6109_v29  ;;  %2854 = vmatpush1.bf16.msra.mxu1 %v6111_v30  ;;  %v5779_v30 = vcombine.low %v222_v16, %v226_v18  ;;  %v278_v16 = vld [vmem:[#allocation2 + $0x318] sm:$0xff]  ;;  %v5825_v18 = vcombine.low %v269_v6, %v273_v7 }
 0x178   :  { %2700 = vmatprep.subr.bf16.mxu0 %v6118_v31  ;;  %2864 = vmatprep.subr.bf16.mxu1 %v6120_v35  ;;  %v5786_v31 = vcombine.high %v229_v23, %v233_v24  ;;  %v238_v35 = vld [vmem:[#allocation2 + $0x1d8] sm:$0xff] }
 0x179   :  { %v5796_v46 = vcombine.high %v238_v35, %v242_v37 }
 0x17a   :  { %2692 = vmatmul.mubr.bf16.vlgmr.msra.gmra.mrb[0].mxu0 %v7556_v38  ;;  %2856 = vmatmul.mubr.bf16.vlgmr.msra.gmra.mrb[0].mxu1 %v7556_v38 }
 0x17b   :  { %2701 = vmatpush1.bf16.msra.mxu0 %v6117_v39  ;;  %2865 = vmatpush1.bf16.msra.mxu1 %v6119_v40  ;;  %v5785_v39 = vcombine.low %v229_v23, %v233_v24  ;;  %v5787_v40 = vcombine.low %v230_v26, %v234_v28  ;;  %v285_v23 = vld [vmem:[#allocation2 + $0x350] sm:$0xff]  ;;  %v286_v26 = vld [vmem:[#allocation2 + $0x358] sm:$0xff] }
 0x17c   :  { %2732 = vmatprep.mubr.bf16.mxu0 %v7326_v43  ;;  %2896 = vmatprep.mubr.bf16.mxu1 %v7326_v43  ;;  %v289_v24 = vld [vmem:[#allocation2 + $0x370] sm:$0xff] }
 0x17d   :  { %2905 = vmatprep.subr.bf16.mxu0 %v5738_v41  ;;  %3069 = vmatprep.subr.bf16.mxu1 %v5740_v42  ;;  %v5794_v41 = vcombine.high %v237_v32, %v241_v33  ;;  %v245_v42 = vld [vmem:[#allocation2 + $0x210] sm:$0xff] }
 0x17e   :  { %v5801_v58 = vcombine.low %v245_v42, %v249_v44  ;;  %v293_v32 = vld [vmem:[#allocation2 + $0x390] sm:$0xff] }
 0x17f   :  { %v297_v33 = vld [vmem:[#allocation2 + $0x3b0] sm:$0xff] }
 0x186   :  { %6125 = vmatmul.mubr.msk.bf16.vlgmr.msra.gmra.mrb[0].mxu0 %vm2573_vm0, %v7565_v49  ;;  %6126 = vmatmul.mubr.msk.bf16.vlgmr.msra.gmra.mrb[0].mxu1 %vm2573_vm0, %v7565_v49 }
 0x187   :  { %2906 = vmatpush1.bf16.msra.mxu0 %v5737_v50  ;;  %3070 = vmatpush1.bf16.msra.mxu1 %v5739_v51  ;;  %v5795_v50 = vcombine.low %v238_v35, %v242_v37  ;;  %v5802_v51 = vcombine.high %v245_v42, %v249_v44  ;;  %v294_v35 = vld [vmem:[#allocation2 + $0x398] sm:$0xff]  ;;  %v5841_v37 = vcombine.low %v285_v23, %v289_v24  ;;  %v301_v42 = vld [vmem:[#allocation2 + $0x3d0] sm:$0xff] }
 0x188   :  { %2907 = vmatprep.subr.bf16.mxu0 %v5746_v52  ;;  %3071 = vmatprep.subr.bf16.mxu1 %v5748_v56  ;;  %v253_v52 = vld [vmem:[#allocation2 + $0x250] sm:$0xff]  ;;  %v258_v56 = vld [vmem:[#allocation2 + $0x278] sm:$0xff] }
 0x189   :  { %2937 = vmatprep.mubr.bf16.mxu0 %v7521_v57  ;;  %3101 = vmatprep.mubr.bf16.mxu1 %v7521_v57  ;;  %v225_v57 = vld [vmem:[#allocation2 + $0x170] sm:$0xff]  ;;  %v5812_v63 = vcombine.high %v254_v54, %v258_v56  ;;  %v5809_v2 = vcombine.low %v253_v52, %v257_v53 }
 0x18a   :  { %v5778_v21 = vcombine.high %v221_v15, %v225_v57  ;;  %v5777_v29 = vcombine.low %v221_v15, %v225_v57  ;;  %v277_v15 = vld [vmem:[#allocation2 + $0x310] sm:$0xff] }
 0x18b   :  { %2908 = vmatpush1.bf16.msra.mxu0 %v5745_v59  ;;  %3072 = vmatpush1.bf16.msra.mxu1 %v5747_v60  ;;  %v5803_v59 = vcombine.low %v246_v45, %v250_v47  ;;  %v5810_v60 = vcombine.high %v253_v52, %v257_v53  ;;  %v281_v57 = vld [vmem:[#allocation2 + $0x330] sm:$0xff]  ;;  %v302_v45 = vld [vmem:[#allocation2 + $0x3d8] sm:$0xff]  ;;  %v5849_v47 = vcombine.low %v293_v32, %v297_v33 }
 0x18c   :  { %2909 = vmatprep.subr.bf16.mxu0 %v5754_v61  ;;  %3073 = vmatprep.subr.bf16.mxu1 %v5756_v1  ;;  %v261_v61 = vld [vmem:[#allocation2 + $0x290] sm:$0xff]  ;;  %v266_v1 = vld [vmem:[#allocation2 + $0x2b8] sm:$0xff]  ;;  %v5833_v28 = vcombine.low %v277_v15, %v281_v57 }
 0x18d   :  { %v5817_v10 = vcombine.low %v261_v61, %v265_v62  ;;  %v305_v44 = vld [vmem:[#allocation2 + $0x3f0] sm:$0xff] }
 0x18e   :  { %v309_v52 = vld [vmem:[#allocation2 + $0x410] sm:$0xff] }
 0x18f   :  { %2910 = vmatpush1.bf16.msra.mxu0 %v5753_v3  ;;  %3074 = vmatpush1.bf16.msra.mxu1 %v5755_v4  ;;  %v5811_v3 = vcombine.low %v254_v54, %v258_v56  ;;  %v5818_v4 = vcombine.high %v261_v61, %v265_v62  ;;  %v313_v53 = vld [vmem:[#allocation2 + $0x430] sm:$0xff]  ;;  %v310_v54 = vld [vmem:[#allocation2 + $0x418] sm:$0xff]  ;;  %v5857_v56 = vcombine.low %v301_v42, %v305_v44 }
 0x190   :  { %2911 = vmatprep.subr.bf16.mxu0 %v5762_v5  ;;  %3075 = vmatprep.subr.bf16.mxu1 %v5764_v9  ;;  %v5820_v5 = vcombine.high %v262_v0, %v266_v1  ;;  %v274_v9 = vld [vmem:[#allocation2 + $0x2f8] sm:$0xff]  ;;  %v317_v61 = vld [vmem:[#allocation2 + $0x450] sm:$0xff] }
 0x191   :  { %v321_v62 = vld [vmem:[#allocation2 + $0x470] sm:$0xff] }
 0x193   :  { %2912 = vmatpush1.bf16.msra.mxu0 %v5761_v11  ;;  %3076 = vmatpush1.bf16.msra.mxu1 %v5763_v13  ;;  %v5819_v11 = vcombine.low %v262_v0, %v266_v1  ;;  %v5826_v13 = vcombine.high %v269_v6, %v273_v7  ;;  %v322_v0 = vld [vmem:[#allocation2 + $0x478] sm:$0xff]  ;;  %v5865_v1 = vcombine.low %v309_v52, %v313_v53  ;;  %v329_v6 = vld [vmem:[#allocation2 + $0x4b0] sm:$0xff] }
 0x194   :  { %2913 = vmatprep.subr.bf16.mxu0 %v5770_v14  ;;  %3077 = vmatprep.subr.bf16.mxu1 %v5772_v17  ;;  %v5828_v14 = vcombine.high %v270_v8, %v274_v9  ;;  %v282_v17 = vld [vmem:[#allocation2 + $0x338] sm:$0xff] }
 0x195   :  { %v326_v7 = vld [vmem:[#allocation2 + $0x498] sm:$0xff] }
 0x197   :  { %2914 = vmatpush1.bf16.msra.mxu0 %v5769_v19  ;;  %3078 = vmatpush1.bf16.msra.mxu1 %v5771_v20  ;;  %v5827_v19 = vcombine.low %v270_v8, %v274_v9  ;;  %v5834_v20 = vcombine.high %v277_v15, %v281_v57  ;;  %v330_v8 = vld [vmem:[#allocation2 + $0x4b8] sm:$0xff]  ;;  %v5873_v9 = vcombine.low %v317_v61, %v321_v62  ;;  %v337_v15 = vld [vmem:[#allocation2 + $0x4f0] sm:$0xff] }
 0x198   :  { %2915 = vmatprep.subr.bf16.mxu0 %v5778_v21  ;;  %3079 = vmatprep.subr.bf16.mxu1 %v5780_v27  ;;  %v5836_v21 = vcombine.high %v278_v16, %v282_v17  ;;  %v290_v27 = vld [vmem:[#allocation2 + $0x378] sm:$0xff] }
 0x199   :  { %v334_v57 = vld [vmem:[#allocation2 + $0x4d8] sm:$0xff] }
 0x19b   :  { %2916 = vmatpush1.bf16.msra.mxu0 %v5777_v29  ;;  %3080 = vmatpush1.bf16.msra.mxu1 %v5779_v30  ;;  %v5835_v29 = vcombine.low %v278_v16, %v282_v17  ;;  %v5842_v30 = vcombine.high %v285_v23, %v289_v24  ;;  %v338_v16 = vld [vmem:[#allocation2 + $0x4f8] sm:$0xff] }
 0x19c   :  { %2917 = vmatprep.subr.bf16.mxu0 %v5786_v31  ;;  %3081 = vmatprep.subr.bf16.mxu1 %v5788_v36  ;;  %v5844_v31 = vcombine.high %v286_v26, %v290_v27  ;;  %v298_v36 = vld [vmem:[#allocation2 + $0x3b8] sm:$0xff] }
 0x19d   :  { %v342_v23 = vld [vmem:[#allocation2 + $0x518] sm:$0xff] }
 0x19e   :  { %v346_v24 = vld [vmem:[#allocation2 + $0x538] sm:$0xff] }
 0x19f   :  { %2918 = vmatpush1.bf16.msra.mxu0 %v5785_v39  ;;  %3082 = vmatpush1.bf16.msra.mxu1 %v5787_v40  ;;  %v5843_v39 = vcombine.low %v286_v26, %v290_v27  ;;  %v5850_v40 = vcombine.high %v293_v32, %v297_v33  ;;  %v5891_v27 = vcombine.low %v334_v57, %v338_v16  ;;  %v354_v32 = vld [vmem:[#allocation2 + $0x578] sm:$0xff] }
 0x1a0   :  { %2919 = vmatprep.subr.bf16.mxu0 %v5794_v41  ;;  %3083 = vmatprep.subr.bf16.mxu1 %v5796_v46  ;;  %v5852_v41 = vcombine.high %v294_v35, %v298_v36  ;;  %v306_v46 = vld [vmem:[#allocation2 + $0x3f8] sm:$0xff] }
 0x1a3   :  { %2920 = vmatpush1.bf16.msra.mxu0 %v5793_v48  ;;  %3084 = vmatpush1.bf16.msra.mxu1 %v5795_v50  ;;  %v5851_v48 = vcombine.low %v294_v35, %v298_v36  ;;  %v5858_v50 = vcombine.high %v301_v42, %v305_v44  ;;  %v5899_v35 = vcombine.low %v342_v23, %v346_v24  ;;  %v362_v42 = vld [vmem:[#allocation2 + $0x5b8] sm:$0xff] }
 0x1a4   :  { %2921 = vmatprep.subr.bf16.mxu0 %v5802_v51  ;;  %3085 = vmatprep.subr.bf16.mxu1 %v5804_v55  ;;  %v5860_v51 = vcombine.high %v302_v45, %v306_v46  ;;  %v314_v55 = vld [vmem:[#allocation2 + $0x438] sm:$0xff] }
 0x1a7   :  { %2922 = vmatpush1.bf16.msra.mxu0 %v5801_v58  ;;  %3086 = vmatpush1.bf16.msra.mxu1 %v5803_v59  ;;  %v5859_v58 = vcombine.low %v302_v45, %v306_v46  ;;  %v5866_v59 = vcombine.high %v309_v52, %v313_v53  ;;  %v370_v52 = vld [vmem:[#allocation2 + $0x5f8] sm:$0xff] }
 0x1a8   :  { %2923 = vmatprep.subr.bf16.mxu0 %v5810_v60  ;;  %3087 = vmatprep.subr.bf16.mxu1 %v5812_v63  ;;  %v5868_v60 = vcombine.high %v310_v54, %v314_v55  ;;  %v318_v63 = vld [vmem:[#allocation2 + $0x458] sm:$0xff] }
 0x1ab   :  { %2924 = vmatpush1.bf16.msra.mxu0 %v5809_v2  ;;  %3088 = vmatpush1.bf16.msra.mxu1 %v5811_v3  ;;  %v5867_v2 = vcombine.low %v310_v54, %v314_v55  ;;  %v5874_v3 = vcombine.high %v317_v61, %v321_v62  ;;  %v378_v61 = vld [vmem:[#allocation2 + $0x638] sm:$0xff] }
 0x1ac   :  { %2925 = vmatprep.subr.bf16.mxu0 %v5818_v4  ;;  %3089 = vmatprep.subr.bf16.mxu1 %v5820_v5  ;;  %v5876_v4 = vcombine.high %v318_v63, %v322_v0  ;;  %v325_v5 = vld [vmem:[#allocation2 + $0x490] sm:$0xff] }
 0x1ad   :  { %v5881_v17 = vcombine.low %v325_v5, %v329_v6 }
 0x1af   :  { %2926 = vmatpush1.bf16.msra.mxu0 %v5817_v10  ;;  %3090 = vmatpush1.bf16.msra.mxu1 %v5819_v11  ;;  %v5875_v10 = vcombine.low %v318_v63, %v322_v0  ;;  %v5882_v11 = vcombine.high %v325_v5, %v329_v6  ;;  %v386_v5 = vld [vmem:[#allocation2 + $0x678] sm:$0xff] }
 0x1b0   :  { %2927 = vmatprep.subr.bf16.mxu0 %v5826_v13  ;;  %3091 = vmatprep.subr.bf16.mxu1 %v5828_v14  ;;  %v5884_v13 = vcombine.high %v326_v7, %v330_v8  ;;  %v333_v14 = vld [vmem:[#allocation2 + $0x4d0] sm:$0xff] }
 0x1b1   :  { %v5889_v26 = vcombine.low %v333_v14, %v337_v15 }
 0x1b3   :  { %2928 = vmatpush1.bf16.msra.mxu0 %v5825_v18  ;;  %3092 = vmatpush1.bf16.msra.mxu1 %v5827_v19  ;;  %v5890_v18 = vcombine.high %v333_v14, %v337_v15  ;;  %v5892_v19 = vcombine.high %v334_v57, %v338_v16  ;;  %v394_v14 = vld [vmem:[#allocation2 + $0x6b8] sm:$0xff] }
 0x1b4   :  { %2929 = vmatprep.subr.bf16.mxu0 %v5834_v20  ;;  %3093 = vmatprep.subr.bf16.mxu1 %v5836_v21  ;;  %v341_v20 = vld [vmem:[#allocation2 + $0x510] sm:$0xff] }
 0x1b5   :  { %v345_v21 = vld [vmem:[#allocation2 + $0x530] sm:$0xff] }
 0x1b6   :  { %v5897_v33 = vcombine.low %v341_v20, %v345_v21 }
 0x1b7   :  { %2930 = vmatpush1.bf16.msra.mxu0 %v5833_v28  ;;  %3094 = vmatpush1.bf16.msra.mxu1 %v5835_v29  ;;  %v5898_v28 = vcombine.high %v341_v20, %v345_v21  ;;  %v349_v29 = vld [vmem:[#allocation2 + $0x550] sm:$0xff]  ;;  %v402_v20 = vld [vmem:[#allocation2 + $0x6f8] sm:$0xff] }
 0x1b8   :  { %2931 = vmatprep.subr.bf16.mxu0 %v5842_v30  ;;  %3095 = vmatprep.subr.bf16.mxu1 %v5844_v31  ;;  %v353_v30 = vld [vmem:[#allocation2 + $0x570] sm:$0xff]  ;;  %v350_v31 = vld [vmem:[#allocation2 + $0x558] sm:$0xff] }
 0x1b9   :  { %v5906_v36 = vcombine.high %v349_v29, %v353_v30  ;;  %v5905_v44 = vcombine.low %v349_v29, %v353_v30  ;;  %v5907_v45 = vcombine.low %v350_v31, %v354_v32  ;;  %v410_v29 = vld [vmem:[#allocation2 + $0x738] sm:$0xff] }
 0x1bb   :  { %2932 = vmatpush1.bf16.msra.mxu0 %v5841_v37  ;;  %3096 = vmatpush1.bf16.msra.mxu1 %v5843_v39  ;;  %v5908_v37 = vcombine.high %v350_v31, %v354_v32  ;;  %v357_v39 = vld [vmem:[#allocation2 + $0x590] sm:$0xff] }
 0x1bc   :  { %2933 = vmatprep.subr.bf16.mxu0 %v5850_v40  ;;  %3097 = vmatprep.subr.bf16.mxu1 %v5852_v41  ;;  %v361_v40 = vld [vmem:[#allocation2 + $0x5b0] sm:$0xff]  ;;  %v358_v41 = vld [vmem:[#allocation2 + $0x598] sm:$0xff] }
 0x1bd   :  { %v5914_v46 = vcombine.high %v357_v39, %v361_v40  ;;  %v5913_v53 = vcombine.low %v357_v39, %v361_v40  ;;  %v5915_v54 = vcombine.low %v358_v41, %v362_v42  ;;  %v418_v39 = vld [vmem:[#allocation2 + $0x778] sm:$0xff] }
 0x1bf   :  { %2934 = vmatpush1.bf16.msra.mxu0 %v5849_v47  ;;  %3098 = vmatpush1.bf16.msra.mxu1 %v5851_v48  ;;  %v5916_v47 = vcombine.high %v358_v41, %v362_v42  ;;  %v365_v48 = vld [vmem:[#allocation2 + $0x5d0] sm:$0xff] }
 0x1c0   :  { %2935 = vmatprep.subr.bf16.mxu0 %v5858_v50  ;;  %3099 = vmatprep.subr.bf16.mxu1 %v5860_v51  ;;  %v369_v50 = vld [vmem:[#allocation2 + $0x5f0] sm:$0xff]  ;;  %v366_v51 = vld [vmem:[#allocation2 + $0x5d8] sm:$0xff] }
 0x1c1   :  { %v5922_v55 = vcombine.high %v365_v48, %v369_v50  ;;  %v5921_v62 = vcombine.low %v365_v48, %v369_v50  ;;  %v5923_v63 = vcombine.low %v366_v51, %v370_v52  ;;  %v426_v48 = vld [vmem:[#allocation2 + $0x7b8] sm:$0xff] }
 0x1c3   :  { %2936 = vmatpush1.bf16.msra.mxu0 %v5857_v56  ;;  %3100 = vmatpush1.bf16.msra.mxu1 %v5859_v58  ;;  %v5924_v56 = vcombine.high %v366_v51, %v370_v52  ;;  %v373_v58 = vld [vmem:[#allocation2 + $0x610] sm:$0xff] }
 0x1c4   :  { %2946 = vmatprep.subr.bf16.mxu0 %v5866_v59  ;;  %3110 = vmatprep.subr.bf16.mxu1 %v5868_v60  ;;  %v377_v59 = vld [vmem:[#allocation2 + $0x630] sm:$0xff]  ;;  %v374_v60 = vld [vmem:[#allocation2 + $0x618] sm:$0xff] }
 0x1c5   :  { %v5930_v0 = vcombine.high %v373_v58, %v377_v59  ;;  %v5929_v6 = vcombine.low %v373_v58, %v377_v59  ;;  %v434_v58 = vld [vmem:[#allocation2 + $0x7f8] sm:$0xff] }
 0x1c6   :  { %2938 = vmatmul.mubr.bf16.vlgmr.msra.gmra.mrb[4].mxu0 %v7528_v12  ;;  %3102 = vmatmul.mubr.bf16.vlgmr.msra.gmra.mrb[4].mxu1 %v7528_v12  ;;  %v5883_v12 = vcombine.low %v326_v7, %v330_v8  ;;  %v5931_v7 = vcombine.low %v374_v60, %v378_v61 }
 0x1c7   :  { %2947 = vmatpush1.bf16.msra.mxu0 %v5865_v1  ;;  %3111 = vmatpush1.bf16.msra.mxu1 %v5867_v2  ;;  %v5932_v1 = vcombine.high %v374_v60, %v378_v61  ;;  %v381_v2 = vld [vmem:[#allocation2 + $0x650] sm:$0xff] }
 0x1c8   :  { %2948 = vmatprep.subr.bf16.mxu0 %v5874_v3  ;;  %3112 = vmatprep.subr.bf16.mxu1 %v5876_v4  ;;  %v385_v3 = vld [vmem:[#allocation2 + $0x670] sm:$0xff]  ;;  %v382_v4 = vld [vmem:[#allocation2 + $0x658] sm:$0xff] }
 0x1c9   :  { %2978 = vmatprep.mubr.bf16.mxu0 %v7533_v22  ;;  %3142 = vmatprep.mubr.bf16.mxu1 %v7533_v22  ;;  %v5900_v22 = vcombine.high %v342_v23, %v346_v24  ;;  %v5938_v8 = vcombine.high %v381_v2, %v385_v3  ;;  %v5937_v15 = vcombine.low %v381_v2, %v385_v3  ;;  %v442_v2 = vld [vmem:[#allocation2 + $0x838] sm:$0xff] }
 0x1ca   :  { %v5939_v57 = vcombine.low %v382_v4, %v386_v5 }
 0x1cb   :  { %2949 = vmatpush1.bf16.msra.mxu0 %v5873_v9  ;;  %3113 = vmatpush1.bf16.msra.mxu1 %v5875_v10  ;;  %v5940_v9 = vcombine.high %v382_v4, %v386_v5  ;;  %v389_v10 = vld [vmem:[#allocation2 + $0x690] sm:$0xff] }
 0x1cc   :  { %2950 = vmatprep.subr.bf16.mxu0 %v5882_v11  ;;  %3114 = vmatprep.subr.bf16.mxu1 %v5884_v13  ;;  %v393_v11 = vld [vmem:[#allocation2 + $0x6b0] sm:$0xff]  ;;  %v390_v13 = vld [vmem:[#allocation2 + $0x698] sm:$0xff] }
 0x1cd   :  { %v5946_v16 = vcombine.high %v389_v10, %v393_v11  ;;  %v5945_v21 = vcombine.low %v389_v10, %v393_v11  ;;  %v5947_v23 = vcombine.low %v390_v13, %v394_v14  ;;  %v450_v10 = vld [vmem:[#allocation2 + $0x878] sm:$0xff] }
 0x1cf   :  { %2951 = vmatpush1.bf16.msra.mxu0 %v5881_v17  ;;  %3115 = vmatpush1.bf16.msra.mxu1 %v5883_v12  ;;  %v5948_v17 = vcombine.high %v390_v13, %v394_v14  ;;  %v397_v12 = vld [vmem:[#allocation2 + $0x6d0] sm:$0xff] }
 0x1d0   :  { %2952 = vmatprep.subr.bf16.mxu0 %v5890_v18  ;;  %3116 = vmatprep.subr.bf16.mxu1 %v5892_v19  ;;  %v401_v18 = vld [vmem:[#allocation2 + $0x6f0] sm:$0xff]  ;;  %v398_v19 = vld [vmem:[#allocation2 + $0x6d8] sm:$0xff] }
 0x1d1   :  { %v5954_v24 = vcombine.high %v397_v12, %v401_v18  ;;  %v5953_v30 = vcombine.low %v397_v12, %v401_v18  ;;  %v5955_v31 = vcombine.low %v398_v19, %v402_v20  ;;  %v458_v12 = vld [vmem:[#allocation2 + $0x8b8] sm:$0xff] }
 0x1d3   :  { %2953 = vmatpush1.bf16.msra.mxu0 %v5889_v26  ;;  %3117 = vmatpush1.bf16.msra.mxu1 %v5891_v27  ;;  %v5956_v26 = vcombine.high %v398_v19, %v402_v20  ;;  %v405_v27 = vld [vmem:[#allocation2 + $0x710] sm:$0xff] }
 0x1d4   :  { %2954 = vmatprep.subr.bf16.mxu0 %v5898_v28  ;;  %3118 = vmatprep.subr.bf16.mxu1 %v5900_v22  ;;  %v409_v28 = vld [vmem:[#allocation2 + $0x730] sm:$0xff]  ;;  %v406_v22 = vld [vmem:[#allocation2 + $0x718] sm:$0xff] }
 0x1d5   :  { %v5962_v32 = vcombine.high %v405_v27, %v409_v28  ;;  %v5961_v40 = vcombine.low %v405_v27, %v409_v28  ;;  %v5963_v41 = vcombine.low %v406_v22, %v410_v29  ;;  %v466_v27 = vld [vmem:[#allocation2 + $0x8f8] sm:$0xff] }
 0x1d7   :  { %2955 = vmatpush1.bf16.msra.mxu0 %v5897_v33  ;;  %3119 = vmatpush1.bf16.msra.mxu1 %v5899_v35  ;;  %v5964_v33 = vcombine.high %v406_v22, %v410_v29  ;;  %v413_v35 = vld [vmem:[#allocation2 + $0x750] sm:$0xff] }
 0x1d8   :  { %2956 = vmatprep.subr.bf16.mxu0 %v5906_v36  ;;  %3120 = vmatprep.subr.bf16.mxu1 %v5908_v37  ;;  %v417_v36 = vld [vmem:[#allocation2 + $0x770] sm:$0xff]  ;;  %v414_v37 = vld [vmem:[#allocation2 + $0x758] sm:$0xff] }
 0x1d9   :  { %v5970_v42 = vcombine.high %v413_v35, %v417_v36  ;;  %v5969_v50 = vcombine.low %v413_v35, %v417_v36  ;;  %v5971_v51 = vcombine.low %v414_v37, %v418_v39 }
 0x1db   :  { %2957 = vmatpush1.bf16.msra.mxu0 %v5905_v44  ;;  %3121 = vmatpush1.bf16.msra.mxu1 %v5907_v45  ;;  %v5972_v44 = vcombine.high %v414_v37, %v418_v39  ;;  %v421_v45 = vld [vmem:[#allocation2 + $0x790] sm:$0xff] }
 0x1dc   :  { %2958 = vmatprep.subr.bf16.mxu0 %v5914_v46  ;;  %3122 = vmatprep.subr.bf16.mxu1 %v5916_v47  ;;  %v425_v46 = vld [vmem:[#allocation2 + $0x7b0] sm:$0xff]  ;;  %v422_v47 = vld [vmem:[#allocation2 + $0x798] sm:$0xff] }
 0x1dd   :  { %v5978_v52 = vcombine.high %v421_v45, %v425_v46  ;;  %v5977_v59 = vcombine.low %v421_v45, %v425_v46  ;;  %v5979_v60 = vcombine.low %v422_v47, %v426_v48  ;;  %v477_v39 = vld [vmem:[#allocation2 + $0x950] sm:$0xff] }
 0x1df   :  { %2959 = vmatpush1.bf16.msra.mxu0 %v5913_v53  ;;  %3123 = vmatpush1.bf16.msra.mxu1 %v5915_v54  ;;  %v5980_v53 = vcombine.high %v422_v47, %v426_v48  ;;  %v429_v54 = vld [vmem:[#allocation2 + $0x7d0] sm:$0xff] }
 0x1e0   :  { %2960 = vmatprep.subr.bf16.mxu0 %v5922_v55  ;;  %3124 = vmatprep.subr.bf16.mxu1 %v5924_v56  ;;  %v433_v55 = vld [vmem:[#allocation2 + $0x7f0] sm:$0xff]  ;;  %v430_v56 = vld [vmem:[#allocation2 + $0x7d8] sm:$0xff] }
 0x1e1   :  { %v5986_v61 = vcombine.high %v429_v54, %v433_v55  ;;  %v5985_v3 = vcombine.low %v429_v54, %v433_v55  ;;  %v5987_v4 = vcombine.low %v430_v56, %v434_v58  ;;  %v485_v48 = vld [vmem:[#allocation2 + $0x990] sm:$0xff] }
 0x1e3   :  { %2961 = vmatpush1.bf16.msra.mxu0 %v5921_v62  ;;  %3125 = vmatpush1.bf16.msra.mxu1 %v5923_v63  ;;  %v5988_v62 = vcombine.high %v430_v56, %v434_v58  ;;  %v437_v63 = vld [vmem:[#allocation2 + $0x810] sm:$0xff] }
 0x1e4   :  { %2962 = vmatprep.subr.bf16.mxu0 %v5930_v0  ;;  %3126 = vmatprep.subr.bf16.mxu1 %v5932_v1  ;;  %v441_v0 = vld [vmem:[#allocation2 + $0x830] sm:$0xff]  ;;  %v438_v1 = vld [vmem:[#allocation2 + $0x818] sm:$0xff] }
 0x1e5   :  { %v5994_v5 = vcombine.high %v437_v63, %v441_v0  ;;  %v5993_v11 = vcombine.low %v437_v63, %v441_v0  ;;  %v5995_v13 = vcombine.low %v438_v1, %v442_v2  ;;  %v493_v58 = vld [vmem:[#allocation2 + $0x9d0] sm:$0xff] }
 0x1e7   :  { %2963 = vmatpush1.bf16.msra.mxu0 %v5929_v6  ;;  %3127 = vmatpush1.bf16.msra.mxu1 %v5931_v7  ;;  %v5996_v6 = vcombine.high %v438_v1, %v442_v2  ;;  %v445_v7 = vld [vmem:[#allocation2 + $0x850] sm:$0xff] }
 0x1e8   :  { %2964 = vmatprep.subr.bf16.mxu0 %v5938_v8  ;;  %3128 = vmatprep.subr.bf16.mxu1 %v5940_v9  ;;  %v449_v8 = vld [vmem:[#allocation2 + $0x870] sm:$0xff]  ;;  %v446_v9 = vld [vmem:[#allocation2 + $0x858] sm:$0xff] }
 0x1e9   :  { %v6002_v14 = vcombine.high %v445_v7, %v449_v8  ;;  %v6001_v18 = vcombine.low %v445_v7, %v449_v8  ;;  %v6003_v19 = vcombine.low %v446_v9, %v450_v10  ;;  %v501_v2 = vld [vmem:[#allocation2 + $0xa10] sm:$0xff] }
 0x1eb   :  { %2965 = vmatpush1.bf16.msra.mxu0 %v5937_v15  ;;  %3129 = vmatpush1.bf16.msra.mxu1 %v5939_v57  ;;  %v6004_v15 = vcombine.high %v446_v9, %v450_v10  ;;  %v453_v57 = vld [vmem:[#allocation2 + $0x890] sm:$0xff] }
 0x1ec   :  { %2966 = vmatprep.subr.bf16.mxu0 %v5946_v16  ;;  %3130 = vmatprep.subr.bf16.mxu1 %v5948_v17  ;;  %v457_v16 = vld [vmem:[#allocation2 + $0x8b0] sm:$0xff]  ;;  %v454_v17 = vld [vmem:[#allocation2 + $0x898] sm:$0xff] }
 0x1ed   :  { %v6010_v20 = vcombine.high %v453_v57, %v457_v16  ;;  %v6009_v28 = vcombine.low %v453_v57, %v457_v16  ;;  %v509_v10 = vld [vmem:[#allocation2 + $0xa50] sm:$0xff] }
 0x1ef   :  { %2967 = vmatpush1.bf16.msra.mxu0 %v5945_v21  ;;  %3131 = vmatpush1.bf16.msra.mxu1 %v5947_v23  ;;  %v6012_v21 = vcombine.high %v454_v17, %v458_v12  ;;  %v461_v23 = vld [vmem:[#allocation2 + $0x8d0] sm:$0xff] }
 0x1f0   :  { %2968 = vmatprep.subr.bf16.mxu0 %v5954_v24  ;;  %3132 = vmatprep.subr.bf16.mxu1 %v5956_v26  ;;  %v465_v24 = vld [vmem:[#allocation2 + $0x8f0] sm:$0xff]  ;;  %v462_v26 = vld [vmem:[#allocation2 + $0x8d8] sm:$0xff] }
 0x1f1   :  { %v6018_v22 = vcombine.high %v461_v23, %v465_v24  ;;  %v6020_v29 = vcombine.high %v462_v26, %v466_v27  ;;  %v6017_v35 = vcombine.low %v461_v23, %v465_v24  ;;  %v6019_v36 = vcombine.low %v462_v26, %v466_v27  ;;  %v525_v27 = vld [vmem:[#allocation2 + $0xad0] sm:$0xff] }
 0x1f3   :  { %2969 = vmatpush1.bf16.msra.mxu0 %v5953_v30  ;;  %3133 = vmatpush1.bf16.msra.mxu1 %v5955_v31  ;;  %v469_v30 = vld [vmem:[#allocation2 + $0x910] sm:$0xff] }
 0x1f4   :  { %2970 = vmatprep.subr.bf16.mxu0 %v5962_v32  ;;  %3134 = vmatprep.subr.bf16.mxu1 %v5964_v33  ;;  %v473_v31 = vld [vmem:[#allocation2 + $0x930] sm:$0xff]  ;;  %v470_v32 = vld [vmem:[#allocation2 + $0x918] sm:$0xff] }
 0x1f5   :  { %v474_v33 = vld [vmem:[#allocation2 + $0x938] sm:$0xff]  ;;  %v6026_v37 = vcombine.high %v469_v30, %v473_v31 }
 0x1f6   :  { %v6027_v45 = vcombine.low %v470_v32, %v474_v33 }
 0x1f7   :  { %2971 = vmatpush1.bf16.msra.mxu0 %v5961_v40  ;;  %3135 = vmatpush1.bf16.msra.mxu1 %v5963_v41  ;;  %v481_v40 = vld [vmem:[#allocation2 + $0x970] sm:$0xff]  ;;  %v478_v41 = vld [vmem:[#allocation2 + $0x958] sm:$0xff] }
 0x1f8   :  { %2972 = vmatprep.subr.bf16.mxu0 %v5970_v42  ;;  %3136 = vmatprep.subr.bf16.mxu1 %v5972_v44  ;;  %v482_v42 = vld [vmem:[#allocation2 + $0x978] sm:$0xff]  ;;  %v6025_v44 = vcombine.low %v469_v30, %v473_v31  ;;  %v6034_v46 = vcombine.high %v477_v39, %v481_v40 }
 0x1f9   :  { %v6036_v47 = vcombine.high %v478_v41, %v482_v42  ;;  %v6035_v54 = vcombine.low %v478_v41, %v482_v42  ;;  %v541_v42 = vld [vmem:[#allocation2 + $0xb50] sm:$0xff] }
 0x1fb   :  { %2973 = vmatpush1.bf16.msra.mxu0 %v5969_v50  ;;  %3137 = vmatpush1.bf16.msra.mxu1 %v5971_v51  ;;  %v489_v50 = vld [vmem:[#allocation2 + $0x9b0] sm:$0xff]  ;;  %v486_v51 = vld [vmem:[#allocation2 + $0x998] sm:$0xff] }
 0x1fc   :  { %2974 = vmatprep.subr.bf16.mxu0 %v5978_v52  ;;  %3138 = vmatprep.subr.bf16.mxu1 %v5980_v53  ;;  %v490_v52 = vld [vmem:[#allocation2 + $0x9b8] sm:$0xff]  ;;  %v6033_v53 = vcombine.low %v477_v39, %v481_v40  ;;  %v6042_v55 = vcombine.high %v485_v48, %v489_v50 }
 0x1fd   :  { %v6044_v56 = vcombine.high %v486_v51, %v490_v52  ;;  %v6043_v63 = vcombine.low %v486_v51, %v490_v52  ;;  %v549_v52 = vld [vmem:[#allocation2 + $0xb90] sm:$0xff] }
 0x1ff   :  { %2975 = vmatpush1.bf16.msra.mxu0 %v5977_v59  ;;  %3139 = vmatpush1.bf16.msra.mxu1 %v5979_v60  ;;  %v497_v59 = vld [vmem:[#allocation2 + $0x9f0] sm:$0xff]  ;;  %v494_v60 = vld [vmem:[#allocation2 + $0x9d8] sm:$0xff] }
 0x200   :  { %2976 = vmatprep.subr.bf16.mxu0 %v5986_v61  ;;  %3140 = vmatprep.subr.bf16.mxu1 %v5988_v62  ;;  %v498_v61 = vld [vmem:[#allocation2 + $0x9f8] sm:$0xff]  ;;  %v6041_v62 = vcombine.low %v485_v48, %v489_v50  ;;  %v6050_v0 = vcombine.high %v493_v58, %v497_v59 }
 0x201   :  { %v6052_v1 = vcombine.high %v494_v60, %v498_v61  ;;  %v6051_v7 = vcombine.low %v494_v60, %v498_v61  ;;  %v557_v61 = vld [vmem:[#allocation2 + $0xbd0] sm:$0xff] }
 0x203   :  { %2977 = vmatpush1.bf16.msra.mxu0 %v5985_v3  ;;  %3141 = vmatpush1.bf16.msra.mxu1 %v5987_v4  ;;  %v505_v3 = vld [vmem:[#allocation2 + $0xa30] sm:$0xff]  ;;  %v502_v4 = vld [vmem:[#allocation2 + $0xa18] sm:$0xff] }
 0x204   :  { %2987 = vmatprep.subr.bf16.mxu0 %v5994_v5  ;;  %3151 = vmatprep.subr.bf16.mxu1 %v5996_v6  ;;  %v506_v5 = vld [vmem:[#allocation2 + $0xa38] sm:$0xff]  ;;  %v6049_v6 = vcombine.low %v493_v58, %v497_v59  ;;  %v6058_v8 = vcombine.high %v501_v2, %v505_v3 }
 0x205   :  { %v6060_v9 = vcombine.high %v502_v4, %v506_v5  ;;  %v6059_v57 = vcombine.low %v502_v4, %v506_v5  ;;  %v565_v5 = vld [vmem:[#allocation2 + $0xc10] sm:$0xff] }
 0x206   :  { %2979 = vmatmul.mubr.bf16.vlgmr.msra.gmra.mrb[4].mxu0 %v7545_v25  ;;  %3143 = vmatmul.mubr.bf16.vlgmr.msra.gmra.mrb[4].mxu1 %v7545_v25  ;;  %v6011_v25 = vcombine.low %v454_v17, %v458_v12  ;;  %v517_v12 = vld [vmem:[#allocation2 + $0xa90] sm:$0xff] }
 0x207   :  { %2988 = vmatpush1.bf16.msra.mxu0 %v5993_v11  ;;  %3152 = vmatpush1.bf16.msra.mxu1 %v5995_v13  ;;  %v513_v11 = vld [vmem:[#allocation2 + $0xa70] sm:$0xff]  ;;  %v510_v13 = vld [vmem:[#allocation2 + $0xa58] sm:$0xff] }
 0x208   :  { %2989 = vmatprep.subr.bf16.mxu0 %v6002_v14  ;;  %3153 = vmatprep.subr.bf16.mxu1 %v6004_v15  ;;  %v514_v14 = vld [vmem:[#allocation2 + $0xa78] sm:$0xff]  ;;  %v6057_v15 = vcombine.low %v501_v2, %v505_v3  ;;  %v6066_v16 = vcombine.high %v509_v10, %v513_v11 }
 0x209   :  { %3019 = vmatprep.mubr.bf16.mxu0 %v7547_v34  ;;  %3183 = vmatprep.mubr.bf16.mxu1 %v7547_v34  ;;  %v6028_v34 = vcombine.high %v470_v32, %v474_v33  ;;  %v6068_v17 = vcombine.high %v510_v13, %v514_v14  ;;  %v6067_v23 = vcombine.low %v510_v13, %v514_v14  ;;  %v533_v33 = vld [vmem:[#allocation2 + $0xb10] sm:$0xff] }
 0x20b   :  { %2990 = vmatpush1.bf16.msra.mxu0 %v6001_v18  ;;  %3154 = vmatpush1.bf16.msra.mxu1 %v6003_v19  ;;  %v521_v18 = vld [vmem:[#allocation2 + $0xab0] sm:$0xff]  ;;  %v518_v19 = vld [vmem:[#allocation2 + $0xa98] sm:$0xff] }
 0x20c   :  { %2991 = vmatprep.subr.bf16.mxu0 %v6010_v20  ;;  %3155 = vmatprep.subr.bf16.mxu1 %v6012_v21  ;;  %v522_v20 = vld [vmem:[#allocation2 + $0xab8] sm:$0xff]  ;;  %v6065_v21 = vcombine.low %v509_v10, %v513_v11  ;;  %v6074_v24 = vcombine.high %v517_v12, %v521_v18 }
 0x20d   :  { %v6076_v26 = vcombine.high %v518_v19, %v522_v20  ;;  %v6075_v30 = vcombine.low %v518_v19, %v522_v20  ;;  %v6644_v19 = vld [vmem:[#allocation6 + $0x8] ss:$16 sps:$4 sm:$0xff]   ;;  %v6649_v20 = vld [vmem:[#allocation6 + $0x24] ss:$16 sps:$4 sm:$0xff]  }
 0x20f   :  { %2992 = vmatpush1.bf16.msra.mxu0 %v6009_v28  ;;  %3156 = vmatpush1.bf16.msra.mxu1 %v6011_v25  ;;  %v529_v28 = vld [vmem:[#allocation2 + $0xaf0] sm:$0xff]  ;;  %v526_v25 = vld [vmem:[#allocation2 + $0xad8] sm:$0xff] }
 0x210   :  { %2993 = vmatprep.subr.bf16.mxu0 %v6018_v22  ;;  %3157 = vmatprep.subr.bf16.mxu1 %v6020_v29  ;;  %v530_v22 = vld [vmem:[#allocation2 + $0xaf8] sm:$0xff]  ;;  %v6073_v29 = vcombine.low %v517_v12, %v521_v18  ;;  %v6082_v31 = vcombine.high %v525_v27, %v529_v28 }
 0x211   :  { %v6084_v32 = vcombine.high %v526_v25, %v530_v22  ;;  %v6083_v39 = vcombine.low %v526_v25, %v530_v22  ;;  %v6641_v12 = vld [vmem:[#allocation6] ss:$16 sps:$4 sm:$0xff]   ;;  %v6661_v22 = vld [vmem:[#allocation6 + $0x64] ss:$16 sps:$4 sm:$0xff]  }
 0x213   :  { %2994 = vmatpush1.bf16.msra.mxu0 %v6017_v35  ;;  %3158 = vmatpush1.bf16.msra.mxu1 %v6019_v36  ;;  %v537_v35 = vld [vmem:[#allocation2 + $0xb30] sm:$0xff]  ;;  %v534_v36 = vld [vmem:[#allocation2 + $0xb18] sm:$0xff] }
 0x214   :  { %2995 = vmatprep.subr.bf16.mxu0 %v6026_v37  ;;  %3159 = vmatprep.subr.bf16.mxu1 %v6028_v34  ;;  %v538_v37 = vld [vmem:[#allocation2 + $0xb38] sm:$0xff]  ;;  %v6081_v34 = vcombine.low %v525_v27, %v529_v28  ;;  %v6090_v40 = vcombine.high %v533_v33, %v537_v35  ;;  %v6658_v27 = vld [vmem:[#allocation6 + $0x4c] ss:$16 sps:$4 sm:$0xff]  }
 0x215   :  { %v6092_v41 = vcombine.high %v534_v36, %v538_v37  ;;  %v6091_v48 = vcombine.low %v534_v36, %v538_v37  ;;  %v6653_v28 = vld [vmem:[#allocation6 + $0x40] ss:$16 sps:$4 sm:$0xff]  }
 0x216   :  { %v6659_v37 = vld [vmem:[#allocation6 + $0x60] ss:$16 sps:$4 sm:$0xff]  }
 0x217   :  { %2996 = vmatpush1.bf16.msra.mxu0 %v6025_v44  ;;  %3160 = vmatpush1.bf16.msra.mxu1 %v6027_v45  ;;  %v545_v44 = vld [vmem:[#allocation2 + $0xb70] sm:$0xff]  ;;  %v542_v45 = vld [vmem:[#allocation2 + $0xb58] sm:$0xff] }
 0x218   :  { %2997 = vmatprep.subr.bf16.mxu0 %v6034_v46  ;;  %3161 = vmatprep.subr.bf16.mxu1 %v6036_v47  ;;  %v546_v46 = vld [vmem:[#allocation2 + $0xb78] sm:$0xff]  ;;  %v6089_v47 = vcombine.low %v533_v33, %v537_v35  ;;  %v6098_v50 = vcombine.high %v541_v42, %v545_v44 }
 0x219   :  { %v6100_v51 = vcombine.high %v542_v45, %v546_v46  ;;  %v6099_v58 = vcombine.low %v542_v45, %v546_v46  ;;  %v6670_v45 = vld [vmem:[#allocation6 + $0x8c] ss:$16 sps:$4 sm:$0xff]  }
 0x21b   :  { %2998 = vmatpush1.bf16.msra.mxu0 %v6033_v53  ;;  %3162 = vmatpush1.bf16.msra.mxu1 %v6035_v54  ;;  %v553_v53 = vld [vmem:[#allocation2 + $0xbb0] sm:$0xff]  ;;  %v550_v54 = vld [vmem:[#allocation2 + $0xb98] sm:$0xff] }
 0x21c   :  { %2999 = vmatprep.subr.bf16.mxu0 %v6042_v55  ;;  %3163 = vmatprep.subr.bf16.mxu1 %v6044_v56  ;;  %v554_v55 = vld [vmem:[#allocation2 + $0xbb8] sm:$0xff]  ;;  %v6097_v56 = vcombine.low %v541_v42, %v545_v44  ;;  %v6106_v59 = vcombine.high %v549_v52, %v553_v53 }
 0x21d   :  { %v6108_v60 = vcombine.high %v550_v54, %v554_v55  ;;  %v6107_v2 = vcombine.low %v550_v54, %v554_v55  ;;  %v6679_v54 = vld [vmem:[#allocation6 + $0xc4] ss:$16 sps:$4 sm:$0xff]   ;;  %v6682_v55 = vld [vmem:[#allocation6 + $0xcc] ss:$16 sps:$4 sm:$0xff]  }
 0x21f   :  { %3000 = vmatpush1.bf16.msra.mxu0 %v6041_v62  ;;  %3164 = vmatpush1.bf16.msra.mxu1 %v6043_v63  ;;  %v561_v62 = vld [vmem:[#allocation2 + $0xbf0] sm:$0xff]  ;;  %v558_v63 = vld [vmem:[#allocation2 + $0xbd8] sm:$0xff] }
 0x220   :  { %3001 = vmatprep.subr.bf16.mxu0 %v6050_v0  ;;  %3165 = vmatprep.subr.bf16.mxu1 %v6052_v1  ;;  %v562_v0 = vld [vmem:[#allocation2 + $0xbf8] sm:$0xff]  ;;  %v6105_v1 = vcombine.low %v549_v52, %v553_v53  ;;  %v6114_v3 = vcombine.high %v557_v61, %v561_v62  ;;  %v6674_v53 = vld [vmem:[#allocation6 + $0xa8] ss:$16 sps:$4 sm:$0xff]  }
 0x221   :  { %v6116_v4 = vcombine.high %v558_v63, %v562_v0  ;;  %v6115_v10 = vcombine.low %v558_v63, %v562_v0  ;;  %v6671_v52 = vld [vmem:[#allocation6 + $0xa0] ss:$16 sps:$4 sm:$0xff]   ;;  %v6691_v63 = vld [vmem:[#allocation6 + $0x104] ss:$16 sps:$4 sm:$0xff]   ;;  %v6694_v0 = vld [vmem:[#allocation6 + $0x10c] ss:$16 sps:$4 sm:$0xff]  }
 0x223   :  { %3002 = vmatpush1.bf16.msra.mxu0 %v6049_v6  ;;  %3166 = vmatpush1.bf16.msra.mxu1 %v6051_v7  ;;  %v569_v6 = vld [vmem:[#allocation2 + $0xc30] sm:$0xff]  ;;  %v566_v7 = vld [vmem:[#allocation2 + $0xc18] sm:$0xff] }
 0x224   :  { %3003 = vmatprep.subr.bf16.mxu0 %v6058_v8  ;;  %3167 = vmatprep.subr.bf16.mxu1 %v6060_v9  ;;  %v570_v8 = vld [vmem:[#allocation2 + $0xc38] sm:$0xff]  ;;  %v6113_v9 = vcombine.low %v557_v61, %v561_v62  ;;  %v6122_v11 = vcombine.high %v565_v5, %v569_v6  ;;  %v6121_v14 = vcombine.low %v565_v5, %v569_v6  ;;  %v6686_v62 = vld [vmem:[#allocation6 + $0xe8] ss:$16 sps:$4 sm:$0xff]  }
 0x225   :  { %v6124_v13 = vcombine.high %v566_v7, %v570_v8  ;;  %v6683_v61 = vld [vmem:[#allocation6 + $0xe0] ss:$16 sps:$4 sm:$0xff]   ;;  %v6698_v6 = vld [vmem:[#allocation6 + $0x128] ss:$16 sps:$4 sm:$0xff]  }
 0x226   :  { %v6695_v5 = vld [vmem:[#allocation6 + $0x120] ss:$16 sps:$4 sm:$0xff]  }
 0x227   :  { %3004 = vmatpush1.bf16.msra.mxu0 %v6057_v15  ;;  %3168 = vmatpush1.bf16.msra.mxu1 %v6059_v57  ;;  %v6123_v15 = vcombine.low %v566_v7, %v570_v8  ;;  %v6643_v57 = vld [vmem:[#allocation6 + $0x4] ss:$16 sps:$4 sm:$0xff]   ;;  %v6706_v8 = vld [vmem:[#allocation6 + $0x14c] ss:$16 sps:$4 sm:$0xff]  }
 0x228   :  { %3005 = vmatprep.subr.bf16.mxu0 %v6066_v16  ;;  %3169 = vmatprep.subr.bf16.mxu1 %v6068_v17  ;;  %v6646_v16 = vld [vmem:[#allocation6 + $0xc] ss:$16 sps:$4 sm:$0xff]   ;;  %v573_v17 = vlaneseq  ;;  %v6703_v7 = vld [vmem:[#allocation6 + $0x144] ss:$16 sps:$4 sm:$0xff]  }
 0x22a   :  { %v7585_v18 = vshrl.u32 %v573_v17, 7  ;;  %v6713_v17 = vld [vmem:[#allocation6 + $0x180] ss:$16 sps:$4 sm:$0xff]  }
 0x22b   :  { %3006 = vmatpush1.bf16.msra.mxu0 %v6065_v21  ;;  %3170 = vmatpush1.bf16.msra.mxu1 %v6067_v23  ;;  %v6652_v21 = vld [vmem:[#allocation6 + $0x2c] ss:$16 sps:$4 sm:$0xff]  }
 0x22c   :  { %3007 = vmatprep.subr.bf16.mxu0 %v6074_v24  ;;  %3171 = vmatprep.subr.bf16.mxu1 %v6076_v26  ;;  %v579_v23 = vsub.s32 1, %v7585_v18  ;;  %v6655_v24 = vld [vmem:[#allocation6 + $0x44] ss:$16 sps:$4 sm:$0xff]   ;;  %v7592_v26 = vld [vmem:[#allocation4] sm:$0xff] }
 0x22e   :  { %v580_v25 = vrot.slane %v7592_v26, %v579_v23 }
 0x22f   :  { %3008 = vmatpush1.bf16.msra.mxu0 %v6073_v29  ;;  %3172 = vmatpush1.bf16.msra.mxu1 %v6075_v30  ;;  %v6664_v30 = vld [vmem:[#allocation6 + $0x6c] ss:$16 sps:$4 sm:$0xff]  }
 0x230   :  { %3009 = vmatprep.subr.bf16.mxu0 %v6082_v31  ;;  %3173 = vmatprep.subr.bf16.mxu1 %v6084_v32 }
 0x233   :  { %3010 = vmatpush1.bf16.msra.mxu0 %v6081_v34  ;;  %3174 = vmatpush1.bf16.msra.mxu1 %v6083_v39 }
 0x234   :  { %3011 = vmatprep.subr.bf16.mxu0 %v6090_v40  ;;  %3175 = vmatprep.subr.bf16.mxu1 %v6092_v41  ;;  %v6662_v40 = vld [vmem:[#allocation6 + $0x68] ss:$16 sps:$4 sm:$0xff]   ;;  %v6667_v41 = vld [vmem:[#allocation6 + $0x84] ss:$16 sps:$4 sm:$0xff]  }
 0x237   :  { %3012 = vmatpush1.bf16.msra.mxu0 %v6089_v47  ;;  %3176 = vmatpush1.bf16.msra.mxu1 %v6091_v48  ;;  %v6665_v47 = vld [vmem:[#allocation6 + $0x80] ss:$16 sps:$4 sm:$0xff]   ;;  %v6668_v48 = vld [vmem:[#allocation6 + $0x88] ss:$16 sps:$4 sm:$0xff]  }
 0x238   :  { %3013 = vmatprep.subr.bf16.mxu0 %v6098_v50  ;;  %3177 = vmatprep.subr.bf16.mxu1 %v6100_v51  ;;  %v6673_v50 = vld [vmem:[#allocation6 + $0xa4] ss:$16 sps:$4 sm:$0xff]   ;;  %v6676_v51 = vld [vmem:[#allocation6 + $0xac] ss:$16 sps:$4 sm:$0xff]  }
 0x23b   :  { %3014 = vmatpush1.bf16.msra.mxu0 %v6097_v56  ;;  %3178 = vmatpush1.bf16.msra.mxu1 %v6099_v58  ;;  %v6677_v56 = vld [vmem:[#allocation6 + $0xc0] ss:$16 sps:$4 sm:$0xff]   ;;  %v6680_v58 = vld [vmem:[#allocation6 + $0xc8] ss:$16 sps:$4 sm:$0xff]  }
 0x23c   :  { %3015 = vmatprep.subr.bf16.mxu0 %v6106_v59  ;;  %3179 = vmatprep.subr.bf16.mxu1 %v6108_v60  ;;  %v6685_v59 = vld [vmem:[#allocation6 + $0xe4] ss:$16 sps:$4 sm:$0xff]   ;;  %v6688_v60 = vld [vmem:[#allocation6 + $0xec] ss:$16 sps:$4 sm:$0xff]  }
 0x23f   :  { %3016 = vmatpush1.bf16.msra.mxu0 %v6105_v1  ;;  %3180 = vmatpush1.bf16.msra.mxu1 %v6107_v2  ;;  %v6689_v1 = vld [vmem:[#allocation6 + $0x100] ss:$16 sps:$4 sm:$0xff]   ;;  %v6692_v2 = vld [vmem:[#allocation6 + $0x108] ss:$16 sps:$4 sm:$0xff]  }
 0x240   :  { %3017 = vmatprep.subr.bf16.mxu0 %v6114_v3  ;;  %3181 = vmatprep.subr.bf16.mxu1 %v6116_v4  ;;  %v6697_v3 = vld [vmem:[#allocation6 + $0x124] ss:$16 sps:$4 sm:$0xff]   ;;  %v6700_v4 = vld [vmem:[#allocation6 + $0x12c] ss:$16 sps:$4 sm:$0xff]  }
 0x243   :  { %3018 = vmatpush1.bf16.msra.mxu0 %v6113_v9  ;;  %3182 = vmatpush1.bf16.msra.mxu1 %v6115_v10  ;;  %v6701_v9 = vld [vmem:[#allocation6 + $0x140] ss:$16 sps:$4 sm:$0xff]   ;;  %v6704_v10 = vld [vmem:[#allocation6 + $0x148] ss:$16 sps:$4 sm:$0xff]  }
 0x244   :  { %3028 = vmatprep.subr.bf16.mxu0 %v6122_v11  ;;  %3192 = vmatprep.subr.bf16.mxu1 %v6124_v13  ;;  %v6709_v11 = vld [vmem:[#allocation6 + $0x164] ss:$16 sps:$4 sm:$0xff]   ;;  %v6712_v13 = vld [vmem:[#allocation6 + $0x16c] ss:$16 sps:$4 sm:$0xff]  }
 0x246   :  { %3020 = vmatmul.mubr.bf16.vlgmr.msra.gmra.mrb[4].mxu0 %v7556_v38  ;;  %3184 = vmatmul.mubr.bf16.vlgmr.msra.gmra.mrb[4].mxu1 %v7556_v38  ;;  %v6647_v38 = vld [vmem:[#allocation6 + $0x20] ss:$16 sps:$4 sm:$0xff]  }
 0x247   :  { %3029 = vmatpush1.bf16.msra.mxu0 %v6121_v14  ;;  %3193 = vmatpush1.bf16.msra.mxu1 %v6123_v15  ;;  %v6707_v14 = vld [vmem:[#allocation6 + $0x160] ss:$16 sps:$4 sm:$0xff]   ;;  %v6710_v15 = vld [vmem:[#allocation6 + $0x168] ss:$16 sps:$4 sm:$0xff]  }
 0x248   :  { %3060 = vmatprep.mubr.bf16.mxu0 %v7326_v43  ;;  %3224 = vmatprep.mubr.bf16.mxu1 %v7326_v43  ;;  %v6650_v43 = vld [vmem:[#allocation6 + $0x28] ss:$16 sps:$4 sm:$0xff]  }
 0x249   :  { %4807 = vmatprep.subr.bf16.mxu0 %v6643_v57  ;;  %4971 = vmatprep.subr.bf16.mxu1 %v6646_v16  ;;  %v6715_v57 = vld [vmem:[#allocation6 + $0x184] ss:$16 sps:$4 sm:$0xff]   ;;  %v6718_v16 = vld [vmem:[#allocation6 + $0x18c] ss:$16 sps:$4 sm:$0xff]  }
 0x252   :  { %6127 = vmatmul.mubr.msk.bf16.vlgmr.msra.gmra.mrb[4].mxu0 %vm2573_vm0, %v7565_v49  ;;  %6128 = vmatmul.mubr.msk.bf16.vlgmr.msra.gmra.mrb[4].mxu1 %vm2573_vm0, %v7565_v49  ;;  %v6656_v49 = vld [vmem:[#allocation6 + $0x48] ss:$16 sps:$4 sm:$0xff]  }
 0x253   :  { %4808 = vmatpush1.bf16.msra.mxu0 %v6641_v12  ;;  %4972 = vmatpush1.bf16.msra.mxu1 %v6644_v19  ;;  %v575_v12 = vsub.s32 0, %v7585_v18  ;;  %v6716_v19 = vld [vmem:[#allocation6 + $0x188] ss:$16 sps:$4 sm:$0xff]  }
 0x254   :  { %4809 = vmatprep.subr.bf16.mxu0 %v6649_v20  ;;  %4973 = vmatprep.subr.bf16.mxu1 %v6652_v21  ;;  %v6721_v20 = vld [vmem:[#allocation6 + $0x1a4] ss:$16 sps:$4 sm:$0xff]   ;;  %v6724_v21 = vld [vmem:[#allocation6 + $0x1ac] ss:$16 sps:$4 sm:$0xff]  }
 0x257   :  { %4810 = vmatpush1.bf16.msra.mxu0 %v6647_v38  ;;  %4974 = vmatpush1.bf16.msra.mxu1 %v6650_v43  ;;  %v587_v38 = vsub.s32 3, %v7585_v18  ;;  %v6719_v43 = vld [vmem:[#allocation6 + $0x1a0] ss:$16 sps:$4 sm:$0xff]  }
 0x258   :  { %4811 = vmatprep.subr.bf16.mxu0 %v6655_v24  ;;  %4975 = vmatprep.subr.bf16.mxu1 %v6658_v27  ;;  %v576_v24 = vrot.slane %v7592_v26, %v575_v12  ;;  %v6722_v27 = vld [vmem:[#allocation6 + $0x1a8] ss:$16 sps:$4 sm:$0xff]  }
 0x259   :  { %v7597_v29 = vpop.f32.mrb[0].mxu0  ;;  %v7599_v31 = vpop.f32.mrb[0].mxu1 }
 0x25a   :  { %v2736_v32 = vpop.f32.mrb[1].mxu0  ;;  %v7601_v35 = vpop.f32.mrb[1].mxu1 }
 0x25b   :  { %4812 = vmatpush1.bf16.msra.mxu0 %v6653_v28  ;;  %v6539_v33 = vadd.f32 %v2736_v32, %v580_v25  ;;  %v2738_v36 = vpop.f32.mrb[2].mxu0  ;;  %4976 = vmatpush1.bf16.msra.mxu1 %v6656_v49  ;;  %v2902_v34 = vpop.f32.mrb[2].mxu1  ;;  %v6727_v28 = vld [vmem:[#allocation6 + $0x1c4] ss:$16 sps:$4 sm:$0xff]   ;;  %v6730_v25 = vld [vmem:[#allocation6 + $0x1cc] ss:$16 sps:$4 sm:$0xff]   ;;  %v588_v49 = vrot.slane %v7592_v26, %v587_v38 }
 0x25c   :  { %v2739_v39 = vpop.f32.mrb[3].mxu0  ;;  %4813 = vmatprep.subr.bf16.mxu0 %v6661_v22  ;;  %v2903_v44 = vpop.f32.mrb[3].mxu1  ;;  %4977 = vmatprep.subr.bf16.mxu1 %v6664_v30  ;;  %v6725_v22 = vld [vmem:[#allocation6 + $0x1c0] ss:$16 sps:$4 sm:$0xff]   ;;  %v6538_v30 = vadd.f32 %v7597_v29, %v576_v24  ;;  %v6728_v32 = vld [vmem:[#allocation6 + $0x1c8] ss:$16 sps:$4 sm:$0xff]  }
 0x25d   :  { %v3234_v42 = vmax.f32 %v6539_v33, 0.0  ;;  %v6733_v33 = vld [vmem:[#allocation6 + $0x1e4] ss:$16 sps:$4 sm:$0xff]   ;;  %v6736_v36 = vld [vmem:[#allocation6 + $0x1ec] ss:$16 sps:$4 sm:$0xff]  }
 0x25e   :  { %v6731_v34 = vld [vmem:[#allocation6 + $0x1e0] ss:$16 sps:$4 sm:$0xff]   ;;  %v3233_v39 = vmax.f32 %v6538_v30, 0.0  ;;  %v6802_v24 = vld [vmem:[#allocation6 + $0x34c] ss:$16 sps:$4 sm:$0xff]  }
 0x25f   :  { %v3242_v46 = vpack.c.bf16 %v3234_v42, %v3234_v42  ;;  %4814 = vmatpush1.bf16.msra.mxu0 %v6659_v37  ;;  %4978 = vmatpush1.bf16.msra.mxu1 %v6662_v40  ;;  %v6541_v37 = vadd.f32 %v7601_v35, %v588_v49  ;;  %v6734_v40 = vld [vmem:[#allocation6 + $0x1e8] ss:$16 sps:$4 sm:$0xff]   ;;  %v6742_v42 = vld [vmem:[#allocation6 + $0x20c] ss:$16 sps:$4 sm:$0xff]   ;;  %v6737_v29 = vld [vmem:[#allocation6 + $0x200] ss:$16 sps:$4 sm:$0xff]  }
 0x260   :  { %4815 = vmatprep.subr.bf16.mxu0 %v6667_v41  ;;  %4979 = vmatprep.subr.bf16.mxu1 %v6670_v45  ;;  %v6739_v41 = vld [vmem:[#allocation6 + $0x204] ss:$16 sps:$4 sm:$0xff]   ;;  %v3241_v45 = vpack.c.bf16 %v3233_v39, %v3233_v39  ;;  %v6748_v35 = vld [vmem:[#allocation6 + $0x22c] ss:$16 sps:$4 sm:$0xff]   ;;  %v6806_v30 = vld [vmem:[#allocation6 + $0x368] ss:$16 sps:$4 sm:$0xff]  }
 0x261   :  { %4839 = vmatprep.mubr.bf16.mxu0 %v3242_v46  ;;  %5003 = vmatprep.mubr.bf16.mxu1 %v3242_v46  ;;  %v3236_v44 = vmax.f32 %v6541_v37, 0.0  ;;  %v6740_v46 = vld [vmem:[#allocation6 + $0x208] ss:$16 sps:$4 sm:$0xff]   ;;  %v6808_v49 = vld [vmem:[#allocation6 + $0x36c] ss:$16 sps:$4 sm:$0xff]   ;;  %v583_v37 = vsub.s32 2, %v7585_v18 }
 0x262   :  { %v6817_v39 = vld [vmem:[#allocation6 + $0x3a4] ss:$16 sps:$4 sm:$0xff]  }
 0x263   :  { %4816 = vmatpush1.bf16.msra.mxu0 %v6665_v47  ;;  %4980 = vmatpush1.bf16.msra.mxu1 %v6668_v48  ;;  %v6745_v47 = vld [vmem:[#allocation6 + $0x224] ss:$16 sps:$4 sm:$0xff]   ;;  %v3244_v48 = vpack.c.bf16 %v3236_v44, %v3236_v44  ;;  %v6818_v44 = vld [vmem:[#allocation6 + $0x3a8] ss:$16 sps:$4 sm:$0xff]  }
 0x264   :  { %4817 = vmatprep.subr.bf16.mxu0 %v6673_v50  ;;  %4981 = vmatprep.subr.bf16.mxu1 %v6676_v51  ;;  %v6743_v50 = vld [vmem:[#allocation6 + $0x220] ss:$16 sps:$4 sm:$0xff]   ;;  %v6746_v51 = vld [vmem:[#allocation6 + $0x228] ss:$16 sps:$4 sm:$0xff]  }
 0x267   :  { %4818 = vmatpush1.bf16.msra.mxu0 %v6671_v52  ;;  %4982 = vmatpush1.bf16.msra.mxu1 %v6674_v53  ;;  %v6751_v52 = vld [vmem:[#allocation6 + $0x244] ss:$16 sps:$4 sm:$0xff]   ;;  %v6754_v53 = vld [vmem:[#allocation6 + $0x24c] ss:$16 sps:$4 sm:$0xff]  }
 0x268   :  { %4819 = vmatprep.subr.bf16.mxu0 %v6679_v54  ;;  %4983 = vmatprep.subr.bf16.mxu1 %v6682_v55  ;;  %v6749_v54 = vld [vmem:[#allocation6 + $0x240] ss:$16 sps:$4 sm:$0xff]   ;;  %v6752_v55 = vld [vmem:[#allocation6 + $0x248] ss:$16 sps:$4 sm:$0xff]  }
 0x26b   :  { %4820 = vmatpush1.bf16.msra.mxu0 %v6677_v56  ;;  %4984 = vmatpush1.bf16.msra.mxu1 %v6680_v58  ;;  %v6757_v56 = vld [vmem:[#allocation6 + $0x264] ss:$16 sps:$4 sm:$0xff]   ;;  %v6760_v58 = vld [vmem:[#allocation6 + $0x26c] ss:$16 sps:$4 sm:$0xff]  }
 0x26c   :  { %4821 = vmatprep.subr.bf16.mxu0 %v6685_v59  ;;  %4985 = vmatprep.subr.bf16.mxu1 %v6688_v60  ;;  %v6755_v59 = vld [vmem:[#allocation6 + $0x260] ss:$16 sps:$4 sm:$0xff]   ;;  %v6758_v60 = vld [vmem:[#allocation6 + $0x268] ss:$16 sps:$4 sm:$0xff]  }
 0x26f   :  { %4822 = vmatpush1.bf16.msra.mxu0 %v6683_v61  ;;  %4986 = vmatpush1.bf16.msra.mxu1 %v6686_v62  ;;  %v6763_v61 = vld [vmem:[#allocation6 + $0x284] ss:$16 sps:$4 sm:$0xff]   ;;  %v6766_v62 = vld [vmem:[#allocation6 + $0x28c] ss:$16 sps:$4 sm:$0xff]  }
 0x270   :  { %4823 = vmatprep.subr.bf16.mxu0 %v6691_v63  ;;  %4987 = vmatprep.subr.bf16.mxu1 %v6694_v0  ;;  %v6761_v63 = vld [vmem:[#allocation6 + $0x280] ss:$16 sps:$4 sm:$0xff]   ;;  %v6764_v0 = vld [vmem:[#allocation6 + $0x288] ss:$16 sps:$4 sm:$0xff]  }
 0x273   :  { %4824 = vmatpush1.bf16.msra.mxu0 %v6689_v1  ;;  %4988 = vmatpush1.bf16.msra.mxu1 %v6692_v2  ;;  %v6769_v1 = vld [vmem:[#allocation6 + $0x2a4] ss:$16 sps:$4 sm:$0xff]   ;;  %v6772_v2 = vld [vmem:[#allocation6 + $0x2ac] ss:$16 sps:$4 sm:$0xff]  }
 0x274   :  { %4825 = vmatprep.subr.bf16.mxu0 %v6697_v3  ;;  %4989 = vmatprep.subr.bf16.mxu1 %v6700_v4  ;;  %v6767_v3 = vld [vmem:[#allocation6 + $0x2a0] ss:$16 sps:$4 sm:$0xff]   ;;  %v6770_v4 = vld [vmem:[#allocation6 + $0x2a8] ss:$16 sps:$4 sm:$0xff]  }
 0x277   :  { %4826 = vmatpush1.bf16.msra.mxu0 %v6695_v5  ;;  %4990 = vmatpush1.bf16.msra.mxu1 %v6698_v6  ;;  %v6775_v5 = vld [vmem:[#allocation6 + $0x2c4] ss:$16 sps:$4 sm:$0xff]   ;;  %v6778_v6 = vld [vmem:[#allocation6 + $0x2cc] ss:$16 sps:$4 sm:$0xff]  }
 0x278   :  { %4827 = vmatprep.subr.bf16.mxu0 %v6703_v7  ;;  %4991 = vmatprep.subr.bf16.mxu1 %v6706_v8  ;;  %v6773_v7 = vld [vmem:[#allocation6 + $0x2c0] ss:$16 sps:$4 sm:$0xff]   ;;  %v6776_v8 = vld [vmem:[#allocation6 + $0x2c8] ss:$16 sps:$4 sm:$0xff]  }
 0x27b   :  { %4828 = vmatpush1.bf16.msra.mxu0 %v6701_v9  ;;  %4992 = vmatpush1.bf16.msra.mxu1 %v6704_v10  ;;  %v6781_v9 = vld [vmem:[#allocation6 + $0x2e4] ss:$16 sps:$4 sm:$0xff]   ;;  %v6784_v10 = vld [vmem:[#allocation6 + $0x2ec] ss:$16 sps:$4 sm:$0xff]  }
 0x27c   :  { %4829 = vmatprep.subr.bf16.mxu0 %v6709_v11  ;;  %4993 = vmatprep.subr.bf16.mxu1 %v6712_v13  ;;  %v6779_v11 = vld [vmem:[#allocation6 + $0x2e0] ss:$16 sps:$4 sm:$0xff]   ;;  %v6782_v13 = vld [vmem:[#allocation6 + $0x2e8] ss:$16 sps:$4 sm:$0xff]  }
 0x27f   :  { %4830 = vmatpush1.bf16.msra.mxu0 %v6707_v14  ;;  %4994 = vmatpush1.bf16.msra.mxu1 %v6710_v15  ;;  %v6787_v14 = vld [vmem:[#allocation6 + $0x304] ss:$16 sps:$4 sm:$0xff]   ;;  %v6790_v15 = vld [vmem:[#allocation6 + $0x30c] ss:$16 sps:$4 sm:$0xff]  }
 0x280   :  { %4831 = vmatprep.subr.bf16.mxu0 %v6715_v57  ;;  %4995 = vmatprep.subr.bf16.mxu1 %v6718_v16  ;;  %v6785_v57 = vld [vmem:[#allocation6 + $0x300] ss:$16 sps:$4 sm:$0xff]   ;;  %v6788_v16 = vld [vmem:[#allocation6 + $0x308] ss:$16 sps:$4 sm:$0xff]  }
 0x283   :  { %4832 = vmatpush1.bf16.msra.mxu0 %v6713_v17  ;;  %4996 = vmatpush1.bf16.msra.mxu1 %v6716_v19  ;;  %v6793_v17 = vld [vmem:[#allocation6 + $0x324] ss:$16 sps:$4 sm:$0xff]   ;;  %v6796_v19 = vld [vmem:[#allocation6 + $0x32c] ss:$16 sps:$4 sm:$0xff]  }
 0x284   :  { %4833 = vmatprep.subr.bf16.mxu0 %v6721_v20  ;;  %4997 = vmatprep.subr.bf16.mxu1 %v6724_v21  ;;  %v6791_v20 = vld [vmem:[#allocation6 + $0x320] ss:$16 sps:$4 sm:$0xff]   ;;  %v6794_v21 = vld [vmem:[#allocation6 + $0x328] ss:$16 sps:$4 sm:$0xff]  }
 0x287   :  { %4834 = vmatpush1.bf16.msra.mxu0 %v6719_v43  ;;  %4998 = vmatpush1.bf16.msra.mxu1 %v6722_v27  ;;  %v6799_v43 = vld [vmem:[#allocation6 + $0x344] ss:$16 sps:$4 sm:$0xff]   ;;  %v6797_v27 = vld [vmem:[#allocation6 + $0x340] ss:$16 sps:$4 sm:$0xff]  }
 0x288   :  { %4835 = vmatprep.subr.bf16.mxu0 %v6727_v28  ;;  %4999 = vmatprep.subr.bf16.mxu1 %v6730_v25  ;;  %v6800_v28 = vld [vmem:[#allocation6 + $0x348] ss:$16 sps:$4 sm:$0xff]   ;;  %v6805_v25 = vld [vmem:[#allocation6 + $0x364] ss:$16 sps:$4 sm:$0xff]  }
 0x28b   :  { %4836 = vmatpush1.bf16.msra.mxu0 %v6725_v22  ;;  %5000 = vmatpush1.bf16.msra.mxu1 %v6728_v32  ;;  %v6803_v22 = vld [vmem:[#allocation6 + $0x360] ss:$16 sps:$4 sm:$0xff]   ;;  %v6811_v32 = vld [vmem:[#allocation6 + $0x384] ss:$16 sps:$4 sm:$0xff]  }
 0x28c   :  { %4837 = vmatprep.subr.bf16.mxu0 %v6733_v33  ;;  %5001 = vmatprep.subr.bf16.mxu1 %v6736_v36  ;;  %v6814_v33 = vld [vmem:[#allocation6 + $0x38c] ss:$16 sps:$4 sm:$0xff]   ;;  %v6809_v36 = vld [vmem:[#allocation6 + $0x380] ss:$16 sps:$4 sm:$0xff]  }
 0x28f   :  { %4838 = vmatpush1.bf16.msra.mxu0 %v6731_v34  ;;  %5002 = vmatpush1.bf16.msra.mxu1 %v6734_v40  ;;  %v6812_v34 = vld [vmem:[#allocation6 + $0x388] ss:$16 sps:$4 sm:$0xff]   ;;  %v6820_v40 = vld [vmem:[#allocation6 + $0x3ac] ss:$16 sps:$4 sm:$0xff]  }
 0x290   :  { %4848 = vmatprep.subr.bf16.mxu0 %v6739_v41  ;;  %5012 = vmatprep.subr.bf16.mxu1 %v6742_v42  ;;  %v6815_v41 = vld [vmem:[#allocation6 + $0x3a0] ss:$16 sps:$4 sm:$0xff]   ;;  %v584_v42 = vrot.slane %v7592_v26, %v583_v37 }
 0x292   :  { %4840 = vmatmul.mubr.bf16.vlgmr.msra.gmra.mrb[8].mxu0 %v3241_v45  ;;  %5004 = vmatmul.mubr.bf16.vlgmr.msra.gmra.mrb[8].mxu1 %v3241_v45  ;;  %v6826_v45 = vld [vmem:[#allocation6 + $0x3cc] ss:$16 sps:$4 sm:$0xff]  }
 0x293   :  { %4849 = vmatpush1.bf16.msra.mxu0 %v6737_v29  ;;  %4880 = vmatprep.mubr.bf16.mxu0 %v3244_v48  ;;  %v6823_v29 = vld [vmem:[#allocation6 + $0x3c4] ss:$16 sps:$4 sm:$0xff]  }
 0x294   :  { %5013 = vmatpush1.bf16.msra.mxu1 %v6740_v46  ;;  %5044 = vmatprep.mubr.bf16.mxu1 %v3244_v48  ;;  %v6821_v46 = vld [vmem:[#allocation6 + $0x3c0] ss:$16 sps:$4 sm:$0xff]   ;;  %v6824_v48 = vld [vmem:[#allocation6 + $0x3c8] ss:$16 sps:$4 sm:$0xff]  }
 0x295   :  { %4850 = vmatprep.subr.bf16.mxu0 %v6745_v47  ;;  %5014 = vmatprep.subr.bf16.mxu1 %v6748_v35  ;;  %v6540_v47 = vadd.f32 %v7599_v31, %v584_v42  ;;  %v6829_v35 = vld [vmem:[#allocation6 + $0x3e4] ss:$16 sps:$4 sm:$0xff]   ;;  %v6836_v31 = vld [vmem:[#allocation6 + $0x408] ss:$16 sps:$4 sm:$0xff]   ;;  %v6904_v42 = vld [vmem:[#allocation6 + $0x56c] ss:$16 sps:$4 sm:$0xff]  }
 0x297   :  { %4851 = vmatpush1.bf16.msra.mxu0 %v6743_v50  ;;  %v6832_v50 = vld [vmem:[#allocation6 + $0x3ec] ss:$16 sps:$4 sm:$0xff]  }
 0x298   :  { %5015 = vmatpush1.bf16.msra.mxu1 %v6746_v51  ;;  %4852 = vmatprep.subr.bf16.mxu0 %v6751_v52  ;;  %v6827_v51 = vld [vmem:[#allocation6 + $0x3e0] ss:$16 sps:$4 sm:$0xff]   ;;  %v3235_v52 = vmax.f32 %v6540_v47, 0.0 }
 0x299   :  { %5016 = vmatprep.subr.bf16.mxu1 %v6754_v53  ;;  %v6830_v53 = vld [vmem:[#allocation6 + $0x3e8] ss:$16 sps:$4 sm:$0xff]   ;;  %v6905_v47 = vld [vmem:[#allocation6 + $0x580] ss:$16 sps:$4 sm:$0xff]  }
 0x29b   :  { %4853 = vmatpush1.bf16.msra.mxu0 %v6749_v54  ;;  %v6835_v54 = vld [vmem:[#allocation6 + $0x404] ss:$16 sps:$4 sm:$0xff]  }
 0x29c   :  { %5017 = vmatpush1.bf16.msra.mxu1 %v6752_v55  ;;  %4854 = vmatprep.subr.bf16.mxu0 %v6757_v56  ;;  %v6838_v55 = vld [vmem:[#allocation6 + $0x40c] ss:$16 sps:$4 sm:$0xff]   ;;  %v6833_v56 = vld [vmem:[#allocation6 + $0x400] ss:$16 sps:$4 sm:$0xff]  }
 0x29d   :  { %5018 = vmatprep.subr.bf16.mxu1 %v6760_v58  ;;  %v3243_v58 = vpack.c.bf16 %v3235_v52, %v3235_v52  ;;  %v6914_v52 = vld [vmem:[#allocation6 + $0x5a8] ss:$16 sps:$4 sm:$0xff]  }
 0x29f   :  { %4855 = vmatpush1.bf16.msra.mxu0 %v6755_v59  ;;  %v6841_v59 = vld [vmem:[#allocation6 + $0x424] ss:$16 sps:$4 sm:$0xff]  }
 0x2a0   :  { %5019 = vmatpush1.bf16.msra.mxu1 %v6758_v60  ;;  %4856 = vmatprep.subr.bf16.mxu0 %v6763_v61  ;;  %v6844_v60 = vld [vmem:[#allocation6 + $0x42c] ss:$16 sps:$4 sm:$0xff]   ;;  %v6839_v61 = vld [vmem:[#allocation6 + $0x420] ss:$16 sps:$4 sm:$0xff]  }
 0x2a1   :  { %5020 = vmatprep.subr.bf16.mxu1 %v6766_v62  ;;  %v6842_v62 = vld [vmem:[#allocation6 + $0x428] ss:$16 sps:$4 sm:$0xff]  }
 0x2a3   :  { %4857 = vmatpush1.bf16.msra.mxu0 %v6761_v63  ;;  %v6847_v63 = vld [vmem:[#allocation6 + $0x444] ss:$16 sps:$4 sm:$0xff]  }
 0x2a4   :  { %5021 = vmatpush1.bf16.msra.mxu1 %v6764_v0  ;;  %4858 = vmatprep.subr.bf16.mxu0 %v6769_v1  ;;  %v6850_v0 = vld [vmem:[#allocation6 + $0x44c] ss:$16 sps:$4 sm:$0xff]   ;;  %v6845_v1 = vld [vmem:[#allocation6 + $0x440] ss:$16 sps:$4 sm:$0xff]  }
 0x2a5   :  { %5022 = vmatprep.subr.bf16.mxu1 %v6772_v2  ;;  %v6848_v2 = vld [vmem:[#allocation6 + $0x448] ss:$16 sps:$4 sm:$0xff]  }
 0x2a7   :  { %4859 = vmatpush1.bf16.msra.mxu0 %v6767_v3  ;;  %v6853_v3 = vld [vmem:[#allocation6 + $0x464] ss:$16 sps:$4 sm:$0xff]  }
 0x2a8   :  { %5023 = vmatpush1.bf16.msra.mxu1 %v6770_v4  ;;  %4860 = vmatprep.subr.bf16.mxu0 %v6775_v5  ;;  %v6856_v4 = vld [vmem:[#allocation6 + $0x46c] ss:$16 sps:$4 sm:$0xff]   ;;  %v6851_v5 = vld [vmem:[#allocation6 + $0x460] ss:$16 sps:$4 sm:$0xff]  }
 0x2a9   :  { %5024 = vmatprep.subr.bf16.mxu1 %v6778_v6  ;;  %v6854_v6 = vld [vmem:[#allocation6 + $0x468] ss:$16 sps:$4 sm:$0xff]  }
 0x2ab   :  { %4861 = vmatpush1.bf16.msra.mxu0 %v6773_v7  ;;  %v6859_v7 = vld [vmem:[#allocation6 + $0x484] ss:$16 sps:$4 sm:$0xff]  }
 0x2ac   :  { %5025 = vmatpush1.bf16.msra.mxu1 %v6776_v8  ;;  %4862 = vmatprep.subr.bf16.mxu0 %v6781_v9  ;;  %v6862_v8 = vld [vmem:[#allocation6 + $0x48c] ss:$16 sps:$4 sm:$0xff]   ;;  %v6857_v9 = vld [vmem:[#allocation6 + $0x480] ss:$16 sps:$4 sm:$0xff]  }
 0x2ad   :  { %5026 = vmatprep.subr.bf16.mxu1 %v6784_v10  ;;  %v6860_v10 = vld [vmem:[#allocation6 + $0x488] ss:$16 sps:$4 sm:$0xff]  }
 0x2af   :  { %4863 = vmatpush1.bf16.msra.mxu0 %v6779_v11  ;;  %v6865_v11 = vld [vmem:[#allocation6 + $0x4a4] ss:$16 sps:$4 sm:$0xff]  }
 0x2b0   :  { %5027 = vmatpush1.bf16.msra.mxu1 %v6782_v13  ;;  %4864 = vmatprep.subr.bf16.mxu0 %v6787_v14  ;;  %v6868_v13 = vld [vmem:[#allocation6 + $0x4ac] ss:$16 sps:$4 sm:$0xff]   ;;  %v6863_v14 = vld [vmem:[#allocation6 + $0x4a0] ss:$16 sps:$4 sm:$0xff]  }
 0x2b1   :  { %5028 = vmatprep.subr.bf16.mxu1 %v6790_v15  ;;  %v6866_v15 = vld [vmem:[#allocation6 + $0x4a8] ss:$16 sps:$4 sm:$0xff]  }
 0x2b3   :  { %4865 = vmatpush1.bf16.msra.mxu0 %v6785_v57  ;;  %v6871_v57 = vld [vmem:[#allocation6 + $0x4c4] ss:$16 sps:$4 sm:$0xff]  }
 0x2b4   :  { %5029 = vmatpush1.bf16.msra.mxu1 %v6788_v16  ;;  %4866 = vmatprep.subr.bf16.mxu0 %v6793_v17  ;;  %v6874_v16 = vld [vmem:[#allocation6 + $0x4cc] ss:$16 sps:$4 sm:$0xff]   ;;  %v6869_v17 = vld [vmem:[#allocation6 + $0x4c0] ss:$16 sps:$4 sm:$0xff]  }
 0x2b5   :  { %5030 = vmatprep.subr.bf16.mxu1 %v6796_v19  ;;  %v6872_v19 = vld [vmem:[#allocation6 + $0x4c8] ss:$16 sps:$4 sm:$0xff]  }
 0x2b7   :  { %4867 = vmatpush1.bf16.msra.mxu0 %v6791_v20  ;;  %v6877_v20 = vld [vmem:[#allocation6 + $0x4e4] ss:$16 sps:$4 sm:$0xff]  }
 0x2b8   :  { %5031 = vmatpush1.bf16.msra.mxu1 %v6794_v21  ;;  %4868 = vmatprep.subr.bf16.mxu0 %v6799_v43  ;;  %v6880_v21 = vld [vmem:[#allocation6 + $0x4ec] ss:$16 sps:$4 sm:$0xff]   ;;  %v6875_v43 = vld [vmem:[#allocation6 + $0x4e0] ss:$16 sps:$4 sm:$0xff]  }
 0x2b9   :  { %5032 = vmatprep.subr.bf16.mxu1 %v6802_v24  ;;  %v6878_v24 = vld [vmem:[#allocation6 + $0x4e8] ss:$16 sps:$4 sm:$0xff]  }
 0x2bb   :  { %4869 = vmatpush1.bf16.msra.mxu0 %v6797_v27  ;;  %v6883_v27 = vld [vmem:[#allocation6 + $0x504] ss:$16 sps:$4 sm:$0xff]  }
 0x2bc   :  { %5033 = vmatpush1.bf16.msra.mxu1 %v6800_v28  ;;  %4870 = vmatprep.subr.bf16.mxu0 %v6805_v25  ;;  %v6886_v28 = vld [vmem:[#allocation6 + $0x50c] ss:$16 sps:$4 sm:$0xff]   ;;  %v6881_v25 = vld [vmem:[#allocation6 + $0x500] ss:$16 sps:$4 sm:$0xff]  }
 0x2bd   :  { %5034 = vmatprep.subr.bf16.mxu1 %v6808_v49  ;;  %v6884_v49 = vld [vmem:[#allocation6 + $0x508] ss:$16 sps:$4 sm:$0xff]  }
 0x2bf   :  { %4871 = vmatpush1.bf16.msra.mxu0 %v6803_v22  ;;  %v6889_v22 = vld [vmem:[#allocation6 + $0x524] ss:$16 sps:$4 sm:$0xff]  }
 0x2c0   :  { %5035 = vmatpush1.bf16.msra.mxu1 %v6806_v30  ;;  %4872 = vmatprep.subr.bf16.mxu0 %v6811_v32  ;;  %v6892_v30 = vld [vmem:[#allocation6 + $0x52c] ss:$16 sps:$4 sm:$0xff]   ;;  %v6887_v32 = vld [vmem:[#allocation6 + $0x520] ss:$16 sps:$4 sm:$0xff]  }
 0x2c1   :  { %5036 = vmatprep.subr.bf16.mxu1 %v6814_v33  ;;  %v6890_v33 = vld [vmem:[#allocation6 + $0x528] ss:$16 sps:$4 sm:$0xff]  }
 0x2c3   :  { %4873 = vmatpush1.bf16.msra.mxu0 %v6809_v36  ;;  %v6895_v36 = vld [vmem:[#allocation6 + $0x544] ss:$16 sps:$4 sm:$0xff]  }
 0x2c4   :  { %5037 = vmatpush1.bf16.msra.mxu1 %v6812_v34  ;;  %4874 = vmatprep.subr.bf16.mxu0 %v6817_v39  ;;  %v6898_v34 = vld [vmem:[#allocation6 + $0x54c] ss:$16 sps:$4 sm:$0xff]   ;;  %v6893_v39 = vld [vmem:[#allocation6 + $0x540] ss:$16 sps:$4 sm:$0xff]  }
 0x2c5   :  { %5038 = vmatprep.subr.bf16.mxu1 %v6820_v40  ;;  %v6896_v40 = vld [vmem:[#allocation6 + $0x548] ss:$16 sps:$4 sm:$0xff]  }
 0x2c7   :  { %4875 = vmatpush1.bf16.msra.mxu0 %v6815_v41  ;;  %v6901_v41 = vld [vmem:[#allocation6 + $0x564] ss:$16 sps:$4 sm:$0xff]  }
 0x2c8   :  { %5039 = vmatpush1.bf16.msra.mxu1 %v6818_v44  ;;  %4876 = vmatprep.subr.bf16.mxu0 %v6823_v29  ;;  %v6899_v44 = vld [vmem:[#allocation6 + $0x560] ss:$16 sps:$4 sm:$0xff]   ;;  %v6902_v29 = vld [vmem:[#allocation6 + $0x568] ss:$16 sps:$4 sm:$0xff]  }
 0x2c9   :  { %5040 = vmatprep.subr.bf16.mxu1 %v6826_v45  ;;  %v6907_v45 = vld [vmem:[#allocation6 + $0x584] ss:$16 sps:$4 sm:$0xff]  }
 0x2cb   :  { %4877 = vmatpush1.bf16.msra.mxu0 %v6821_v46  ;;  %v6910_v46 = vld [vmem:[#allocation6 + $0x58c] ss:$16 sps:$4 sm:$0xff]  }
 0x2cc   :  { %5041 = vmatpush1.bf16.msra.mxu1 %v6824_v48  ;;  %4878 = vmatprep.subr.bf16.mxu0 %v6829_v35  ;;  %v6908_v48 = vld [vmem:[#allocation6 + $0x588] ss:$16 sps:$4 sm:$0xff]   ;;  %v6913_v35 = vld [vmem:[#allocation6 + $0x5a4] ss:$16 sps:$4 sm:$0xff]  }
 0x2cd   :  { %5042 = vmatprep.subr.bf16.mxu1 %v6832_v50  ;;  %v6916_v50 = vld [vmem:[#allocation6 + $0x5ac] ss:$16 sps:$4 sm:$0xff]  }
 0x2cf   :  { %4879 = vmatpush1.bf16.msra.mxu0 %v6827_v51  ;;  %v6911_v51 = vld [vmem:[#allocation6 + $0x5a0] ss:$16 sps:$4 sm:$0xff]  }
 0x2d0   :  { %5043 = vmatpush1.bf16.msra.mxu1 %v6830_v53  ;;  %4889 = vmatprep.subr.bf16.mxu0 %v6835_v54  ;;  %v6919_v53 = vld [vmem:[#allocation6 + $0x5c4] ss:$16 sps:$4 sm:$0xff]   ;;  %v6922_v54 = vld [vmem:[#allocation6 + $0x5cc] ss:$16 sps:$4 sm:$0xff]  }
 0x2d1   :  { %5053 = vmatprep.subr.bf16.mxu1 %v6838_v55  ;;  %v6917_v55 = vld [vmem:[#allocation6 + $0x5c0] ss:$16 sps:$4 sm:$0xff]  }
 0x2d2   :  { %4881 = vmatmul.mubr.bf16.vlgmr.msra.gmra.mrb[8].mxu0 %v3243_v58 }
 0x2d3   :  { %5045 = vmatmul.mubr.bf16.vlgmr.msra.gmra.mrb[8].mxu1 %v3243_v58  ;;  %4890 = vmatpush1.bf16.msra.mxu0 %v6833_v56  ;;  %v6920_v56 = vld [vmem:[#allocation6 + $0x5c8] ss:$16 sps:$4 sm:$0xff]   ;;  %v6925_v58 = vld [vmem:[#allocation6 + $0x5e4] ss:$16 sps:$4 sm:$0xff]  }
 0x2d4   :  { %5054 = vmatpush1.bf16.msra.mxu1 %v6836_v31  ;;  %4891 = vmatprep.subr.bf16.mxu0 %v6841_v59  ;;  %v6928_v31 = vld [vmem:[#allocation6 + $0x5ec] ss:$16 sps:$4 sm:$0xff]   ;;  %v6923_v59 = vld [vmem:[#allocation6 + $0x5e0] ss:$16 sps:$4 sm:$0xff]  }
 0x2d5   :  { %5055 = vmatprep.subr.bf16.mxu1 %v6844_v60  ;;  %v6926_v60 = vld [vmem:[#allocation6 + $0x5e8] ss:$16 sps:$4 sm:$0xff]  }
 0x2d7   :  { %4892 = vmatpush1.bf16.msra.mxu0 %v6839_v61  ;;  %v6931_v61 = vld [vmem:[#allocation6 + $0x604] ss:$16 sps:$4 sm:$0xff]  }
 0x2d8   :  { %5056 = vmatpush1.bf16.msra.mxu1 %v6842_v62  ;;  %4893 = vmatprep.subr.bf16.mxu0 %v6847_v63  ;;  %v6934_v62 = vld [vmem:[#allocation6 + $0x60c] ss:$16 sps:$4 sm:$0xff]   ;;  %v591_v63 = vsub.s32 4, %v7585_v18 }
 0x2d9   :  { %5057 = vmatprep.subr.bf16.mxu1 %v6850_v0  ;;  %v595_v0 = vsub.s32 5, %v7585_v18 }
 0x2db   :  { %4894 = vmatpush1.bf16.msra.mxu0 %v6845_v1  ;;  %v603_v1 = vsub.s32 7, %v7585_v18 }
 0x2dc   :  { %5058 = vmatpush1.bf16.msra.mxu1 %v6848_v2  ;;  %4895 = vmatprep.subr.bf16.mxu0 %v6853_v3  ;;  %v592_v2 = vrot.slane %v7592_v26, %v591_v63  ;;  %v596_v3 = vrot.slane %v7592_v26, %v595_v0  ;;  %v6983_v63 = vld [vmem:[#allocation6 + $0x720] ss:$16 sps:$4 sm:$0xff]   ;;  %v6986_v0 = vld [vmem:[#allocation6 + $0x728] ss:$16 sps:$4 sm:$0xff]  }
 0x2dd   :  { %5059 = vmatprep.subr.bf16.mxu1 %v6856_v4  ;;  %v604_v4 = vrot.slane %v7592_v26, %v603_v1  ;;  %v6937_v26 = vld [vmem:[#allocation6 + $0x624] ss:$16 sps:$4 sm:$0xff]  }
 0x2de   :  { %v6991_v1 = vld [vmem:[#allocation6 + $0x744] ss:$16 sps:$4 sm:$0xff]  }
 0x2df   :  { %4896 = vmatpush1.bf16.msra.mxu0 %v6851_v5 }
 0x2e0   :  { %5060 = vmatpush1.bf16.msra.mxu1 %v6854_v6  ;;  %4897 = vmatprep.subr.bf16.mxu0 %v6859_v7 }
 0x2e1   :  { %5061 = vmatprep.subr.bf16.mxu1 %v6862_v8 }
 0x2e3   :  { %4898 = vmatpush1.bf16.msra.mxu0 %v6857_v9 }
 0x2e4   :  { %5062 = vmatpush1.bf16.msra.mxu1 %v6860_v10  ;;  %4899 = vmatprep.subr.bf16.mxu0 %v6865_v11 }
 0x2e5   :  { %5063 = vmatprep.subr.bf16.mxu1 %v6868_v13 }
 0x2e7   :  { %4900 = vmatpush1.bf16.msra.mxu0 %v6863_v14 }
 0x2e8   :  { %5064 = vmatpush1.bf16.msra.mxu1 %v6866_v15  ;;  %4901 = vmatprep.subr.bf16.mxu0 %v6871_v57 }
 0x2e9   :  { %5065 = vmatprep.subr.bf16.mxu1 %v6874_v16 }
 0x2eb   :  { %4902 = vmatpush1.bf16.msra.mxu0 %v6869_v17 }
 0x2ec   :  { %5066 = vmatpush1.bf16.msra.mxu1 %v6872_v19  ;;  %4903 = vmatprep.subr.bf16.mxu0 %v6877_v20 }
 0x2ed   :  { %5067 = vmatprep.subr.bf16.mxu1 %v6880_v21  ;;  %v6929_v21 = vld [vmem:[#allocation6 + $0x600] ss:$16 sps:$4 sm:$0xff]  }
 0x2ef   :  { %4904 = vmatpush1.bf16.msra.mxu0 %v6875_v43  ;;  %v6932_v43 = vld [vmem:[#allocation6 + $0x608] ss:$16 sps:$4 sm:$0xff]  }
 0x2f0   :  { %5068 = vmatpush1.bf16.msra.mxu1 %v6878_v24  ;;  %4905 = vmatprep.subr.bf16.mxu0 %v6883_v27  ;;  %v6940_v27 = vld [vmem:[#allocation6 + $0x62c] ss:$16 sps:$4 sm:$0xff]  }
 0x2f1   :  { %5069 = vmatprep.subr.bf16.mxu1 %v6886_v28 }
 0x2f3   :  { %4906 = vmatpush1.bf16.msra.mxu0 %v6881_v25  ;;  %v6935_v25 = vld [vmem:[#allocation6 + $0x620] ss:$16 sps:$4 sm:$0xff]  }
 0x2f4   :  { %5070 = vmatpush1.bf16.msra.mxu1 %v6884_v49  ;;  %4907 = vmatprep.subr.bf16.mxu0 %v6889_v22  ;;  %v6938_v49 = vld [vmem:[#allocation6 + $0x628] ss:$16 sps:$4 sm:$0xff]   ;;  %v6943_v22 = vld [vmem:[#allocation6 + $0x644] ss:$16 sps:$4 sm:$0xff]  }
 0x2f5   :  { %5071 = vmatprep.subr.bf16.mxu1 %v6892_v30  ;;  %v6946_v30 = vld [vmem:[#allocation6 + $0x64c] ss:$16 sps:$4 sm:$0xff]  }
 0x2f7   :  { %4908 = vmatpush1.bf16.msra.mxu0 %v6887_v32  ;;  %v6941_v32 = vld [vmem:[#allocation6 + $0x640] ss:$16 sps:$4 sm:$0xff]  }
 0x2f8   :  { %5072 = vmatpush1.bf16.msra.mxu1 %v6890_v33  ;;  %4909 = vmatprep.subr.bf16.mxu0 %v6895_v36  ;;  %v6944_v33 = vld [vmem:[#allocation6 + $0x648] ss:$16 sps:$4 sm:$0xff]   ;;  %v6949_v36 = vld [vmem:[#allocation6 + $0x664] ss:$16 sps:$4 sm:$0xff]  }
 0x2f9   :  { %5073 = vmatprep.subr.bf16.mxu1 %v6898_v34  ;;  %v6952_v34 = vld [vmem:[#allocation6 + $0x66c] ss:$16 sps:$4 sm:$0xff]  }
 0x2fb   :  { %4910 = vmatpush1.bf16.msra.mxu0 %v6893_v39  ;;  %v6947_v39 = vld [vmem:[#allocation6 + $0x660] ss:$16 sps:$4 sm:$0xff]  }
 0x2fc   :  { %5074 = vmatpush1.bf16.msra.mxu1 %v6896_v40  ;;  %4911 = vmatprep.subr.bf16.mxu0 %v6901_v41  ;;  %v6950_v40 = vld [vmem:[#allocation6 + $0x668] ss:$16 sps:$4 sm:$0xff]   ;;  %v6955_v41 = vld [vmem:[#allocation6 + $0x684] ss:$16 sps:$4 sm:$0xff]  }
 0x2fd   :  { %5075 = vmatprep.subr.bf16.mxu1 %v6904_v42  ;;  %v6958_v42 = vld [vmem:[#allocation6 + $0x68c] ss:$16 sps:$4 sm:$0xff]  }
 0x2ff   :  { %4912 = vmatpush1.bf16.msra.mxu0 %v6899_v44  ;;  %v6953_v44 = vld [vmem:[#allocation6 + $0x680] ss:$16 sps:$4 sm:$0xff]  }
 0x300   :  { %5076 = vmatpush1.bf16.msra.mxu1 %v6902_v29  ;;  %4913 = vmatprep.subr.bf16.mxu0 %v6907_v45  ;;  %v6956_v29 = vld [vmem:[#allocation6 + $0x688] ss:$16 sps:$4 sm:$0xff]   ;;  %v6961_v45 = vld [vmem:[#allocation6 + $0x6a4] ss:$16 sps:$4 sm:$0xff]  }
 0x301   :  { %5077 = vmatprep.subr.bf16.mxu1 %v6910_v46  ;;  %v6964_v46 = vld [vmem:[#allocation6 + $0x6ac] ss:$16 sps:$4 sm:$0xff]  }
 0x303   :  { %4914 = vmatpush1.bf16.msra.mxu0 %v6905_v47  ;;  %v6959_v47 = vld [vmem:[#allocation6 + $0x6a0] ss:$16 sps:$4 sm:$0xff]  }
 0x304   :  { %5078 = vmatpush1.bf16.msra.mxu1 %v6908_v48  ;;  %4915 = vmatprep.subr.bf16.mxu0 %v6913_v35  ;;  %v6962_v48 = vld [vmem:[#allocation6 + $0x6a8] ss:$16 sps:$4 sm:$0xff]   ;;  %v6967_v35 = vld [vmem:[#allocation6 + $0x6c4] ss:$16 sps:$4 sm:$0xff]  }
 0x305   :  { %5079 = vmatprep.subr.bf16.mxu1 %v6916_v50  ;;  %v6970_v50 = vld [vmem:[#allocation6 + $0x6cc] ss:$16 sps:$4 sm:$0xff]  }
 0x307   :  { %4916 = vmatpush1.bf16.msra.mxu0 %v6911_v51  ;;  %v6965_v51 = vld [vmem:[#allocation6 + $0x6c0] ss:$16 sps:$4 sm:$0xff]  }
 0x308   :  { %5080 = vmatpush1.bf16.msra.mxu1 %v6914_v52  ;;  %4917 = vmatprep.subr.bf16.mxu0 %v6919_v53  ;;  %v6968_v52 = vld [vmem:[#allocation6 + $0x6c8] ss:$16 sps:$4 sm:$0xff]   ;;  %v6973_v53 = vld [vmem:[#allocation6 + $0x6e4] ss:$16 sps:$4 sm:$0xff]  }
 0x309   :  { %5081 = vmatprep.subr.bf16.mxu1 %v6922_v54  ;;  %v6976_v54 = vld [vmem:[#allocation6 + $0x6ec] ss:$16 sps:$4 sm:$0xff]  }
 0x30b   :  { %4918 = vmatpush1.bf16.msra.mxu0 %v6917_v55  ;;  %v6971_v55 = vld [vmem:[#allocation6 + $0x6e0] ss:$16 sps:$4 sm:$0xff]  }
 0x30c   :  { %5082 = vmatpush1.bf16.msra.mxu1 %v6920_v56  ;;  %4919 = vmatprep.subr.bf16.mxu0 %v6925_v58  ;;  %v6974_v56 = vld [vmem:[#allocation6 + $0x6e8] ss:$16 sps:$4 sm:$0xff]   ;;  %v6979_v58 = vld [vmem:[#allocation6 + $0x704] ss:$16 sps:$4 sm:$0xff]  }
 0x30d   :  { %5083 = vmatprep.subr.bf16.mxu1 %v6928_v31  ;;  %v6982_v31 = vld [vmem:[#allocation6 + $0x70c] ss:$16 sps:$4 sm:$0xff]  }
 0x30f   :  { %4920 = vmatpush1.bf16.msra.mxu0 %v6923_v59  ;;  %v6977_v59 = vld [vmem:[#allocation6 + $0x700] ss:$16 sps:$4 sm:$0xff]  }
 0x310   :  { %5084 = vmatpush1.bf16.msra.mxu1 %v6926_v60  ;;  %4930 = vmatprep.subr.bf16.mxu0 %v6931_v61  ;;  %v6980_v60 = vld [vmem:[#allocation6 + $0x708] ss:$16 sps:$4 sm:$0xff]   ;;  %v6985_v61 = vld [vmem:[#allocation6 + $0x724] ss:$16 sps:$4 sm:$0xff]  }
 0x311   :  { %5094 = vmatprep.subr.bf16.mxu1 %v6934_v62  ;;  %v6988_v62 = vld [vmem:[#allocation6 + $0x72c] ss:$16 sps:$4 sm:$0xff]  }
 0x325   :  { %v3062_v5 = vpop.f32.mrb[4].mxu0  ;;  %v7624_v7 = vpop.f32.mrb[4].mxu1 }
 0x326   :  { %v6542_v6 = vadd.f32 %v3062_v5, %v592_v2  ;;  %v3064_v8 = vpop.f32.mrb[5].mxu0  ;;  %v3228_v10 = vpop.f32.mrb[5].mxu1  ;;  %v6994_v2 = vld [vmem:[#allocation6 + $0x74c] ss:$16 sps:$4 sm:$0xff]   ;;  %v6997_v5 = vld [vmem:[#allocation6 + $0x764] ss:$16 sps:$4 sm:$0xff]  }
 0x327   :  { %v6543_v9 = vadd.f32 %v3064_v8, %v596_v3  ;;  %v3066_v11 = vpop.f32.mrb[6].mxu0  ;;  %v6545_v14 = vadd.f32 %v3228_v10, %v604_v4  ;;  %v3230_v15 = vpop.f32.mrb[6].mxu1  ;;  %v6989_v3 = vld [vmem:[#allocation6 + $0x740] ss:$16 sps:$4 sm:$0xff]   ;;  %v6992_v4 = vld [vmem:[#allocation6 + $0x748] ss:$16 sps:$4 sm:$0xff]  }
 0x328   :  { %v3237_v13 = vmax.f32 %v6542_v6, 0.0  ;;  %v3067_v57 = vpop.f32.mrb[7].mxu0  ;;  %v3231_v17 = vpop.f32.mrb[7].mxu1  ;;  %v7000_v6 = vld [vmem:[#allocation6 + $0x76c] ss:$16 sps:$4 sm:$0xff]   ;;  %v599_v15 = vsub.s32 6, %v7585_v18 }
 0x329   :  { %v3238_v16 = vmax.f32 %v6543_v9, 0.0  ;;  %v3240_v19 = vmax.f32 %v6545_v14, 0.0  ;;  %v6995_v8 = vld [vmem:[#allocation6 + $0x760] ss:$16 sps:$4 sm:$0xff]   ;;  %v6998_v9 = vld [vmem:[#allocation6 + $0x768] ss:$16 sps:$4 sm:$0xff]  }
 0x32a   :  { %v3245_v24 = vpack.c.bf16 %v3237_v13, %v3237_v13  ;;  %v7003_v10 = vld [vmem:[#allocation6 + $0x784] ss:$16 sps:$4 sm:$0xff]   ;;  %v7006_v11 = vld [vmem:[#allocation6 + $0x78c] ss:$16 sps:$4 sm:$0xff]   ;;  %v7001_v13 = vld [vmem:[#allocation6 + $0x780] ss:$16 sps:$4 sm:$0xff]  }
 0x32b   :  { %v3246_v20 = vpack.c.bf16 %v3238_v16, %v3238_v16  ;;  %v3248_v28 = vpack.c.bf16 %v3240_v19, %v3240_v19  ;;  %v7004_v14 = vld [vmem:[#allocation6 + $0x788] ss:$16 sps:$4 sm:$0xff]   ;;  %v7009_v57 = vld [vmem:[#allocation6 + $0x7a4] ss:$16 sps:$4 sm:$0xff]   ;;  %v7012_v16 = vld [vmem:[#allocation6 + $0x7ac] ss:$16 sps:$4 sm:$0xff]  }
 0x32c   :  { %v7007_v17 = vld [vmem:[#allocation6 + $0x7a0] ss:$16 sps:$4 sm:$0xff]   ;;  %v7010_v19 = vld [vmem:[#allocation6 + $0x7a8] ss:$16 sps:$4 sm:$0xff]  }
 0x32d   :  { %4921 = vmatprep.mubr.bf16.mxu0 %v3246_v20  ;;  %5085 = vmatprep.mubr.bf16.mxu1 %v3246_v20  ;;  %v7077_v20 = vld [vmem:[#allocation4] sm:$0xff]  ;;  %v7057_v18 = vld [vmem:[#allocation12] sm:$0xff]  }
 0x32e   :  { %4922 = vmatmul.mubr.bf16.vlgmr.msra.gmra.mrb[8].mxu0 %v3245_v24  ;;  %5086 = vmatmul.mubr.bf16.vlgmr.msra.gmra.mrb[8].mxu1 %v3245_v24  ;;  %v7018_v24 = vld [vmem:[#allocation6 + $0x7cc] ss:$16 sps:$4 sm:$0xff]  }
 0x32f   :  { %4931 = vmatpush1.bf16.msra.mxu0 %v6929_v21  ;;  %5095 = vmatpush1.bf16.msra.mxu1 %v6932_v43  ;;  %v600_v21 = vrot.slane %v7077_v20, %v599_v15  ;;  %v7015_v43 = vld [vmem:[#allocation6 + $0x7c4] ss:$16 sps:$4 sm:$0xff]  }
 0x330   :  { %4962 = vmatprep.mubr.bf16.mxu0 %v3248_v28  ;;  %5126 = vmatprep.mubr.bf16.mxu1 %v3248_v28 }
 0x331   :  { %4932 = vmatprep.subr.bf16.mxu0 %v6937_v26  ;;  %5096 = vmatprep.subr.bf16.mxu1 %v6940_v27  ;;  %v7013_v26 = vld [vmem:[#allocation6 + $0x7c0] ss:$16 sps:$4 sm:$0xff]   ;;  %v7016_v27 = vld [vmem:[#allocation6 + $0x7c8] ss:$16 sps:$4 sm:$0xff]   ;;  %v6544_v28 = vadd.f32 %v7624_v7, %v600_v21 }
 0x332   :  { %v7029_v7 = vld [vmem:[#allocation9 + $0x48] sm:$0xff]  }
 0x333   :  { %4933 = vmatpush1.bf16.msra.mxu0 %v6935_v25  ;;  %5097 = vmatpush1.bf16.msra.mxu1 %v6938_v49  ;;  %v7021_v25 = vld [vmem:[#allocation6 + $0x7e4] ss:$16 sps:$4 sm:$0xff]   ;;  %v7024_v49 = vld [vmem:[#allocation6 + $0x7ec] ss:$16 sps:$4 sm:$0xff]  }
 0x334   :  { %4934 = vmatprep.subr.bf16.mxu0 %v6943_v22  ;;  %5098 = vmatprep.subr.bf16.mxu1 %v6946_v30  ;;  %v7019_v22 = vld [vmem:[#allocation6 + $0x7e0] ss:$16 sps:$4 sm:$0xff]   ;;  %v7022_v30 = vld [vmem:[#allocation6 + $0x7e8] ss:$16 sps:$4 sm:$0xff]  }
 0x337   :  { %4935 = vmatpush1.bf16.msra.mxu0 %v6941_v32  ;;  %5099 = vmatpush1.bf16.msra.mxu1 %v6944_v33  ;;  %v3239_v32 = vmax.f32 %v6544_v28, 0.0  ;;  %v7025_v33 = vld [vmem:[#allocation9 + $0x40] sm:$0xff]  }
 0x338   :  { %4936 = vmatprep.subr.bf16.mxu0 %v6949_v36  ;;  %5100 = vmatprep.subr.bf16.mxu1 %v6952_v34  ;;  %v7026_v36 = vld [vmem:[#allocation9 + $0xc0] sm:$0xff]  }
 0x339   :  { %v7027_v34 = vld [vmem:[#allocation9] sm:$0xff]  }
 0x33b   :  { %4937 = vmatpush1.bf16.msra.mxu0 %v6947_v39  ;;  %5101 = vmatpush1.bf16.msra.mxu1 %v6950_v40  ;;  %v7028_v39 = vld [vmem:[#allocation9 + $0x80] sm:$0xff]   ;;  %v3247_v40 = vpack.c.bf16 %v3239_v32, %v3239_v32 }
 0x33c   :  { %4938 = vmatprep.subr.bf16.mxu0 %v6955_v41  ;;  %5102 = vmatprep.subr.bf16.mxu1 %v6958_v42  ;;  %v7030_v41 = vld [vmem:[#allocation9 + $0xc8] sm:$0xff]  }
 0x33d   :  { %v7031_v42 = vld [vmem:[#allocation9 + $0x8] sm:$0xff]  }
 0x33e   :  { %v7061_v32 = vld [vmem:[#allocation12 + $0x20] sm:$0xff]  }
 0x33f   :  { %4939 = vmatpush1.bf16.msra.mxu0 %v6953_v44  ;;  %5103 = vmatpush1.bf16.msra.mxu1 %v6956_v29  ;;  %v7032_v44 = vld [vmem:[#allocation9 + $0x88] sm:$0xff]   ;;  %v7033_v29 = vld [vmem:[#allocation9 + $0x50] sm:$0xff]  }
 0x340   :  { %4940 = vmatprep.subr.bf16.mxu0 %v6961_v45  ;;  %5104 = vmatprep.subr.bf16.mxu1 %v6964_v46  ;;  %v7034_v45 = vld [vmem:[#allocation9 + $0xd0] sm:$0xff]  }
 0x341   :  { %v7035_v46 = vld [vmem:[#allocation9 + $0x10] sm:$0xff]  }
 0x343   :  { %4941 = vmatpush1.bf16.msra.mxu0 %v6959_v47  ;;  %5105 = vmatpush1.bf16.msra.mxu1 %v6962_v48  ;;  %v7036_v47 = vld [vmem:[#allocation9 + $0x90] sm:$0xff]   ;;  %v7037_v48 = vld [vmem:[#allocation9 + $0x58] sm:$0xff]  }
 0x344   :  { %4942 = vmatprep.subr.bf16.mxu0 %v6967_v35  ;;  %5106 = vmatprep.subr.bf16.mxu1 %v6970_v50  ;;  %v7038_v35 = vld [vmem:[#allocation9 + $0xd8] sm:$0xff]  }
 0x345   :  { %v7039_v50 = vld [vmem:[#allocation9 + $0x18] sm:$0xff]  }
 0x347   :  { %4943 = vmatpush1.bf16.msra.mxu0 %v6965_v51  ;;  %5107 = vmatpush1.bf16.msra.mxu1 %v6968_v52  ;;  %v7040_v51 = vld [vmem:[#allocation9 + $0x98] sm:$0xff]   ;;  %v7041_v52 = vld [vmem:[#allocation9 + $0x60] sm:$0xff]  }
 0x348   :  { %4944 = vmatprep.subr.bf16.mxu0 %v6973_v53  ;;  %5108 = vmatprep.subr.bf16.mxu1 %v6976_v54  ;;  %v7042_v53 = vld [vmem:[#allocation9 + $0xe0] sm:$0xff]  }
 0x349   :  { %v7043_v54 = vld [vmem:[#allocation9 + $0x20] sm:$0xff]  }
 0x34b   :  { %4945 = vmatpush1.bf16.msra.mxu0 %v6971_v55  ;;  %5109 = vmatpush1.bf16.msra.mxu1 %v6974_v56  ;;  %v7044_v55 = vld [vmem:[#allocation9 + $0xa0] sm:$0xff]   ;;  %v7045_v56 = vld [vmem:[#allocation9 + $0x68] sm:$0xff]  }
 0x34c   :  { %4946 = vmatprep.subr.bf16.mxu0 %v6979_v58  ;;  %5110 = vmatprep.subr.bf16.mxu1 %v6982_v31  ;;  %v7046_v58 = vld [vmem:[#allocation9 + $0xe8] sm:$0xff]  }
 0x34d   :  { %v7047_v31 = vld [vmem:[#allocation9 + $0x28] sm:$0xff]  }
 0x34f   :  { %4947 = vmatpush1.bf16.msra.mxu0 %v6977_v59  ;;  %5111 = vmatpush1.bf16.msra.mxu1 %v6980_v60  ;;  %v7048_v59 = vld [vmem:[#allocation9 + $0xa8] sm:$0xff]   ;;  %v7049_v60 = vld [vmem:[#allocation9 + $0x70] sm:$0xff]  }
 0x350   :  { %4948 = vmatprep.subr.bf16.mxu0 %v6985_v61  ;;  %5112 = vmatprep.subr.bf16.mxu1 %v6988_v62  ;;  %v7050_v61 = vld [vmem:[#allocation9 + $0xf0] sm:$0xff]  }
 0x351   :  { %v7051_v62 = vld [vmem:[#allocation9 + $0x30] sm:$0xff]  }
 0x353   :  { %4949 = vmatpush1.bf16.msra.mxu0 %v6983_v63  ;;  %5113 = vmatpush1.bf16.msra.mxu1 %v6986_v0  ;;  %v7052_v63 = vld [vmem:[#allocation9 + $0xb0] sm:$0xff]   ;;  %v7053_v0 = vld [vmem:[#allocation9 + $0x78] sm:$0xff]  }
 0x354   :  { %4950 = vmatprep.subr.bf16.mxu0 %v6991_v1  ;;  %5114 = vmatprep.subr.bf16.mxu1 %v6994_v2  ;;  %v7054_v1 = vld [vmem:[#allocation9 + $0xf8] sm:$0xff]  }
 0x355   :  { %v7055_v2 = vld [vmem:[#allocation9 + $0x38] sm:$0xff]  }
 0x357   :  { %4951 = vmatpush1.bf16.msra.mxu0 %v6989_v3  ;;  %5115 = vmatpush1.bf16.msra.mxu1 %v6992_v4  ;;  %v7056_v3 = vld [vmem:[#allocation9 + $0xb8] sm:$0xff]   ;;  %v7327_v4 = vmov 0.0  }
 0x358   :  { %4952 = vmatprep.subr.bf16.mxu0 %v6997_v5  ;;  %5116 = vmatprep.subr.bf16.mxu1 %v7000_v6  ;;  %v3505_v5 = vld [vmem:[#allocation7] sm:$0xf] }
 0x359   :  { %v3510_v6 = vrot.slane %v3505_v5, %v575_v12 }
 0x35b   :  { %4953 = vmatpush1.bf16.msra.mxu0 %v6995_v8  ;;  %5117 = vmatpush1.bf16.msra.mxu1 %v6998_v9  ;;  %v3518_v8 = vrot.slane %v3505_v5, %v583_v37  ;;  %v3514_v9 = vrot.slane %v3505_v5, %v579_v23 }
 0x35c   :  { %4954 = vmatprep.subr.bf16.mxu0 %v7003_v10  ;;  %5118 = vmatprep.subr.bf16.mxu1 %v7006_v11  ;;  %v3522_v10 = vrot.slane %v3505_v5, %v587_v38 }
 0x35f   :  { %4955 = vmatpush1.bf16.msra.mxu0 %v7001_v13  ;;  %5119 = vmatpush1.bf16.msra.mxu1 %v7004_v14 }
 0x360   :  { %4956 = vmatprep.subr.bf16.mxu0 %v7009_v57  ;;  %5120 = vmatprep.subr.bf16.mxu1 %v7012_v16 }
 0x363   :  { %4957 = vmatpush1.bf16.msra.mxu0 %v7007_v17  ;;  %5121 = vmatpush1.bf16.msra.mxu1 %v7010_v19 }
 0x364   :  { %4958 = vmatprep.subr.bf16.mxu0 %v7015_v43  ;;  %5122 = vmatprep.subr.bf16.mxu1 %v7018_v24 }
 0x367   :  { %4959 = vmatpush1.bf16.msra.mxu0 %v7013_v26  ;;  %5123 = vmatpush1.bf16.msra.mxu1 %v7016_v27 }
 0x368   :  { %4960 = vmatprep.subr.bf16.mxu0 %v7021_v25  ;;  %5124 = vmatprep.subr.bf16.mxu1 %v7024_v49  ;;  %v7058_v49 = vld [vmem:[#allocation12 + $0x8] sm:$0xff]  }
 0x36b   :  { %4961 = vmatpush1.bf16.msra.mxu0 %v7019_v22  ;;  %5125 = vmatpush1.bf16.msra.mxu1 %v7022_v30  ;;  %v7059_v22 = vld [vmem:[#allocation12 + $0x10] sm:$0xff]   ;;  %v7060_v30 = vld [vmem:[#allocation12 + $0x18] sm:$0xff]  }
 0x36c   :  { %6436 = vmatprep.subr.bf16.mxu0 %v7025_v33  ;;  %6458 = vmatprep.subr.bf16.mxu1 %v7026_v36  ;;  %v7062_v33 = vld [vmem:[#allocation12 + $0x28] sm:$0xff]   ;;  %v7063_v36 = vld [vmem:[#allocation12 + $0x30] sm:$0xff]  }
 0x36e   :  { %4963 = vmatmul.mubr.bf16.vlgmr.msra.gmra.mrb[8].mxu0 %v3247_v40  ;;  %5127 = vmatmul.mubr.bf16.vlgmr.msra.gmra.mrb[8].mxu1 %v3247_v40  ;;  %v7066_v40 = vld [vmem:[#allocation15 + $0x8] sm:$0xff]  }
 0x36f   :  { %6437 = vmatpush3.bf16.msra.mxu0 %v7027_v34  ;;  %6459 = vmatpush3.bf16.msra.mxu1 %v7028_v39  ;;  %v7064_v34 = vld [vmem:[#allocation12 + $0x38] sm:$0xff]   ;;  %v7065_v39 = vld [vmem:[#allocation15] sm:$0xff]  }
 0x370   :  { %6438 = vmatprep.subr.bf16.mxu0 %v7029_v7  ;;  %6460 = vmatprep.subr.bf16.mxu1 %v7030_v41  ;;  %v7067_v7 = vld [vmem:[#allocation15 + $0x10] sm:$0xff]   ;;  %v7068_v41 = vld [vmem:[#allocation15 + $0x18] sm:$0xff]  }
 0x373   :  { %6439 = vmatpush3.bf16.msra.mxu0 %v7031_v42  ;;  %6461 = vmatpush3.bf16.msra.mxu1 %v7032_v44  ;;  %v7069_v42 = vld [vmem:[#allocation15 + $0x20] sm:$0xff]   ;;  %v7070_v44 = vld [vmem:[#allocation15 + $0x28] sm:$0xff]  }
 0x374   :  { %6440 = vmatprep.subr.bf16.mxu0 %v7033_v29  ;;  %6462 = vmatprep.subr.bf16.mxu1 %v7034_v45 }
 0x377   :  { %6441 = vmatpush3.bf16.msra.mxu0 %v7035_v46  ;;  %6463 = vmatpush3.bf16.msra.mxu1 %v7036_v47  ;;  %v6385_v46 = vld [vmem:[#allocation10] ss:$0 sm:$0xff] }
 0x378   :  { %6442 = vmatprep.subr.bf16.mxu0 %v7037_v48  ;;  %6464 = vmatprep.subr.bf16.mxu1 %v7038_v35 }
 0x37b   :  { %6443 = vmatpush3.bf16.msra.mxu0 %v7039_v50  ;;  %6465 = vmatpush3.bf16.msra.mxu1 %v7040_v51 }
 0x37c   :  { %6444 = vmatprep.subr.bf16.mxu0 %v7041_v52  ;;  %6466 = vmatprep.subr.bf16.mxu1 %v7042_v53 }
 0x37f   :  { %6445 = vmatpush3.bf16.msra.mxu0 %v7043_v54  ;;  %6467 = vmatpush3.bf16.msra.mxu1 %v7044_v55 }
 0x380   :  { %6446 = vmatprep.subr.bf16.mxu0 %v7045_v56  ;;  %6468 = vmatprep.subr.bf16.mxu1 %v7046_v58 }
 0x383   :  { %6447 = vmatpush3.bf16.msra.mxu0 %v7047_v31  ;;  %6469 = vmatpush3.bf16.msra.mxu1 %v7048_v59  ;;  %v7071_v59 = vld [vmem:[#allocation15 + $0x30] sm:$0xff]  }
 0x384   :  { %6448 = vmatprep.subr.bf16.mxu0 %v7049_v60  ;;  %6470 = vmatprep.subr.bf16.mxu1 %v7050_v61  ;;  %v7072_v60 = vld [vmem:[#allocation15 + $0x38] sm:$0xff]  }
 0x385   :  { %v6418_v61 = vld [vmem:[#allocation13] ss:$0 sm:$0xff] }
 0x387   :  { %6449 = vmatpush3.bf16.msra.mxu0 %v7051_v62  ;;  %6471 = vmatpush3.bf16.msra.mxu1 %v7052_v63 }
 0x388   :  { %6450 = vmatprep.subr.bf16.mxu0 %v7053_v0  ;;  %6472 = vmatprep.subr.bf16.mxu1 %v7054_v1 }
 0x38b   :  { %6451 = vmatpush3.bf16.msra.mxu0 %v7055_v2  ;;  %6473 = vmatpush3.bf16.msra.mxu1 %v7056_v3 }
 0x38c   :  { %6498 = vmatprep.subr.bf16.mxu0 %v7327_v4  ;;  %6518 = vmatprep.subr.bf16.mxu1 %v7327_v4 }
 0x441   :  { %v4964_v11 = vpop.f32.mrb[8].mxu0  ;;  %v5128_v13 = vpop.f32.mrb[8].mxu1 }
 0x442   :  { %v6546_v14 = vadd.f32 %v4964_v11, %v3510_v6  ;;  %v6548_v15 = vadd.f32 %v5128_v13, %v3518_v8  ;;  %v4966_v57 = vpop.f32.mrb[9].mxu0  ;;  %v5130_v16 = vpop.f32.mrb[9].mxu1  ;;  %v6427_v6 = vld [vmem:[#allocation16] ss:$0 sm:$0xff] }
 0x443   :  { %v6547_v17 = vadd.f32 %v4966_v57, %v3514_v9  ;;  %v6549_v19 = vadd.f32 %v5130_v16, %v3522_v10  ;;  %v4968_v20 = vpop.f32.mrb[10].mxu0  ;;  %v5132_v21 = vpop.f32.mrb[10].mxu1 }
 0x444   :  { %v5135_v12 = vmax.f32 %v6546_v14, 0.0  ;;  %v5137_v43 = vmax.f32 %v6548_v15, 0.0  ;;  %v4969_v24 = vpop.f32.mrb[11].mxu0  ;;  %v5133_v37 = vpop.f32.mrb[11].mxu1 }
 0x445   :  { %v5136_v26 = vmax.f32 %v6547_v17, 0.0  ;;  %v5138_v27 = vmax.f32 %v6549_v19, 0.0 }
 0x446   :  { %v5139_v38 = vpack.c.bf16 %v5135_v12, %v5135_v12  ;;  %v5141_v25 = vpack.c.bf16 %v5137_v43, %v5137_v43 }
 0x447   :  { %v5140_v23 = vpack.c.bf16 %v5136_v26, %v5136_v26  ;;  %v5142_v28 = vpack.c.bf16 %v5138_v27, %v5138_v27 }
 0x449   :  { %5438 = vmatprep.mubr.bf16.mxu0 %v5140_v23  ;;  %5478 = vmatprep.mubr.bf16.mxu1 %v5142_v28 }
 0x44a   :  { %5439 = vmatmul.mubr.bf16.vlgmr.msra.gmra.mrb[12].mxu0 %v5139_v38  ;;  %5479 = vmatmul.mubr.bf16.vlgmr.msra.gmra.mrb[12].mxu1 %v5141_v25 }
 0x44b   :  { %6499 = vmatpush3.bf16.msra.mxu0 %v7057_v18  ;;  %6514 = vmatprep.mubr.msk.bf16.mxu0 %vm7328_vm1, %v7327_v4 }
 0x44c   :  { %6500 = vmatprep.subr.bf16.mxu0 %v7327_v4  ;;  %6534 = vmatprep.mubr.msk.bf16.mxu1 %vm7328_vm1, %v7327_v4 }
 0x44d   :  { %6519 = vmatpush3.bf16.msra.mxu1 %v7065_v39 }
 0x44e   :  { %6520 = vmatprep.subr.bf16.mxu1 %v7327_v4 }
 0x44f   :  { %6501 = vmatpush3.bf16.msra.mxu0 %v7058_v49 }
 0x450   :  { %6502 = vmatprep.subr.bf16.mxu0 %v7327_v4 }
 0x451   :  { %6521 = vmatpush3.bf16.msra.mxu1 %v7066_v40 }
 0x452   :  { %6522 = vmatprep.subr.bf16.mxu1 %v7327_v4 }
 0x453   :  { %6503 = vmatpush3.bf16.msra.mxu0 %v7059_v22 }
 0x454   :  { %6504 = vmatprep.subr.bf16.mxu0 %v7327_v4 }
 0x455   :  { %6523 = vmatpush3.bf16.msra.mxu1 %v7067_v7 }
 0x456   :  { %6524 = vmatprep.subr.bf16.mxu1 %v7327_v4 }
 0x457   :  { %6505 = vmatpush3.bf16.msra.mxu0 %v7060_v30 }
 0x458   :  { %6506 = vmatprep.subr.bf16.mxu0 %v7327_v4 }
 0x459   :  { %6525 = vmatpush3.bf16.msra.mxu1 %v7068_v41 }
 0x45a   :  { %6526 = vmatprep.subr.bf16.mxu1 %v7327_v4 }
 0x45b   :  { %6507 = vmatpush3.bf16.msra.mxu0 %v7061_v32 }
 0x45c   :  { %6508 = vmatprep.subr.bf16.mxu0 %v7327_v4 }
 0x45d   :  { %6527 = vmatpush3.bf16.msra.mxu1 %v7069_v42 }
 0x45e   :  { %6528 = vmatprep.subr.bf16.mxu1 %v7327_v4 }
 0x45f   :  { %6509 = vmatpush3.bf16.msra.mxu0 %v7062_v33 }
 0x460   :  { %6510 = vmatprep.subr.bf16.mxu0 %v7327_v4 }
 0x461   :  { %6529 = vmatpush3.bf16.msra.mxu1 %v7070_v44 }
 0x462   :  { %6530 = vmatprep.subr.bf16.mxu1 %v7327_v4 }
 0x463   :  { %6511 = vmatpush3.bf16.msra.mxu0 %v7063_v36 }
 0x464   :  { %6512 = vmatprep.subr.bf16.mxu0 %v7327_v4 }
 0x465   :  { %6531 = vmatpush3.bf16.msra.mxu1 %v7071_v59 }
 0x466   :  { %6532 = vmatprep.subr.bf16.mxu1 %v7327_v4 }
 0x467   :  { %6513 = vmatpush3.bf16.msra.mxu0 %v7064_v34 }
 0x469   :  { %6533 = vmatpush3.bf16.msra.mxu1 %v7072_v60 }
 0x51d   :  { %v6452_v29 = vpop.f32.mrb[12].mxu0  ;;  %v6474_v45 = vpop.f32.mrb[12].mxu1 }
 0x51e   :  { %v6453_v47 = vpop.f32.mrb[13].mxu0  ;;  %v6475_v48 = vpop.f32.mrb[13].mxu1 }
 0x51f   :  { %v6454_v35 = vadd.f32 %v6453_v47, %v6452_v29  ;;  %v6476_v50 = vadd.f32 %v6475_v48, %v6474_v45  ;;  %v6455_v51 = vpop.f32.mrb[14].mxu0  ;;  %v6477_v52 = vpop.f32.mrb[14].mxu1 }
 0x520   :  { %v6456_v53 = vpop.f32.mrb[15].mxu0  ;;  %v6478_v54 = vpop.f32.mrb[15].mxu1 }
 0x521   :  { %v5441_v55 = vadd.f32 %v6454_v35, %v6385_v46 }
 0x523   :  { %v5481_v56 = vadd.f32 %v6476_v50, %v5441_v55 }
 0x525   :  { %v5486_v58 = vmax.f32 %v5481_v56, 0.0 }
 0x527   :  { %v5487_v31 = vpack.c.bf16 %v5486_v58, %v5486_v58 }
 0x529   :  { %6515 = vmatmul.mubr.bf16.vlgmr.msra.gmra.mrb[16].mxu0 %v5487_v31 }
 0x5fc   :  { %v5593_v62 = vpop.f32.mrb[16].mxu0 }
 0x5fd   :  { %v5594_v63 = vadd.f32 %v6418_v61, %v5593_v62  ;;  %v6516_v0 = vpop.f32.mrb[17].mxu0 }
 0x5fe   :  { %v5596_v1 = vpop.f32.mrb[18].mxu0 }
 0x5ff   :  { %v5599_v2 = vmax.f32 %v5594_v63, 0.0  ;;  %v6517_v3 = vpop.f32.mrb[19].mxu0 }
 0x601   :  { %v5600_v5 = vpack.c.bf16 %v5599_v2, %v5599_v2 }
 0x603   :  { %6535 = vmatmul.mubr.bf16.vlgmr.msra.gmra.mrb[16].mxu1 %v5600_v5 }
 0x6d6   :  { %v5706_v8 = vpop.f32.mrb[16].mxu1 }
 0x6d7   :  { %v5707_v9 = vadd.f32 %v6427_v6, %v5706_v8  ;;  %v6536_v10 = vpop.f32.mrb[17].mxu1 }
 0x6d8   :  { %v5709_v11 = vpop.f32.mrb[18].mxu1 }
 0x6d9   :  { %5712 = vmax.xlane.f32.xlu0 %v5707_v9  ;;  %v6537_v13 = vpop.f32.mrb[19].mxu1 }
 0x766   :  { %v5713_v14 = vpop.xlane.xlu0 %5712 }
 0x767   :  { %v5714_v4 = vsub.f32 %v5707_v9, %v5713_v14 }
 0x769   :  { %v5715_v15 = vmul.f32 1.442695, %v5714_v4 }
 0x76b   :  { %7073 = vpow2.f32 %v5715_v15 }
 0x775   :  { %v7074_v57 = vpop.eup %7073 }
 0x776   :  { %5717 = vadd.xlane.f32.xlu0 %v7074_v57 }
 0x803   :  { %v5718_v16 = vpop.xlane.xlu0 %5717 }
 0x804   :  { %7075 = vlog2.f32 %v5718_v16 }
 0x80e   :  { %v7076_v17 = vpop.eup %7075 }
 0x80f   :  { %v5720_v19 = vmul.f32 0.6931472, %v7076_v17 }
 0x811   :  { %v5721_v20 = vsub.f32 %v5714_v4, %v5720_v19 }
 0x813   :  { %5722 = vst [vmem:[%s7668_s11] sm:$0xff] %v5721_v20 }
 0x814   :  { %5727 = vsyncpa [#allocation3], 1 }
 0x815   :  { %5728 = vsyncpa [#allocation5], 1 }
 0x816   :  { %5729 = vsyncpa [#allocation8], 1 }
 0x817   :  { %5730 = vsyncpa [#allocation11], 1 }
 0x818   :  { %5731 = vsyncpa [#allocation14], 1 }
 0x819   :  { %5732 = vsyncpa [#allocation17], 1 }

</bundles_post_ra>
